<compile_context>
chip_gen: v6e
topology: v6e:2x2x1
jax: 0.10.0
libtpu: 0.0.40
codegen_flags: <defaults>
</compile_context>

<pallas_src>
import functools

import jax
import jax.numpy as jnp
from jax.experimental import pallas as pl
from jax.experimental.pallas import tpu as pltpu

NEG_SLOPE = 0.2

# f32 keeps the correctness check tight; on v6e/v7x this can be set to
# jnp.bfloat16 to feed the MXU at full rate (accumulation stays f32 via
# preferred_element_type).  At these tiny shapes the kernel is latency-bound,
# so f32 is kept as the safe default (also avoids bf16 VPU casts on v5e).
MATMUL_DTYPE = jnp.float32


# ----------------------------------------------------------------------------
# Fused kernel: whole network for one sample per grid step.
# ----------------------------------------------------------------------------
def _fused_kernel(x_ref,
                  w1_ref, b1_ref, w2_ref, b2_ref, w3_ref, b3_ref,
                  w4_ref, b4_ref, w5_ref, b5_ref,
                  o_ref,
                  pad2, pad3, pad4, pad5,
                  tap1, tap2, tap3, tap4, tap5,
                  *, dims):
    """dims: tuple of (H, W, Cin, Cout) per layer (4 dw+pw blocks + classifier)."""
    w_refs = (w1_ref, w2_ref, w3_ref, w4_ref, w5_ref)
    b_refs = (b1_ref, b2_ref, b3_ref, b4_ref, b5_ref)
    # padded input plane for each layer: layer 1 reads the pre-padded input
    # block directly, layers 2..5 read VMEM scratch written by the previous one.
    pad_refs = (x_ref, pad2, pad3, pad4, pad5)
    tap_refs = (tap1, tap2, tap3, tap4, tap5)

    y = None
    n_layers = len(dims)
    for l, (H, W, Cin, Cout) in enumerate(dims):
        OH, OW = H // 2, W // 2
        pad_ref = pad_refs[l]
        tap_ref = tap_refs[l]

        if l > 0:
            # zero-pad the previous activation into this layer's scratch plane
            # (the zeroed border supplies the conv's padding=1).
            pad_ref[...] = jnp.zeros_like(pad_ref)
            pad_ref[1:H + 1, 1:W + 1, :] = y

        # Gather the 16 stride-2 taps of the 4x4 window and lay them out
        # concatenated along channels:  tap matrix column  k*Cin + ci.
        for kh in range(4):
            for kw in range(4):
                k = kh * 4 + kw
                row_idx = pl.ds(kh, OH, stride=2) if OH > 1 else pl.ds(kh, 1)
                col_idx = pl.ds(kw, OW, stride=2) if OW > 1 else pl.ds(kw, 1)
                tap_ref[:, :, k * Cin:(k + 1) * Cin] = pad_ref[row_idx, col_idx, :]

        # depthwise + pointwise (or classifier) folded into one MXU matmul.
        t = tap_ref[...].reshape(OH * OW, 16 * Cin)
        y = jnp.dot(t.astype(MATMUL_DTYPE), w_refs[l][...].astype(MATMUL_DTYPE),
                    preferred_element_type=jnp.float32)
        y = y + b_refs[l][...]
        if l + 1 < n_layers:                       # LeakyReLU on all but classifier
            y = jnp.where(y >= 0.0, y, NEG_SLOPE * y)
        y = y.reshape(OH, OW, Cout)

    o_ref[...] = y                                  # (OHf, OWf, 1) -> HBM


# ----------------------------------------------------------------------------
# Weight folding (PyTorch layouts -> combined matmul weights)
# ----------------------------------------------------------------------------
def _combine_dwpw(wd, bd, wp, bp):
    """depthwise (C,1,4,4)+(C,) and pointwise (Cout,C,1,1)+(Cout,) ->
       W_comb (16*C, Cout), b_comb (1, Cout), row index = k*C + ci, k = kh*4+kw."""
    C = wd.shape[0]
    dw_t = jnp.transpose(wd[:, 0].reshape(C, 16), (1, 0))      # (16, C)
    wp_t = jnp.transpose(wp[:, :, 0, 0], (1, 0))               # (C, Cout)
    w_comb = (dw_t[:, :, None] * wp_t[None, :, :]).reshape(16 * C, wp.shape[0])
    b_comb = bd @ wp_t + bp                                    # (Cout,)
    return w_comb, b_comb.reshape(1, -1)


def _combine_cls(wc, bc):
    """classifier (1, Cin, 4, 4)+(1,) -> (16*Cin, 1), (1, 1)."""
    Cin = wc.shape[1]
    w_comb = jnp.transpose(wc[0].reshape(Cin, 16), (1, 0)).reshape(16 * Cin, 1)
    return w_comb, bc.reshape(1, 1)


# ----------------------------------------------------------------------------
# Public wrapper: NCHW in / NCHW out, everything else inside one pallas_call.
# ----------------------------------------------------------------------------
def light_discriminator_forward(x_nchw, params):
    x = jnp.transpose(x_nchw, (0, 2, 3, 1)).astype(jnp.float32)   # NCHW -> NHWC
    N, H, W, C0 = x.shape
    xp = jnp.pad(x, ((0, 0), (1, 1), (1, 1), (0, 0)))             # pad once, up front

    # combined weights / biases + static per-layer dims
    ws, bs, dims = [], [], []
    h, w, cin = H, W, C0
    for i in range(1, 5):
        w_comb, b_comb = _combine_dwpw(params[f"depth{i}_w"], params[f"depth{i}_b"],
                                       params[f"point{i}_w"], params[f"point{i}_b"])
        dims.append((h, w, cin, w_comb.shape[1]))
        ws.append(w_comb)
        bs.append(b_comb)
        h, w, cin = h // 2, w // 2, w_comb.shape[1]
    w_comb, b_comb = _combine_cls(params["classifier_w"], params["classifier_b"])
    dims.append((h, w, cin, 1))
    ws.append(w_comb)
    bs.append(b_comb)
    oh_f, ow_f = h // 2, w // 2

    kern = functools.partial(_fused_kernel, dims=tuple(dims))

    in_specs = [pl.BlockSpec((None, H + 2, W + 2, C0), lambda n: (n, 0, 0, 0))]
    args = [xp]
    for w_c, b_c in zip(ws, bs):
        in_specs.append(pl.BlockSpec(w_c.shape, lambda n: (0, 0)))
        in_specs.append(pl.BlockSpec(b_c.shape, lambda n: (0, 0)))
        args.extend([w_c, b_c])

    scratch = ([pltpu.VMEM((hh + 2, ww + 2, ci), jnp.float32)
                for (hh, ww, ci, _) in dims[1:]]            # padded inter-layer planes
               + [pltpu.VMEM((hh // 2, ww // 2, 16 * ci), jnp.float32)
                  for (hh, ww, ci, _) in dims])             # tap matrices

    out = pl.pallas_call(
        kern,
        out_shape=jax.ShapeDtypeStruct((N, oh_f, ow_f, 1), jnp.float32),
        grid=(N,),
        in_specs=in_specs,
        out_specs=pl.BlockSpec((None, oh_f, ow_f, 1), lambda n: (n, 0, 0, 0)),
        scratch_shapes=scratch,
        compiler_params=pltpu.CompilerParams(dimension_semantics=("parallel",)),
    )(*args)
    return jnp.transpose(out, (0, 3, 1, 2))                  # NHWC -> NCHW


# ----------------------------------------------------------------------------
# Pure-JAX reference (lax conv) for correctness checking
# ----------------------------------------------------------------------------
def _conv_ref(x, w, b, stride, pad, groups):
    y = jax.lax.conv_general_dilated(
        x, w, (stride, stride), ((pad, pad), (pad, pad)),
        dimension_numbers=("NCHW", "OIHW", "NCHW"),
        feature_group_count=groups)
    return y + b[None, :, None, None]


def reference_forward(x, p, num_classes, ndf):
    lrelu = lambda v: jnp.where(v >= 0, v, NEG_SLOPE * v)
    chans = [num_classes, ndf, ndf * 2, ndf * 4]
    for i in range(1, 5):
        c = chans[i - 1]
        x = _conv_ref(x, p[f"depth{i}_w"], p[f"depth{i}_b"], 2, 1, c)
        x = _conv_ref(x, p[f"point{i}_w"], p[f"point{i}_b"], 1, 0, 1)
        x = lrelu(x)
    x = _conv_ref(x, p["classifier_w"], p["classifier_b"], 2, 1, 1)
    return x


# ----------------------------------------------------------------------------
def init_params(key, num_classes, ndf):
    specs = {
        "depth1_w": (num_classes, 1, 4, 4), "depth1_b": (num_classes,),
        "point1_w": (ndf, num_classes, 1, 1), "point1_b": (ndf,),
        "depth2_w": (ndf, 1, 4, 4), "depth2_b": (ndf,),
        "point2_w": (ndf * 2, ndf, 1, 1), "point2_b": (ndf * 2,),
        "depth3_w": (ndf * 2, 1, 4, 4), "depth3_b": (ndf * 2,),
        "point3_w": (ndf * 4, ndf * 2, 1, 1), "point3_b": (ndf * 4,),
        "depth4_w": (ndf * 4, 1, 4, 4), "depth4_b": (ndf * 4,),
        "point4_w": (ndf * 8, ndf * 4, 1, 1), "point4_b": (ndf * 8,),
        "classifier_w": (1, ndf * 8, 4, 4), "classifier_b": (1,),
    }
    keys = jax.random.split(key, len(specs))
    return {name: 0.1 * jax.random.normal(k, shape, jnp.float32)
            for k, (name, shape) in zip(keys, specs.items())}


if __name__ == "__main__":
    num_classes, ndf = 4, 16          # small synthetic config
    N, H, W = 2, 32, 32               # 32 -> 16 -> 8 -> 4 -> 2 -> 1

    kx, kp = jax.random.split(jax.random.PRNGKey(0))
    params = init_params(kp, num_classes, ndf)
    x = jax.random.normal(kx, (N, num_classes, H, W), jnp.float32)

    fwd = jax.jit(light_discriminator_forward)
    out = jax.block_until_ready(fwd(x, params))

    assert out.shape == (N, 1, 1, 1), out.shape

    ref = jax.block_until_ready(reference_forward(x, params, num_classes, ndf))
    assert bool(jnp.allclose(out, ref, rtol=2e-2, atol=2e-2)), (
        f"mismatch: max abs err {float(jnp.max(jnp.abs(out - ref)))}")

    print("KERNEL_OK")
</pallas_src>

<mosaic_0001>
module attributes {stable_mosaic.version = 11 : i64} {
  func.func @_fused_kernel(%arg0: i32, %arg1: memref<1x34x34x4xf32, #tpu.memory_space<vmem>>, %arg2: memref<64x16xf32, #tpu.memory_space<vmem>>, %arg3: memref<1x16xf32, #tpu.memory_space<vmem>>, %arg4: memref<256x32xf32, #tpu.memory_space<vmem>>, %arg5: memref<1x32xf32, #tpu.memory_space<vmem>>, %arg6: memref<512x64xf32, #tpu.memory_space<vmem>>, %arg7: memref<1x64xf32, #tpu.memory_space<vmem>>, %arg8: memref<1024x128xf32, #tpu.memory_space<vmem>>, %arg9: memref<1x128xf32, #tpu.memory_space<vmem>>, %arg10: memref<2048x1xf32, #tpu.memory_space<vmem>>, %arg11: memref<1x1xf32, #tpu.memory_space<vmem>>, %arg12: memref<1x1x1x1xf32, #tpu.memory_space<vmem>>, %arg13: memref<18x18x16xf32, #tpu.memory_space<vmem>>, %arg14: memref<10x10x32xf32, #tpu.memory_space<vmem>>, %arg15: memref<6x6x64xf32, #tpu.memory_space<vmem>>, %arg16: memref<4x4x128xf32, #tpu.memory_space<vmem>>, %arg17: memref<16x16x64xf32, #tpu.memory_space<vmem>>, %arg18: memref<8x8x256xf32, #tpu.memory_space<vmem>>, %arg19: memref<4x4x512xf32, #tpu.memory_space<vmem>>, %arg20: memref<2x2x1024xf32, #tpu.memory_space<vmem>>, %arg21: memref<1x1x2048xf32, #tpu.memory_space<vmem>>) attributes {dimension_semantics = [#tpu.dimension_semantics<parallel>], iteration_bounds = array<i64: 2>, scalar_prefetch = 0 : i64, scratch_operands = 9 : i64, tpu.core_type = #tpu.core_type<tc>, window_params = [{transform_indices = @transform_0, window_bounds = array<i64: 1, 34, 34, 4>}, {pipeline_mode = #tpu.pipeline_mode<synchronous>, transform_indices = @transform_1, window_bounds = array<i64: 64, 16>}, {pipeline_mode = #tpu.pipeline_mode<synchronous>, transform_indices = @transform_2, window_bounds = array<i64: 1, 16>}, {pipeline_mode = #tpu.pipeline_mode<synchronous>, transform_indices = @transform_3, window_bounds = array<i64: 256, 32>}, {pipeline_mode = #tpu.pipeline_mode<synchronous>, transform_indices = @transform_4, window_bounds = array<i64: 1, 32>}, {pipeline_mode = #tpu.pipeline_mode<synchronous>, transform_indices = @transform_5, window_bounds = array<i64: 512, 64>}, {pipeline_mode = #tpu.pipeline_mode<synchronous>, transform_indices = @transform_6, window_bounds = array<i64: 1, 64>}, {pipeline_mode = #tpu.pipeline_mode<synchronous>, transform_indices = @transform_7, window_bounds = array<i64: 1024, 128>}, {pipeline_mode = #tpu.pipeline_mode<synchronous>, transform_indices = @transform_8, window_bounds = array<i64: 1, 128>}, {pipeline_mode = #tpu.pipeline_mode<synchronous>, transform_indices = @transform_9, window_bounds = array<i64: 2048, 1>}, {pipeline_mode = #tpu.pipeline_mode<synchronous>, transform_indices = @transform_10, window_bounds = array<i64: 1, 1>}, {transform_indices = @transform_11, window_bounds = array<i64: 1, 1, 1, 1>}]} {
    %c0 = arith.constant 0 : index
    %c0_0 = arith.constant 0 : index
    %c0_1 = arith.constant 0 : index
    %c0_2 = arith.constant 0 : index
    %0 = tpu.strided_load %arg1[%c0, %c0_0, %c0_1, %c0_2] {strides = array<i32: 1, 2, 2, 1>} : memref<1x34x34x4xf32, #tpu.memory_space<vmem>>, vector<1x16x16x4xf32>
    %1 = vector.shape_cast %0 : vector<1x16x16x4xf32> to vector<16x16x4xf32>
    %c0_3 = arith.constant 0 : index
    %c0_4 = arith.constant 0 : index
    %c0_5 = arith.constant 0 : index
    %2 = vector.load %arg17[%c0_3, %c0_4, %c0_5] : memref<16x16x64xf32, #tpu.memory_space<vmem>>, vector<16x16x4xf32>
    tpu.vector_store %arg17[%c0_3, %c0_4, %c0_5], %1 {strides = array<i32>} : memref<16x16x64xf32, #tpu.memory_space<vmem>>, vector<16x16x4xf32>,
    %c0_6 = arith.constant 0 : index
    %c0_7 = arith.constant 0 : index
    %c1 = arith.constant 1 : index
    %c0_8 = arith.constant 0 : index
    %3 = tpu.strided_load %arg1[%c0_6, %c0_7, %c1, %c0_8] {strides = array<i32: 1, 2, 2, 1>} : memref<1x34x34x4xf32, #tpu.memory_space<vmem>>, vector<1x16x16x4xf32>
    %4 = vector.shape_cast %3 : vector<1x16x16x4xf32> to vector<16x16x4xf32>
    %c0_9 = arith.constant 0 : index
    %c0_10 = arith.constant 0 : index
    %c4 = arith.constant 4 : index
    %5 = vector.load %arg17[%c0_9, %c0_10, %c4] : memref<16x16x64xf32, #tpu.memory_space<vmem>>, vector<16x16x4xf32>
    tpu.vector_store %arg17[%c0_9, %c0_10, %c4], %4 {strides = array<i32>} : memref<16x16x64xf32, #tpu.memory_space<vmem>>, vector<16x16x4xf32>,
    %c0_11 = arith.constant 0 : index
    %c0_12 = arith.constant 0 : index
    %c2 = arith.constant 2 : index
    %c0_13 = arith.constant 0 : index
    %6 = tpu.strided_load %arg1[%c0_11, %c0_12, %c2, %c0_13] {strides = array<i32: 1, 2, 2, 1>} : memref<1x34x34x4xf32, #tpu.memory_space<vmem>>, vector<1x16x16x4xf32>
    %7 = vector.shape_cast %6 : vector<1x16x16x4xf32> to vector<16x16x4xf32>
    %c0_14 = arith.constant 0 : index
    %c0_15 = arith.constant 0 : index
    %c8 = arith.constant 8 : index
    %8 = vector.load %arg17[%c0_14, %c0_15, %c8] : memref<16x16x64xf32, #tpu.memory_space<vmem>>, vector<16x16x4xf32>
    tpu.vector_store %arg17[%c0_14, %c0_15, %c8], %7 {strides = array<i32>} : memref<16x16x64xf32, #tpu.memory_space<vmem>>, vector<16x16x4xf32>,
    %c0_16 = arith.constant 0 : index
    %c0_17 = arith.constant 0 : index
    %c3 = arith.constant 3 : index
    %c0_18 = arith.constant 0 : index
    %9 = tpu.strided_load %arg1[%c0_16, %c0_17, %c3, %c0_18] {strides = array<i32: 1, 2, 2, 1>} : memref<1x34x34x4xf32, #tpu.memory_space<vmem>>, vector<1x16x16x4xf32>
    %10 = vector.shape_cast %9 : vector<1x16x16x4xf32> to vector<16x16x4xf32>
    %c0_19 = arith.constant 0 : index
    %c0_20 = arith.constant 0 : index
    %c12 = arith.constant 12 : index
    %11 = vector.load %arg17[%c0_19, %c0_20, %c12] : memref<16x16x64xf32, #tpu.memory_space<vmem>>, vector<16x16x4xf32>
    tpu.vector_store %arg17[%c0_19, %c0_20, %c12], %10 {strides = array<i32>} : memref<16x16x64xf32, #tpu.memory_space<vmem>>, vector<16x16x4xf32>,
    %c0_21 = arith.constant 0 : index
    %c1_22 = arith.constant 1 : index
    %c0_23 = arith.constant 0 : index
    %c0_24 = arith.constant 0 : index
    %12 = tpu.strided_load %arg1[%c0_21, %c1_22, %c0_23, %c0_24] {strides = array<i32: 1, 2, 2, 1>} : memref<1x34x34x4xf32, #tpu.memory_space<vmem>>, vector<1x16x16x4xf32>
    %13 = vector.shape_cast %12 : vector<1x16x16x4xf32> to vector<16x16x4xf32>
    %c0_25 = arith.constant 0 : index
    %c0_26 = arith.constant 0 : index
    %c16 = arith.constant 16 : index
    %14 = vector.load %arg17[%c0_25, %c0_26, %c16] : memref<16x16x64xf32, #tpu.memory_space<vmem>>, vector<16x16x4xf32>
    tpu.vector_store %arg17[%c0_25, %c0_26, %c16], %13 {strides = array<i32>} : memref<16x16x64xf32, #tpu.memory_space<vmem>>, vector<16x16x4xf32>,
    %c0_27 = arith.constant 0 : index
    %c1_28 = arith.constant 1 : index
    %c1_29 = arith.constant 1 : index
    %c0_30 = arith.constant 0 : index
    %15 = tpu.strided_load %arg1[%c0_27, %c1_28, %c1_29, %c0_30] {strides = array<i32: 1, 2, 2, 1>} : memref<1x34x34x4xf32, #tpu.memory_space<vmem>>, vector<1x16x16x4xf32>
    %16 = vector.shape_cast %15 : vector<1x16x16x4xf32> to vector<16x16x4xf32>
    %c0_31 = arith.constant 0 : index
    %c0_32 = arith.constant 0 : index
    %c20 = arith.constant 20 : index
    %17 = vector.load %arg17[%c0_31, %c0_32, %c20] : memref<16x16x64xf32, #tpu.memory_space<vmem>>, vector<16x16x4xf32>
    tpu.vector_store %arg17[%c0_31, %c0_32, %c20], %16 {strides = array<i32>} : memref<16x16x64xf32, #tpu.memory_space<vmem>>, vector<16x16x4xf32>,
    %c0_33 = arith.constant 0 : index
    %c1_34 = arith.constant 1 : index
    %c2_35 = arith.constant 2 : index
    %c0_36 = arith.constant 0 : index
    %18 = tpu.strided_load %arg1[%c0_33, %c1_34, %c2_35, %c0_36] {strides = array<i32: 1, 2, 2, 1>} : memref<1x34x34x4xf32, #tpu.memory_space<vmem>>, vector<1x16x16x4xf32>
    %19 = vector.shape_cast %18 : vector<1x16x16x4xf32> to vector<16x16x4xf32>
    %c0_37 = arith.constant 0 : index
    %c0_38 = arith.constant 0 : index
    %c24 = arith.constant 24 : index
    %20 = vector.load %arg17[%c0_37, %c0_38, %c24] : memref<16x16x64xf32, #tpu.memory_space<vmem>>, vector<16x16x4xf32>
    tpu.vector_store %arg17[%c0_37, %c0_38, %c24], %19 {strides = array<i32>} : memref<16x16x64xf32, #tpu.memory_space<vmem>>, vector<16x16x4xf32>,
    %c0_39 = arith.constant 0 : index
    %c1_40 = arith.constant 1 : index
    %c3_41 = arith.constant 3 : index
    %c0_42 = arith.constant 0 : index
    %21 = tpu.strided_load %arg1[%c0_39, %c1_40, %c3_41, %c0_42] {strides = array<i32: 1, 2, 2, 1>} : memref<1x34x34x4xf32, #tpu.memory_space<vmem>>, vector<1x16x16x4xf32>
    %22 = vector.shape_cast %21 : vector<1x16x16x4xf32> to vector<16x16x4xf32>
    %c0_43 = arith.constant 0 : index
    %c0_44 = arith.constant 0 : index
    %c28 = arith.constant 28 : index
    %23 = vector.load %arg17[%c0_43, %c0_44, %c28] : memref<16x16x64xf32, #tpu.memory_space<vmem>>, vector<16x16x4xf32>
    tpu.vector_store %arg17[%c0_43, %c0_44, %c28], %22 {strides = array<i32>} : memref<16x16x64xf32, #tpu.memory_space<vmem>>, vector<16x16x4xf32>,
    %c0_45 = arith.constant 0 : index
    %c2_46 = arith.constant 2 : index
    %c0_47 = arith.constant 0 : index
    %c0_48 = arith.constant 0 : index
    %24 = tpu.strided_load %arg1[%c0_45, %c2_46, %c0_47, %c0_48] {strides = array<i32: 1, 2, 2, 1>} : memref<1x34x34x4xf32, #tpu.memory_space<vmem>>, vector<1x16x16x4xf32>
    %25 = vector.shape_cast %24 : vector<1x16x16x4xf32> to vector<16x16x4xf32>
    %c0_49 = arith.constant 0 : index
    %c0_50 = arith.constant 0 : index
    %c32 = arith.constant 32 : index
    %26 = vector.load %arg17[%c0_49, %c0_50, %c32] : memref<16x16x64xf32, #tpu.memory_space<vmem>>, vector<16x16x4xf32>
    tpu.vector_store %arg17[%c0_49, %c0_50, %c32], %25 {strides = array<i32>} : memref<16x16x64xf32, #tpu.memory_space<vmem>>, vector<16x16x4xf32>,
    %c0_51 = arith.constant 0 : index
    %c2_52 = arith.constant 2 : index
    %c1_53 = arith.constant 1 : index
    %c0_54 = arith.constant 0 : index
    %27 = tpu.strided_load %arg1[%c0_51, %c2_52, %c1_53, %c0_54] {strides = array<i32: 1, 2, 2, 1>} : memref<1x34x34x4xf32, #tpu.memory_space<vmem>>, vector<1x16x16x4xf32>
    %28 = vector.shape_cast %27 : vector<1x16x16x4xf32> to vector<16x16x4xf32>
    %c0_55 = arith.constant 0 : index
    %c0_56 = arith.constant 0 : index
    %c36 = arith.constant 36 : index
    %29 = vector.load %arg17[%c0_55, %c0_56, %c36] : memref<16x16x64xf32, #tpu.memory_space<vmem>>, vector<16x16x4xf32>
    tpu.vector_store %arg17[%c0_55, %c0_56, %c36], %28 {strides = array<i32>} : memref<16x16x64xf32, #tpu.memory_space<vmem>>, vector<16x16x4xf32>,
    %c0_57 = arith.constant 0 : index
    %c2_58 = arith.constant 2 : index
    %c2_59 = arith.constant 2 : index
    %c0_60 = arith.constant 0 : index
    %30 = tpu.strided_load %arg1[%c0_57, %c2_58, %c2_59, %c0_60] {strides = array<i32: 1, 2, 2, 1>} : memref<1x34x34x4xf32, #tpu.memory_space<vmem>>, vector<1x16x16x4xf32>
    %31 = vector.shape_cast %30 : vector<1x16x16x4xf32> to vector<16x16x4xf32>
    %c0_61 = arith.constant 0 : index
    %c0_62 = arith.constant 0 : index
    %c40 = arith.constant 40 : index
    %32 = vector.load %arg17[%c0_61, %c0_62, %c40] : memref<16x16x64xf32, #tpu.memory_space<vmem>>, vector<16x16x4xf32>
    tpu.vector_store %arg17[%c0_61, %c0_62, %c40], %31 {strides = array<i32>} : memref<16x16x64xf32, #tpu.memory_space<vmem>>, vector<16x16x4xf32>,
    %c0_63 = arith.constant 0 : index
    %c2_64 = arith.constant 2 : index
    %c3_65 = arith.constant 3 : index
    %c0_66 = arith.constant 0 : index
    %33 = tpu.strided_load %arg1[%c0_63, %c2_64, %c3_65, %c0_66] {strides = array<i32: 1, 2, 2, 1>} : memref<1x34x34x4xf32, #tpu.memory_space<vmem>>, vector<1x16x16x4xf32>
    %34 = vector.shape_cast %33 : vector<1x16x16x4xf32> to vector<16x16x4xf32>
    %c0_67 = arith.constant 0 : index
    %c0_68 = arith.constant 0 : index
    %c44 = arith.constant 44 : index
    %35 = vector.load %arg17[%c0_67, %c0_68, %c44] : memref<16x16x64xf32, #tpu.memory_space<vmem>>, vector<16x16x4xf32>
    tpu.vector_store %arg17[%c0_67, %c0_68, %c44], %34 {strides = array<i32>} : memref<16x16x64xf32, #tpu.memory_space<vmem>>, vector<16x16x4xf32>,
    %c0_69 = arith.constant 0 : index
    %c3_70 = arith.constant 3 : index
    %c0_71 = arith.constant 0 : index
    %c0_72 = arith.constant 0 : index
    %36 = tpu.strided_load %arg1[%c0_69, %c3_70, %c0_71, %c0_72] {strides = array<i32: 1, 2, 2, 1>} : memref<1x34x34x4xf32, #tpu.memory_space<vmem>>, vector<1x16x16x4xf32>
    %37 = vector.shape_cast %36 : vector<1x16x16x4xf32> to vector<16x16x4xf32>
    %c0_73 = arith.constant 0 : index
    %c0_74 = arith.constant 0 : index
    %c48 = arith.constant 48 : index
    %38 = vector.load %arg17[%c0_73, %c0_74, %c48] : memref<16x16x64xf32, #tpu.memory_space<vmem>>, vector<16x16x4xf32>
    tpu.vector_store %arg17[%c0_73, %c0_74, %c48], %37 {strides = array<i32>} : memref<16x16x64xf32, #tpu.memory_space<vmem>>, vector<16x16x4xf32>,
    %c0_75 = arith.constant 0 : index
    %c3_76 = arith.constant 3 : index
    %c1_77 = arith.constant 1 : index
    %c0_78 = arith.constant 0 : index
    %39 = tpu.strided_load %arg1[%c0_75, %c3_76, %c1_77, %c0_78] {strides = array<i32: 1, 2, 2, 1>} : memref<1x34x34x4xf32, #tpu.memory_space<vmem>>, vector<1x16x16x4xf32>
    %40 = vector.shape_cast %39 : vector<1x16x16x4xf32> to vector<16x16x4xf32>
    %c0_79 = arith.constant 0 : index
    %c0_80 = arith.constant 0 : index
    %c52 = arith.constant 52 : index
    %41 = vector.load %arg17[%c0_79, %c0_80, %c52] : memref<16x16x64xf32, #tpu.memory_space<vmem>>, vector<16x16x4xf32>
    tpu.vector_store %arg17[%c0_79, %c0_80, %c52], %40 {strides = array<i32>} : memref<16x16x64xf32, #tpu.memory_space<vmem>>, vector<16x16x4xf32>,
    %c0_81 = arith.constant 0 : index
    %c3_82 = arith.constant 3 : index
    %c2_83 = arith.constant 2 : index
    %c0_84 = arith.constant 0 : index
    %42 = tpu.strided_load %arg1[%c0_81, %c3_82, %c2_83, %c0_84] {strides = array<i32: 1, 2, 2, 1>} : memref<1x34x34x4xf32, #tpu.memory_space<vmem>>, vector<1x16x16x4xf32>
    %43 = vector.shape_cast %42 : vector<1x16x16x4xf32> to vector<16x16x4xf32>
    %c0_85 = arith.constant 0 : index
    %c0_86 = arith.constant 0 : index
    %c56 = arith.constant 56 : index
    %44 = vector.load %arg17[%c0_85, %c0_86, %c56] : memref<16x16x64xf32, #tpu.memory_space<vmem>>, vector<16x16x4xf32>
    tpu.vector_store %arg17[%c0_85, %c0_86, %c56], %43 {strides = array<i32>} : memref<16x16x64xf32, #tpu.memory_space<vmem>>, vector<16x16x4xf32>,
    %c0_87 = arith.constant 0 : index
    %c3_88 = arith.constant 3 : index
    %c3_89 = arith.constant 3 : index
    %c0_90 = arith.constant 0 : index
    %45 = tpu.strided_load %arg1[%c0_87, %c3_88, %c3_89, %c0_90] {strides = array<i32: 1, 2, 2, 1>} : memref<1x34x34x4xf32, #tpu.memory_space<vmem>>, vector<1x16x16x4xf32>
    %46 = vector.shape_cast %45 : vector<1x16x16x4xf32> to vector<16x16x4xf32>
    %c0_91 = arith.constant 0 : index
    %c0_92 = arith.constant 0 : index
    %c60 = arith.constant 60 : index
    %47 = vector.load %arg17[%c0_91, %c0_92, %c60] : memref<16x16x64xf32, #tpu.memory_space<vmem>>, vector<16x16x4xf32>
    tpu.vector_store %arg17[%c0_91, %c0_92, %c60], %46 {strides = array<i32>} : memref<16x16x64xf32, #tpu.memory_space<vmem>>, vector<16x16x4xf32>,
    %c0_93 = arith.constant 0 : index
    %c0_94 = arith.constant 0 : index
    %c0_95 = arith.constant 0 : index
    %48 = vector.load %arg17[%c0_93, %c0_94, %c0_95] : memref<16x16x64xf32, #tpu.memory_space<vmem>>, vector<16x16x64xf32>
    %49 = vector.shape_cast %48 : vector<16x16x64xf32> to vector<256x64xf32>
    %c0_96 = arith.constant 0 : index
    %c0_97 = arith.constant 0 : index
    %50 = vector.load %arg2[%c0_96, %c0_97] : memref<64x16xf32, #tpu.memory_space<vmem>>, vector<64x16xf32>
    %cst = arith.constant dense<0.000000e+00> : vector<256x16xf32>
    %51 = tpu.matmul %49, %50, %cst {dimension_numbers = #tpu.dot_dimension_numbers<[1], [0], [0], [1], [0, 0, 1, 1], [], []>} : vector<256x64xf32>, vector<64x16xf32>, vector<256x16xf32> -> vector<256x16xf32>
    %c0_98 = arith.constant 0 : index
    %c0_99 = arith.constant 0 : index
    %52 = vector.load %arg3[%c0_98, %c0_99] : memref<1x16xf32, #tpu.memory_space<vmem>>, vector<1x16xf32>
    %53 = vector.broadcast %52 : vector<1x16xf32> to vector<256x16xf32>
    %54 = arith.addf %51, %53 : vector<256x16xf32>
    %cst_100 = arith.constant 0.000000e+00 : f32
    %55 = vector.broadcast %cst_100 : f32 to vector<256x16xf32>
    %56 = arith.cmpf oge, %54, %55 : vector<256x16xf32>
    %cst_101 = arith.constant 2.000000e-01 : f32
    %57 = vector.broadcast %cst_101 : f32 to vector<256x16xf32>
    %58 = arith.mulf %57, %54 : vector<256x16xf32>
    %59 = arith.select %56, %54, %58 : vector<256x16xi1>, vector<256x16xf32>
    %60 = vector.shape_cast %59 : vector<256x16xf32> to vector<16x16x16xf32>
    %cst_102 = arith.constant 0.000000e+00 : f32
    %61 = vector.broadcast %cst_102 : f32 to vector<18x18x16xf32>
    %c0_103 = arith.constant 0 : index
    %c0_104 = arith.constant 0 : index
    %c0_105 = arith.constant 0 : index
    %62 = vector.load %arg13[%c0_103, %c0_104, %c0_105] : memref<18x18x16xf32, #tpu.memory_space<vmem>>, vector<18x18x16xf32>
    tpu.vector_store %arg13[%c0_103, %c0_104, %c0_105], %61 {strides = array<i32>} : memref<18x18x16xf32, #tpu.memory_space<vmem>>, vector<18x18x16xf32>,
    %c1_106 = arith.constant 1 : index
    %c1_107 = arith.constant 1 : index
    %c0_108 = arith.constant 0 : index
    %63 = vector.load %arg13[%c1_106, %c1_107, %c0_108] : memref<18x18x16xf32, #tpu.memory_space<vmem>>, vector<16x16x16xf32>
    tpu.vector_store %arg13[%c1_106, %c1_107, %c0_108], %60 {strides = array<i32>} : memref<18x18x16xf32, #tpu.memory_space<vmem>>, vector<16x16x16xf32>,
    %c0_109 = arith.constant 0 : index
    %c0_110 = arith.constant 0 : index
    %c0_111 = arith.constant 0 : index
    %64 = tpu.strided_load %arg13[%c0_109, %c0_110, %c0_111] {strides = array<i32: 2, 2, 1>} : memref<18x18x16xf32, #tpu.memory_space<vmem>>, vector<8x8x16xf32>
    %c0_112 = arith.constant 0 : index
    %c0_113 = arith.constant 0 : index
    %c0_114 = arith.constant 0 : index
    %65 = vector.load %arg18[%c0_112, %c0_113, %c0_114] : memref<8x8x256xf32, #tpu.memory_space<vmem>>, vector<8x8x16xf32>
    tpu.vector_store %arg18[%c0_112, %c0_113, %c0_114], %64 {strides = array<i32>} : memref<8x8x256xf32, #tpu.memory_space<vmem>>, vector<8x8x16xf32>,
    %c0_115 = arith.constant 0 : index
    %c1_116 = arith.constant 1 : index
    %c0_117 = arith.constant 0 : index
    %66 = tpu.strided_load %arg13[%c0_115, %c1_116, %c0_117] {strides = array<i32: 2, 2, 1>} : memref<18x18x16xf32, #tpu.memory_space<vmem>>, vector<8x8x16xf32>
    %c0_118 = arith.constant 0 : index
    %c0_119 = arith.constant 0 : index
    %c16_120 = arith.constant 16 : index
    %67 = vector.load %arg18[%c0_118, %c0_119, %c16_120] : memref<8x8x256xf32, #tpu.memory_space<vmem>>, vector<8x8x16xf32>
    tpu.vector_store %arg18[%c0_118, %c0_119, %c16_120], %66 {strides = array<i32>} : memref<8x8x256xf32, #tpu.memory_space<vmem>>, vector<8x8x16xf32>,
    %c0_121 = arith.constant 0 : index
    %c2_122 = arith.constant 2 : index
    %c0_123 = arith.constant 0 : index
    %68 = tpu.strided_load %arg13[%c0_121, %c2_122, %c0_123] {strides = array<i32: 2, 2, 1>} : memref<18x18x16xf32, #tpu.memory_space<vmem>>, vector<8x8x16xf32>
    %c0_124 = arith.constant 0 : index
    %c0_125 = arith.constant 0 : index
    %c32_126 = arith.constant 32 : index
    %69 = vector.load %arg18[%c0_124, %c0_125, %c32_126] : memref<8x8x256xf32, #tpu.memory_space<vmem>>, vector<8x8x16xf32>
    tpu.vector_store %arg18[%c0_124, %c0_125, %c32_126], %68 {strides = array<i32>} : memref<8x8x256xf32, #tpu.memory_space<vmem>>, vector<8x8x16xf32>,
    %c0_127 = arith.constant 0 : index
    %c3_128 = arith.constant 3 : index
    %c0_129 = arith.constant 0 : index
    %70 = tpu.strided_load %arg13[%c0_127, %c3_128, %c0_129] {strides = array<i32: 2, 2, 1>} : memref<18x18x16xf32, #tpu.memory_space<vmem>>, vector<8x8x16xf32>
    %c0_130 = arith.constant 0 : index
    %c0_131 = arith.constant 0 : index
    %c48_132 = arith.constant 48 : index
    %71 = vector.load %arg18[%c0_130, %c0_131, %c48_132] : memref<8x8x256xf32, #tpu.memory_space<vmem>>, vector<8x8x16xf32>
    tpu.vector_store %arg18[%c0_130, %c0_131, %c48_132], %70 {strides = array<i32>} : memref<8x8x256xf32, #tpu.memory_space<vmem>>, vector<8x8x16xf32>,
    %c1_133 = arith.constant 1 : index
    %c0_134 = arith.constant 0 : index
    %c0_135 = arith.constant 0 : index
    %72 = tpu.strided_load %arg13[%c1_133, %c0_134, %c0_135] {strides = array<i32: 2, 2, 1>} : memref<18x18x16xf32, #tpu.memory_space<vmem>>, vector<8x8x16xf32>
    %c0_136 = arith.constant 0 : index
    %c0_137 = arith.constant 0 : index
    %c64 = arith.constant 64 : index
    %73 = vector.load %arg18[%c0_136, %c0_137, %c64] : memref<8x8x256xf32, #tpu.memory_space<vmem>>, vector<8x8x16xf32>
    tpu.vector_store %arg18[%c0_136, %c0_137, %c64], %72 {strides = array<i32>} : memref<8x8x256xf32, #tpu.memory_space<vmem>>, vector<8x8x16xf32>,
    %c1_138 = arith.constant 1 : index
    %c1_139 = arith.constant 1 : index
    %c0_140 = arith.constant 0 : index
    %74 = tpu.strided_load %arg13[%c1_138, %c1_139, %c0_140] {strides = array<i32: 2, 2, 1>} : memref<18x18x16xf32, #tpu.memory_space<vmem>>, vector<8x8x16xf32>
    %c0_141 = arith.constant 0 : index
    %c0_142 = arith.constant 0 : index
    %c80 = arith.constant 80 : index
    %75 = vector.load %arg18[%c0_141, %c0_142, %c80] : memref<8x8x256xf32, #tpu.memory_space<vmem>>, vector<8x8x16xf32>
    tpu.vector_store %arg18[%c0_141, %c0_142, %c80], %74 {strides = array<i32>} : memref<8x8x256xf32, #tpu.memory_space<vmem>>, vector<8x8x16xf32>,
    %c1_143 = arith.constant 1 : index
    %c2_144 = arith.constant 2 : index
    %c0_145 = arith.constant 0 : index
    %76 = tpu.strided_load %arg13[%c1_143, %c2_144, %c0_145] {strides = array<i32: 2, 2, 1>} : memref<18x18x16xf32, #tpu.memory_space<vmem>>, vector<8x8x16xf32>
    %c0_146 = arith.constant 0 : index
    %c0_147 = arith.constant 0 : index
    %c96 = arith.constant 96 : index
    %77 = vector.load %arg18[%c0_146, %c0_147, %c96] : memref<8x8x256xf32, #tpu.memory_space<vmem>>, vector<8x8x16xf32>
    tpu.vector_store %arg18[%c0_146, %c0_147, %c96], %76 {strides = array<i32>} : memref<8x8x256xf32, #tpu.memory_space<vmem>>, vector<8x8x16xf32>,
    %c1_148 = arith.constant 1 : index
    %c3_149 = arith.constant 3 : index
    %c0_150 = arith.constant 0 : index
    %78 = tpu.strided_load %arg13[%c1_148, %c3_149, %c0_150] {strides = array<i32: 2, 2, 1>} : memref<18x18x16xf32, #tpu.memory_space<vmem>>, vector<8x8x16xf32>
    %c0_151 = arith.constant 0 : index
    %c0_152 = arith.constant 0 : index
    %c112 = arith.constant 112 : index
    %79 = vector.load %arg18[%c0_151, %c0_152, %c112] : memref<8x8x256xf32, #tpu.memory_space<vmem>>, vector<8x8x16xf32>
    tpu.vector_store %arg18[%c0_151, %c0_152, %c112], %78 {strides = array<i32>} : memref<8x8x256xf32, #tpu.memory_space<vmem>>, vector<8x8x16xf32>,
    %c2_153 = arith.constant 2 : index
    %c0_154 = arith.constant 0 : index
    %c0_155 = arith.constant 0 : index
    %80 = tpu.strided_load %arg13[%c2_153, %c0_154, %c0_155] {strides = array<i32: 2, 2, 1>} : memref<18x18x16xf32, #tpu.memory_space<vmem>>, vector<8x8x16xf32>
    %c0_156 = arith.constant 0 : index
    %c0_157 = arith.constant 0 : index
    %c128 = arith.constant 128 : index
    %81 = vector.load %arg18[%c0_156, %c0_157, %c128] : memref<8x8x256xf32, #tpu.memory_space<vmem>>, vector<8x8x16xf32>
    tpu.vector_store %arg18[%c0_156, %c0_157, %c128], %80 {strides = array<i32>} : memref<8x8x256xf32, #tpu.memory_space<vmem>>, vector<8x8x16xf32>,
    %c2_158 = arith.constant 2 : index
    %c1_159 = arith.constant 1 : index
    %c0_160 = arith.constant 0 : index
    %82 = tpu.strided_load %arg13[%c2_158, %c1_159, %c0_160] {strides = array<i32: 2, 2, 1>} : memref<18x18x16xf32, #tpu.memory_space<vmem>>, vector<8x8x16xf32>
    %c0_161 = arith.constant 0 : index
    %c0_162 = arith.constant 0 : index
    %c144 = arith.constant 144 : index
    %83 = vector.load %arg18[%c0_161, %c0_162, %c144] : memref<8x8x256xf32, #tpu.memory_space<vmem>>, vector<8x8x16xf32>
    tpu.vector_store %arg18[%c0_161, %c0_162, %c144], %82 {strides = array<i32>} : memref<8x8x256xf32, #tpu.memory_space<vmem>>, vector<8x8x16xf32>,
    %c2_163 = arith.constant 2 : index
    %c2_164 = arith.constant 2 : index
    %c0_165 = arith.constant 0 : index
    %84 = tpu.strided_load %arg13[%c2_163, %c2_164, %c0_165] {strides = array<i32: 2, 2, 1>} : memref<18x18x16xf32, #tpu.memory_space<vmem>>, vector<8x8x16xf32>
    %c0_166 = arith.constant 0 : index
    %c0_167 = arith.constant 0 : index
    %c160 = arith.constant 160 : index
    %85 = vector.load %arg18[%c0_166, %c0_167, %c160] : memref<8x8x256xf32, #tpu.memory_space<vmem>>, vector<8x8x16xf32>
    tpu.vector_store %arg18[%c0_166, %c0_167, %c160], %84 {strides = array<i32>} : memref<8x8x256xf32, #tpu.memory_space<vmem>>, vector<8x8x16xf32>,
    %c2_168 = arith.constant 2 : index
    %c3_169 = arith.constant 3 : index
    %c0_170 = arith.constant 0 : index
    %86 = tpu.strided_load %arg13[%c2_168, %c3_169, %c0_170] {strides = array<i32: 2, 2, 1>} : memref<18x18x16xf32, #tpu.memory_space<vmem>>, vector<8x8x16xf32>
    %c0_171 = arith.constant 0 : index
    %c0_172 = arith.constant 0 : index
    %c176 = arith.constant 176 : index
    %87 = vector.load %arg18[%c0_171, %c0_172, %c176] : memref<8x8x256xf32, #tpu.memory_space<vmem>>, vector<8x8x16xf32>
    tpu.vector_store %arg18[%c0_171, %c0_172, %c176], %86 {strides = array<i32>} : memref<8x8x256xf32, #tpu.memory_space<vmem>>, vector<8x8x16xf32>,
    %c3_173 = arith.constant 3 : index
    %c0_174 = arith.constant 0 : index
    %c0_175 = arith.constant 0 : index
    %88 = tpu.strided_load %arg13[%c3_173, %c0_174, %c0_175] {strides = array<i32: 2, 2, 1>} : memref<18x18x16xf32, #tpu.memory_space<vmem>>, vector<8x8x16xf32>
    %c0_176 = arith.constant 0 : index
    %c0_177 = arith.constant 0 : index
    %c192 = arith.constant 192 : index
    %89 = vector.load %arg18[%c0_176, %c0_177, %c192] : memref<8x8x256xf32, #tpu.memory_space<vmem>>, vector<8x8x16xf32>
    tpu.vector_store %arg18[%c0_176, %c0_177, %c192], %88 {strides = array<i32>} : memref<8x8x256xf32, #tpu.memory_space<vmem>>, vector<8x8x16xf32>,
    %c3_178 = arith.constant 3 : index
    %c1_179 = arith.constant 1 : index
    %c0_180 = arith.constant 0 : index
    %90 = tpu.strided_load %arg13[%c3_178, %c1_179, %c0_180] {strides = array<i32: 2, 2, 1>} : memref<18x18x16xf32, #tpu.memory_space<vmem>>, vector<8x8x16xf32>
    %c0_181 = arith.constant 0 : index
    %c0_182 = arith.constant 0 : index
    %c208 = arith.constant 208 : index
    %91 = vector.load %arg18[%c0_181, %c0_182, %c208] : memref<8x8x256xf32, #tpu.memory_space<vmem>>, vector<8x8x16xf32>
    tpu.vector_store %arg18[%c0_181, %c0_182, %c208], %90 {strides = array<i32>} : memref<8x8x256xf32, #tpu.memory_space<vmem>>, vector<8x8x16xf32>,
    %c3_183 = arith.constant 3 : index
    %c2_184 = arith.constant 2 : index
    %c0_185 = arith.constant 0 : index
    %92 = tpu.strided_load %arg13[%c3_183, %c2_184, %c0_185] {strides = array<i32: 2, 2, 1>} : memref<18x18x16xf32, #tpu.memory_space<vmem>>, vector<8x8x16xf32>
    %c0_186 = arith.constant 0 : index
    %c0_187 = arith.constant 0 : index
    %c224 = arith.constant 224 : index
    %93 = vector.load %arg18[%c0_186, %c0_187, %c224] : memref<8x8x256xf32, #tpu.memory_space<vmem>>, vector<8x8x16xf32>
    tpu.vector_store %arg18[%c0_186, %c0_187, %c224], %92 {strides = array<i32>} : memref<8x8x256xf32, #tpu.memory_space<vmem>>, vector<8x8x16xf32>,
    %c3_188 = arith.constant 3 : index
    %c3_189 = arith.constant 3 : index
    %c0_190 = arith.constant 0 : index
    %94 = tpu.strided_load %arg13[%c3_188, %c3_189, %c0_190] {strides = array<i32: 2, 2, 1>} : memref<18x18x16xf32, #tpu.memory_space<vmem>>, vector<8x8x16xf32>
    %c0_191 = arith.constant 0 : index
    %c0_192 = arith.constant 0 : index
    %c240 = arith.constant 240 : index
    %95 = vector.load %arg18[%c0_191, %c0_192, %c240] : memref<8x8x256xf32, #tpu.memory_space<vmem>>, vector<8x8x16xf32>
    tpu.vector_store %arg18[%c0_191, %c0_192, %c240], %94 {strides = array<i32>} : memref<8x8x256xf32, #tpu.memory_space<vmem>>, vector<8x8x16xf32>,
    %c0_193 = arith.constant 0 : index
    %c0_194 = arith.constant 0 : index
    %c0_195 = arith.constant 0 : index
    %96 = vector.load %arg18[%c0_193, %c0_194, %c0_195] : memref<8x8x256xf32, #tpu.memory_space<vmem>>, vector<8x8x256xf32>
    %97 = vector.shape_cast %96 : vector<8x8x256xf32> to vector<64x256xf32>
    %c0_196 = arith.constant 0 : index
    %c0_197 = arith.constant 0 : index
    %98 = vector.load %arg4[%c0_196, %c0_197] : memref<256x32xf32, #tpu.memory_space<vmem>>, vector<256x32xf32>
    %cst_198 = arith.constant dense<0.000000e+00> : vector<64x32xf32>
    %99 = tpu.matmul %97, %98, %cst_198 {dimension_numbers = #tpu.dot_dimension_numbers<[1], [0], [0], [1], [0, 0, 1, 1], [], []>} : vector<64x256xf32>, vector<256x32xf32>, vector<64x32xf32> -> vector<64x32xf32>
    %c0_199 = arith.constant 0 : index
    %c0_200 = arith.constant 0 : index
    %100 = vector.load %arg5[%c0_199, %c0_200] : memref<1x32xf32, #tpu.memory_space<vmem>>, vector<1x32xf32>
    %101 = vector.broadcast %100 : vector<1x32xf32> to vector<64x32xf32>
    %102 = arith.addf %99, %101 : vector<64x32xf32>
    %cst_201 = arith.constant 0.000000e+00 : f32
    %103 = vector.broadcast %cst_201 : f32 to vector<64x32xf32>
    %104 = arith.cmpf oge, %102, %103 : vector<64x32xf32>
    %cst_202 = arith.constant 2.000000e-01 : f32
    %105 = vector.broadcast %cst_202 : f32 to vector<64x32xf32>
    %106 = arith.mulf %105, %102 : vector<64x32xf32>
    %107 = arith.select %104, %102, %106 : vector<64x32xi1>, vector<64x32xf32>
    %108 = vector.shape_cast %107 : vector<64x32xf32> to vector<8x8x32xf32>
    %cst_203 = arith.constant 0.000000e+00 : f32
    %109 = vector.broadcast %cst_203 : f32 to vector<10x10x32xf32>
    %c0_204 = arith.constant 0 : index
    %c0_205 = arith.constant 0 : index
    %c0_206 = arith.constant 0 : index
    %110 = vector.load %arg14[%c0_204, %c0_205, %c0_206] : memref<10x10x32xf32, #tpu.memory_space<vmem>>, vector<10x10x32xf32>
    tpu.vector_store %arg14[%c0_204, %c0_205, %c0_206], %109 {strides = array<i32>} : memref<10x10x32xf32, #tpu.memory_space<vmem>>, vector<10x10x32xf32>,
    %c1_207 = arith.constant 1 : index
    %c1_208 = arith.constant 1 : index
    %c0_209 = arith.constant 0 : index
    %111 = vector.load %arg14[%c1_207, %c1_208, %c0_209] : memref<10x10x32xf32, #tpu.memory_space<vmem>>, vector<8x8x32xf32>
    tpu.vector_store %arg14[%c1_207, %c1_208, %c0_209], %108 {strides = array<i32>} : memref<10x10x32xf32, #tpu.memory_space<vmem>>, vector<8x8x32xf32>,
    %c0_210 = arith.constant 0 : index
    %c0_211 = arith.constant 0 : index
    %c0_212 = arith.constant 0 : index
    %112 = tpu.strided_load %arg14[%c0_210, %c0_211, %c0_212] {strides = array<i32: 2, 2, 1>} : memref<10x10x32xf32, #tpu.memory_space<vmem>>, vector<4x4x32xf32>
    %c0_213 = arith.constant 0 : index
    %c0_214 = arith.constant 0 : index
    %c0_215 = arith.constant 0 : index
    %113 = vector.load %arg19[%c0_213, %c0_214, %c0_215] : memref<4x4x512xf32, #tpu.memory_space<vmem>>, vector<4x4x32xf32>
    tpu.vector_store %arg19[%c0_213, %c0_214, %c0_215], %112 {strides = array<i32>} : memref<4x4x512xf32, #tpu.memory_space<vmem>>, vector<4x4x32xf32>,
    %c0_216 = arith.constant 0 : index
    %c1_217 = arith.constant 1 : index
    %c0_218 = arith.constant 0 : index
    %114 = tpu.strided_load %arg14[%c0_216, %c1_217, %c0_218] {strides = array<i32: 2, 2, 1>} : memref<10x10x32xf32, #tpu.memory_space<vmem>>, vector<4x4x32xf32>
    %c0_219 = arith.constant 0 : index
    %c0_220 = arith.constant 0 : index
    %c32_221 = arith.constant 32 : index
    %115 = vector.load %arg19[%c0_219, %c0_220, %c32_221] : memref<4x4x512xf32, #tpu.memory_space<vmem>>, vector<4x4x32xf32>
    tpu.vector_store %arg19[%c0_219, %c0_220, %c32_221], %114 {strides = array<i32>} : memref<4x4x512xf32, #tpu.memory_space<vmem>>, vector<4x4x32xf32>,
    %c0_222 = arith.constant 0 : index
    %c2_223 = arith.constant 2 : index
    %c0_224 = arith.constant 0 : index
    %116 = tpu.strided_load %arg14[%c0_222, %c2_223, %c0_224] {strides = array<i32: 2, 2, 1>} : memref<10x10x32xf32, #tpu.memory_space<vmem>>, vector<4x4x32xf32>
    %c0_225 = arith.constant 0 : index
    %c0_226 = arith.constant 0 : index
    %c64_227 = arith.constant 64 : index
    %117 = vector.load %arg19[%c0_225, %c0_226, %c64_227] : memref<4x4x512xf32, #tpu.memory_space<vmem>>, vector<4x4x32xf32>
    tpu.vector_store %arg19[%c0_225, %c0_226, %c64_227], %116 {strides = array<i32>} : memref<4x4x512xf32, #tpu.memory_space<vmem>>, vector<4x4x32xf32>,
    %c0_228 = arith.constant 0 : index
    %c3_229 = arith.constant 3 : index
    %c0_230 = arith.constant 0 : index
    %118 = tpu.strided_load %arg14[%c0_228, %c3_229, %c0_230] {strides = array<i32: 2, 2, 1>} : memref<10x10x32xf32, #tpu.memory_space<vmem>>, vector<4x4x32xf32>
    %c0_231 = arith.constant 0 : index
    %c0_232 = arith.constant 0 : index
    %c96_233 = arith.constant 96 : index
    %119 = vector.load %arg19[%c0_231, %c0_232, %c96_233] : memref<4x4x512xf32, #tpu.memory_space<vmem>>, vector<4x4x32xf32>
    tpu.vector_store %arg19[%c0_231, %c0_232, %c96_233], %118 {strides = array<i32>} : memref<4x4x512xf32, #tpu.memory_space<vmem>>, vector<4x4x32xf32>,
    %c1_234 = arith.constant 1 : index
    %c0_235 = arith.constant 0 : index
    %c0_236 = arith.constant 0 : index
    %120 = tpu.strided_load %arg14[%c1_234, %c0_235, %c0_236] {strides = array<i32: 2, 2, 1>} : memref<10x10x32xf32, #tpu.memory_space<vmem>>, vector<4x4x32xf32>
    %c0_237 = arith.constant 0 : index
    %c0_238 = arith.constant 0 : index
    %c128_239 = arith.constant 128 : index
    %121 = vector.load %arg19[%c0_237, %c0_238, %c128_239] : memref<4x4x512xf32, #tpu.memory_space<vmem>>, vector<4x4x32xf32>
    tpu.vector_store %arg19[%c0_237, %c0_238, %c128_239], %120 {strides = array<i32>} : memref<4x4x512xf32, #tpu.memory_space<vmem>>, vector<4x4x32xf32>,
    %c1_240 = arith.constant 1 : index
    %c1_241 = arith.constant 1 : index
    %c0_242 = arith.constant 0 : index
    %122 = tpu.strided_load %arg14[%c1_240, %c1_241, %c0_242] {strides = array<i32: 2, 2, 1>} : memref<10x10x32xf32, #tpu.memory_space<vmem>>, vector<4x4x32xf32>
    %c0_243 = arith.constant 0 : index
    %c0_244 = arith.constant 0 : index
    %c160_245 = arith.constant 160 : index
    %123 = vector.load %arg19[%c0_243, %c0_244, %c160_245] : memref<4x4x512xf32, #tpu.memory_space<vmem>>, vector<4x4x32xf32>
    tpu.vector_store %arg19[%c0_243, %c0_244, %c160_245], %122 {strides = array<i32>} : memref<4x4x512xf32, #tpu.memory_space<vmem>>, vector<4x4x32xf32>,
    %c1_246 = arith.constant 1 : index
    %c2_247 = arith.constant 2 : index
    %c0_248 = arith.constant 0 : index
    %124 = tpu.strided_load %arg14[%c1_246, %c2_247, %c0_248] {strides = array<i32: 2, 2, 1>} : memref<10x10x32xf32, #tpu.memory_space<vmem>>, vector<4x4x32xf32>
    %c0_249 = arith.constant 0 : index
    %c0_250 = arith.constant 0 : index
    %c192_251 = arith.constant 192 : index
    %125 = vector.load %arg19[%c0_249, %c0_250, %c192_251] : memref<4x4x512xf32, #tpu.memory_space<vmem>>, vector<4x4x32xf32>
    tpu.vector_store %arg19[%c0_249, %c0_250, %c192_251], %124 {strides = array<i32>} : memref<4x4x512xf32, #tpu.memory_space<vmem>>, vector<4x4x32xf32>,
    %c1_252 = arith.constant 1 : index
    %c3_253 = arith.constant 3 : index
    %c0_254 = arith.constant 0 : index
    %126 = tpu.strided_load %arg14[%c1_252, %c3_253, %c0_254] {strides = array<i32: 2, 2, 1>} : memref<10x10x32xf32, #tpu.memory_space<vmem>>, vector<4x4x32xf32>
    %c0_255 = arith.constant 0 : index
    %c0_256 = arith.constant 0 : index
    %c224_257 = arith.constant 224 : index
    %127 = vector.load %arg19[%c0_255, %c0_256, %c224_257] : memref<4x4x512xf32, #tpu.memory_space<vmem>>, vector<4x4x32xf32>
    tpu.vector_store %arg19[%c0_255, %c0_256, %c224_257], %126 {strides = array<i32>} : memref<4x4x512xf32, #tpu.memory_space<vmem>>, vector<4x4x32xf32>,
    %c2_258 = arith.constant 2 : index
    %c0_259 = arith.constant 0 : index
    %c0_260 = arith.constant 0 : index
    %128 = tpu.strided_load %arg14[%c2_258, %c0_259, %c0_260] {strides = array<i32: 2, 2, 1>} : memref<10x10x32xf32, #tpu.memory_space<vmem>>, vector<4x4x32xf32>
    %c0_261 = arith.constant 0 : index
    %c0_262 = arith.constant 0 : index
    %c256 = arith.constant 256 : index
    %129 = vector.load %arg19[%c0_261, %c0_262, %c256] : memref<4x4x512xf32, #tpu.memory_space<vmem>>, vector<4x4x32xf32>
    tpu.vector_store %arg19[%c0_261, %c0_262, %c256], %128 {strides = array<i32>} : memref<4x4x512xf32, #tpu.memory_space<vmem>>, vector<4x4x32xf32>,
    %c2_263 = arith.constant 2 : index
    %c1_264 = arith.constant 1 : index
    %c0_265 = arith.constant 0 : index
    %130 = tpu.strided_load %arg14[%c2_263, %c1_264, %c0_265] {strides = array<i32: 2, 2, 1>} : memref<10x10x32xf32, #tpu.memory_space<vmem>>, vector<4x4x32xf32>
    %c0_266 = arith.constant 0 : index
    %c0_267 = arith.constant 0 : index
    %c288 = arith.constant 288 : index
    %131 = vector.load %arg19[%c0_266, %c0_267, %c288] : memref<4x4x512xf32, #tpu.memory_space<vmem>>, vector<4x4x32xf32>
    tpu.vector_store %arg19[%c0_266, %c0_267, %c288], %130 {strides = array<i32>} : memref<4x4x512xf32, #tpu.memory_space<vmem>>, vector<4x4x32xf32>,
    %c2_268 = arith.constant 2 : index
    %c2_269 = arith.constant 2 : index
    %c0_270 = arith.constant 0 : index
    %132 = tpu.strided_load %arg14[%c2_268, %c2_269, %c0_270] {strides = array<i32: 2, 2, 1>} : memref<10x10x32xf32, #tpu.memory_space<vmem>>, vector<4x4x32xf32>
    %c0_271 = arith.constant 0 : index
    %c0_272 = arith.constant 0 : index
    %c320 = arith.constant 320 : index
    %133 = vector.load %arg19[%c0_271, %c0_272, %c320] : memref<4x4x512xf32, #tpu.memory_space<vmem>>, vector<4x4x32xf32>
    tpu.vector_store %arg19[%c0_271, %c0_272, %c320], %132 {strides = array<i32>} : memref<4x4x512xf32, #tpu.memory_space<vmem>>, vector<4x4x32xf32>,
    %c2_273 = arith.constant 2 : index
    %c3_274 = arith.constant 3 : index
    %c0_275 = arith.constant 0 : index
    %134 = tpu.strided_load %arg14[%c2_273, %c3_274, %c0_275] {strides = array<i32: 2, 2, 1>} : memref<10x10x32xf32, #tpu.memory_space<vmem>>, vector<4x4x32xf32>
    %c0_276 = arith.constant 0 : index
    %c0_277 = arith.constant 0 : index
    %c352 = arith.constant 352 : index
    %135 = vector.load %arg19[%c0_276, %c0_277, %c352] : memref<4x4x512xf32, #tpu.memory_space<vmem>>, vector<4x4x32xf32>
    tpu.vector_store %arg19[%c0_276, %c0_277, %c352], %134 {strides = array<i32>} : memref<4x4x512xf32, #tpu.memory_space<vmem>>, vector<4x4x32xf32>,
    %c3_278 = arith.constant 3 : index
    %c0_279 = arith.constant 0 : index
    %c0_280 = arith.constant 0 : index
    %136 = tpu.strided_load %arg14[%c3_278, %c0_279, %c0_280] {strides = array<i32: 2, 2, 1>} : memref<10x10x32xf32, #tpu.memory_space<vmem>>, vector<4x4x32xf32>
    %c0_281 = arith.constant 0 : index
    %c0_282 = arith.constant 0 : index
    %c384 = arith.constant 384 : index
    %137 = vector.load %arg19[%c0_281, %c0_282, %c384] : memref<4x4x512xf32, #tpu.memory_space<vmem>>, vector<4x4x32xf32>
    tpu.vector_store %arg19[%c0_281, %c0_282, %c384], %136 {strides = array<i32>} : memref<4x4x512xf32, #tpu.memory_space<vmem>>, vector<4x4x32xf32>,
    %c3_283 = arith.constant 3 : index
    %c1_284 = arith.constant 1 : index
    %c0_285 = arith.constant 0 : index
    %138 = tpu.strided_load %arg14[%c3_283, %c1_284, %c0_285] {strides = array<i32: 2, 2, 1>} : memref<10x10x32xf32, #tpu.memory_space<vmem>>, vector<4x4x32xf32>
    %c0_286 = arith.constant 0 : index
    %c0_287 = arith.constant 0 : index
    %c416 = arith.constant 416 : index
    %139 = vector.load %arg19[%c0_286, %c0_287, %c416] : memref<4x4x512xf32, #tpu.memory_space<vmem>>, vector<4x4x32xf32>
    tpu.vector_store %arg19[%c0_286, %c0_287, %c416], %138 {strides = array<i32>} : memref<4x4x512xf32, #tpu.memory_space<vmem>>, vector<4x4x32xf32>,
    %c3_288 = arith.constant 3 : index
    %c2_289 = arith.constant 2 : index
    %c0_290 = arith.constant 0 : index
    %140 = tpu.strided_load %arg14[%c3_288, %c2_289, %c0_290] {strides = array<i32: 2, 2, 1>} : memref<10x10x32xf32, #tpu.memory_space<vmem>>, vector<4x4x32xf32>
    %c0_291 = arith.constant 0 : index
    %c0_292 = arith.constant 0 : index
    %c448 = arith.constant 448 : index
    %141 = vector.load %arg19[%c0_291, %c0_292, %c448] : memref<4x4x512xf32, #tpu.memory_space<vmem>>, vector<4x4x32xf32>
    tpu.vector_store %arg19[%c0_291, %c0_292, %c448], %140 {strides = array<i32>} : memref<4x4x512xf32, #tpu.memory_space<vmem>>, vector<4x4x32xf32>,
    %c3_293 = arith.constant 3 : index
    %c3_294 = arith.constant 3 : index
    %c0_295 = arith.constant 0 : index
    %142 = tpu.strided_load %arg14[%c3_293, %c3_294, %c0_295] {strides = array<i32: 2, 2, 1>} : memref<10x10x32xf32, #tpu.memory_space<vmem>>, vector<4x4x32xf32>
    %c0_296 = arith.constant 0 : index
    %c0_297 = arith.constant 0 : index
    %c480 = arith.constant 480 : index
    %143 = vector.load %arg19[%c0_296, %c0_297, %c480] : memref<4x4x512xf32, #tpu.memory_space<vmem>>, vector<4x4x32xf32>
    tpu.vector_store %arg19[%c0_296, %c0_297, %c480], %142 {strides = array<i32>} : memref<4x4x512xf32, #tpu.memory_space<vmem>>, vector<4x4x32xf32>,
    %c0_298 = arith.constant 0 : index
    %c0_299 = arith.constant 0 : index
    %c0_300 = arith.constant 0 : index
    %144 = vector.load %arg19[%c0_298, %c0_299, %c0_300] : memref<4x4x512xf32, #tpu.memory_space<vmem>>, vector<4x4x512xf32>
    %145 = vector.shape_cast %144 : vector<4x4x512xf32> to vector<16x512xf32>
    %c0_301 = arith.constant 0 : index
    %c0_302 = arith.constant 0 : index
    %146 = vector.load %arg6[%c0_301, %c0_302] : memref<512x64xf32, #tpu.memory_space<vmem>>, vector<512x64xf32>
    %cst_303 = arith.constant dense<0.000000e+00> : vector<16x64xf32>
    %147 = tpu.matmul %145, %146, %cst_303 {dimension_numbers = #tpu.dot_dimension_numbers<[1], [0], [0], [1], [0, 0, 1, 1], [], []>} : vector<16x512xf32>, vector<512x64xf32>, vector<16x64xf32> -> vector<16x64xf32>
    %c0_304 = arith.constant 0 : index
    %c0_305 = arith.constant 0 : index
    %148 = vector.load %arg7[%c0_304, %c0_305] : memref<1x64xf32, #tpu.memory_space<vmem>>, vector<1x64xf32>
    %149 = vector.broadcast %148 : vector<1x64xf32> to vector<16x64xf32>
    %150 = arith.addf %147, %149 : vector<16x64xf32>
    %cst_306 = arith.constant 0.000000e+00 : f32
    %151 = vector.broadcast %cst_306 : f32 to vector<16x64xf32>
    %152 = arith.cmpf oge, %150, %151 : vector<16x64xf32>
    %cst_307 = arith.constant 2.000000e-01 : f32
    %153 = vector.broadcast %cst_307 : f32 to vector<16x64xf32>
    %154 = arith.mulf %153, %150 : vector<16x64xf32>
    %155 = arith.select %152, %150, %154 : vector<16x64xi1>, vector<16x64xf32>
    %156 = vector.shape_cast %155 : vector<16x64xf32> to vector<4x4x64xf32>
    %cst_308 = arith.constant 0.000000e+00 : f32
    %157 = vector.broadcast %cst_308 : f32 to vector<6x6x64xf32>
    %c0_309 = arith.constant 0 : index
    %c0_310 = arith.constant 0 : index
    %c0_311 = arith.constant 0 : index
    %158 = vector.load %arg15[%c0_309, %c0_310, %c0_311] : memref<6x6x64xf32, #tpu.memory_space<vmem>>, vector<6x6x64xf32>
    tpu.vector_store %arg15[%c0_309, %c0_310, %c0_311], %157 {strides = array<i32>} : memref<6x6x64xf32, #tpu.memory_space<vmem>>, vector<6x6x64xf32>,
    %c1_312 = arith.constant 1 : index
    %c1_313 = arith.constant 1 : index
    %c0_314 = arith.constant 0 : index
    %159 = vector.load %arg15[%c1_312, %c1_313, %c0_314] : memref<6x6x64xf32, #tpu.memory_space<vmem>>, vector<4x4x64xf32>
    tpu.vector_store %arg15[%c1_312, %c1_313, %c0_314], %156 {strides = array<i32>} : memref<6x6x64xf32, #tpu.memory_space<vmem>>, vector<4x4x64xf32>,
    %c0_315 = arith.constant 0 : index
    %c0_316 = arith.constant 0 : index
    %c0_317 = arith.constant 0 : index
    %160 = tpu.strided_load %arg15[%c0_315, %c0_316, %c0_317] {strides = array<i32: 2, 2, 1>} : memref<6x6x64xf32, #tpu.memory_space<vmem>>, vector<2x2x64xf32>
    %c0_318 = arith.constant 0 : index
    %c0_319 = arith.constant 0 : index
    %c0_320 = arith.constant 0 : index
    %161 = vector.load %arg20[%c0_318, %c0_319, %c0_320] : memref<2x2x1024xf32, #tpu.memory_space<vmem>>, vector<2x2x64xf32>
    tpu.vector_store %arg20[%c0_318, %c0_319, %c0_320], %160 {strides = array<i32>} : memref<2x2x1024xf32, #tpu.memory_space<vmem>>, vector<2x2x64xf32>,
    %c0_321 = arith.constant 0 : index
    %c1_322 = arith.constant 1 : index
    %c0_323 = arith.constant 0 : index
    %162 = tpu.strided_load %arg15[%c0_321, %c1_322, %c0_323] {strides = array<i32: 2, 2, 1>} : memref<6x6x64xf32, #tpu.memory_space<vmem>>, vector<2x2x64xf32>
    %c0_324 = arith.constant 0 : index
    %c0_325 = arith.constant 0 : index
    %c64_326 = arith.constant 64 : index
    %163 = vector.load %arg20[%c0_324, %c0_325, %c64_326] : memref<2x2x1024xf32, #tpu.memory_space<vmem>>, vector<2x2x64xf32>
    tpu.vector_store %arg20[%c0_324, %c0_325, %c64_326], %162 {strides = array<i32>} : memref<2x2x1024xf32, #tpu.memory_space<vmem>>, vector<2x2x64xf32>,
    %c0_327 = arith.constant 0 : index
    %c2_328 = arith.constant 2 : index
    %c0_329 = arith.constant 0 : index
    %164 = tpu.strided_load %arg15[%c0_327, %c2_328, %c0_329] {strides = array<i32: 2, 2, 1>} : memref<6x6x64xf32, #tpu.memory_space<vmem>>, vector<2x2x64xf32>
    %c0_330 = arith.constant 0 : index
    %c0_331 = arith.constant 0 : index
    %c128_332 = arith.constant 128 : index
    %165 = vector.load %arg20[%c0_330, %c0_331, %c128_332] : memref<2x2x1024xf32, #tpu.memory_space<vmem>>, vector<2x2x64xf32>
    tpu.vector_store %arg20[%c0_330, %c0_331, %c128_332], %164 {strides = array<i32>} : memref<2x2x1024xf32, #tpu.memory_space<vmem>>, vector<2x2x64xf32>,
    %c0_333 = arith.constant 0 : index
    %c3_334 = arith.constant 3 : index
    %c0_335 = arith.constant 0 : index
    %166 = tpu.strided_load %arg15[%c0_333, %c3_334, %c0_335] {strides = array<i32: 2, 2, 1>} : memref<6x6x64xf32, #tpu.memory_space<vmem>>, vector<2x2x64xf32>
    %c0_336 = arith.constant 0 : index
    %c0_337 = arith.constant 0 : index
    %c192_338 = arith.constant 192 : index
    %167 = vector.load %arg20[%c0_336, %c0_337, %c192_338] : memref<2x2x1024xf32, #tpu.memory_space<vmem>>, vector<2x2x64xf32>
    tpu.vector_store %arg20[%c0_336, %c0_337, %c192_338], %166 {strides = array<i32>} : memref<2x2x1024xf32, #tpu.memory_space<vmem>>, vector<2x2x64xf32>,
    %c1_339 = arith.constant 1 : index
    %c0_340 = arith.constant 0 : index
    %c0_341 = arith.constant 0 : index
    %168 = tpu.strided_load %arg15[%c1_339, %c0_340, %c0_341] {strides = array<i32: 2, 2, 1>} : memref<6x6x64xf32, #tpu.memory_space<vmem>>, vector<2x2x64xf32>
    %c0_342 = arith.constant 0 : index
    %c0_343 = arith.constant 0 : index
    %c256_344 = arith.constant 256 : index
    %169 = vector.load %arg20[%c0_342, %c0_343, %c256_344] : memref<2x2x1024xf32, #tpu.memory_space<vmem>>, vector<2x2x64xf32>
    tpu.vector_store %arg20[%c0_342, %c0_343, %c256_344], %168 {strides = array<i32>} : memref<2x2x1024xf32, #tpu.memory_space<vmem>>, vector<2x2x64xf32>,
    %c1_345 = arith.constant 1 : index
    %c1_346 = arith.constant 1 : index
    %c0_347 = arith.constant 0 : index
    %170 = tpu.strided_load %arg15[%c1_345, %c1_346, %c0_347] {strides = array<i32: 2, 2, 1>} : memref<6x6x64xf32, #tpu.memory_space<vmem>>, vector<2x2x64xf32>
    %c0_348 = arith.constant 0 : index
    %c0_349 = arith.constant 0 : index
    %c320_350 = arith.constant 320 : index
    %171 = vector.load %arg20[%c0_348, %c0_349, %c320_350] : memref<2x2x1024xf32, #tpu.memory_space<vmem>>, vector<2x2x64xf32>
    tpu.vector_store %arg20[%c0_348, %c0_349, %c320_350], %170 {strides = array<i32>} : memref<2x2x1024xf32, #tpu.memory_space<vmem>>, vector<2x2x64xf32>,
    %c1_351 = arith.constant 1 : index
    %c2_352 = arith.constant 2 : index
    %c0_353 = arith.constant 0 : index
    %172 = tpu.strided_load %arg15[%c1_351, %c2_352, %c0_353] {strides = array<i32: 2, 2, 1>} : memref<6x6x64xf32, #tpu.memory_space<vmem>>, vector<2x2x64xf32>
    %c0_354 = arith.constant 0 : index
    %c0_355 = arith.constant 0 : index
    %c384_356 = arith.constant 384 : index
    %173 = vector.load %arg20[%c0_354, %c0_355, %c384_356] : memref<2x2x1024xf32, #tpu.memory_space<vmem>>, vector<2x2x64xf32>
    tpu.vector_store %arg20[%c0_354, %c0_355, %c384_356], %172 {strides = array<i32>} : memref<2x2x1024xf32, #tpu.memory_space<vmem>>, vector<2x2x64xf32>,
    %c1_357 = arith.constant 1 : index
    %c3_358 = arith.constant 3 : index
    %c0_359 = arith.constant 0 : index
    %174 = tpu.strided_load %arg15[%c1_357, %c3_358, %c0_359] {strides = array<i32: 2, 2, 1>} : memref<6x6x64xf32, #tpu.memory_space<vmem>>, vector<2x2x64xf32>
    %c0_360 = arith.constant 0 : index
    %c0_361 = arith.constant 0 : index
    %c448_362 = arith.constant 448 : index
    %175 = vector.load %arg20[%c0_360, %c0_361, %c448_362] : memref<2x2x1024xf32, #tpu.memory_space<vmem>>, vector<2x2x64xf32>
    tpu.vector_store %arg20[%c0_360, %c0_361, %c448_362], %174 {strides = array<i32>} : memref<2x2x1024xf32, #tpu.memory_space<vmem>>, vector<2x2x64xf32>,
    %c2_363 = arith.constant 2 : index
    %c0_364 = arith.constant 0 : index
    %c0_365 = arith.constant 0 : index
    %176 = tpu.strided_load %arg15[%c2_363, %c0_364, %c0_365] {strides = array<i32: 2, 2, 1>} : memref<6x6x64xf32, #tpu.memory_space<vmem>>, vector<2x2x64xf32>
    %c0_366 = arith.constant 0 : index
    %c0_367 = arith.constant 0 : index
    %c512 = arith.constant 512 : index
    %177 = vector.load %arg20[%c0_366, %c0_367, %c512] : memref<2x2x1024xf32, #tpu.memory_space<vmem>>, vector<2x2x64xf32>
    tpu.vector_store %arg20[%c0_366, %c0_367, %c512], %176 {strides = array<i32>} : memref<2x2x1024xf32, #tpu.memory_space<vmem>>, vector<2x2x64xf32>,
    %c2_368 = arith.constant 2 : index
    %c1_369 = arith.constant 1 : index
    %c0_370 = arith.constant 0 : index
    %178 = tpu.strided_load %arg15[%c2_368, %c1_369, %c0_370] {strides = array<i32: 2, 2, 1>} : memref<6x6x64xf32, #tpu.memory_space<vmem>>, vector<2x2x64xf32>
    %c0_371 = arith.constant 0 : index
    %c0_372 = arith.constant 0 : index
    %c576 = arith.constant 576 : index
    %179 = vector.load %arg20[%c0_371, %c0_372, %c576] : memref<2x2x1024xf32, #tpu.memory_space<vmem>>, vector<2x2x64xf32>
    tpu.vector_store %arg20[%c0_371, %c0_372, %c576], %178 {strides = array<i32>} : memref<2x2x1024xf32, #tpu.memory_space<vmem>>, vector<2x2x64xf32>,
    %c2_373 = arith.constant 2 : index
    %c2_374 = arith.constant 2 : index
    %c0_375 = arith.constant 0 : index
    %180 = tpu.strided_load %arg15[%c2_373, %c2_374, %c0_375] {strides = array<i32: 2, 2, 1>} : memref<6x6x64xf32, #tpu.memory_space<vmem>>, vector<2x2x64xf32>
    %c0_376 = arith.constant 0 : index
    %c0_377 = arith.constant 0 : index
    %c640 = arith.constant 640 : index
    %181 = vector.load %arg20[%c0_376, %c0_377, %c640] : memref<2x2x1024xf32, #tpu.memory_space<vmem>>, vector<2x2x64xf32>
    tpu.vector_store %arg20[%c0_376, %c0_377, %c640], %180 {strides = array<i32>} : memref<2x2x1024xf32, #tpu.memory_space<vmem>>, vector<2x2x64xf32>,
    %c2_378 = arith.constant 2 : index
    %c3_379 = arith.constant 3 : index
    %c0_380 = arith.constant 0 : index
    %182 = tpu.strided_load %arg15[%c2_378, %c3_379, %c0_380] {strides = array<i32: 2, 2, 1>} : memref<6x6x64xf32, #tpu.memory_space<vmem>>, vector<2x2x64xf32>
    %c0_381 = arith.constant 0 : index
    %c0_382 = arith.constant 0 : index
    %c704 = arith.constant 704 : index
    %183 = vector.load %arg20[%c0_381, %c0_382, %c704] : memref<2x2x1024xf32, #tpu.memory_space<vmem>>, vector<2x2x64xf32>
    tpu.vector_store %arg20[%c0_381, %c0_382, %c704], %182 {strides = array<i32>} : memref<2x2x1024xf32, #tpu.memory_space<vmem>>, vector<2x2x64xf32>,
    %c3_383 = arith.constant 3 : index
    %c0_384 = arith.constant 0 : index
    %c0_385 = arith.constant 0 : index
    %184 = tpu.strided_load %arg15[%c3_383, %c0_384, %c0_385] {strides = array<i32: 2, 2, 1>} : memref<6x6x64xf32, #tpu.memory_space<vmem>>, vector<2x2x64xf32>
    %c0_386 = arith.constant 0 : index
    %c0_387 = arith.constant 0 : index
    %c768 = arith.constant 768 : index
    %185 = vector.load %arg20[%c0_386, %c0_387, %c768] : memref<2x2x1024xf32, #tpu.memory_space<vmem>>, vector<2x2x64xf32>
    tpu.vector_store %arg20[%c0_386, %c0_387, %c768], %184 {strides = array<i32>} : memref<2x2x1024xf32, #tpu.memory_space<vmem>>, vector<2x2x64xf32>,
    %c3_388 = arith.constant 3 : index
    %c1_389 = arith.constant 1 : index
    %c0_390 = arith.constant 0 : index
    %186 = tpu.strided_load %arg15[%c3_388, %c1_389, %c0_390] {strides = array<i32: 2, 2, 1>} : memref<6x6x64xf32, #tpu.memory_space<vmem>>, vector<2x2x64xf32>
    %c0_391 = arith.constant 0 : index
    %c0_392 = arith.constant 0 : index
    %c832 = arith.constant 832 : index
    %187 = vector.load %arg20[%c0_391, %c0_392, %c832] : memref<2x2x1024xf32, #tpu.memory_space<vmem>>, vector<2x2x64xf32>
    tpu.vector_store %arg20[%c0_391, %c0_392, %c832], %186 {strides = array<i32>} : memref<2x2x1024xf32, #tpu.memory_space<vmem>>, vector<2x2x64xf32>,
    %c3_393 = arith.constant 3 : index
    %c2_394 = arith.constant 2 : index
    %c0_395 = arith.constant 0 : index
    %188 = tpu.strided_load %arg15[%c3_393, %c2_394, %c0_395] {strides = array<i32: 2, 2, 1>} : memref<6x6x64xf32, #tpu.memory_space<vmem>>, vector<2x2x64xf32>
    %c0_396 = arith.constant 0 : index
    %c0_397 = arith.constant 0 : index
    %c896 = arith.constant 896 : index
    %189 = vector.load %arg20[%c0_396, %c0_397, %c896] : memref<2x2x1024xf32, #tpu.memory_space<vmem>>, vector<2x2x64xf32>
    tpu.vector_store %arg20[%c0_396, %c0_397, %c896], %188 {strides = array<i32>} : memref<2x2x1024xf32, #tpu.memory_space<vmem>>, vector<2x2x64xf32>,
    %c3_398 = arith.constant 3 : index
    %c3_399 = arith.constant 3 : index
    %c0_400 = arith.constant 0 : index
    %190 = tpu.strided_load %arg15[%c3_398, %c3_399, %c0_400] {strides = array<i32: 2, 2, 1>} : memref<6x6x64xf32, #tpu.memory_space<vmem>>, vector<2x2x64xf32>
    %c0_401 = arith.constant 0 : index
    %c0_402 = arith.constant 0 : index
    %c960 = arith.constant 960 : index
    %191 = vector.load %arg20[%c0_401, %c0_402, %c960] : memref<2x2x1024xf32, #tpu.memory_space<vmem>>, vector<2x2x64xf32>
    tpu.vector_store %arg20[%c0_401, %c0_402, %c960], %190 {strides = array<i32>} : memref<2x2x1024xf32, #tpu.memory_space<vmem>>, vector<2x2x64xf32>,
    %c0_403 = arith.constant 0 : index
    %c0_404 = arith.constant 0 : index
    %c0_405 = arith.constant 0 : index
    %192 = vector.load %arg20[%c0_403, %c0_404, %c0_405] : memref<2x2x1024xf32, #tpu.memory_space<vmem>>, vector<2x2x1024xf32>
    %193 = vector.shape_cast %192 : vector<2x2x1024xf32> to vector<4x1024xf32>
    %c0_406 = arith.constant 0 : index
    %c0_407 = arith.constant 0 : index
    %194 = vector.load %arg8[%c0_406, %c0_407] : memref<1024x128xf32, #tpu.memory_space<vmem>>, vector<1024x128xf32>
    %cst_408 = arith.constant dense<0.000000e+00> : vector<4x128xf32>
    %195 = tpu.matmul %193, %194, %cst_408 {dimension_numbers = #tpu.dot_dimension_numbers<[1], [0], [0], [1], [0, 0, 1, 1], [], []>} : vector<4x1024xf32>, vector<1024x128xf32>, vector<4x128xf32> -> vector<4x128xf32>
    %c0_409 = arith.constant 0 : index
    %c0_410 = arith.constant 0 : index
    %196 = vector.load %arg9[%c0_409, %c0_410] : memref<1x128xf32, #tpu.memory_space<vmem>>, vector<1x128xf32>
    %197 = vector.broadcast %196 : vector<1x128xf32> to vector<4x128xf32>
    %198 = arith.addf %195, %197 : vector<4x128xf32>
    %cst_411 = arith.constant 0.000000e+00 : f32
    %199 = vector.broadcast %cst_411 : f32 to vector<4x128xf32>
    %200 = arith.cmpf oge, %198, %199 : vector<4x128xf32>
    %cst_412 = arith.constant 2.000000e-01 : f32
    %201 = vector.broadcast %cst_412 : f32 to vector<4x128xf32>
    %202 = arith.mulf %201, %198 : vector<4x128xf32>
    %203 = arith.select %200, %198, %202 : vector<4x128xi1>, vector<4x128xf32>
    %204 = vector.shape_cast %203 : vector<4x128xf32> to vector<2x2x128xf32>
    %cst_413 = arith.constant 0.000000e+00 : f32
    %205 = vector.broadcast %cst_413 : f32 to vector<4x4x128xf32>
    %c0_414 = arith.constant 0 : index
    %c0_415 = arith.constant 0 : index
    %c0_416 = arith.constant 0 : index
    %206 = vector.load %arg16[%c0_414, %c0_415, %c0_416] : memref<4x4x128xf32, #tpu.memory_space<vmem>>, vector<4x4x128xf32>
    tpu.vector_store %arg16[%c0_414, %c0_415, %c0_416], %205 {strides = array<i32>} : memref<4x4x128xf32, #tpu.memory_space<vmem>>, vector<4x4x128xf32>,
    %c1_417 = arith.constant 1 : index
    %c1_418 = arith.constant 1 : index
    %c0_419 = arith.constant 0 : index
    %207 = vector.load %arg16[%c1_417, %c1_418, %c0_419] : memref<4x4x128xf32, #tpu.memory_space<vmem>>, vector<2x2x128xf32>
    tpu.vector_store %arg16[%c1_417, %c1_418, %c0_419], %204 {strides = array<i32>} : memref<4x4x128xf32, #tpu.memory_space<vmem>>, vector<2x2x128xf32>,
    %c0_420 = arith.constant 0 : index
    %c0_421 = arith.constant 0 : index
    %c0_422 = arith.constant 0 : index
    %208 = vector.load %arg16[%c0_420, %c0_421, %c0_422] : memref<4x4x128xf32, #tpu.memory_space<vmem>>, vector<1x1x128xf32>
    %c0_423 = arith.constant 0 : index
    %c0_424 = arith.constant 0 : index
    %c0_425 = arith.constant 0 : index
    %209 = vector.load %arg21[%c0_423, %c0_424, %c0_425] : memref<1x1x2048xf32, #tpu.memory_space<vmem>>, vector<1x1x128xf32>
    tpu.vector_store %arg21[%c0_423, %c0_424, %c0_425], %208 {strides = array<i32>} : memref<1x1x2048xf32, #tpu.memory_space<vmem>>, vector<1x1x128xf32>,
    %c0_426 = arith.constant 0 : index
    %c1_427 = arith.constant 1 : index
    %c0_428 = arith.constant 0 : index
    %210 = vector.load %arg16[%c0_426, %c1_427, %c0_428] : memref<4x4x128xf32, #tpu.memory_space<vmem>>, vector<1x1x128xf32>
    %c0_429 = arith.constant 0 : index
    %c0_430 = arith.constant 0 : index
    %c128_431 = arith.constant 128 : index
    %211 = vector.load %arg21[%c0_429, %c0_430, %c128_431] : memref<1x1x2048xf32, #tpu.memory_space<vmem>>, vector<1x1x128xf32>
    tpu.vector_store %arg21[%c0_429, %c0_430, %c128_431], %210 {strides = array<i32>} : memref<1x1x2048xf32, #tpu.memory_space<vmem>>, vector<1x1x128xf32>,
    %c0_432 = arith.constant 0 : index
    %c2_433 = arith.constant 2 : index
    %c0_434 = arith.constant 0 : index
    %212 = vector.load %arg16[%c0_432, %c2_433, %c0_434] : memref<4x4x128xf32, #tpu.memory_space<vmem>>, vector<1x1x128xf32>
    %c0_435 = arith.constant 0 : index
    %c0_436 = arith.constant 0 : index
    %c256_437 = arith.constant 256 : index
    %213 = vector.load %arg21[%c0_435, %c0_436, %c256_437] : memref<1x1x2048xf32, #tpu.memory_space<vmem>>, vector<1x1x128xf32>
    tpu.vector_store %arg21[%c0_435, %c0_436, %c256_437], %212 {strides = array<i32>} : memref<1x1x2048xf32, #tpu.memory_space<vmem>>, vector<1x1x128xf32>,
    %c0_438 = arith.constant 0 : index
    %c3_439 = arith.constant 3 : index
    %c0_440 = arith.constant 0 : index
    %214 = vector.load %arg16[%c0_438, %c3_439, %c0_440] : memref<4x4x128xf32, #tpu.memory_space<vmem>>, vector<1x1x128xf32>
    %c0_441 = arith.constant 0 : index
    %c0_442 = arith.constant 0 : index
    %c384_443 = arith.constant 384 : index
    %215 = vector.load %arg21[%c0_441, %c0_442, %c384_443] : memref<1x1x2048xf32, #tpu.memory_space<vmem>>, vector<1x1x128xf32>
    tpu.vector_store %arg21[%c0_441, %c0_442, %c384_443], %214 {strides = array<i32>} : memref<1x1x2048xf32, #tpu.memory_space<vmem>>, vector<1x1x128xf32>,
    %c1_444 = arith.constant 1 : index
    %c0_445 = arith.constant 0 : index
    %c0_446 = arith.constant 0 : index
    %216 = vector.load %arg16[%c1_444, %c0_445, %c0_446] : memref<4x4x128xf32, #tpu.memory_space<vmem>>, vector<1x1x128xf32>
    %c0_447 = arith.constant 0 : index
    %c0_448 = arith.constant 0 : index
    %c512_449 = arith.constant 512 : index
    %217 = vector.load %arg21[%c0_447, %c0_448, %c512_449] : memref<1x1x2048xf32, #tpu.memory_space<vmem>>, vector<1x1x128xf32>
    tpu.vector_store %arg21[%c0_447, %c0_448, %c512_449], %216 {strides = array<i32>} : memref<1x1x2048xf32, #tpu.memory_space<vmem>>, vector<1x1x128xf32>,
    %c1_450 = arith.constant 1 : index
    %c1_451 = arith.constant 1 : index
    %c0_452 = arith.constant 0 : index
    %218 = vector.load %arg16[%c1_450, %c1_451, %c0_452] : memref<4x4x128xf32, #tpu.memory_space<vmem>>, vector<1x1x128xf32>
    %c0_453 = arith.constant 0 : index
    %c0_454 = arith.constant 0 : index
    %c640_455 = arith.constant 640 : index
    %219 = vector.load %arg21[%c0_453, %c0_454, %c640_455] : memref<1x1x2048xf32, #tpu.memory_space<vmem>>, vector<1x1x128xf32>
    tpu.vector_store %arg21[%c0_453, %c0_454, %c640_455], %218 {strides = array<i32>} : memref<1x1x2048xf32, #tpu.memory_space<vmem>>, vector<1x1x128xf32>,
    %c1_456 = arith.constant 1 : index
    %c2_457 = arith.constant 2 : index
    %c0_458 = arith.constant 0 : index
    %220 = vector.load %arg16[%c1_456, %c2_457, %c0_458] : memref<4x4x128xf32, #tpu.memory_space<vmem>>, vector<1x1x128xf32>
    %c0_459 = arith.constant 0 : index
    %c0_460 = arith.constant 0 : index
    %c768_461 = arith.constant 768 : index
    %221 = vector.load %arg21[%c0_459, %c0_460, %c768_461] : memref<1x1x2048xf32, #tpu.memory_space<vmem>>, vector<1x1x128xf32>
    tpu.vector_store %arg21[%c0_459, %c0_460, %c768_461], %220 {strides = array<i32>} : memref<1x1x2048xf32, #tpu.memory_space<vmem>>, vector<1x1x128xf32>,
    %c1_462 = arith.constant 1 : index
    %c3_463 = arith.constant 3 : index
    %c0_464 = arith.constant 0 : index
    %222 = vector.load %arg16[%c1_462, %c3_463, %c0_464] : memref<4x4x128xf32, #tpu.memory_space<vmem>>, vector<1x1x128xf32>
    %c0_465 = arith.constant 0 : index
    %c0_466 = arith.constant 0 : index
    %c896_467 = arith.constant 896 : index
    %223 = vector.load %arg21[%c0_465, %c0_466, %c896_467] : memref<1x1x2048xf32, #tpu.memory_space<vmem>>, vector<1x1x128xf32>
    tpu.vector_store %arg21[%c0_465, %c0_466, %c896_467], %222 {strides = array<i32>} : memref<1x1x2048xf32, #tpu.memory_space<vmem>>, vector<1x1x128xf32>,
    %c2_468 = arith.constant 2 : index
    %c0_469 = arith.constant 0 : index
    %c0_470 = arith.constant 0 : index
    %224 = vector.load %arg16[%c2_468, %c0_469, %c0_470] : memref<4x4x128xf32, #tpu.memory_space<vmem>>, vector<1x1x128xf32>
    %c0_471 = arith.constant 0 : index
    %c0_472 = arith.constant 0 : index
    %c1024 = arith.constant 1024 : index
    %225 = vector.load %arg21[%c0_471, %c0_472, %c1024] : memref<1x1x2048xf32, #tpu.memory_space<vmem>>, vector<1x1x128xf32>
    tpu.vector_store %arg21[%c0_471, %c0_472, %c1024], %224 {strides = array<i32>} : memref<1x1x2048xf32, #tpu.memory_space<vmem>>, vector<1x1x128xf32>,
    %c2_473 = arith.constant 2 : index
    %c1_474 = arith.constant 1 : index
    %c0_475 = arith.constant 0 : index
    %226 = vector.load %arg16[%c2_473, %c1_474, %c0_475] : memref<4x4x128xf32, #tpu.memory_space<vmem>>, vector<1x1x128xf32>
    %c0_476 = arith.constant 0 : index
    %c0_477 = arith.constant 0 : index
    %c1152 = arith.constant 1152 : index
    %227 = vector.load %arg21[%c0_476, %c0_477, %c1152] : memref<1x1x2048xf32, #tpu.memory_space<vmem>>, vector<1x1x128xf32>
    tpu.vector_store %arg21[%c0_476, %c0_477, %c1152], %226 {strides = array<i32>} : memref<1x1x2048xf32, #tpu.memory_space<vmem>>, vector<1x1x128xf32>,
    %c2_478 = arith.constant 2 : index
    %c2_479 = arith.constant 2 : index
    %c0_480 = arith.constant 0 : index
    %228 = vector.load %arg16[%c2_478, %c2_479, %c0_480] : memref<4x4x128xf32, #tpu.memory_space<vmem>>, vector<1x1x128xf32>
    %c0_481 = arith.constant 0 : index
    %c0_482 = arith.constant 0 : index
    %c1280 = arith.constant 1280 : index
    %229 = vector.load %arg21[%c0_481, %c0_482, %c1280] : memref<1x1x2048xf32, #tpu.memory_space<vmem>>, vector<1x1x128xf32>
    tpu.vector_store %arg21[%c0_481, %c0_482, %c1280], %228 {strides = array<i32>} : memref<1x1x2048xf32, #tpu.memory_space<vmem>>, vector<1x1x128xf32>,
    %c2_483 = arith.constant 2 : index
    %c3_484 = arith.constant 3 : index
    %c0_485 = arith.constant 0 : index
    %230 = vector.load %arg16[%c2_483, %c3_484, %c0_485] : memref<4x4x128xf32, #tpu.memory_space<vmem>>, vector<1x1x128xf32>
    %c0_486 = arith.constant 0 : index
    %c0_487 = arith.constant 0 : index
    %c1408 = arith.constant 1408 : index
    %231 = vector.load %arg21[%c0_486, %c0_487, %c1408] : memref<1x1x2048xf32, #tpu.memory_space<vmem>>, vector<1x1x128xf32>
    tpu.vector_store %arg21[%c0_486, %c0_487, %c1408], %230 {strides = array<i32>} : memref<1x1x2048xf32, #tpu.memory_space<vmem>>, vector<1x1x128xf32>,
    %c3_488 = arith.constant 3 : index
    %c0_489 = arith.constant 0 : index
    %c0_490 = arith.constant 0 : index
    %232 = vector.load %arg16[%c3_488, %c0_489, %c0_490] : memref<4x4x128xf32, #tpu.memory_space<vmem>>, vector<1x1x128xf32>
    %c0_491 = arith.constant 0 : index
    %c0_492 = arith.constant 0 : index
    %c1536 = arith.constant 1536 : index
    %233 = vector.load %arg21[%c0_491, %c0_492, %c1536] : memref<1x1x2048xf32, #tpu.memory_space<vmem>>, vector<1x1x128xf32>
    tpu.vector_store %arg21[%c0_491, %c0_492, %c1536], %232 {strides = array<i32>} : memref<1x1x2048xf32, #tpu.memory_space<vmem>>, vector<1x1x128xf32>,
    %c3_493 = arith.constant 3 : index
    %c1_494 = arith.constant 1 : index
    %c0_495 = arith.constant 0 : index
    %234 = vector.load %arg16[%c3_493, %c1_494, %c0_495] : memref<4x4x128xf32, #tpu.memory_space<vmem>>, vector<1x1x128xf32>
    %c0_496 = arith.constant 0 : index
    %c0_497 = arith.constant 0 : index
    %c1664 = arith.constant 1664 : index
    %235 = vector.load %arg21[%c0_496, %c0_497, %c1664] : memref<1x1x2048xf32, #tpu.memory_space<vmem>>, vector<1x1x128xf32>
    tpu.vector_store %arg21[%c0_496, %c0_497, %c1664], %234 {strides = array<i32>} : memref<1x1x2048xf32, #tpu.memory_space<vmem>>, vector<1x1x128xf32>,
    %c3_498 = arith.constant 3 : index
    %c2_499 = arith.constant 2 : index
    %c0_500 = arith.constant 0 : index
    %236 = vector.load %arg16[%c3_498, %c2_499, %c0_500] : memref<4x4x128xf32, #tpu.memory_space<vmem>>, vector<1x1x128xf32>
    %c0_501 = arith.constant 0 : index
    %c0_502 = arith.constant 0 : index
    %c1792 = arith.constant 1792 : index
    %237 = vector.load %arg21[%c0_501, %c0_502, %c1792] : memref<1x1x2048xf32, #tpu.memory_space<vmem>>, vector<1x1x128xf32>
    tpu.vector_store %arg21[%c0_501, %c0_502, %c1792], %236 {strides = array<i32>} : memref<1x1x2048xf32, #tpu.memory_space<vmem>>, vector<1x1x128xf32>,
    %c3_503 = arith.constant 3 : index
    %c3_504 = arith.constant 3 : index
    %c0_505 = arith.constant 0 : index
    %238 = vector.load %arg16[%c3_503, %c3_504, %c0_505] : memref<4x4x128xf32, #tpu.memory_space<vmem>>, vector<1x1x128xf32>
    %c0_506 = arith.constant 0 : index
    %c0_507 = arith.constant 0 : index
    %c1920 = arith.constant 1920 : index
    %239 = vector.load %arg21[%c0_506, %c0_507, %c1920] : memref<1x1x2048xf32, #tpu.memory_space<vmem>>, vector<1x1x128xf32>
    tpu.vector_store %arg21[%c0_506, %c0_507, %c1920], %238 {strides = array<i32>} : memref<1x1x2048xf32, #tpu.memory_space<vmem>>, vector<1x1x128xf32>,
    %c0_508 = arith.constant 0 : index
    %c0_509 = arith.constant 0 : index
    %c0_510 = arith.constant 0 : index
    %240 = vector.load %arg21[%c0_508, %c0_509, %c0_510] : memref<1x1x2048xf32, #tpu.memory_space<vmem>>, vector<1x1x2048xf32>
    %241 = vector.shape_cast %240 : vector<1x1x2048xf32> to vector<1x2048xf32>
    %c0_511 = arith.constant 0 : index
    %c0_512 = arith.constant 0 : index
    %242 = vector.load %arg10[%c0_511, %c0_512] : memref<2048x1xf32, #tpu.memory_space<vmem>>, vector<2048x1xf32>
    %cst_513 = arith.constant dense<0.000000e+00> : vector<1x1xf32>
    %243 = tpu.matmul %241, %242, %cst_513 {dimension_numbers = #tpu.dot_dimension_numbers<[1], [0], [0], [1], [0, 0, 1, 1], [], []>} : vector<1x2048xf32>, vector<2048x1xf32>, vector<1x1xf32> -> vector<1x1xf32>
    %c0_514 = arith.constant 0 : index
    %c0_515 = arith.constant 0 : index
    %244 = vector.load %arg11[%c0_514, %c0_515] : memref<1x1xf32, #tpu.memory_space<vmem>>, vector<1x1xf32>
    %245 = arith.addf %243, %244 : vector<1x1xf32>
    %246 = vector.shape_cast %245 : vector<1x1xf32> to vector<1x1x1xf32>
    %c0_516 = arith.constant 0 : index
    %c0_517 = arith.constant 0 : index
    %c0_518 = arith.constant 0 : index
    %c0_519 = arith.constant 0 : index
    %247 = vector.load %arg12[%c0_516, %c0_517, %c0_518, %c0_519] : memref<1x1x1x1xf32, #tpu.memory_space<vmem>>, vector<1x1x1x1xf32>
    %248 = vector.shape_cast %247 : vector<1x1x1x1xf32> to vector<1x1x1xf32>
    %249 = vector.shape_cast %246 : vector<1x1x1xf32> to vector<1x1x1x1xf32>
    tpu.vector_store %arg12[%c0_516, %c0_517, %c0_518, %c0_519], %249 {strides = array<i32>} : memref<1x1x1x1xf32, #tpu.memory_space<vmem>>, vector<1x1x1x1xf32>,
    return
  }
  func.func @transform_0(%arg0: i32) -> (i32, i32, i32, i32) {
    %c0_i32 = arith.constant 0 : i32
    %c0_i32_0 = arith.constant 0 : i32
    %c0_i32_1 = arith.constant 0 : i32
    %c0_i32_2 = arith.constant 0 : i32
    return %arg0, %c0_i32, %c0_i32_0, %c0_i32_1 : i32, i32, i32, i32
  }
  func.func @transform_1(%arg0: i32) -> (i32, i32) {
    %c0_i32 = arith.constant 0 : i32
    %c0_i32_0 = arith.constant 0 : i32
    %c0_i32_1 = arith.constant 0 : i32
    return %c0_i32, %c0_i32_0 : i32, i32
  }
  func.func @transform_2(%arg0: i32) -> (i32, i32) {
    %c0_i32 = arith.constant 0 : i32
    %c0_i32_0 = arith.constant 0 : i32
    %c0_i32_1 = arith.constant 0 : i32
    return %c0_i32, %c0_i32_0 : i32, i32
  }
  func.func @transform_3(%arg0: i32) -> (i32, i32) {
    %c0_i32 = arith.constant 0 : i32
    %c0_i32_0 = arith.constant 0 : i32
    %c0_i32_1 = arith.constant 0 : i32
    return %c0_i32, %c0_i32_0 : i32, i32
  }
  func.func @transform_4(%arg0: i32) -> (i32, i32) {
    %c0_i32 = arith.constant 0 : i32
    %c0_i32_0 = arith.constant 0 : i32
    %c0_i32_1 = arith.constant 0 : i32
    return %c0_i32, %c0_i32_0 : i32, i32
  }
  func.func @transform_5(%arg0: i32) -> (i32, i32) {
    %c0_i32 = arith.constant 0 : i32
    %c0_i32_0 = arith.constant 0 : i32
    %c0_i32_1 = arith.constant 0 : i32
    return %c0_i32, %c0_i32_0 : i32, i32
  }
  func.func @transform_6(%arg0: i32) -> (i32, i32) {
    %c0_i32 = arith.constant 0 : i32
    %c0_i32_0 = arith.constant 0 : i32
    %c0_i32_1 = arith.constant 0 : i32
    return %c0_i32, %c0_i32_0 : i32, i32
  }
  func.func @transform_7(%arg0: i32) -> (i32, i32) {
    %c0_i32 = arith.constant 0 : i32
    %c0_i32_0 = arith.constant 0 : i32
    %c0_i32_1 = arith.constant 0 : i32
    return %c0_i32, %c0_i32_0 : i32, i32
  }
  func.func @transform_8(%arg0: i32) -> (i32, i32) {
    %c0_i32 = arith.constant 0 : i32
    %c0_i32_0 = arith.constant 0 : i32
    %c0_i32_1 = arith.constant 0 : i32
    return %c0_i32, %c0_i32_0 : i32, i32
  }
  func.func @transform_9(%arg0: i32) -> (i32, i32) {
    %c0_i32 = arith.constant 0 : i32
    %c0_i32_0 = arith.constant 0 : i32
    %c0_i32_1 = arith.constant 0 : i32
    return %c0_i32, %c0_i32_0 : i32, i32
  }
  func.func @transform_10(%arg0: i32) -> (i32, i32) {
    %c0_i32 = arith.constant 0 : i32
    %c0_i32_0 = arith.constant 0 : i32
    %c0_i32_1 = arith.constant 0 : i32
    return %c0_i32, %c0_i32_0 : i32, i32
  }
  func.func @transform_11(%arg0: i32) -> (i32, i32, i32, i32) {
    %c0_i32 = arith.constant 0 : i32
    %c0_i32_0 = arith.constant 0 : i32
    %c0_i32_1 = arith.constant 0 : i32
    %c0_i32_2 = arith.constant 0 : i32
    return %arg0, %c0_i32, %c0_i32_0, %c0_i32_1 : i32, i32, i32, i32
  }
}

</mosaic_0001>

<bundles_post_ra>
// kernel: squeeze.9
= control target key start
LH: loop header
LB: loop body
LE: loop exit
PB: predicated region body
PF: predicated region fallthrough
CT: control target
= control target key end

     0   :  { %2 = vsyncpa [#allocation1], 0  ;;  %s89_s6 = smov [#allocation0]   ;;  %s109_s0 = inlined_call_operand.hbm [shape: f32[4,1,4,4], index: 0, kind: input, shape index: {}]   ;;  %s110_s1 = inlined_call_operand.vmem [shape: f32[4,16], index: 1, kind: output, shape index: {}]  }
   0x1   :  { %s7_s7 = sshll.u32 %s89_s6, 4  ;;  %s8_s7 = int_to_ptr.vmem [resolvable:$true] %s7_s7 }
   0x2   :  { %s75_s8 = scalar_lea.vmem %s8_s7, 256  ;;  %p80_p1 = scmp.lt.s32.totalorder %s8_s7, %s8_s7 }
   0x3   :  { %p76_p0 = scmp.ne.s32.totalorder %s8_s7, %s75_s8  ;;  %p81_p2 = scmp.lt.s32.totalorder %s75_s8, %s75_s8 }
   0x5   :  { %p82_p3 = por %p81_p2, %p80_p1 }
   0x7   :  { %p83_p4 = pnand %p82_p3, %p76_p0 }
   0x9   :  { %86 = shalt.err (!%p83_p4)
}
   0xa   :  { %10 = dma.hbm_to_vmem [thread:$0]  %s109_s0, 256, %s8_s7, [#allocation1]  }
   0xb   :  { %87 = dma.done.wait [#allocation1], 256  }
   0xc   :  { %88 = vsyncadd [#allocation1], 4294967040  ;;  %v17_v0 = vld [vmem:[#allocation0 + $0xc] sm:$0xf]  ;;  %v22_v1 = vld [vmem:[#allocation0 + $0x8] sm:$0xf] }
   0xd   :  { %v26_v2 = vld [vmem:[#allocation0 + $0x4] sm:$0xf]  ;;  %19 = vst [vmem:[#allocation3 + $0x18] sm:$0xf] %v17_v0  ;;  %24 = vst [vmem:[#allocation3 + $0x10] sm:$0xf] %v22_v1 }
   0xe   :  { %28 = vst [vmem:[#allocation3 + $0x8] sm:$0xf] %v26_v2  ;;  %v29_v3 = vld [vmem:[#allocation0] sm:$0xf]  ;;  %vm32_vm0 = vcmask 31744   ;;  %s90_s0 = smov 12  }
   0xf   :  { %30 = vst [vmem:[#allocation3] sm:$0xf] %v29_v3  ;;  %s91_s11 = smov 4   ;;  %s92_s12 = smov 8   ;;  %vm38_vm1 = vcmask 130144   ;;  %vm44_vm2 = vcmask 97344  }
  0x10   :  { %vm50_vm3 = vcmask 64544  }
  0x16   :  { %v35_v4 = vld [vmem:[#allocation3 + $0x3] ss:$8 sm:$0xf]   ;;  %v47_v5 = vld [vmem:[#allocation3 + $0x1] ss:$8 sm:$0xf]  }
  0x17   :  { %36 = vrot.lane.b32.xlu0 %v35_v4, %s90_s0  ;;  %v31_v6 = vld [vmem:[#allocation3] ss:$8 sm:$0xf]   ;;  %v41_v7 = vld [vmem:[#allocation3 + $0x2] ss:$8 sm:$0xf]   ;;  %48 = vrot.lane.b32.xlu1 %v47_v5, %s91_s11 }
  0x18   :  { %33 = vst.msk [vmem:[#allocation2] sm:$0xf] %vm32_vm0, %v31_v6  }
  0x1b   :  { %42 = vrot.lane.b32.xlu0 %v41_v7, %s92_s12 }
  0x89   :  { %v37_v8 = vpop.permute.xlu0 %36   ;;  %v49_v9 = vpop.permute.xlu1 %48  }
  0x8a   :  { %39 = vst.msk [vmem:[#allocation2] sm:$0xf] %vm38_vm1, %v37_v8  }
  0x8d   :  { %v43_v10 = vpop.permute.xlu0 %42  }
  0x8e   :  { %45 = vst.msk [vmem:[#allocation2] sm:$0xf] %vm44_vm2, %v43_v10  }
  0x8f   :  { %51 = vst.msk [vmem:[#allocation2] sm:$0xf] %vm50_vm3, %v49_v9  }
  0x96   :  { %v56_v11 = vld [vmem:[#allocation2] sm:$0xf] }
  0x97   :  { %59 = vst [vmem:[%s110_s1] sm:$0xf] %v56_v11 }
  0x98   :  { %60 = vsyncpa [#allocation1], 1 }

// kernel: light_discriminator_forward.1
= control target key start
LH: loop header
LB: loop body
LE: loop exit
PB: predicated region body
PF: predicated region fallthrough
CT: control target
= control target key end

     0   :  { %s9769_s19 = smov 0   ;;  %s13609_s0 = inlined_call_operand.vmem [shape: f32[2,34,34,4], index: 0, kind: input, shape index: {}]   ;;  %s13610_s1 = inlined_call_operand.vmem [shape: f32[64,16], index: 1, kind: input, shape index: {}]   ;;  %s13611_s2 = inlined_call_operand.vmem [shape: f32[1,16], index: 2, kind: input, shape index: {}]   ;;  %s13612_s3 = inlined_call_operand.vmem [shape: f32[256,32], index: 3, kind: input, shape index: {}]   ;;  %s13613_s4 = inlined_call_operand.vmem [shape: f32[1,32], index: 4, kind: input, shape index: {}]   ;;  %s13614_s5 = inlined_call_operand.vmem [shape: f32[512,64], index: 5, kind: input, shape index: {}]   ;;  %s13615_s6 = inlined_call_operand.vmem [shape: f32[1,64], index: 6, kind: input, shape index: {}]   ;;  %s13616_s7 = inlined_call_operand.vmem [shape: f32[1024,128], index: 7, kind: input, shape index: {}]   ;;  %s13617_s8 = inlined_call_operand.vmem [shape: f32[1,128], index: 8, kind: input, shape index: {}]   ;;  %s13618_s9 = inlined_call_operand.vmem [shape: f32[2048,1], index: 9, kind: input, shape index: {}]   ;;  %s13619_s10 = inlined_call_operand.<no memory space> [shape: f32[1,1], index: 10, kind: input, shape index: {}]   ;;  %s13620_s11 = inlined_call_operand.vmem [shape: f32[2,1,1,1], index: 11, kind: output, shape index: {}]  }
   0x1   :  { %v16_v0 = vstv %s13619_s10 }
   0x2   :  { %17 = vst [vmem:[#allocation11] sm:$0x1] %v16_v0 }
   0x3 LB: > { %s8414_s20 = sadd.s32 4294967295, %s9683_s19   ;;  %p8418_p0 = scmp.ge.s32.totalorder %s9683_s19, 1  ;;  %s9683_s19 = sphi %s9769_s19, %s23_s19  }
   0x4   : > { %p339_p1 = scmp.lt.s32.totalorder %s9683_s19, 3 }
   0x6   : > { %p340_p2 = pnand %p8418_p0, %p339_p1 }
   0x7   : > { %p377_p3 = scmp.lt.s32.totalorder (!%p340_p2), %s8414_s20, 1  ;;  %s9685_s24 = smov (!%p340_p2), 8  }
   0x8   : > { %343 = sbr.rel (%p340_p2) target bundleno = 2723 (0xaa3), region = 64  ;;  %s9686_s25 = smov (!%p340_p2), 4  }
   0x9   : > { %s9687_s26 = smov (!%p340_p2), 12   ;;  %s9688_s27 = smov (!%p340_p2), 16  }
   0xa   : > { %s9689_s28 = smov (!%p340_p2), 20   ;;  %s13621_s29 = smov (!%p340_p2), 24  }
   0xb   : > { %s9691_s30 = smov (!%p340_p2), 28   ;;  %s9692_s12 = smov (!%p340_p2), 32  }
   0xc   : > { %s9693_s13 = smov (!%p340_p2), 36   ;;  %s13623_s14 = smov (!%p340_p2), 40  }
   0xd   : > { %s13765_s20 = smov (!%p377_p3, %s8414_s20), 1  ;;  %vm13627_vm0 = vcmask 31744   ;;  %s9695_s15 = smov 44   ;;  %vm13629_vm1 = vcmask 64544   ;;  %vm898_vm2 = vcmask 97344   ;;  %vm1123_vm3 = vcmask 130144  }
   0xe   : > { %s9626_s10 = smul.u32 1360, %s13765_s20  ;;  %s9696_s16 = smov 48   ;;  %vm1348_vm4 = vcmask 162944   ;;  %vm13626_vm5 = vcmask 195744   ;;  %vm1798_vm6 = vcmask 228544   ;;  %vm2023_vm7 = vcmask 261344  }
   0xf   : > { %s9697_s17 = smov 52   ;;  %s9698_s18 = smov 56   ;;  %vm2248_vm8 = vcmask 294144   ;;  %vm2473_vm9 = vcmask 326944   ;;  %vm2698_vm10 = vcmask 359744   ;;  %vm2923_vm11 = vcmask 392544  }
  0x10   : > { %s9783_s23 = scalar_lea.vmem %s13609_s0, %s9626_s10  ;;  %s13632_s10 = smov 24   ;;  %vm13630_vm12 = vcmask 425344   ;;  %vm3373_vm13 = vcmask 458144   ;;  %vm13625_vm14 = vcmask 490944   ;;  %vm3823_vm15 = vcmask 523744  }
  0x11   : > { %v8483_v1 = vld [vmem:[%s9783_s23 + $0x2] ss:$2 sm:$0xff]  ;;  %v8451_v2 = vld [vmem:[%s9783_s23 + $0x1] ss:$2 sm:$0xff]  ;;  %v8484_v3 = vld [vmem:[%s9783_s23 + $0x12] ss:$2 sm:$0xff] }
  0x12   : > { %802 = vrot.lane.b32.xlu1 %v8483_v1, %s9685_s24  ;;  %577 = vrot.lane.b32.xlu0 %v8451_v2, %s9686_s25  ;;  %v8452_v4 = vld [vmem:[%s9783_s23 + $0x11] ss:$2 sm:$0xff]  ;;  %v8547_v8 = vld [vmem:[%s9783_s23 + $0x28] ss:$2 sm:$0xff]  ;;  %s13633_s21 = smov 40  }
  0x13   : > { %v8516_v5 = vld [vmem:[%s9783_s23 + $0x13] ss:$2 sm:$0xff]  ;;  %v8515_v6 = vld [vmem:[%s9783_s23 + $0x3] ss:$2 sm:$0xff]  ;;  %v8548_v10 = vld [vmem:[%s9783_s23 + $0x38] ss:$2 sm:$0xff] }
  0x14   : > { %v8453_v7 = vld [vmem:[%s9783_s23 + $0x51] ss:$2 sm:$0xff]  ;;  %v8485_v11 = vld [vmem:[%s9783_s23 + $0x52] ss:$2 sm:$0xff]  ;;  %v8454_v12 = vld [vmem:[%s9783_s23 + $0x61] ss:$2 sm:$0xff] }
  0x15   : > { %v8579_v9 = vld [vmem:[%s9783_s23 + $0x29] ss:$2 sm:$0xff]  ;;  %v385_v13 = vld [vmem:[%s9783_s23] ss:$2 sm:$0xff]  ;;  %v8580_v15 = vld [vmem:[%s9783_s23 + $0x39] ss:$2 sm:$0xff] }
  0x16   : > { %804 = vrot.lane.b32.xlu1 %v8484_v3, %s9685_s24  ;;  %579 = vrot.lane.b32.xlu0 %v8452_v4, %s9686_s25  ;;  %v8611_v14 = vld [vmem:[%s9783_s23 + $0x2a] ss:$2 sm:$0xff]  ;;  %449 = vst.msk [vmem:[#allocation6] sm:$0xff] %vm13627_vm0, %v385_v13  ;;  %v8517_v18 = vld [vmem:[%s9783_s23 + $0x53] ss:$2 sm:$0xff] }
  0x17   : > { %v8420_v16 = vld [vmem:[%s9783_s23 + $0x10] ss:$2 sm:$0xff]  ;;  %v8422_v20 = vld [vmem:[%s9783_s23 + $0x60] ss:$2 sm:$0xff]  ;;  %v8643_v21 = vld [vmem:[%s9783_s23 + $0x2b] ss:$2 sm:$0xff] }
  0x18   : > { %450 = vst.msk [vmem:[#allocation6 + $0x8] sm:$0xff] %vm13627_vm0, %v8420_v16  ;;  %v8421_v17 = vld [vmem:[%s9783_s23 + $0x50] ss:$2 sm:$0xff]  ;;  %452 = vst.msk [vmem:[#allocation6 + $0x18] sm:$0xff] %vm13627_vm0, %v8422_v20  ;;  %v8423_v23 = vld [vmem:[%s9783_s23 + $0xa0] ss:$2 sm:$0xff] }
  0x19   : > { %451 = vst.msk [vmem:[#allocation6 + $0x10] sm:$0xff] %vm13627_vm0, %v8421_v17  ;;  %v8486_v19 = vld [vmem:[%s9783_s23 + $0x62] ss:$2 sm:$0xff]  ;;  %453 = vst.msk [vmem:[#allocation6 + $0x20] sm:$0xff] %vm13627_vm0, %v8423_v23  ;;  %v8518_v25 = vld [vmem:[%s9783_s23 + $0x63] ss:$2 sm:$0xff] }
  0x1a   : > { %1029 = vrot.lane.b32.xlu1 %v8516_v5, %s9687_s26  ;;  %1027 = vrot.lane.b32.xlu0 %v8515_v6, %s9687_s26  ;;  %v8612_v22 = vld [vmem:[%s9783_s23 + $0x3a] ss:$2 sm:$0xff]  ;;  %v8644_v27 = vld [vmem:[%s9783_s23 + $0x3b] ss:$2 sm:$0xff] }
  0x1b   : > { %v8549_v24 = vld [vmem:[%s9783_s23 + $0x78] ss:$2 sm:$0xff]  ;;  %v8550_v29 = vld [vmem:[%s9783_s23 + $0x88] ss:$2 sm:$0xff]  ;;  %v8455_v30 = vld [vmem:[%s9783_s23 + $0xa1] ss:$2 sm:$0xff] }
  0x1c   : > { %v8675_v26 = vld [vmem:[%s9783_s23 + $0x50] ss:$2 sm:$0xff]  ;;  %v8676_v31 = vld [vmem:[%s9783_s23 + $0x60] ss:$2 sm:$0xff]  ;;  %v8581_v32 = vld [vmem:[%s9783_s23 + $0x79] ss:$2 sm:$0xff] }
  0x1d   : > { %v8424_v28 = vld [vmem:[%s9783_s23 + $0xb0] ss:$2 sm:$0xff]  ;;  %v8456_v33 = vld [vmem:[%s9783_s23 + $0xb1] ss:$2 sm:$0xff]  ;;  %v8708_v37 = vld [vmem:[%s9783_s23 + $0x61] ss:$2 sm:$0xff] }
  0x1e   : > { %581 = vrot.lane.b32.xlu1 %v8453_v7, %s9686_s25  ;;  %1252 = vrot.lane.b32.xlu0 %v8547_v8, %s9688_s27  ;;  %454 = vst.msk [vmem:[#allocation6 + $0x28] sm:$0xff] %vm13627_vm0, %v8424_v28  ;;  %v8707_v34 = vld [vmem:[%s9783_s23 + $0x51] ss:$2 sm:$0xff]  ;;  %v8487_v36 = vld [vmem:[%s9783_s23 + $0xa2] ss:$2 sm:$0xff] }
  0x1f   : > { %v8582_v35 = vld [vmem:[%s9783_s23 + $0x89] ss:$2 sm:$0xff]  ;;  %v8613_v38 = vld [vmem:[%s9783_s23 + $0x7a] ss:$2 sm:$0xff]  ;;  %v8614_v41 = vld [vmem:[%s9783_s23 + $0x8a] ss:$2 sm:$0xff] }
  0x20   : > { %v8488_v39 = vld [vmem:[%s9783_s23 + $0xb2] ss:$2 sm:$0xff]  ;;  %v8519_v42 = vld [vmem:[%s9783_s23 + $0xa3] ss:$2 sm:$0xff]  ;;  %v8740_v43 = vld [vmem:[%s9783_s23 + $0x62] ss:$2 sm:$0xff] }
  0x21   : > { %v8739_v40 = vld [vmem:[%s9783_s23 + $0x52] ss:$2 sm:$0xff]  ;;  %v8645_v44 = vld [vmem:[%s9783_s23 + $0x7b] ss:$2 sm:$0xff]  ;;  %v8646_v48 = vld [vmem:[%s9783_s23 + $0x8b] ss:$2 sm:$0xff] }
  0x22   : > { %1477 = vrot.lane.b32.xlu1 %v8579_v9, %s9689_s28  ;;  %1254 = vrot.lane.b32.xlu0 %v8548_v10, %s9688_s27  ;;  %v8520_v45 = vld [vmem:[%s9783_s23 + $0xb3] ss:$2 sm:$0xff]  ;;  %v8425_v47 = vld [vmem:[%s9783_s23 + $0xf0] ss:$2 sm:$0xff] }
  0x23   : > { %v8771_v46 = vld [vmem:[%s9783_s23 + $0x53] ss:$2 sm:$0xff]  ;;  %455 = vst.msk [vmem:[#allocation6 + $0x30] sm:$0xff] %vm13627_vm0, %v8425_v47  ;;  %v8551_v49 = vld [vmem:[%s9783_s23 + $0xc8] ss:$2 sm:$0xff] }
  0x24   : > { %v8772_v50 = vld [vmem:[%s9783_s23 + $0x63] ss:$2 sm:$0xff]  ;;  %v8677_v51 = vld [vmem:[%s9783_s23 + $0xa0] ss:$2 sm:$0xff]  ;;  %v8678_v58 = vld [vmem:[%s9783_s23 + $0xb0] ss:$2 sm:$0xff] }
  0x25   : > { %v8457_v52 = vld [vmem:[%s9783_s23 + $0xf1] ss:$2 sm:$0xff]  ;;  %v8803_v53 = vld [vmem:[%s9783_s23 + $0x78] ss:$2 sm:$0xff]  ;;  %v8709_v57 = vld [vmem:[%s9783_s23 + $0xa1] ss:$2 sm:$0xff] }
  0x26   : > { %806 = vrot.lane.b32.xlu1 %v8485_v11, %s9685_s24  ;;  %583 = vrot.lane.b32.xlu0 %v8454_v12, %s9686_s25  ;;  %v8583_v54 = vld [vmem:[%s9783_s23 + $0xc9] ss:$2 sm:$0xff]  ;;  %v8552_v55 = vld [vmem:[%s9783_s23 + $0xd8] ss:$2 sm:$0xff] }
  0x27   : > { %v8426_v56 = vld [vmem:[%s9783_s23 + $0x100] ss:$2 sm:$0xff]  ;;  %v8835_v59 = vld [vmem:[%s9783_s23 + $0x79] ss:$2 sm:$0xff]  ;;  %v8836_v4 = vld [vmem:[%s9783_s23 + $0x89] ss:$2 sm:$0xff] }
  0x28   : > { %456 = vst.msk [vmem:[#allocation6 + $0x38] sm:$0xff] %vm13627_vm0, %v8426_v56  ;;  %v8804_v60 = vld [vmem:[%s9783_s23 + $0x88] ss:$2 sm:$0xff]  ;;  %v8458_v62 = vld [vmem:[%s9783_s23 + $0x101] ss:$2 sm:$0xff] }
  0x29   : > { %v8489_v61 = vld [vmem:[%s9783_s23 + $0xf2] ss:$2 sm:$0xff]  ;;  %v8584_v0 = vld [vmem:[%s9783_s23 + $0xd9] ss:$2 sm:$0xff]  ;;  %v8741_v1 = vld [vmem:[%s9783_s23 + $0xa2] ss:$2 sm:$0xff] }
  0x2a   : > { %1702 = vrot.lane.b32.xlu1 %v8611_v14, %s13621_s29  ;;  %1479 = vrot.lane.b32.xlu0 %v8580_v15, %s9689_s28  ;;  %v8615_v63 = vld [vmem:[%s9783_s23 + $0xca] ss:$2 sm:$0xff]  ;;  %v8710_v2 = vld [vmem:[%s9783_s23 + $0xb1] ss:$2 sm:$0xff] }
  0x2b   : > { %v8867_v3 = vld [vmem:[%s9783_s23 + $0x7a] ss:$2 sm:$0xff]  ;;  %v8521_v7 = vld [vmem:[%s9783_s23 + $0xf3] ss:$2 sm:$0xff]  ;;  %v8773_v15 = vld [vmem:[%s9783_s23 + $0xa3] ss:$2 sm:$0xff] }
  0x2c   : > { %v8490_v8 = vld [vmem:[%s9783_s23 + $0x102] ss:$2 sm:$0xff]  ;;  %v8647_v11 = vld [vmem:[%s9783_s23 + $0xcb] ss:$2 sm:$0xff]  ;;  %v8742_v16 = vld [vmem:[%s9783_s23 + $0xb2] ss:$2 sm:$0xff] }
  0x2d   : > { %v8616_v12 = vld [vmem:[%s9783_s23 + $0xda] ss:$2 sm:$0xff]  ;;  %v3894_v20 = vld [vmem:[%s13610_s1 + $0x30] sm:$0xff] }
  0x2e   : > { %1031 = vrot.lane.b32.xlu1 %v8517_v18, %s9687_s26  ;;  %808 = vrot.lane.b32.xlu0 %v8486_v19, %s9685_s24  ;;  %v3895_v19 = vld [vmem:[%s13610_s1 + $0x38] sm:$0xff]  ;;  %v8522_v28 = vld [vmem:[%s9783_s23 + $0x103] ss:$2 sm:$0xff] }
  0x2f   : > { %9562 = vmatprep.subr.mxu0 %v3895_v19 }
  0x30   : > { %9563 = vmatpush3.msra.mxu0 %v3895_v19 }
  0x31   : > { %9564 = vmatprep.subr.mxu0 %v3894_v20 }
  0x32   : > { %1927 = vrot.lane.b32.xlu1 %v8643_v21, %s9691_s30  ;;  %1704 = vrot.lane.b32.xlu0 %v8612_v22, %s13621_s29  ;;  %v8899_v21 = vld [vmem:[%s9783_s23 + $0x7b] ss:$2 sm:$0xff]  ;;  %v8868_v22 = vld [vmem:[%s9783_s23 + $0x8a] ss:$2 sm:$0xff] }
  0x33   : > { %9565 = vmatpush3.msra.mxu0 %v3894_v20 }
  0x36   : > { %1256 = vrot.lane.b32.xlu1 %v8549_v24, %s9688_s27  ;;  %1033 = vrot.lane.b32.xlu0 %v8518_v25, %s9687_s26  ;;  %v3893_v25 = vld [vmem:[%s13610_s1 + $0x28] sm:$0xff] }
  0x37   : > { %9566 = vmatprep.subr.mxu0 %v3893_v25 }
  0x38   : > { %9567 = vmatpush3.msra.mxu0 %v3893_v25  ;;  %v8901_v25 = vld [vmem:[%s9783_s23 + $0xcb] ss:$2 sm:$0xff] }
  0x3a   : > { %2152 = vrot.lane.b32.xlu1 %v8675_v26, %s9692_s12  ;;  %1929 = vrot.lane.b32.xlu0 %v8644_v27, %s9691_s30  ;;  %v3892_v26 = vld [vmem:[%s13610_s1 + $0x20] sm:$0xff] }
  0x3b   : > { %v8553_v27 = vld [vmem:[%s9783_s23 + $0x118] ss:$2 sm:$0xff]  ;;  %9568 = vmatprep.subr.mxu0 %v3892_v26 }
  0x3c   : > { %9569 = vmatpush3.msra.mxu0 %v3892_v26  ;;  %v8870_v26 = vld [vmem:[%s9783_s23 + $0xda] ss:$2 sm:$0xff] }
  0x3e   : > { %1258 = vrot.lane.b32.xlu1 %v8550_v29, %s9688_s27  ;;  %585 = vrot.lane.b32.xlu0 %v8455_v30, %s9686_s25 }
  0x42   : > { %2154 = vrot.lane.b32.xlu1 %v8676_v31, %s9692_s12  ;;  %1481 = vrot.lane.b32.xlu0 %v8581_v32, %s9689_s28  ;;  %v8427_v31 = vld [vmem:[%s9783_s23 + $0x140] ss:$2 sm:$0xff]  ;;  %v3891_v32 = vld [vmem:[%s13610_s1 + $0x18] sm:$0xff] }
  0x43   : > { %457 = vst.msk [vmem:[#allocation6 + $0x40] sm:$0xff] %vm13627_vm0, %v8427_v31  ;;  %9570 = vmatprep.subr.mxu0 %v3891_v32 }
  0x44   : > { %9571 = vmatpush3.msra.mxu0 %v3891_v32 }
  0x46   : > { %587 = vrot.lane.b32.xlu1 %v8456_v33, %s9686_s25  ;;  %2377 = vrot.lane.b32.xlu0 %v8707_v34, %s9693_s13  ;;  %v8679_v33 = vld [vmem:[%s9783_s23 + $0xf0] ss:$2 sm:$0xff]  ;;  %v8648_v34 = vld [vmem:[%s9783_s23 + $0xdb] ss:$2 sm:$0xff] }
  0x4a   : > { %1483 = vrot.lane.b32.xlu1 %v8582_v35, %s9689_s28  ;;  %810 = vrot.lane.b32.xlu0 %v8487_v36, %s9685_s24 }
  0x4e   : > { %2379 = vrot.lane.b32.xlu1 %v8708_v37, %s9693_s13  ;;  %1706 = vrot.lane.b32.xlu0 %v8613_v38, %s13621_s29  ;;  %v3890_v37 = vld [vmem:[%s13610_s1 + $0x10] sm:$0xff]  ;;  %v3889_v38 = vld [vmem:[%s13610_s1 + $0x8] sm:$0xff] }
  0x4f   : > { %9572 = vmatprep.subr.mxu0 %v3890_v37 }
  0x50   : > { %9573 = vmatpush3.msra.mxu0 %v3890_v37 }
  0x51   : > { %9574 = vmatprep.subr.mxu0 %v3889_v38 }
  0x52   : > { %812 = vrot.lane.b32.xlu1 %v8488_v39, %s9685_s24  ;;  %2602 = vrot.lane.b32.xlu0 %v8739_v40, %s13623_s14  ;;  %v8805_v39 = vld [vmem:[%s9783_s23 + $0xc8] ss:$2 sm:$0xff]  ;;  %v8774_v40 = vld [vmem:[%s9783_s23 + $0xb3] ss:$2 sm:$0xff] }
  0x53   : > { %9575 = vmatpush3.msra.mxu0 %v3889_v38  ;;  %v8807_v38 = vld [vmem:[%s9783_s23 + $0x118] ss:$2 sm:$0xff] }
  0x56   : > { %1708 = vrot.lane.b32.xlu1 %v8614_v41, %s13621_s29  ;;  %1035 = vrot.lane.b32.xlu0 %v8519_v42, %s9687_s26 }
  0x5a   : > { %2604 = vrot.lane.b32.xlu1 %v8740_v43, %s13623_s14  ;;  %1931 = vrot.lane.b32.xlu0 %v8645_v44, %s9691_s30  ;;  %v3888_v43 = vld [vmem:[%s13610_s1] sm:$0xff] }
  0x5b   : > { %v8459_v44 = vld [vmem:[%s9783_s23 + $0x141] ss:$2 sm:$0xff]  ;;  %9576 = vmatprep.subr.mxu0 %v3888_v43 }
  0x5c   : > { %9577 = vmatpush3.msra.mxu0 %v3888_v43  ;;  %v8902_v43 = vld [vmem:[%s9783_s23 + $0xdb] ss:$2 sm:$0xff] }
  0x5e   : > { %1037 = vrot.lane.b32.xlu1 %v8520_v45, %s9687_s26  ;;  %2827 = vrot.lane.b32.xlu0 %v8771_v46, %s9695_s15  ;;  %v8900_v45 = vld [vmem:[%s9783_s23 + $0x8b] ss:$2 sm:$0xff] }
  0x62   : > { %1933 = vrot.lane.b32.xlu1 %v8646_v48, %s9691_s30  ;;  %1260 = vrot.lane.b32.xlu0 %v8551_v49, %s9688_s27  ;;  %v8585_v48 = vld [vmem:[%s9783_s23 + $0x119] ss:$2 sm:$0xff]  ;;  %v8554_v49 = vld [vmem:[%s9783_s23 + $0x128] ss:$2 sm:$0xff] }
  0x66   : > { %2829 = vrot.lane.b32.xlu1 %v8772_v50, %s9695_s15  ;;  %2156 = vrot.lane.b32.xlu0 %v8677_v51, %s9692_s12  ;;  %v8428_v50 = vld [vmem:[%s9783_s23 + $0x150] ss:$2 sm:$0xff] }
  0x67   : > { %458 = vst.msk [vmem:[#allocation6 + $0x48] sm:$0xff] %vm13627_vm0, %v8428_v50 }
  0x6a   : > { %589 = vrot.lane.b32.xlu1 %v8457_v52, %s9686_s25  ;;  %3052 = vrot.lane.b32.xlu0 %v8803_v53, %s9696_s16  ;;  %v8711_v53 = vld [vmem:[%s9783_s23 + $0xf1] ss:$2 sm:$0xff] }
  0x6e   : > { %1485 = vrot.lane.b32.xlu1 %v8583_v54, %s9689_s28  ;;  %1262 = vrot.lane.b32.xlu0 %v8552_v55, %s9688_s27  ;;  %v8680_v54 = vld [vmem:[%s9783_s23 + $0x100] ss:$2 sm:$0xff] }
  0x72   : > { %2381 = vrot.lane.b32.xlu1 %v8709_v57, %s9693_s13  ;;  %2158 = vrot.lane.b32.xlu0 %v8678_v58, %s9692_s12  ;;  %v8837_v57 = vld [vmem:[%s9783_s23 + $0xc9] ss:$2 sm:$0xff]  ;;  %v8806_v58 = vld [vmem:[%s9783_s23 + $0xd8] ss:$2 sm:$0xff] }
  0x76   : > { %3277 = vrot.lane.b32.xlu1 %v8835_v59, %s9697_s17  ;;  %3054 = vrot.lane.b32.xlu0 %v8804_v60, %s9696_s16 }
  0x7a   : > { %814 = vrot.lane.b32.xlu1 %v8489_v61, %s9685_s24  ;;  %591 = vrot.lane.b32.xlu0 %v8458_v62, %s9686_s25  ;;  %v8491_v61 = vld [vmem:[%s9783_s23 + $0x142] ss:$2 sm:$0xff]  ;;  %v8460_v62 = vld [vmem:[%s9783_s23 + $0x151] ss:$2 sm:$0xff] }
  0x7e   : > { %1710 = vrot.lane.b32.xlu1 %v8615_v63, %s13621_s29  ;;  %1487 = vrot.lane.b32.xlu0 %v8584_v0, %s9689_s28 }
  0x82   : > { %2606 = vrot.lane.b32.xlu1 %v8741_v1, %s13623_s14  ;;  %2383 = vrot.lane.b32.xlu0 %v8710_v2, %s9693_s13  ;;  %v8617_v1 = vld [vmem:[%s9783_s23 + $0x11a] ss:$2 sm:$0xff]  ;;  %v8586_v2 = vld [vmem:[%s9783_s23 + $0x129] ss:$2 sm:$0xff] }
  0x84   : > { %v803_v5 = vpop.permute.xlu1 %802  ;;  %v578_v6 = vpop.permute.xlu0 %577 }
  0x85   : > { %674 = vst.msk [vmem:[#allocation6] sm:$0xff] %vm13629_vm1, %v578_v6  ;;  %v8712_v6 = vld [vmem:[%s9783_s23 + $0x101] ss:$2 sm:$0xff] }
  0x86   : > { %3502 = vrot.lane.b32.xlu1 %v8867_v3, %s9698_s18  ;;  %3279 = vrot.lane.b32.xlu0 %v8836_v4, %s9697_s17  ;;  %899 = vst.msk [vmem:[#allocation6] sm:$0xff] %vm898_vm2, %v803_v5  ;;  %v8743_v5 = vld [vmem:[%s9783_s23 + $0xf2] ss:$2 sm:$0xff] }
  0x88   : > { %v805_v9 = vpop.permute.xlu1 %804  ;;  %v580_v10 = vpop.permute.xlu0 %579 }
  0x89   : > { %675 = vst.msk [vmem:[#allocation6 + $0x8] sm:$0xff] %vm13629_vm1, %v580_v10  ;;  %v8838_v10 = vld [vmem:[%s9783_s23 + $0xd9] ss:$2 sm:$0xff] }
  0x8a   : > { %1039 = vrot.lane.b32.xlu1 %v8521_v7, %s9687_s26  ;;  %816 = vrot.lane.b32.xlu0 %v8490_v8, %s9685_s24  ;;  %900 = vst.msk [vmem:[#allocation6 + $0x8] sm:$0xff] %vm898_vm2, %v805_v9  ;;  %v8869_v9 = vld [vmem:[%s9783_s23 + $0xca] ss:$2 sm:$0xff] }
  0x8c   : > { %v1030_v13 = vpop.permute.xlu1 %1029  ;;  %v1028_v14 = vpop.permute.xlu0 %1027 }
  0x8d   : > { %1125 = vst.msk [vmem:[#allocation6 + $0x8] sm:$0xff] %vm1123_vm3, %v1030_v13  ;;  %1124 = vst.msk [vmem:[#allocation6] sm:$0xff] %vm1123_vm3, %v1028_v14  ;;  %v8523_v13 = vld [vmem:[%s9783_s23 + $0x143] ss:$2 sm:$0xff]  ;;  %v8492_v14 = vld [vmem:[%s9783_s23 + $0x152] ss:$2 sm:$0xff] }
  0x8e   : > { %1935 = vrot.lane.b32.xlu1 %v8647_v11, %s9691_s30  ;;  %1712 = vrot.lane.b32.xlu0 %v8616_v12, %s13621_s29  ;;  %s9699_s29 = smov 60  }
  0x90   : > { %v582_v17 = vpop.permute.xlu1 %581  ;;  %v1253_v18 = vpop.permute.xlu0 %1252 }
  0x91   : > { %676 = vst.msk [vmem:[#allocation6 + $0x10] sm:$0xff] %vm13629_vm1, %v582_v17  ;;  %v8649_v17 = vld [vmem:[%s9783_s23 + $0x11b] ss:$2 sm:$0xff] }
  0x92   : > { %1349 = vst.msk [vmem:[#allocation6] sm:$0xff] %vm1348_vm4, %v1253_v18  ;;  %2831 = vrot.lane.b32.xlu1 %v8773_v15, %s9695_s15  ;;  %2608 = vrot.lane.b32.xlu0 %v8742_v16, %s13623_s14  ;;  %v8618_v18 = vld [vmem:[%s9783_s23 + $0x12a] ss:$2 sm:$0xff] }
  0x94   : > { %v1478_v23 = vpop.permute.xlu1 %1477  ;;  %v1255_v24 = vpop.permute.xlu0 %1254 }
  0x95   : > { %1574 = vst.msk [vmem:[#allocation6] sm:$0xff] %vm13626_vm5, %v1478_v23 }
  0x96   : > { %1350 = vst.msk [vmem:[#allocation6 + $0x8] sm:$0xff] %vm1348_vm4, %v1255_v24  ;;  %3727 = vrot.lane.b32.xlu1 %v8899_v21, %s9699_s29  ;;  %3504 = vrot.lane.b32.xlu0 %v8868_v22, %s9698_s18  ;;  %v8775_v21 = vld [vmem:[%s9783_s23 + $0xf3] ss:$2 sm:$0xff]  ;;  %v8744_v22 = vld [vmem:[%s9783_s23 + $0x102] ss:$2 sm:$0xff] }
  0x98   : > { %v807_v29 = vpop.permute.xlu1 %806  ;;  %v584_v30 = vpop.permute.xlu0 %583 }
  0x99   : > { %901 = vst.msk [vmem:[#allocation6 + $0x10] sm:$0xff] %vm898_vm2, %v807_v29  ;;  %v8555_v29 = vld [vmem:[%s9783_s23 + $0x168] ss:$2 sm:$0xff] }
  0x9a   : > { %677 = vst.msk [vmem:[#allocation6 + $0x18] sm:$0xff] %vm13629_vm1, %v584_v30  ;;  %1264 = vrot.lane.b32.xlu1 %v8553_v27, %s9688_s27  ;;  %1041 = vrot.lane.b32.xlu0 %v8522_v28, %s9687_s26  ;;  %v8524_v30 = vld [vmem:[%s9783_s23 + $0x153] ss:$2 sm:$0xff] }
  0x9c   : > { %v1703_v35 = vpop.permute.xlu1 %1702  ;;  %v1480_v36 = vpop.permute.xlu0 %1479 }
  0x9d   : > { %1799 = vst.msk [vmem:[#allocation6] sm:$0xff] %vm1798_vm6, %v1703_v35  ;;  %v8650_v35 = vld [vmem:[%s9783_s23 + $0x12b] ss:$2 sm:$0xff] }
  0x9e   : > { %1575 = vst.msk [vmem:[#allocation6 + $0x8] sm:$0xff] %vm13626_vm5, %v1480_v36  ;;  %2160 = vrot.lane.b32.xlu1 %v8679_v33, %s9692_s12  ;;  %1937 = vrot.lane.b32.xlu0 %v8648_v34, %s9691_s30  ;;  %v8429_v33 = vld [vmem:[%s9783_s23 + $0x190] ss:$2 sm:$0xff]  ;;  %v8681_v34 = vld [vmem:[%s9783_s23 + $0x140] ss:$2 sm:$0xff] }
  0x9f   : > { %459 = vst.msk [vmem:[#allocation6 + $0x50] sm:$0xff] %vm13627_vm0, %v8429_v33  ;;  %v8683_v33 = vld [vmem:[%s9783_s23 + $0x190] ss:$2 sm:$0xff] }
  0xa0   : > { %v1032_v41 = vpop.permute.xlu1 %1031  ;;  %v809_v42 = vpop.permute.xlu0 %808 }
  0xa1   : > { %1126 = vst.msk [vmem:[#allocation6 + $0x10] sm:$0xff] %vm1123_vm3, %v1032_v41 }
  0xa2   : > { %902 = vst.msk [vmem:[#allocation6 + $0x18] sm:$0xff] %vm898_vm2, %v809_v42  ;;  %3056 = vrot.lane.b32.xlu1 %v8805_v39, %s9696_s16  ;;  %2833 = vrot.lane.b32.xlu0 %v8774_v40, %s9695_s15  ;;  %v8776_v39 = vld [vmem:[%s9783_s23 + $0x103] ss:$2 sm:$0xff] }
  0xa3   : > { %v8461_v42 = vld [vmem:[%s9783_s23 + $0x191] ss:$2 sm:$0xff] }
  0xa4   : > { %v1928_v46 = vpop.permute.xlu1 %1927  ;;  %v1705_v47 = vpop.permute.xlu0 %1704 }
  0xa5   : > { %2024 = vst.msk [vmem:[#allocation6] sm:$0xff] %vm2023_vm7, %v1928_v46  ;;  %v8587_v46 = vld [vmem:[%s9783_s23 + $0x169] ss:$2 sm:$0xff] }
  0xa6   : > { %1800 = vst.msk [vmem:[#allocation6 + $0x8] sm:$0xff] %vm1798_vm6, %v1705_v47  ;;  %593 = vrot.lane.b32.xlu1 %v8459_v44, %s9686_s25  ;;  %3729 = vrot.lane.b32.xlu0 %v8900_v45, %s9699_s29  ;;  %v8556_v47 = vld [vmem:[%s9783_s23 + $0x178] ss:$2 sm:$0xff] }
  0xa8   : > { %v1257_v51 = vpop.permute.xlu1 %1256  ;;  %v1034_v52 = vpop.permute.xlu0 %1033 }
  0xa9   : > { %1351 = vst.msk [vmem:[#allocation6 + $0x10] sm:$0xff] %vm1348_vm4, %v1257_v51  ;;  %v8713_v51 = vld [vmem:[%s9783_s23 + $0x141] ss:$2 sm:$0xff] }
  0xaa   : > { %1127 = vst.msk [vmem:[#allocation6 + $0x18] sm:$0xff] %vm1123_vm3, %v1034_v52  ;;  %1489 = vrot.lane.b32.xlu1 %v8585_v48, %s9689_s28  ;;  %1266 = vrot.lane.b32.xlu0 %v8554_v49, %s9688_s27  ;;  %v8430_v48 = vld [vmem:[%s9783_s23 + $0x1a0] ss:$2 sm:$0xff]  ;;  %v8682_v52 = vld [vmem:[%s9783_s23 + $0x150] ss:$2 sm:$0xff] }
  0xab   : > { %460 = vst.msk [vmem:[#allocation6 + $0x58] sm:$0xff] %vm13627_vm0, %v8430_v48 }
  0xac   : > { %v2153_v55 = vpop.permute.xlu1 %2152  ;;  %v1930_v56 = vpop.permute.xlu0 %1929 }
  0xad   : > { %2249 = vst.msk [vmem:[#allocation6] sm:$0xff] %vm2248_vm8, %v2153_v55  ;;  %v8839_v55 = vld [vmem:[%s9783_s23 + $0x119] ss:$2 sm:$0xff] }
  0xae   : > { %2025 = vst.msk [vmem:[#allocation6 + $0x8] sm:$0xff] %vm2023_vm7, %v1930_v56  ;;  %2385 = vrot.lane.b32.xlu1 %v8711_v53, %s9693_s13  ;;  %2162 = vrot.lane.b32.xlu0 %v8680_v54, %s9692_s12  ;;  %v8808_v56 = vld [vmem:[%s9783_s23 + $0x128] ss:$2 sm:$0xff] }
  0xb0   : > { %v1259_v59 = vpop.permute.xlu1 %1258  ;;  %v586_v60 = vpop.permute.xlu0 %585 }
  0xb1   : > { %1352 = vst.msk [vmem:[#allocation6 + $0x18] sm:$0xff] %vm1348_vm4, %v1259_v59  ;;  %v8493_v59 = vld [vmem:[%s9783_s23 + $0x192] ss:$2 sm:$0xff] }
  0xb2   : > { %678 = vst.msk [vmem:[#allocation6 + $0x20] sm:$0xff] %vm13629_vm1, %v586_v60  ;;  %3281 = vrot.lane.b32.xlu1 %v8837_v57, %s9697_s17  ;;  %3058 = vrot.lane.b32.xlu0 %v8806_v58, %s9696_s16  ;;  %v8462_v60 = vld [vmem:[%s9783_s23 + $0x1a1] ss:$2 sm:$0xff] }
  0xb4   : > { %v2155_v63 = vpop.permute.xlu1 %2154  ;;  %v1482_v0 = vpop.permute.xlu0 %1481 }
  0xb5   : > { %2250 = vst.msk [vmem:[#allocation6 + $0x8] sm:$0xff] %vm2248_vm8, %v2155_v63  ;;  %v8619_v63 = vld [vmem:[%s9783_s23 + $0x16a] ss:$2 sm:$0xff] }
  0xb6   : > { %1576 = vst.msk [vmem:[#allocation6 + $0x10] sm:$0xff] %vm13626_vm5, %v1482_v0  ;;  %818 = vrot.lane.b32.xlu1 %v8491_v61, %s9685_s24  ;;  %595 = vrot.lane.b32.xlu0 %v8460_v62, %s9686_s25  ;;  %v8588_v0 = vld [vmem:[%s9783_s23 + $0x179] ss:$2 sm:$0xff] }
  0xb8   : > { %v588_v3 = vpop.permute.xlu1 %587  ;;  %v2378_v4 = vpop.permute.xlu0 %2377 }
  0xb9   : > { %679 = vst.msk [vmem:[#allocation6 + $0x28] sm:$0xff] %vm13629_vm1, %v588_v3  ;;  %v8745_v3 = vld [vmem:[%s9783_s23 + $0x142] ss:$2 sm:$0xff] }
  0xba   : > { %2474 = vst.msk [vmem:[#allocation6] sm:$0xff] %vm2473_vm9, %v2378_v4  ;;  %1714 = vrot.lane.b32.xlu1 %v8617_v1, %s13632_s10  ;;  %1491 = vrot.lane.b32.xlu0 %v8586_v2, %s9689_s28  ;;  %v8714_v4 = vld [vmem:[%s9783_s23 + $0x151] ss:$2 sm:$0xff] }
  0xbc   : > { %v1484_v7 = vpop.permute.xlu1 %1483  ;;  %v811_v8 = vpop.permute.xlu0 %810 }
  0xbd   : > { %1577 = vst.msk [vmem:[#allocation6 + $0x18] sm:$0xff] %vm13626_vm5, %v1484_v7  ;;  %v8871_v7 = vld [vmem:[%s9783_s23 + $0x11a] ss:$2 sm:$0xff] }
  0xbe   : > { %903 = vst.msk [vmem:[#allocation6 + $0x20] sm:$0xff] %vm898_vm2, %v811_v8  ;;  %2610 = vrot.lane.b32.xlu1 %v8743_v5, %s13633_s21  ;;  %2387 = vrot.lane.b32.xlu0 %v8712_v6, %s9693_s13  ;;  %v8840_v8 = vld [vmem:[%s9783_s23 + $0x129] ss:$2 sm:$0xff] }
  0xc0   : > { %v2380_v11 = vpop.permute.xlu1 %2379  ;;  %v1707_v12 = vpop.permute.xlu0 %1706 }
  0xc1   : > { %2475 = vst.msk [vmem:[#allocation6 + $0x8] sm:$0xff] %vm2473_vm9, %v2380_v11  ;;  %v8525_v11 = vld [vmem:[%s9783_s23 + $0x193] ss:$2 sm:$0xff] }
  0xc2   : > { %1801 = vst.msk [vmem:[#allocation6 + $0x10] sm:$0xff] %vm1798_vm6, %v1707_v12  ;;  %3506 = vrot.lane.b32.xlu1 %v8869_v9, %s9698_s18  ;;  %3283 = vrot.lane.b32.xlu0 %v8838_v10, %s9697_s17  ;;  %v8494_v12 = vld [vmem:[%s9783_s23 + $0x1a2] ss:$2 sm:$0xff] }
  0xc4   : > { %v813_v15 = vpop.permute.xlu1 %812  ;;  %v2603_v16 = vpop.permute.xlu0 %2602 }
  0xc5   : > { %904 = vst.msk [vmem:[#allocation6 + $0x28] sm:$0xff] %vm898_vm2, %v813_v15  ;;  %v8651_v15 = vld [vmem:[%s9783_s23 + $0x16b] ss:$2 sm:$0xff] }
  0xc6   : > { %2699 = vst.msk [vmem:[#allocation6] sm:$0xff] %vm2698_vm10, %v2603_v16  ;;  %1043 = vrot.lane.b32.xlu1 %v8523_v13, %s9687_s26  ;;  %820 = vrot.lane.b32.xlu0 %v8492_v14, %s9685_s24  ;;  %v8620_v16 = vld [vmem:[%s9783_s23 + $0x17a] ss:$2 sm:$0xff] }
  0xc8   : > { %v1709_v19 = vpop.permute.xlu1 %1708  ;;  %v1036_v20 = vpop.permute.xlu0 %1035 }
  0xc9   : > { %1802 = vst.msk [vmem:[#allocation6 + $0x18] sm:$0xff] %vm1798_vm6, %v1709_v19  ;;  %v8777_v19 = vld [vmem:[%s9783_s23 + $0x143] ss:$2 sm:$0xff] }
  0xca   : > { %1128 = vst.msk [vmem:[#allocation6 + $0x20] sm:$0xff] %vm1123_vm3, %v1036_v20  ;;  %1939 = vrot.lane.b32.xlu1 %v8649_v17, %s9691_s30  ;;  %1716 = vrot.lane.b32.xlu0 %v8618_v18, %s13632_s10  ;;  %v8746_v20 = vld [vmem:[%s9783_s23 + $0x152] ss:$2 sm:$0xff] }
  0xcc   : > { %v2605_v23 = vpop.permute.xlu1 %2604  ;;  %v1932_v24 = vpop.permute.xlu0 %1931 }
  0xcd   : > { %2700 = vst.msk [vmem:[#allocation6 + $0x8] sm:$0xff] %vm2698_vm10, %v2605_v23  ;;  %v8903_v23 = vld [vmem:[%s9783_s23 + $0x11b] ss:$2 sm:$0xff] }
  0xce   : > { %2026 = vst.msk [vmem:[#allocation6 + $0x10] sm:$0xff] %vm2023_vm7, %v1932_v24  ;;  %2835 = vrot.lane.b32.xlu1 %v8775_v21, %s9695_s15  ;;  %2612 = vrot.lane.b32.xlu0 %v8744_v22, %s13633_s21  ;;  %v8872_v24 = vld [vmem:[%s9783_s23 + $0x12a] ss:$2 sm:$0xff] }
  0xd0   : > { %v1038_v27 = vpop.permute.xlu1 %1037  ;;  %v2828_v28 = vpop.permute.xlu0 %2827 }
  0xd1   : > { %1129 = vst.msk [vmem:[#allocation6 + $0x28] sm:$0xff] %vm1123_vm3, %v1038_v27  ;;  %v8557_v27 = vld [vmem:[%s9783_s23 + $0x1b8] ss:$2 sm:$0xff] }
  0xd2   : > { %2924 = vst.msk [vmem:[#allocation6] sm:$0xff] %vm2923_vm11, %v2828_v28  ;;  %3731 = vrot.lane.b32.xlu1 %v8901_v25, %s9699_s29  ;;  %3508 = vrot.lane.b32.xlu0 %v8870_v26, %s9698_s18  ;;  %v8526_v28 = vld [vmem:[%s9783_s23 + $0x1a3] ss:$2 sm:$0xff] }
  0xd4   : > { %v1934_v31 = vpop.permute.xlu1 %1933  ;;  %v1261_v32 = vpop.permute.xlu0 %1260 }
  0xd5   : > { %2027 = vst.msk [vmem:[#allocation6 + $0x18] sm:$0xff] %vm2023_vm7, %v1934_v31 }
  0xd6   : > { %1353 = vst.msk [vmem:[#allocation6 + $0x20] sm:$0xff] %vm1348_vm4, %v1261_v32  ;;  %1268 = vrot.lane.b32.xlu1 %v8555_v29, %s9688_s27  ;;  %1045 = vrot.lane.b32.xlu0 %v8524_v30, %s9687_s26  ;;  %v8431_v32 = vld [vmem:[%s9783_s23 + $0x1e0] ss:$2 sm:$0xff] }
  0xd7   : > { %461 = vst.msk [vmem:[#allocation6 + $0x60] sm:$0xff] %vm13627_vm0, %v8431_v32  ;;  %v8433_v32 = vld [vmem:[%s9783_s23 + $0x230] ss:$2 sm:$0xff] }
  0xd8   : > { %v2830_v36 = vpop.permute.xlu1 %2829  ;;  %v2157_v37 = vpop.permute.xlu0 %2156  ;;  %463 = vst.msk [vmem:[#allocation6 + $0x70] sm:$0xff] %vm13627_vm0, %v8433_v32 }
  0xd9   : > { %2925 = vst.msk [vmem:[#allocation6 + $0x8] sm:$0xff] %vm2923_vm11, %v2830_v36 }
  0xda   : > { %2251 = vst.msk [vmem:[#allocation6 + $0x10] sm:$0xff] %vm2248_vm8, %v2157_v37  ;;  %2164 = vrot.lane.b32.xlu1 %v8681_v34, %s9692_s12  ;;  %1941 = vrot.lane.b32.xlu0 %v8650_v35, %s9691_s30  ;;  %v8652_v34 = vld [vmem:[%s9783_s23 + $0x17b] ss:$2 sm:$0xff]  ;;  %v8809_v37 = vld [vmem:[%s9783_s23 + $0x168] ss:$2 sm:$0xff] }
  0xdc   : > { %v590_v40 = vpop.permute.xlu1 %589  ;;  %v3053_v41 = vpop.permute.xlu0 %3052 }
  0xdd   : > { %680 = vst.msk [vmem:[#allocation6 + $0x30] sm:$0xff] %vm13629_vm1, %v590_v40 }
  0xde   : > { %3149 = vst.msk [vmem:[#allocation6] sm:$0xff] %vm13630_vm12, %v3053_v41  ;;  %3060 = vrot.lane.b32.xlu1 %v8807_v38, %s9696_s16  ;;  %2837 = vrot.lane.b32.xlu0 %v8776_v39, %s9695_s15  ;;  %v8778_v38 = vld [vmem:[%s9783_s23 + $0x153] ss:$2 sm:$0xff] }
  0xdf   : > { %v8463_v41 = vld [vmem:[%s9783_s23 + $0x1e1] ss:$2 sm:$0xff] }
  0xe0   : > { %v1486_v44 = vpop.permute.xlu1 %1485  ;;  %v1263_v45 = vpop.permute.xlu0 %1262 }
  0xe1   : > { %1578 = vst.msk [vmem:[#allocation6 + $0x20] sm:$0xff] %vm13626_vm5, %v1486_v44 }
  0xe2   : > { %1354 = vst.msk [vmem:[#allocation6 + $0x28] sm:$0xff] %vm1348_vm4, %v1263_v45  ;;  %597 = vrot.lane.b32.xlu1 %v8461_v42, %s9686_s25  ;;  %3733 = vrot.lane.b32.xlu0 %v8902_v43, %s9699_s29  ;;  %v8904_v42 = vld [vmem:[%s9783_s23 + $0x12b] ss:$2 sm:$0xff] }
  0xe3   : > { %v8589_v45 = vld [vmem:[%s9783_s23 + $0x1b9] ss:$2 sm:$0xff] }
  0xe4   : > { %v2382_v49 = vpop.permute.xlu1 %2381  ;;  %v2159_v50 = vpop.permute.xlu0 %2158 }
  0xe5   : > { %2476 = vst.msk [vmem:[#allocation6 + $0x10] sm:$0xff] %vm2473_vm9, %v2382_v49 }
  0xe6   : > { %2252 = vst.msk [vmem:[#allocation6 + $0x18] sm:$0xff] %vm2248_vm8, %v2159_v50  ;;  %1493 = vrot.lane.b32.xlu1 %v8587_v46, %s9689_s28  ;;  %1270 = vrot.lane.b32.xlu0 %v8556_v47, %s9688_s27  ;;  %v8558_v46 = vld [vmem:[%s9783_s23 + $0x1c8] ss:$2 sm:$0xff] }
  0xe7   : > { %v8432_v47 = vld [vmem:[%s9783_s23 + $0x1f0] ss:$2 sm:$0xff] }
  0xe8   : > { %v3278_v53 = vpop.permute.xlu1 %3277  ;;  %v3055_v54 = vpop.permute.xlu0 %3054  ;;  %462 = vst.msk [vmem:[#allocation6 + $0x68] sm:$0xff] %vm13627_vm0, %v8432_v47  ;;  %v8434_v47 = vld [vmem:[%s9783_s23 + $0x240] ss:$2 sm:$0xff] }
  0xe9   : > { %3374 = vst.msk [vmem:[#allocation6] sm:$0xff] %vm3373_vm13, %v3278_v53 }
  0xea   : > { %3150 = vst.msk [vmem:[#allocation6 + $0x8] sm:$0xff] %vm13630_vm12, %v3055_v54  ;;  %2389 = vrot.lane.b32.xlu1 %v8713_v51, %s9693_s13  ;;  %2166 = vrot.lane.b32.xlu0 %v8682_v52, %s9692_s12  ;;  %v8715_v51 = vld [vmem:[%s9783_s23 + $0x191] ss:$2 sm:$0xff]  ;;  %v8684_v52 = vld [vmem:[%s9783_s23 + $0x1a0] ss:$2 sm:$0xff] }
  0xeb   : > { %464 = vst.msk [vmem:[#allocation6 + $0x78] sm:$0xff] %vm13627_vm0, %v8434_v47  ;;  %vm4324_vm0 = vcmask 123904   ;;  %v8562_v47 = vld [vmem:[%s9783_s23 + $0x268] ss:$2 sm:$0xff] }
  0xec   : > { %v815_v57 = vpop.permute.xlu1 %814  ;;  %v592_v58 = vpop.permute.xlu0 %591 }
  0xed   : > { %905 = vst.msk [vmem:[#allocation6 + $0x30] sm:$0xff] %vm898_vm2, %v815_v57 }
  0xee   : > { %681 = vst.msk [vmem:[#allocation6 + $0x38] sm:$0xff] %vm13629_vm1, %v592_v58  ;;  %3285 = vrot.lane.b32.xlu1 %v8839_v55, %s9697_s17  ;;  %3062 = vrot.lane.b32.xlu0 %v8808_v56, %s9696_s16  ;;  %v8841_v55 = vld [vmem:[%s9783_s23 + $0x169] ss:$2 sm:$0xff]  ;;  %v8810_v56 = vld [vmem:[%s9783_s23 + $0x178] ss:$2 sm:$0xff] }
  0xf0   : > { %v1711_v61 = vpop.permute.xlu1 %1710  ;;  %v1488_v62 = vpop.permute.xlu0 %1487 }
  0xf1   : > { %1803 = vst.msk [vmem:[#allocation6 + $0x20] sm:$0xff] %vm1798_vm6, %v1711_v61 }
  0xf2   : > { %1579 = vst.msk [vmem:[#allocation6 + $0x28] sm:$0xff] %vm13626_vm5, %v1488_v62  ;;  %822 = vrot.lane.b32.xlu1 %v8493_v59, %s9685_s24  ;;  %599 = vrot.lane.b32.xlu0 %v8462_v60, %s9686_s25  ;;  %v8495_v59 = vld [vmem:[%s9783_s23 + $0x1e2] ss:$2 sm:$0xff]  ;;  %v8464_v60 = vld [vmem:[%s9783_s23 + $0x1f1] ss:$2 sm:$0xff] }
  0xf4   : > { %v2607_v1 = vpop.permute.xlu1 %2606  ;;  %v2384_v2 = vpop.permute.xlu0 %2383 }
  0xf5   : > { %2701 = vst.msk [vmem:[#allocation6 + $0x10] sm:$0xff] %vm2698_vm10, %v2607_v1 }
  0xf6   : > { %2477 = vst.msk [vmem:[#allocation6 + $0x18] sm:$0xff] %vm2473_vm9, %v2384_v2  ;;  %1718 = vrot.lane.b32.xlu1 %v8619_v63, %s13632_s10  ;;  %1495 = vrot.lane.b32.xlu0 %v8588_v0, %s9689_s28  ;;  %v8621_v63 = vld [vmem:[%s9783_s23 + $0x1ba] ss:$2 sm:$0xff]  ;;  %v8590_v0 = vld [vmem:[%s9783_s23 + $0x1c9] ss:$2 sm:$0xff] }
  0xf8   : > { %v3503_v5 = vpop.permute.xlu1 %3502  ;;  %v3280_v6 = vpop.permute.xlu0 %3279 }
  0xf9   : > { %3599 = vst.msk [vmem:[#allocation6] sm:$0xff] %vm13625_vm14, %v3503_v5 }
  0xfa   : > { %3375 = vst.msk [vmem:[#allocation6 + $0x8] sm:$0xff] %vm3373_vm13, %v3280_v6  ;;  %2614 = vrot.lane.b32.xlu1 %v8745_v3, %s13633_s21  ;;  %2391 = vrot.lane.b32.xlu0 %v8714_v4, %s9693_s13  ;;  %v8747_v3 = vld [vmem:[%s9783_s23 + $0x192] ss:$2 sm:$0xff]  ;;  %v8716_v4 = vld [vmem:[%s9783_s23 + $0x1a1] ss:$2 sm:$0xff] }
  0xfc   : > { %v1040_v9 = vpop.permute.xlu1 %1039  ;;  %v817_v10 = vpop.permute.xlu0 %816 }
  0xfd   : > { %1130 = vst.msk [vmem:[#allocation6 + $0x30] sm:$0xff] %vm1123_vm3, %v1040_v9 }
  0xfe   : > { %906 = vst.msk [vmem:[#allocation6 + $0x38] sm:$0xff] %vm898_vm2, %v817_v10  ;;  %3510 = vrot.lane.b32.xlu1 %v8871_v7, %s9698_s18  ;;  %3287 = vrot.lane.b32.xlu0 %v8840_v8, %s9697_s17  ;;  %v8873_v7 = vld [vmem:[%s9783_s23 + $0x16a] ss:$2 sm:$0xff]  ;;  %v8842_v8 = vld [vmem:[%s9783_s23 + $0x179] ss:$2 sm:$0xff] }
 0x100   : > { %v1936_v13 = vpop.permute.xlu1 %1935  ;;  %v1713_v14 = vpop.permute.xlu0 %1712 }
 0x101   : > { %2028 = vst.msk [vmem:[#allocation6 + $0x20] sm:$0xff] %vm2023_vm7, %v1936_v13 }
 0x102   : > { %1804 = vst.msk [vmem:[#allocation6 + $0x28] sm:$0xff] %vm1798_vm6, %v1713_v14  ;;  %1047 = vrot.lane.b32.xlu1 %v8525_v11, %s9687_s26  ;;  %824 = vrot.lane.b32.xlu0 %v8494_v12, %s9685_s24  ;;  %v8527_v11 = vld [vmem:[%s9783_s23 + $0x1e3] ss:$2 sm:$0xff]  ;;  %v8496_v12 = vld [vmem:[%s9783_s23 + $0x1f2] ss:$2 sm:$0xff] }
 0x104   : > { %v2832_v17 = vpop.permute.xlu1 %2831  ;;  %v2609_v18 = vpop.permute.xlu0 %2608 }
 0x105   : > { %2926 = vst.msk [vmem:[#allocation6 + $0x10] sm:$0xff] %vm2923_vm11, %v2832_v17 }
 0x106   : > { %2702 = vst.msk [vmem:[#allocation6 + $0x18] sm:$0xff] %vm2698_vm10, %v2609_v18  ;;  %1943 = vrot.lane.b32.xlu1 %v8651_v15, %s9691_s30  ;;  %1720 = vrot.lane.b32.xlu0 %v8620_v16, %s13632_s10  ;;  %v8653_v15 = vld [vmem:[%s9783_s23 + $0x1bb] ss:$2 sm:$0xff]  ;;  %v8622_v16 = vld [vmem:[%s9783_s23 + $0x1ca] ss:$2 sm:$0xff] }
 0x108   : > { %v3728_v21 = vpop.permute.xlu1 %3727  ;;  %v3505_v22 = vpop.permute.xlu0 %3504 }
 0x109   : > { %3824 = vst.msk [vmem:[#allocation6] sm:$0xff] %vm3823_vm15, %v3728_v21 }
 0x10a   : > { %3600 = vst.msk [vmem:[#allocation6 + $0x8] sm:$0xff] %vm13625_vm14, %v3505_v22  ;;  %2839 = vrot.lane.b32.xlu1 %v8777_v19, %s9695_s15  ;;  %2616 = vrot.lane.b32.xlu0 %v8746_v20, %s13633_s21  ;;  %vm13631_vm14 = vcmask 523264   ;;  %v8779_v19 = vld [vmem:[%s9783_s23 + $0x193] ss:$2 sm:$0xff]  ;;  %v8748_v20 = vld [vmem:[%s9783_s23 + $0x1a2] ss:$2 sm:$0xff] }
 0x10c   : > { %v1265_v25 = vpop.permute.xlu1 %1264  ;;  %v1042_v26 = vpop.permute.xlu0 %1041 }
 0x10d   : > { %1355 = vst.msk [vmem:[#allocation6 + $0x30] sm:$0xff] %vm1348_vm4, %v1265_v25 }
 0x10e   : > { %1131 = vst.msk [vmem:[#allocation6 + $0x38] sm:$0xff] %vm1123_vm3, %v1042_v26  ;;  %3735 = vrot.lane.b32.xlu1 %v8903_v23, %s9699_s29  ;;  %3512 = vrot.lane.b32.xlu0 %v8872_v24, %s9698_s18  ;;  %v8905_v23 = vld [vmem:[%s9783_s23 + $0x16b] ss:$2 sm:$0xff]  ;;  %v8874_v24 = vld [vmem:[%s9783_s23 + $0x17a] ss:$2 sm:$0xff] }
 0x110   : > { %v2161_v29 = vpop.permute.xlu1 %2160  ;;  %v1938_v30 = vpop.permute.xlu0 %1937  ;;  %v3856_v31 = vld [vmem:[#allocation6] sm:$0xff] }
 0x111   : > { %2253 = vst.msk [vmem:[#allocation6 + $0x20] sm:$0xff] %vm2248_vm8, %v2161_v29  ;;  %9578 = vmatprep.mubr.msk.f32.mxu0 %vm13631_vm14, %v3856_v31 }
 0x112   : > { %2029 = vst.msk [vmem:[#allocation6 + $0x28] sm:$0xff] %vm2023_vm7, %v1938_v30  ;;  %1272 = vrot.lane.b32.xlu1 %v8557_v27, %s9688_s27  ;;  %1049 = vrot.lane.b32.xlu0 %v8526_v28, %s9687_s26  ;;  %v8559_v27 = vld [vmem:[%s9783_s23 + $0x208] ss:$2 sm:$0xff]  ;;  %v8528_v28 = vld [vmem:[%s9783_s23 + $0x1f3] ss:$2 sm:$0xff] }
 0x114   : > { %v3057_v35 = vpop.permute.xlu1 %3056  ;;  %v2834_v36 = vpop.permute.xlu0 %2833 }
 0x115   : > { %3151 = vst.msk [vmem:[#allocation6 + $0x10] sm:$0xff] %vm13630_vm12, %v3057_v35 }
 0x116   : > { %2927 = vst.msk [vmem:[#allocation6 + $0x18] sm:$0xff] %vm2923_vm11, %v2834_v36  ;;  %2168 = vrot.lane.b32.xlu1 %v8683_v33, %s9692_s12  ;;  %1945 = vrot.lane.b32.xlu0 %v8652_v34, %s9691_s30  ;;  %v8685_v33 = vld [vmem:[%s9783_s23 + $0x1e0] ss:$2 sm:$0xff]  ;;  %v8654_v34 = vld [vmem:[%s9783_s23 + $0x1cb] ss:$2 sm:$0xff] }
 0x118   : > { %v594_v39 = vpop.permute.xlu1 %593  ;;  %v3730_v40 = vpop.permute.xlu0 %3729 }
 0x119   : > { %682 = vst.msk [vmem:[#allocation6 + $0x40] sm:$0xff] %vm13629_vm1, %v594_v39 }
 0x11a   : > { %3825 = vst.msk [vmem:[#allocation6 + $0x8] sm:$0xff] %vm3823_vm15, %v3730_v40  ;;  %3064 = vrot.lane.b32.xlu1 %v8809_v37, %s9696_s16  ;;  %2841 = vrot.lane.b32.xlu0 %v8778_v38, %s9695_s15  ;;  %v8811_v37 = vld [vmem:[%s9783_s23 + $0x1b8] ss:$2 sm:$0xff]  ;;  %v8780_v38 = vld [vmem:[%s9783_s23 + $0x1a3] ss:$2 sm:$0xff] }
 0x11c   : > { %v1490_v43 = vpop.permute.xlu1 %1489  ;;  %v1267_v44 = vpop.permute.xlu0 %1266 }
 0x11d   : > { %1580 = vst.msk [vmem:[#allocation6 + $0x30] sm:$0xff] %vm13626_vm5, %v1490_v43 }
 0x11e   : > { %1356 = vst.msk [vmem:[#allocation6 + $0x38] sm:$0xff] %vm1348_vm4, %v1267_v44  ;;  %601 = vrot.lane.b32.xlu1 %v8463_v41, %s9686_s25  ;;  %3737 = vrot.lane.b32.xlu0 %v8904_v42, %s9699_s29  ;;  %v8465_v41 = vld [vmem:[%s9783_s23 + $0x231] ss:$2 sm:$0xff] }
 0x11f   : > { %v8906_v42 = vld [vmem:[%s9783_s23 + $0x17b] ss:$2 sm:$0xff] }
 0x120   : > { %v2386_v48 = vpop.permute.xlu1 %2385  ;;  %v2163_v49 = vpop.permute.xlu0 %2162 }
 0x121   : > { %v3857_v50 = vld [vmem:[#allocation6 + $0x8] sm:$0xff]  ;;  %2478 = vst.msk [vmem:[#allocation6 + $0x20] sm:$0xff] %vm2473_vm9, %v2386_v48 }
 0x122   : > { %2254 = vst.msk [vmem:[#allocation6 + $0x28] sm:$0xff] %vm2248_vm8, %v2163_v49  ;;  %9579 = vmatmul.mubr.msk.f32.vlgmr.msra.gmra.mxu0 %vm13631_vm14, %v3857_v50  ;;  %1497 = vrot.lane.b32.xlu1 %v8589_v45, %s9689_s28  ;;  %v8591_v45 = vld [vmem:[%s9783_s23 + $0x209] ss:$2 sm:$0xff] }
 0x123   : > { %1274 = vrot.lane.b32.xlu0 %v8558_v46, %s9688_s27  ;;  %v8560_v46 = vld [vmem:[%s9783_s23 + $0x218] ss:$2 sm:$0xff] }
 0x124   : > { %v3282_v53 = vpop.permute.xlu1 %3281  ;;  %v3059_v54 = vpop.permute.xlu0 %3058 }
 0x125   : > { %3376 = vst.msk [vmem:[#allocation6 + $0x10] sm:$0xff] %vm3373_vm13, %v3282_v53 }
 0x126   : > { %3152 = vst.msk [vmem:[#allocation6 + $0x18] sm:$0xff] %vm13630_vm12, %v3059_v54  ;;  %2393 = vrot.lane.b32.xlu1 %v8715_v51, %s9693_s13  ;;  %v8717_v51 = vld [vmem:[%s9783_s23 + $0x1e1] ss:$2 sm:$0xff] }
 0x127   : > { %2170 = vrot.lane.b32.xlu0 %v8684_v52, %s9692_s12  ;;  %v8686_v52 = vld [vmem:[%s9783_s23 + $0x1f0] ss:$2 sm:$0xff] }
 0x128   : > { %v819_v57 = vpop.permute.xlu1 %818  ;;  %v596_v58 = vpop.permute.xlu0 %595 }
 0x129   : > { %907 = vst.msk [vmem:[#allocation6 + $0x40] sm:$0xff] %vm898_vm2, %v819_v57 }
 0x12a   : > { %683 = vst.msk [vmem:[#allocation6 + $0x48] sm:$0xff] %vm13629_vm1, %v596_v58  ;;  %3289 = vrot.lane.b32.xlu1 %v8841_v55, %s9697_s17  ;;  %v8843_v55 = vld [vmem:[%s9783_s23 + $0x1b9] ss:$2 sm:$0xff] }
 0x12b   : > { %3066 = vrot.lane.b32.xlu0 %v8810_v56, %s9696_s16  ;;  %v8812_v56 = vld [vmem:[%s9783_s23 + $0x1c8] ss:$2 sm:$0xff] }
 0x12c   : > { %v1715_v61 = vpop.permute.xlu1 %1714  ;;  %v1492_v62 = vpop.permute.xlu0 %1491 }
 0x12d   : > { %1805 = vst.msk [vmem:[#allocation6 + $0x30] sm:$0xff] %vm1798_vm6, %v1715_v61  ;;  %v8466_v61 = vld [vmem:[%s9783_s23 + $0x241] ss:$2 sm:$0xff] }
 0x12e   : > { %1581 = vst.msk [vmem:[#allocation6 + $0x38] sm:$0xff] %vm13626_vm5, %v1492_v62  ;;  %826 = vrot.lane.b32.xlu1 %v8495_v59, %s9685_s24  ;;  %vm13634_vm5 = vcmask 490944   ;;  %v9700_v59 = vmov 0.0  }
 0x12f   : > { %603 = vrot.lane.b32.xlu0 %v8464_v60, %s9686_s25  ;;  %4328 = vst.msk [vmem:[#allocation2 + $0x28] sm:$0x3] %vm4324_vm0, %v9700_v59  ;;  %4325 = vst.msk [vmem:[#allocation2 + $0x10] sm:$0x3] %vm4324_vm0, %v9700_v59  ;;  %v8497_v60 = vld [vmem:[%s9783_s23 + $0x232] ss:$2 sm:$0xff] }
 0x130   : > { %v2611_v1 = vpop.permute.xlu1 %2610  ;;  %v2388_v2 = vpop.permute.xlu0 %2387  ;;  %4331 = vst.msk [vmem:[#allocation2 + $0x40] sm:$0x3] %vm4324_vm0, %v9700_v59  ;;  %4334 = vst.msk [vmem:[#allocation2 + $0x58] sm:$0x3] %vm4324_vm0, %v9700_v59 }
 0x131   : > { %2703 = vst.msk [vmem:[#allocation6 + $0x20] sm:$0xff] %vm2698_vm10, %v2611_v1  ;;  %6879 = vst [vmem:[#allocation5] sm:$0xf] %v9700_v59  ;;  %v8592_v1 = vld [vmem:[%s9783_s23 + $0x219] ss:$2 sm:$0xff] }
 0x132   : > { %2479 = vst.msk [vmem:[#allocation6 + $0x28] sm:$0xff] %vm2473_vm9, %v2388_v2  ;;  %1722 = vrot.lane.b32.xlu1 %v8621_v63, %s13632_s10  ;;  %6880 = vst [vmem:[#allocation5 + $0x4] sm:$0xf] %v9700_v59 }
 0x133   : > { %1499 = vrot.lane.b32.xlu0 %v8590_v0, %s9689_s28  ;;  %4337 = vst.msk [vmem:[#allocation2 + $0x70] sm:$0x3] %vm4324_vm0, %v9700_v59  ;;  %4340 = vst.msk [vmem:[#allocation2 + $0x88] sm:$0x3] %vm4324_vm0, %v9700_v59  ;;  %v8623_v0 = vld [vmem:[%s9783_s23 + $0x20a] ss:$2 sm:$0xff] }
 0x134   : > { %v3507_v5 = vpop.permute.xlu1 %3506  ;;  %v3284_v6 = vpop.permute.xlu0 %3283  ;;  %4343 = vst.msk [vmem:[#allocation2 + $0xa0] sm:$0x3] %vm4324_vm0, %v9700_v59  ;;  %4346 = vst.msk [vmem:[#allocation2 + $0xb8] sm:$0x3] %vm4324_vm0, %v9700_v59 }
 0x135   : > { %3601 = vst.msk [vmem:[#allocation6 + $0x10] sm:$0xff] %vm13634_vm5, %v3507_v5  ;;  %6881 = vst [vmem:[#allocation5 + $0x8] sm:$0xf] %v9700_v59  ;;  %v8718_v5 = vld [vmem:[%s9783_s23 + $0x1f1] ss:$2 sm:$0xff] }
 0x136   : > { %3377 = vst.msk [vmem:[#allocation6 + $0x18] sm:$0xff] %vm3373_vm13, %v3284_v6  ;;  %2618 = vrot.lane.b32.xlu1 %v8747_v3, %s13633_s21  ;;  %6882 = vst [vmem:[#allocation5 + $0xc] sm:$0xf] %v9700_v59 }
 0x137   : > { %2395 = vrot.lane.b32.xlu0 %v8716_v4, %s9693_s13  ;;  %4349 = vst.msk [vmem:[#allocation2 + $0xd0] sm:$0x3] %vm4324_vm0, %v9700_v59  ;;  %4352 = vst.msk [vmem:[#allocation2 + $0xe8] sm:$0x3] %vm4324_vm0, %v9700_v59  ;;  %v8749_v4 = vld [vmem:[%s9783_s23 + $0x1e2] ss:$2 sm:$0xff] }
 0x138   : > { %v1044_v9 = vpop.permute.xlu1 %1043  ;;  %v821_v10 = vpop.permute.xlu0 %820  ;;  %4355 = vst.msk [vmem:[#allocation2 + $0x100] sm:$0x3] %vm4324_vm0, %v9700_v59  ;;  %4358 = vst.msk [vmem:[#allocation2 + $0x118] sm:$0x3] %vm4324_vm0, %v9700_v59 }
 0x139   : > { %1132 = vst.msk [vmem:[#allocation6 + $0x40] sm:$0xff] %vm1123_vm3, %v1044_v9  ;;  %v8844_v9 = vld [vmem:[%s9783_s23 + $0x1c9] ss:$2 sm:$0xff] }
 0x13a   : > { %908 = vst.msk [vmem:[#allocation6 + $0x48] sm:$0xff] %vm898_vm2, %v821_v10  ;;  %3514 = vrot.lane.b32.xlu1 %v8873_v7, %s9698_s18 }
 0x13b   : > { %3291 = vrot.lane.b32.xlu0 %v8842_v8, %s9697_s17  ;;  %4361 = vst.msk [vmem:[#allocation2 + $0x130] sm:$0x3] %vm4324_vm0, %v9700_v59  ;;  %4364 = vst.msk [vmem:[#allocation2 + $0x148] sm:$0x3] %vm4324_vm0, %v9700_v59  ;;  %v8875_v8 = vld [vmem:[%s9783_s23 + $0x1ba] ss:$2 sm:$0xff] }
 0x13c   : > { %v1940_v13 = vpop.permute.xlu1 %1939  ;;  %v1717_v14 = vpop.permute.xlu0 %1716  ;;  %4367 = vst.msk [vmem:[#allocation2 + $0x160] sm:$0x3] %vm4324_vm0, %v9700_v59  ;;  %4370 = vst.msk [vmem:[#allocation2 + $0x178] sm:$0x3] %vm4324_vm0, %v9700_v59 }
 0x13d   : > { %2030 = vst.msk [vmem:[#allocation6 + $0x30] sm:$0xff] %vm2023_vm7, %v1940_v13  ;;  %v8498_v13 = vld [vmem:[%s9783_s23 + $0x242] ss:$2 sm:$0xff] }
 0x13e   : > { %1806 = vst.msk [vmem:[#allocation6 + $0x38] sm:$0xff] %vm1798_vm6, %v1717_v14  ;;  %1051 = vrot.lane.b32.xlu1 %v8527_v11, %s9687_s26 }
 0x13f   : > { %828 = vrot.lane.b32.xlu0 %v8496_v12, %s9685_s24  ;;  %4373 = vst.msk [vmem:[#allocation2 + $0x190] sm:$0x3] %vm4324_vm0, %v9700_v59  ;;  %4376 = vst.msk [vmem:[#allocation2 + $0x1a8] sm:$0x3] %vm4324_vm0, %v9700_v59  ;;  %vm13637_vm0 = vcmask 490944  }
 0x140   : > { %v2836_v17 = vpop.permute.xlu1 %2835  ;;  %v2613_v18 = vpop.permute.xlu0 %2612  ;;  %v8529_v12 = vld [vmem:[%s9783_s23 + $0x233] ss:$2 sm:$0xff] }
 0x141   : > { %2928 = vst.msk [vmem:[#allocation6 + $0x20] sm:$0xff] %vm2923_vm11, %v2836_v17  ;;  %v8624_v17 = vld [vmem:[%s9783_s23 + $0x21a] ss:$2 sm:$0xff] }
 0x142   : > { %2704 = vst.msk [vmem:[#allocation6 + $0x28] sm:$0xff] %vm2698_vm10, %v2613_v18  ;;  %1947 = vrot.lane.b32.xlu1 %v8653_v15, %s9691_s30 }
 0x143   : > { %1724 = vrot.lane.b32.xlu0 %v8622_v16, %s13632_s10  ;;  %v8655_v16 = vld [vmem:[%s9783_s23 + $0x20b] ss:$2 sm:$0xff] }
 0x144   : > { %v3732_v21 = vpop.permute.xlu1 %3731  ;;  %v3509_v22 = vpop.permute.xlu0 %3508 }
 0x145   : > { %3826 = vst.msk [vmem:[#allocation6 + $0x10] sm:$0xff] %vm3823_vm15, %v3732_v21  ;;  %v8750_v21 = vld [vmem:[%s9783_s23 + $0x1f2] ss:$2 sm:$0xff] }
 0x146   : > { %3602 = vst.msk [vmem:[#allocation6 + $0x18] sm:$0xff] %vm13634_vm5, %v3509_v22  ;;  %2843 = vrot.lane.b32.xlu1 %v8779_v19, %s9695_s15  ;;  %vm13635_vm5 = vcmask 195744  }
 0x147   : > { %2620 = vrot.lane.b32.xlu0 %v8748_v20, %s13633_s21  ;;  %v8781_v20 = vld [vmem:[%s9783_s23 + $0x1e3] ss:$2 sm:$0xff] }
 0x148   : > { %v1269_v25 = vpop.permute.xlu1 %1268  ;;  %v1046_v26 = vpop.permute.xlu0 %1045 }
 0x149   : > { %1357 = vst.msk [vmem:[#allocation6 + $0x40] sm:$0xff] %vm1348_vm4, %v1269_v25  ;;  %v8876_v25 = vld [vmem:[%s9783_s23 + $0x1ca] ss:$2 sm:$0xff] }
 0x14a   : > { %1133 = vst.msk [vmem:[#allocation6 + $0x48] sm:$0xff] %vm1123_vm3, %v1046_v26  ;;  %3739 = vrot.lane.b32.xlu1 %v8905_v23, %s9699_s29 }
 0x14b   : > { %3516 = vrot.lane.b32.xlu0 %v8874_v24, %s9698_s18  ;;  %v8907_v24 = vld [vmem:[%s9783_s23 + $0x1bb] ss:$2 sm:$0xff] }
 0x14c   : > { %v2165_v29 = vpop.permute.xlu1 %2164  ;;  %v1942_v30 = vpop.permute.xlu0 %1941  ;;  %v3858_v31 = vld [vmem:[#allocation6 + $0x10] sm:$0xff] }
 0x14d   : > { %2255 = vst.msk [vmem:[#allocation6 + $0x30] sm:$0xff] %vm2248_vm8, %v2165_v29  ;;  %9581 = vmatprep.mubr.msk.f32.mxu0 %vm13631_vm14, %v3858_v31  ;;  %v8530_v29 = vld [vmem:[%s9783_s23 + $0x243] ss:$2 sm:$0xff] }
 0x14e   : > { %2031 = vst.msk [vmem:[#allocation6 + $0x38] sm:$0xff] %vm2023_vm7, %v1942_v30  ;;  %1276 = vrot.lane.b32.xlu1 %v8559_v27, %s9688_s27 }
 0x14f   : > { %1053 = vrot.lane.b32.xlu0 %v8528_v28, %s9687_s26  ;;  %v8561_v28 = vld [vmem:[%s9783_s23 + $0x258] ss:$2 sm:$0xff] }
 0x150   : > { %v3061_v35 = vpop.permute.xlu1 %3060  ;;  %v2838_v36 = vpop.permute.xlu0 %2837 }
 0x151   : > { %3153 = vst.msk [vmem:[#allocation6 + $0x20] sm:$0xff] %vm13630_vm12, %v3061_v35  ;;  %v8656_v35 = vld [vmem:[%s9783_s23 + $0x21b] ss:$2 sm:$0xff] }
 0x152   : > { %2929 = vst.msk [vmem:[#allocation6 + $0x28] sm:$0xff] %vm2923_vm11, %v2838_v36  ;;  %2172 = vrot.lane.b32.xlu1 %v8685_v33, %s9692_s12  ;;  %v8435_v33 = vld [vmem:[%s9783_s23 + $0x280] ss:$2 sm:$0xff] }
 0x153   : > { %1949 = vrot.lane.b32.xlu0 %v8654_v34, %s9691_s30  ;;  %v8687_v34 = vld [vmem:[%s9783_s23 + $0x230] ss:$2 sm:$0xff] }
 0x154   : > { %v598_v39 = vpop.permute.xlu1 %597  ;;  %v3734_v40 = vpop.permute.xlu0 %3733 }
 0x155   : > { %684 = vst.msk [vmem:[#allocation6 + $0x50] sm:$0xff] %vm13629_vm1, %v598_v39  ;;  %v8782_v39 = vld [vmem:[%s9783_s23 + $0x1f3] ss:$2 sm:$0xff] }
 0x156   : > { %3827 = vst.msk [vmem:[#allocation6 + $0x18] sm:$0xff] %vm3823_vm15, %v3734_v40  ;;  %3068 = vrot.lane.b32.xlu1 %v8811_v37, %s9696_s16 }
 0x157   : > { %2845 = vrot.lane.b32.xlu0 %v8780_v38, %s9695_s15  ;;  %v8813_v38 = vld [vmem:[%s9783_s23 + $0x208] ss:$2 sm:$0xff] }
 0x158   : > { %v1494_v43 = vpop.permute.xlu1 %1493  ;;  %v1271_v44 = vpop.permute.xlu0 %1270 }
 0x159   : > { %1582 = vst.msk [vmem:[#allocation6 + $0x40] sm:$0xff] %vm13635_vm5, %v1494_v43  ;;  %vm13628_vm5 = vcmask 130048   ;;  %v8908_v43 = vld [vmem:[%s9783_s23 + $0x1cb] ss:$2 sm:$0xff] }
 0x15a   : > { %1358 = vst.msk [vmem:[#allocation6 + $0x48] sm:$0xff] %vm1348_vm4, %v1271_v44  ;;  %605 = vrot.lane.b32.xlu1 %v8465_v41, %s9686_s25 }
 0x15b   : > { %3741 = vrot.lane.b32.xlu0 %v8906_v42, %s9699_s29  ;;  %4327 = vst.msk [vmem:[#allocation2 + $0x20] sm:$0xff] %vm13628_vm5, %v9700_v59  ;;  %4322 = vst.msk [vmem:[#allocation2] sm:$0xff] %vm13628_vm5, %v9700_v59  ;;  %v8467_v42 = vld [vmem:[%s9783_s23 + $0x281] ss:$2 sm:$0xff] }
 0x15c   : > { %v2390_v48 = vpop.permute.xlu1 %2389  ;;  %v2167_v49 = vpop.permute.xlu0 %2166  ;;  %4323 = vst.msk [vmem:[#allocation2 + $0x8] sm:$0xff] %vm13628_vm5, %v9700_v59  ;;  %4326 = vst.msk [vmem:[#allocation2 + $0x18] sm:$0xff] %vm13628_vm5, %v9700_v59 }
 0x15d   : > { %v3859_v50 = vld [vmem:[#allocation6 + $0x18] sm:$0xff]  ;;  %2480 = vst.msk [vmem:[#allocation6 + $0x30] sm:$0xff] %vm2473_vm9, %v2390_v48  ;;  %v8436_v48 = vld [vmem:[%s9783_s23 + $0x290] ss:$2 sm:$0xff] }
 0x15e   : > { %2256 = vst.msk [vmem:[#allocation6 + $0x38] sm:$0xff] %vm2248_vm8, %v2167_v49  ;;  %9582 = vmatmul.mubr.msk.f32.gmra.mxu0 %vm13631_vm14, %v3859_v50  ;;  %1501 = vrot.lane.b32.xlu1 %v8591_v45, %s9689_s28 }
 0x15f   : > { %1278 = vrot.lane.b32.xlu0 %v8560_v46, %s9688_s27  ;;  %4329 = vst.msk [vmem:[#allocation2 + $0x30] sm:$0xff] %vm13628_vm5, %v9700_v59  ;;  %4330 = vst.msk [vmem:[#allocation2 + $0x38] sm:$0xff] %vm13628_vm5, %v9700_v59  ;;  %v8593_v46 = vld [vmem:[%s9783_s23 + $0x259] ss:$2 sm:$0xff] }
 0x160   : > { %v3286_v53 = vpop.permute.xlu1 %3285  ;;  %v3063_v54 = vpop.permute.xlu0 %3062  ;;  %4332 = vst.msk [vmem:[#allocation2 + $0x48] sm:$0xff] %vm13628_vm5, %v9700_v59  ;;  %4333 = vst.msk [vmem:[#allocation2 + $0x50] sm:$0xff] %vm13628_vm5, %v9700_v59 }
 0x161   : > { %3378 = vst.msk [vmem:[#allocation6 + $0x20] sm:$0xff] %vm3373_vm13, %v3286_v53  ;;  %v8688_v53 = vld [vmem:[%s9783_s23 + $0x240] ss:$2 sm:$0xff] }
 0x162   : > { %3154 = vst.msk [vmem:[#allocation6 + $0x28] sm:$0xff] %vm13630_vm12, %v3063_v54  ;;  %2397 = vrot.lane.b32.xlu1 %v8717_v51, %s9693_s13 }
 0x163   : > { %2174 = vrot.lane.b32.xlu0 %v8686_v52, %s9692_s12  ;;  %4335 = vst.msk [vmem:[#allocation2 + $0x60] sm:$0xff] %vm13628_vm5, %v9700_v59  ;;  %4336 = vst.msk [vmem:[#allocation2 + $0x68] sm:$0xff] %vm13628_vm5, %v9700_v59  ;;  %v8719_v52 = vld [vmem:[%s9783_s23 + $0x231] ss:$2 sm:$0xff] }
 0x164   : > { %v823_v57 = vpop.permute.xlu1 %822  ;;  %v600_v58 = vpop.permute.xlu0 %599  ;;  %4338 = vst.msk [vmem:[#allocation2 + $0x78] sm:$0xff] %vm13628_vm5, %v9700_v59  ;;  %4339 = vst.msk [vmem:[#allocation2 + $0x80] sm:$0xff] %vm13628_vm5, %v9700_v59 }
 0x165   : > { %909 = vst.msk [vmem:[#allocation6 + $0x50] sm:$0xff] %vm898_vm2, %v823_v57  ;;  %v8814_v57 = vld [vmem:[%s9783_s23 + $0x218] ss:$2 sm:$0xff] }
 0x166   : > { %685 = vst.msk [vmem:[#allocation6 + $0x58] sm:$0xff] %vm13629_vm1, %v600_v58  ;;  %3293 = vrot.lane.b32.xlu1 %v8843_v55, %s9697_s17 }
 0x167   : > { %3070 = vrot.lane.b32.xlu0 %v8812_v56, %s9696_s16  ;;  %4341 = vst.msk [vmem:[#allocation2 + $0x90] sm:$0xff] %vm13628_vm5, %v9700_v59  ;;  %4342 = vst.msk [vmem:[#allocation2 + $0x98] sm:$0xff] %vm13628_vm5, %v9700_v59  ;;  %v8845_v56 = vld [vmem:[%s9783_s23 + $0x209] ss:$2 sm:$0xff] }
 0x168   : > { %4344 = vst.msk [vmem:[#allocation2 + $0xa8] sm:$0xff] %vm13628_vm5, %v9700_v59  ;;  %4345 = vst.msk [vmem:[#allocation2 + $0xb0] sm:$0xff] %vm13628_vm5, %v9700_v59  ;;  %v1719_v62 = vpop.permute.xlu1 %1718  ;;  %v1496_v63 = vpop.permute.xlu0 %1495 }
 0x169   : > { %4347 = vst.msk [vmem:[#allocation2 + $0xc0] sm:$0xff] %vm13628_vm5, %v9700_v59  ;;  %4348 = vst.msk [vmem:[#allocation2 + $0xc8] sm:$0xff] %vm13628_vm5, %v9700_v59 }
 0x16a   : > { %4350 = vst.msk [vmem:[#allocation2 + $0xd8] sm:$0xff] %vm13628_vm5, %v9700_v59  ;;  %4351 = vst.msk [vmem:[#allocation2 + $0xe0] sm:$0xff] %vm13628_vm5, %v9700_v59  ;;  %830 = vrot.lane.b32.xlu1 %v8497_v60, %s9685_s24 }
 0x16b   : > { %4353 = vst.msk [vmem:[#allocation2 + $0xf0] sm:$0xff] %vm13628_vm5, %v9700_v59  ;;  %4354 = vst.msk [vmem:[#allocation2 + $0xf8] sm:$0xff] %vm13628_vm5, %v9700_v59  ;;  %607 = vrot.lane.b32.xlu0 %v8466_v61, %s9686_s25  ;;  %v8499_v61 = vld [vmem:[%s9783_s23 + $0x282] ss:$2 sm:$0xff] }
 0x16c   : > { %4356 = vst.msk [vmem:[#allocation2 + $0x108] sm:$0xff] %vm13628_vm5, %v9700_v59  ;;  %4357 = vst.msk [vmem:[#allocation2 + $0x110] sm:$0xff] %vm13628_vm5, %v9700_v59  ;;  %v2615_v2 = vpop.permute.xlu1 %2614  ;;  %v2392_v3 = vpop.permute.xlu0 %2391 }
 0x16d   : > { %4359 = vst.msk [vmem:[#allocation2 + $0x120] sm:$0xff] %vm13628_vm5, %v9700_v59  ;;  %4360 = vst.msk [vmem:[#allocation2 + $0x128] sm:$0xff] %vm13628_vm5, %v9700_v59 }
 0x16e   : > { %4362 = vst.msk [vmem:[#allocation2 + $0x138] sm:$0xff] %vm13628_vm5, %v9700_v59  ;;  %4363 = vst.msk [vmem:[#allocation2 + $0x140] sm:$0xff] %vm13628_vm5, %v9700_v59  ;;  %1726 = vrot.lane.b32.xlu1 %v8623_v0, %s13632_s10 }
 0x16f   : > { %4365 = vst.msk [vmem:[#allocation2 + $0x150] sm:$0xff] %vm13628_vm5, %v9700_v59  ;;  %4366 = vst.msk [vmem:[#allocation2 + $0x158] sm:$0xff] %vm13628_vm5, %v9700_v59  ;;  %1503 = vrot.lane.b32.xlu0 %v8592_v1, %s9689_s28  ;;  %v8625_v1 = vld [vmem:[%s9783_s23 + $0x25a] ss:$2 sm:$0xff] }
 0x170   : > { %4368 = vst.msk [vmem:[#allocation2 + $0x168] sm:$0xff] %vm13628_vm5, %v9700_v59  ;;  %4369 = vst.msk [vmem:[#allocation2 + $0x170] sm:$0xff] %vm13628_vm5, %v9700_v59  ;;  %v3511_v6 = vpop.permute.xlu1 %3510  ;;  %v3288_v7 = vpop.permute.xlu0 %3287 }
 0x171   : > { %4371 = vst.msk [vmem:[#allocation2 + $0x180] sm:$0xff] %vm13628_vm5, %v9700_v59  ;;  %4372 = vst.msk [vmem:[#allocation2 + $0x188] sm:$0xff] %vm13628_vm5, %v9700_v59 }
 0x172   : > { %4374 = vst.msk [vmem:[#allocation2 + $0x198] sm:$0xff] %vm13628_vm5, %v9700_v59  ;;  %4375 = vst.msk [vmem:[#allocation2 + $0x1a0] sm:$0xff] %vm13628_vm5, %v9700_v59  ;;  %vm13636_vm5 = vcmask 195744   ;;  %2622 = vrot.lane.b32.xlu1 %v8749_v4, %s13633_s21 }
 0x173   : > { %1807 = vst.msk [vmem:[#allocation6 + $0x40] sm:$0xff] %vm1798_vm6, %v1719_v62  ;;  %2399 = vrot.lane.b32.xlu0 %v8718_v5, %s9693_s13  ;;  %v8468_v62 = vld [vmem:[%s9783_s23 + $0x291] ss:$2 sm:$0xff]  ;;  %v8751_v5 = vld [vmem:[%s9783_s23 + $0x232] ss:$2 sm:$0xff] }
 0x174   : > { %1583 = vst.msk [vmem:[#allocation6 + $0x48] sm:$0xff] %vm13636_vm5, %v1496_v63  ;;  %v1048_v10 = vpop.permute.xlu1 %1047  ;;  %v825_v11 = vpop.permute.xlu0 %824  ;;  %vm13638_vm5 = vmmov %vm13637_vm0 }
 0x175   : > { %2705 = vst.msk [vmem:[#allocation6 + $0x30] sm:$0xff] %vm2698_vm10, %v2615_v2  ;;  %v8594_v2 = vld [vmem:[%s9783_s23 + $0x269] ss:$2 sm:$0xff] }
 0x176   : > { %2481 = vst.msk [vmem:[#allocation6 + $0x38] sm:$0xff] %vm2473_vm9, %v2392_v3  ;;  %3518 = vrot.lane.b32.xlu1 %v8875_v8, %s9698_s18 }
 0x177   : > { %3603 = vst.msk [vmem:[#allocation6 + $0x20] sm:$0xff] %vm13637_vm0, %v3511_v6  ;;  %3295 = vrot.lane.b32.xlu0 %v8844_v9, %s9697_s17  ;;  %vm13639_vm0 = vcmask 31744   ;;  %v8720_v6 = vld [vmem:[%s9783_s23 + $0x241] ss:$2 sm:$0xff]  ;;  %v8877_v9 = vld [vmem:[%s9783_s23 + $0x20a] ss:$2 sm:$0xff] }
 0x178   : > { %3379 = vst.msk [vmem:[#allocation6 + $0x28] sm:$0xff] %vm3373_vm13, %v3288_v7  ;;  %v1944_v14 = vpop.permute.xlu1 %1943  ;;  %v1721_v15 = vpop.permute.xlu0 %1720 }
 0x179   : > { %1134 = vst.msk [vmem:[#allocation6 + $0x50] sm:$0xff] %vm1123_vm3, %v1048_v10  ;;  %v8846_v10 = vld [vmem:[%s9783_s23 + $0x219] ss:$2 sm:$0xff] }
 0x17a   : > { %910 = vst.msk [vmem:[#allocation6 + $0x58] sm:$0xff] %vm898_vm2, %v825_v11  ;;  %1055 = vrot.lane.b32.xlu1 %v8529_v12, %s9687_s26 }
 0x17b   : > { %2032 = vst.msk [vmem:[#allocation6 + $0x40] sm:$0xff] %vm2023_vm7, %v1944_v14  ;;  %832 = vrot.lane.b32.xlu0 %v8498_v13, %s9685_s24  ;;  %v8531_v13 = vld [vmem:[%s9783_s23 + $0x283] ss:$2 sm:$0xff]  ;;  %v8500_v14 = vld [vmem:[%s9783_s23 + $0x292] ss:$2 sm:$0xff] }
 0x17c   : > { %1808 = vst.msk [vmem:[#allocation6 + $0x48] sm:$0xff] %vm1798_vm6, %v1721_v15  ;;  %v2840_v18 = vpop.permute.xlu1 %2839  ;;  %v2617_v19 = vpop.permute.xlu0 %2616 }
 0x17d   : > { %2930 = vst.msk [vmem:[#allocation6 + $0x30] sm:$0xff] %vm2923_vm11, %v2840_v18  ;;  %v8626_v18 = vld [vmem:[%s9783_s23 + $0x26a] ss:$2 sm:$0xff] }
 0x17e   : > { %2706 = vst.msk [vmem:[#allocation6 + $0x38] sm:$0xff] %vm2698_vm10, %v2617_v19  ;;  %1951 = vrot.lane.b32.xlu1 %v8655_v16, %s9691_s30 }
 0x17f   : > { %1728 = vrot.lane.b32.xlu0 %v8624_v17, %s13632_s10  ;;  %465 = vst.msk [vmem:[#allocation6 + $0x80] sm:$0xff] %vm13639_vm0, %v8435_v33  ;;  %466 = vst.msk [vmem:[#allocation6 + $0x88] sm:$0xff] %vm13639_vm0, %v8436_v48  ;;  %vm13641_vm0 = vcmask 490944   ;;  %v8657_v17 = vld [vmem:[%s9783_s23 + $0x25b] ss:$2 sm:$0xff] }
 0x180   : > { %v3736_v22 = vpop.permute.xlu1 %3735  ;;  %v3513_v23 = vpop.permute.xlu0 %3512  ;;  %v8564_v48 = vld [vmem:[%s9783_s23 + $0x2b8] ss:$2 sm:$0xff] }
 0x181   : > { %3828 = vst.msk [vmem:[#allocation6 + $0x20] sm:$0xff] %vm3823_vm15, %v3736_v22  ;;  %v8752_v22 = vld [vmem:[%s9783_s23 + $0x242] ss:$2 sm:$0xff] }
 0x182   : > { %3604 = vst.msk [vmem:[#allocation6 + $0x28] sm:$0xff] %vm13638_vm5, %v3513_v23  ;;  %2847 = vrot.lane.b32.xlu1 %v8781_v20, %s9695_s15  ;;  %vm13640_vm5 = vcmask 195744  }
 0x183   : > { %2624 = vrot.lane.b32.xlu0 %v8750_v21, %s13633_s21  ;;  %v8783_v21 = vld [vmem:[%s9783_s23 + $0x233] ss:$2 sm:$0xff] }
 0x184   : > { %v1273_v26 = vpop.permute.xlu1 %1272  ;;  %v1050_v27 = vpop.permute.xlu0 %1049 }
 0x185   : > { %1359 = vst.msk [vmem:[#allocation6 + $0x50] sm:$0xff] %vm1348_vm4, %v1273_v26  ;;  %v8878_v26 = vld [vmem:[%s9783_s23 + $0x21a] ss:$2 sm:$0xff] }
 0x186   : > { %1135 = vst.msk [vmem:[#allocation6 + $0x58] sm:$0xff] %vm1123_vm3, %v1050_v27  ;;  %3743 = vrot.lane.b32.xlu1 %v8907_v24, %s9699_s29 }
 0x187   : > { %3520 = vrot.lane.b32.xlu0 %v8876_v25, %s9698_s18  ;;  %v8909_v25 = vld [vmem:[%s9783_s23 + $0x20b] ss:$2 sm:$0xff] }
 0x188   : > { %v2169_v30 = vpop.permute.xlu1 %2168  ;;  %v1946_v31 = vpop.permute.xlu0 %1945  ;;  %v3860_v32 = vld [vmem:[#allocation6 + $0x20] sm:$0xff] }
 0x189   : > { %2257 = vst.msk [vmem:[#allocation6 + $0x40] sm:$0xff] %vm2248_vm8, %v2169_v30  ;;  %9584 = vmatprep.mubr.msk.f32.mxu0 %vm13631_vm14, %v3860_v32  ;;  %v8532_v30 = vld [vmem:[%s9783_s23 + $0x293] ss:$2 sm:$0xff] }
 0x18a   : > { %2033 = vst.msk [vmem:[#allocation6 + $0x48] sm:$0xff] %vm2023_vm7, %v1946_v31  ;;  %1280 = vrot.lane.b32.xlu1 %v8561_v28, %s9688_s27 }
 0x18b   : > { %1057 = vrot.lane.b32.xlu0 %v8530_v29, %s9687_s26  ;;  %v8563_v29 = vld [vmem:[%s9783_s23 + $0x2a8] ss:$2 sm:$0xff] }
 0x18c   : > { %v3065_v36 = vpop.permute.xlu1 %3064  ;;  %v2842_v37 = vpop.permute.xlu0 %2841 }
 0x18d   : > { %3155 = vst.msk [vmem:[#allocation6 + $0x30] sm:$0xff] %vm13630_vm12, %v3065_v36  ;;  %v8658_v36 = vld [vmem:[%s9783_s23 + $0x26b] ss:$2 sm:$0xff] }
 0x18e   : > { %2931 = vst.msk [vmem:[#allocation6 + $0x38] sm:$0xff] %vm2923_vm11, %v2842_v37  ;;  %2176 = vrot.lane.b32.xlu1 %v8687_v34, %s9692_s12  ;;  %v8437_v34 = vld [vmem:[%s9783_s23 + $0x2d0] ss:$2 sm:$0xff] }
 0x18f   : > { %1953 = vrot.lane.b32.xlu0 %v8656_v35, %s9691_s30  ;;  %v8689_v35 = vld [vmem:[%s9783_s23 + $0x280] ss:$2 sm:$0xff] }
 0x190   : > { %v602_v40 = vpop.permute.xlu1 %601  ;;  %v3738_v41 = vpop.permute.xlu0 %3737 }
 0x191   : > { %686 = vst.msk [vmem:[#allocation6 + $0x60] sm:$0xff] %vm13629_vm1, %v602_v40  ;;  %v8784_v40 = vld [vmem:[%s9783_s23 + $0x243] ss:$2 sm:$0xff] }
 0x192   : > { %3829 = vst.msk [vmem:[#allocation6 + $0x28] sm:$0xff] %vm3823_vm15, %v3738_v41  ;;  %3072 = vrot.lane.b32.xlu1 %v8813_v38, %s9696_s16 }
 0x193   : > { %2849 = vrot.lane.b32.xlu0 %v8782_v39, %s9695_s15  ;;  %v8815_v39 = vld [vmem:[%s9783_s23 + $0x258] ss:$2 sm:$0xff] }
 0x194   : > { %v1498_v44 = vpop.permute.xlu1 %1497 }
 0x195   : > { %v1275_v45 = vpop.permute.xlu0 %1274  ;;  %1584 = vst.msk [vmem:[#allocation6 + $0x50] sm:$0xff] %vm13640_vm5, %v1498_v44  ;;  %v8910_v44 = vld [vmem:[%s9783_s23 + $0x21b] ss:$2 sm:$0xff] }
 0x196   : > { %1360 = vst.msk [vmem:[#allocation6 + $0x58] sm:$0xff] %vm1348_vm4, %v1275_v45  ;;  %609 = vrot.lane.b32.xlu1 %v8467_v42, %s9686_s25 }
 0x197   : > { %3745 = vrot.lane.b32.xlu0 %v8908_v43, %s9699_s29  ;;  %v8469_v43 = vld [vmem:[%s9783_s23 + $0x2d1] ss:$2 sm:$0xff] }
 0x198   : > { %v2394_v49 = vpop.permute.xlu1 %2393 }
 0x199   : > { %v2171_v50 = vpop.permute.xlu0 %2170  ;;  %v3861_v51 = vld [vmem:[#allocation6 + $0x28] sm:$0xff]  ;;  %2482 = vst.msk [vmem:[#allocation6 + $0x40] sm:$0xff] %vm2473_vm9, %v2394_v49  ;;  %v8438_v49 = vld [vmem:[%s9783_s23 + $0x2e0] ss:$2 sm:$0xff] }
 0x19a   : > { %2258 = vst.msk [vmem:[#allocation6 + $0x48] sm:$0xff] %vm2248_vm8, %v2171_v50  ;;  %9585 = vmatmul.mubr.msk.f32.gmra.mxu0 %vm13631_vm14, %v3861_v51  ;;  %1505 = vrot.lane.b32.xlu1 %v8593_v46, %s9689_s28 }
 0x19b   : > { %1282 = vrot.lane.b32.xlu0 %v8562_v47, %s9688_s27  ;;  %v8595_v47 = vld [vmem:[%s9783_s23 + $0x2a9] ss:$2 sm:$0xff] }
 0x19c   : > { %v3290_v54 = vpop.permute.xlu1 %3289 }
 0x19d   : > { %v3067_v55 = vpop.permute.xlu0 %3066  ;;  %3380 = vst.msk [vmem:[#allocation6 + $0x30] sm:$0xff] %vm3373_vm13, %v3290_v54  ;;  %v8690_v54 = vld [vmem:[%s9783_s23 + $0x290] ss:$2 sm:$0xff] }
 0x19e   : > { %3156 = vst.msk [vmem:[#allocation6 + $0x38] sm:$0xff] %vm13630_vm12, %v3067_v55  ;;  %2401 = vrot.lane.b32.xlu1 %v8719_v52, %s9693_s13 }
 0x19f   : > { %2178 = vrot.lane.b32.xlu0 %v8688_v53, %s9692_s12  ;;  %v8721_v53 = vld [vmem:[%s9783_s23 + $0x281] ss:$2 sm:$0xff] }
 0x1a0   : > { %v827_v58 = vpop.permute.xlu1 %826 }
 0x1a1   : > { %v604_v60 = vpop.permute.xlu0 %603  ;;  %911 = vst.msk [vmem:[#allocation6 + $0x60] sm:$0xff] %vm898_vm2, %v827_v58  ;;  %v8816_v58 = vld [vmem:[%s9783_s23 + $0x268] ss:$2 sm:$0xff] }
 0x1a2   : > { %687 = vst.msk [vmem:[#allocation6 + $0x68] sm:$0xff] %vm13629_vm1, %v604_v60  ;;  %3297 = vrot.lane.b32.xlu1 %v8845_v56, %s9697_s17 }
 0x1a3   : > { %3074 = vrot.lane.b32.xlu0 %v8814_v57, %s9696_s16  ;;  %v8847_v57 = vld [vmem:[%s9783_s23 + $0x259] ss:$2 sm:$0xff] }
 0x1a4   : > { %v1723_v63 = vpop.permute.xlu1 %1722 }
 0x1a5   : > { %v1500_v0 = vpop.permute.xlu0 %1499  ;;  %1809 = vst.msk [vmem:[#allocation6 + $0x50] sm:$0xff] %vm1798_vm6, %v1723_v63  ;;  %v8501_v63 = vld [vmem:[%s9783_s23 + $0x2d2] ss:$2 sm:$0xff] }
 0x1a6   : > { %1585 = vst.msk [vmem:[#allocation6 + $0x58] sm:$0xff] %vm13640_vm5, %v1500_v0  ;;  %834 = vrot.lane.b32.xlu1 %v8499_v61, %s9685_s24  ;;  %vm13642_vm5 = vmmov %vm13641_vm0  ;;  %v8470_v0 = vld [vmem:[%s9783_s23 + $0x2e1] ss:$2 sm:$0xff] }
 0x1a7   : > { %611 = vrot.lane.b32.xlu0 %v8468_v62, %s9686_s25  ;;  %v10610_v62 = vld [vmem:[%s13611_s2] ss:$0 sm:$0xff] }
 0x1a8   : > { %v2619_v3 = vpop.permute.xlu1 %2618 }
 0x1a9   : > { %v2396_v4 = vpop.permute.xlu0 %2395  ;;  %2707 = vst.msk [vmem:[#allocation6 + $0x40] sm:$0xff] %vm2698_vm10, %v2619_v3 }
 0x1aa   : > { %2483 = vst.msk [vmem:[#allocation6 + $0x48] sm:$0xff] %vm2473_vm9, %v2396_v4  ;;  %1730 = vrot.lane.b32.xlu1 %v8625_v1, %s13632_s10 }
 0x1ab   : > { %1507 = vrot.lane.b32.xlu0 %v8594_v2, %s9689_s28 }
 0x1ac   : > { %v3515_v7 = vpop.permute.xlu1 %3514 }
 0x1ad   : > { %v3292_v8 = vpop.permute.xlu0 %3291  ;;  %3605 = vst.msk [vmem:[#allocation6 + $0x30] sm:$0xff] %vm13641_vm0, %v3515_v7  ;;  %vm13643_vm0 = vcmask 31744   ;;  %v8596_v7 = vld [vmem:[%s9783_s23 + $0x2b9] ss:$2 sm:$0xff] }
 0x1ae   : > { %3381 = vst.msk [vmem:[#allocation6 + $0x38] sm:$0xff] %vm3373_vm13, %v3292_v8  ;;  %2626 = vrot.lane.b32.xlu1 %v8751_v5, %s13633_s21 }
 0x1af   : > { %2403 = vrot.lane.b32.xlu0 %v8720_v6, %s9693_s13  ;;  %467 = vst.msk [vmem:[#allocation6 + $0x90] sm:$0xff] %vm13643_vm0, %v8437_v34  ;;  %468 = vst.msk [vmem:[#allocation6 + $0x98] sm:$0xff] %vm13643_vm0, %v8438_v49  ;;  %v8627_v6 = vld [vmem:[%s9783_s23 + $0x2aa] ss:$2 sm:$0xff] }
 0x1b0   : > { %v1052_v11 = vpop.permute.xlu1 %1051  ;;  %v8817_v49 = vld [vmem:[%s9783_s23 + $0x2a8] ss:$2 sm:$0xff] }
 0x1b1   : > { %v829_v12 = vpop.permute.xlu0 %828  ;;  %1136 = vst.msk [vmem:[#allocation6 + $0x60] sm:$0xff] %vm1123_vm3, %v1052_v11 }
 0x1b2   : > { %912 = vst.msk [vmem:[#allocation6 + $0x68] sm:$0xff] %vm898_vm2, %v829_v12  ;;  %3522 = vrot.lane.b32.xlu1 %v8877_v9, %s9698_s18 }
 0x1b3   : > { %3299 = vrot.lane.b32.xlu0 %v8846_v10, %s9697_s17 }
 0x1b4   : > { %v1948_v15 = vpop.permute.xlu1 %1947 }
 0x1b5   : > { %v1725_v16 = vpop.permute.xlu0 %1724  ;;  %2034 = vst.msk [vmem:[#allocation6 + $0x50] sm:$0xff] %vm2023_vm7, %v1948_v15  ;;  %v8722_v15 = vld [vmem:[%s9783_s23 + $0x291] ss:$2 sm:$0xff] }
 0x1b6   : > { %1810 = vst.msk [vmem:[#allocation6 + $0x58] sm:$0xff] %vm1798_vm6, %v1725_v16  ;;  %1059 = vrot.lane.b32.xlu1 %v8531_v13, %s9687_s26 }
 0x1b7   : > { %836 = vrot.lane.b32.xlu0 %v8500_v14, %s9685_s24  ;;  %v8753_v14 = vld [vmem:[%s9783_s23 + $0x282] ss:$2 sm:$0xff] }
 0x1b8   : > { %v2844_v19 = vpop.permute.xlu1 %2843 }
 0x1b9   : > { %v2621_v20 = vpop.permute.xlu0 %2620  ;;  %2932 = vst.msk [vmem:[#allocation6 + $0x40] sm:$0xff] %vm2923_vm11, %v2844_v19  ;;  %v8879_v19 = vld [vmem:[%s9783_s23 + $0x25a] ss:$2 sm:$0xff] }
 0x1ba   : > { %2708 = vst.msk [vmem:[#allocation6 + $0x48] sm:$0xff] %vm2698_vm10, %v2621_v20  ;;  %1955 = vrot.lane.b32.xlu1 %v8657_v17, %s9691_s30  ;;  %v8848_v20 = vld [vmem:[%s9783_s23 + $0x269] ss:$2 sm:$0xff] }
 0x1bb   : > { %1732 = vrot.lane.b32.xlu0 %v8626_v18, %s13632_s10 }
 0x1bc   : > { %v3740_v23 = vpop.permute.xlu1 %3739 }
 0x1bd   : > { %v3517_v24 = vpop.permute.xlu0 %3516  ;;  %3830 = vst.msk [vmem:[#allocation6 + $0x30] sm:$0xff] %vm3823_vm15, %v3740_v23  ;;  %v8533_v23 = vld [vmem:[%s9783_s23 + $0x2d3] ss:$2 sm:$0xff] }
 0x1be   : > { %3606 = vst.msk [vmem:[#allocation6 + $0x38] sm:$0xff] %vm13642_vm5, %v3517_v24  ;;  %2851 = vrot.lane.b32.xlu1 %v8783_v21, %s9695_s15  ;;  %vm13644_vm5 = vcmask 195744   ;;  %v8502_v24 = vld [vmem:[%s9783_s23 + $0x2e2] ss:$2 sm:$0xff] }
 0x1bf   : > { %2628 = vrot.lane.b32.xlu0 %v8752_v22, %s13633_s21 }
 0x1c0   : > { %v1277_v27 = vpop.permute.xlu1 %1276 }
 0x1c1   : > { %v1054_v28 = vpop.permute.xlu0 %1053  ;;  %1361 = vst.msk [vmem:[#allocation6 + $0x60] sm:$0xff] %vm1348_vm4, %v1277_v27  ;;  %v8659_v27 = vld [vmem:[%s9783_s23 + $0x2ab] ss:$2 sm:$0xff] }
 0x1c2   : > { %1137 = vst.msk [vmem:[#allocation6 + $0x68] sm:$0xff] %vm1123_vm3, %v1054_v28  ;;  %3747 = vrot.lane.b32.xlu1 %v8909_v25, %s9699_s29  ;;  %v8628_v28 = vld [vmem:[%s9783_s23 + $0x2ba] ss:$2 sm:$0xff] }
 0x1c3   : > { %3524 = vrot.lane.b32.xlu0 %v8878_v26, %s9698_s18 }
 0x1c4   : > { %v2173_v31 = vpop.permute.xlu1 %2172  ;;  %v3862_v33 = vld [vmem:[#allocation6 + $0x30] sm:$0xff] }
 0x1c5   : > { %v1950_v32 = vpop.permute.xlu0 %1949  ;;  %2259 = vst.msk [vmem:[#allocation6 + $0x50] sm:$0xff] %vm2248_vm8, %v2173_v31  ;;  %9587 = vmatprep.mubr.msk.f32.mxu0 %vm13631_vm14, %v3862_v33  ;;  %v8785_v31 = vld [vmem:[%s9783_s23 + $0x283] ss:$2 sm:$0xff] }
 0x1c6   : > { %2035 = vst.msk [vmem:[#allocation6 + $0x58] sm:$0xff] %vm2023_vm7, %v1950_v32  ;;  %1284 = vrot.lane.b32.xlu1 %v8563_v29, %s9688_s27  ;;  %v8754_v32 = vld [vmem:[%s9783_s23 + $0x292] ss:$2 sm:$0xff] }
 0x1c7   : > { %1061 = vrot.lane.b32.xlu0 %v8532_v30, %s9687_s26 }
 0x1c8   : > { %v3069_v37 = vpop.permute.xlu1 %3068 }
 0x1c9   : > { %v2846_v38 = vpop.permute.xlu0 %2845  ;;  %3157 = vst.msk [vmem:[#allocation6 + $0x40] sm:$0xff] %vm13630_vm12, %v3069_v37 }
 0x1ca   : > { %2933 = vst.msk [vmem:[#allocation6 + $0x48] sm:$0xff] %vm2923_vm11, %v2846_v38  ;;  %2180 = vrot.lane.b32.xlu1 %v8689_v35, %s9692_s12  ;;  %v8911_v35 = vld [vmem:[%s9783_s23 + $0x25b] ss:$2 sm:$0xff] }
 0x1cb   : > { %1957 = vrot.lane.b32.xlu0 %v8658_v36, %s9691_s30  ;;  %v8880_v36 = vld [vmem:[%s9783_s23 + $0x26a] ss:$2 sm:$0xff] }
 0x1cc   : > { %v606_v41 = vpop.permute.xlu1 %605 }
 0x1cd   : > { %v3742_v42 = vpop.permute.xlu0 %3741  ;;  %688 = vst.msk [vmem:[#allocation6 + $0x70] sm:$0xff] %vm13629_vm1, %v606_v41 }
 0x1ce   : > { %3831 = vst.msk [vmem:[#allocation6 + $0x38] sm:$0xff] %vm3823_vm15, %v3742_v42  ;;  %3076 = vrot.lane.b32.xlu1 %v8815_v39, %s9696_s16  ;;  %v8565_v39 = vld [vmem:[%s9783_s23 + $0x2f8] ss:$2 sm:$0xff] }
 0x1cf   : > { %2853 = vrot.lane.b32.xlu0 %v8784_v40, %s9695_s15  ;;  %v8534_v40 = vld [vmem:[%s9783_s23 + $0x2e3] ss:$2 sm:$0xff] }
 0x1d0   : > { %v1502_v45 = vpop.permute.xlu1 %1501 }
 0x1d1   : > { %v1279_v46 = vpop.permute.xlu0 %1278  ;;  %1586 = vst.msk [vmem:[#allocation6 + $0x60] sm:$0xff] %vm13644_vm5, %v1502_v45  ;;  %v8691_v45 = vld [vmem:[%s9783_s23 + $0x2d0] ss:$2 sm:$0xff] }
 0x1d2   : > { %1362 = vst.msk [vmem:[#allocation6 + $0x68] sm:$0xff] %vm1348_vm4, %v1279_v46  ;;  %613 = vrot.lane.b32.xlu1 %v8469_v43, %s9686_s25  ;;  %v8660_v46 = vld [vmem:[%s9783_s23 + $0x2bb] ss:$2 sm:$0xff] }
 0x1d3   : > { %3749 = vrot.lane.b32.xlu0 %v8910_v44, %s9699_s29  ;;  %v8439_v44 = vld [vmem:[%s9783_s23 + $0x320] ss:$2 sm:$0xff] }
 0x1d4   : > { %v2398_v50 = vpop.permute.xlu1 %2397 }
 0x1d5   : > { %v2175_v51 = vpop.permute.xlu0 %2174  ;;  %v3863_v52 = vld [vmem:[#allocation6 + $0x38] sm:$0xff]  ;;  %2484 = vst.msk [vmem:[#allocation6 + $0x50] sm:$0xff] %vm2473_vm9, %v2398_v50  ;;  %v8786_v50 = vld [vmem:[%s9783_s23 + $0x293] ss:$2 sm:$0xff] }
 0x1d6   : > { %2260 = vst.msk [vmem:[#allocation6 + $0x58] sm:$0xff] %vm2248_vm8, %v2175_v51  ;;  %9588 = vmatmul.mubr.msk.f32.gmra.mxu0 %vm13631_vm14, %v3863_v52  ;;  %1509 = vrot.lane.b32.xlu1 %v8595_v47, %s9689_s28 }
 0x1d7   : > { %1286 = vrot.lane.b32.xlu0 %v8564_v48, %s9688_s27 }
 0x1d8   : > { %v3294_v55 = vpop.permute.xlu1 %3293 }
 0x1d9   : > { %v3071_v56 = vpop.permute.xlu0 %3070  ;;  %3382 = vst.msk [vmem:[#allocation6 + $0x40] sm:$0xff] %vm3373_vm13, %v3294_v55 }
 0x1da   : > { %3158 = vst.msk [vmem:[#allocation6 + $0x48] sm:$0xff] %vm13630_vm12, %v3071_v56  ;;  %2405 = vrot.lane.b32.xlu1 %v8721_v53, %s9693_s13  ;;  %v8471_v53 = vld [vmem:[%s9783_s23 + $0x321] ss:$2 sm:$0xff] }
 0x1db   : > { %2182 = vrot.lane.b32.xlu0 %v8690_v54, %s9692_s12  ;;  %v8912_v54 = vld [vmem:[%s9783_s23 + $0x26b] ss:$2 sm:$0xff] }
 0x1dc   : > { %v831_v60 = vpop.permute.xlu1 %830 }
 0x1dd   : > { %v608_v61 = vpop.permute.xlu0 %607  ;;  %913 = vst.msk [vmem:[#allocation6 + $0x70] sm:$0xff] %vm898_vm2, %v831_v60  ;;  %v8440_v60 = vld [vmem:[%s9783_s23 + $0x330] ss:$2 sm:$0xff] }
 0x1de   : > { %689 = vst.msk [vmem:[#allocation6 + $0x78] sm:$0xff] %vm13629_vm1, %v608_v61  ;;  %3301 = vrot.lane.b32.xlu1 %v8847_v57, %s9697_s17  ;;  %vm13645_vm1 = vcmask 130048   ;;  %v8597_v57 = vld [vmem:[%s9783_s23 + $0x2f9] ss:$2 sm:$0xff] }
 0x1df   : > { %3078 = vrot.lane.b32.xlu0 %v8816_v58, %s9696_s16  ;;  %vm13646_vm12 = vmmov %vm13645_vm1  ;;  %v8566_v58 = vld [vmem:[%s9783_s23 + $0x308] ss:$2 sm:$0xff] }
 0x1e0   : > { %v1727_v1 = vpop.permute.xlu1 %1726 }
 0x1e1   : > { %v1504_v2 = vpop.permute.xlu0 %1503  ;;  %1811 = vst.msk [vmem:[#allocation6 + $0x60] sm:$0xff] %vm1798_vm6, %v1727_v1  ;;  %v8723_v1 = vld [vmem:[%s9783_s23 + $0x2d1] ss:$2 sm:$0xff] }
 0x1e2   : > { %1587 = vst.msk [vmem:[#allocation6 + $0x68] sm:$0xff] %vm13644_vm5, %v1504_v2  ;;  %v9580_v3 = vpop.f32.mrf.mxu0  ;;  %838 = vrot.lane.b32.xlu1 %v8501_v63, %s9685_s24  ;;  %v8692_v2 = vld [vmem:[%s9783_s23 + $0x2e0] ss:$2 sm:$0xff] }
 0x1e3   : > { %v4072_v4 = vadd.f32 %v9580_v3, %v10610_v62  ;;  %615 = vrot.lane.b32.xlu0 %v8470_v0, %s9686_s25 }
 0x1e4   : > { %v4066_v5 = vpop.f32.mrf.mxu0  ;;  %v2623_v10 = vpop.permute.xlu1 %2622 }
 0x1e5   : > { %vm4226_vm0 = vcmp.ge.f32.partialorder %v4072_v4, 0.0  ;;  %v4258_v8 = vmul.f32 0.2, %v4072_v4  ;;  %v4067_v9 = vadd.f32 %v10610_v62, %v4066_v5  ;;  %v2400_v11 = vpop.permute.xlu0 %2399  ;;  %2709 = vst.msk [vmem:[#allocation6 + $0x50] sm:$0xff] %vm2698_vm10, %v2623_v10  ;;  %v8849_v5 = vld [vmem:[%s9783_s23 + $0x2a9] ss:$2 sm:$0xff] }
 0x1e6   : > { %2485 = vst.msk [vmem:[#allocation6 + $0x58] sm:$0xff] %vm2473_vm9, %v2400_v11  ;;  %1734 = vrot.lane.b32.xlu1 %v8627_v6, %s13632_s10  ;;  %v8818_v6 = vld [vmem:[%s9783_s23 + $0x2b8] ss:$2 sm:$0xff]  ;;  %v8472_v10 = vld [vmem:[%s9783_s23 + $0x331] ss:$2 sm:$0xff] }
 0x1e7   : > { %v4290_v12 = vsel %vm4226_vm0, %v4072_v4, %v4258_v8  ;;  %vm4225_vm5 = vcmp.ge.f32.partialorder %v4067_v9, 0.0  ;;  %v4257_v13 = vmul.f32 0.2, %v4067_v9  ;;  %1511 = vrot.lane.b32.xlu0 %v8596_v7, %s9689_s28  ;;  %vm13647_vm0 = vcmask 490944  }
 0x1e8   : > { %4379 = vst.msk [vmem:[#allocation2 + $0x21] sm:$0xff] %vm13645_vm1, %v4290_v12  ;;  %v3519_v17 = vpop.permute.xlu1 %3518  ;;  %vm13648_vm1 = vmmov %vm13647_vm0 }
 0x1e9   : > { %v4289_v16 = vsel %vm4225_vm5, %v4067_v9, %v4257_v13  ;;  %v3296_v18 = vpop.permute.xlu0 %3295  ;;  %3607 = vst.msk [vmem:[#allocation6 + $0x40] sm:$0xff] %vm13647_vm0, %v3519_v17  ;;  %vm13650_vm5 = vcmask 425344   ;;  %vm13651_vm0 = vcmask 64544   ;;  %v8503_v9 = vld [vmem:[%s9783_s23 + $0x322] ss:$2 sm:$0xff] }
 0x1ea   : > { %4378 = vst.msk [vmem:[#allocation2 + $0x19] sm:$0xff] %vm13646_vm12, %v4289_v16  ;;  %2630 = vrot.lane.b32.xlu1 %v8753_v14, %s13633_s21  ;;  %vm13649_vm12 = vcmask 31744   ;;  %v8629_v16 = vld [vmem:[%s9783_s23 + $0x2fa] ss:$2 sm:$0xff]  ;;  %v8598_v17 = vld [vmem:[%s9783_s23 + $0x309] ss:$2 sm:$0xff] }
 0x1eb   : > { %3383 = vst.msk [vmem:[#allocation6 + $0x48] sm:$0xff] %vm3373_vm13, %v3296_v18  ;;  %2407 = vrot.lane.b32.xlu0 %v8722_v15, %s9693_s13 }
 0x1ec   : > { %v1056_v21 = vpop.permute.xlu1 %1055  ;;  %469 = vst.msk [vmem:[#allocation6 + $0xa0] sm:$0xff] %vm13649_vm12, %v8439_v44  ;;  %470 = vst.msk [vmem:[#allocation6 + $0xa8] sm:$0xff] %vm13649_vm12, %v8440_v60  ;;  %v8756_v44 = vld [vmem:[%s9783_s23 + $0x2e2] ss:$2 sm:$0xff] }
 0x1ed   : > { %v833_v22 = vpop.permute.xlu0 %832  ;;  %1138 = vst.msk [vmem:[#allocation6 + $0x70] sm:$0xff] %vm1123_vm3, %v1056_v21 }
 0x1ee   : > { %914 = vst.msk [vmem:[#allocation6 + $0x78] sm:$0xff] %vm898_vm2, %v833_v22  ;;  %3526 = vrot.lane.b32.xlu1 %v8879_v19, %s9698_s18 }
 0x1ef   : > { %3303 = vrot.lane.b32.xlu0 %v8848_v20, %s9697_s17 }
 0x1f0   : > { %v1952_v25 = vpop.permute.xlu1 %1951 }
 0x1f1   : > { %v1729_v26 = vpop.permute.xlu0 %1728  ;;  %2036 = vst.msk [vmem:[#allocation6 + $0x60] sm:$0xff] %vm2023_vm7, %v1952_v25  ;;  %v8724_v25 = vld [vmem:[%s9783_s23 + $0x2e1] ss:$2 sm:$0xff] }
 0x1f2   : > { %1812 = vst.msk [vmem:[#allocation6 + $0x68] sm:$0xff] %vm1798_vm6, %v1729_v26  ;;  %1063 = vrot.lane.b32.xlu1 %v8533_v23, %s9687_s26 }
 0x1f3   : > { %840 = vrot.lane.b32.xlu0 %v8502_v24, %s9685_s24  ;;  %v8755_v24 = vld [vmem:[%s9783_s23 + $0x2d2] ss:$2 sm:$0xff] }
 0x1f4   : > { %v2848_v29 = vpop.permute.xlu1 %2847 }
 0x1f5   : > { %v2625_v30 = vpop.permute.xlu0 %2624  ;;  %2934 = vst.msk [vmem:[#allocation6 + $0x50] sm:$0xff] %vm2923_vm11, %v2848_v29  ;;  %v8881_v29 = vld [vmem:[%s9783_s23 + $0x2aa] ss:$2 sm:$0xff] }
 0x1f6   : > { %2710 = vst.msk [vmem:[#allocation6 + $0x58] sm:$0xff] %vm2698_vm10, %v2625_v30  ;;  %1959 = vrot.lane.b32.xlu1 %v8659_v27, %s9691_s30  ;;  %v8850_v30 = vld [vmem:[%s9783_s23 + $0x2b9] ss:$2 sm:$0xff] }
 0x1f7   : > { %1736 = vrot.lane.b32.xlu0 %v8628_v28, %s13632_s10 }
 0x1f8   : > { %v3744_v33 = vpop.permute.xlu1 %3743 }
 0x1f9   : > { %v3521_v34 = vpop.permute.xlu0 %3520  ;;  %3832 = vst.msk [vmem:[#allocation6 + $0x40] sm:$0xff] %vm3823_vm15, %v3744_v33  ;;  %v8535_v33 = vld [vmem:[%s9783_s23 + $0x323] ss:$2 sm:$0xff] }
 0x1fa   : > { %3608 = vst.msk [vmem:[#allocation6 + $0x48] sm:$0xff] %vm13648_vm1, %v3521_v34  ;;  %2855 = vrot.lane.b32.xlu1 %v8785_v31, %s9695_s15  ;;  %vm13652_vm1 = vcmask 195744   ;;  %v8504_v34 = vld [vmem:[%s9783_s23 + $0x332] ss:$2 sm:$0xff] }
 0x1fb   : > { %2632 = vrot.lane.b32.xlu0 %v8754_v32, %s13633_s21 }
 0x1fc   : > { %v1281_v37 = vpop.permute.xlu1 %1280 }
 0x1fd   : > { %v1058_v38 = vpop.permute.xlu0 %1057  ;;  %1363 = vst.msk [vmem:[#allocation6 + $0x70] sm:$0xff] %vm1348_vm4, %v1281_v37 }
 0x1fe   : > { %1139 = vst.msk [vmem:[#allocation6 + $0x78] sm:$0xff] %vm1123_vm3, %v1058_v38  ;;  %3751 = vrot.lane.b32.xlu1 %v8911_v35, %s9699_s29  ;;  %v8661_v38 = vld [vmem:[%s9783_s23 + $0x2fb] ss:$2 sm:$0xff] }
 0x1ff   : > { %3528 = vrot.lane.b32.xlu0 %v8880_v36, %s9698_s18 }
 0x200   : > { %v2177_v41 = vpop.permute.xlu1 %2176  ;;  %v3864_v43 = vld [vmem:[#allocation6 + $0x40] sm:$0xff] }
 0x201   : > { %v1954_v42 = vpop.permute.xlu0 %1953  ;;  %2261 = vst.msk [vmem:[#allocation6 + $0x60] sm:$0xff] %vm2248_vm8, %v2177_v41  ;;  %9590 = vmatprep.mubr.msk.f32.mxu0 %vm13631_vm14, %v3864_v43  ;;  %v8787_v43 = vld [vmem:[%s9783_s23 + $0x2d3] ss:$2 sm:$0xff] }
 0x202   : > { %2037 = vst.msk [vmem:[#allocation6 + $0x68] sm:$0xff] %vm2023_vm7, %v1954_v42  ;;  %1288 = vrot.lane.b32.xlu1 %v8565_v39, %s9688_s27  ;;  %v8630_v39 = vld [vmem:[%s9783_s23 + $0x30a] ss:$2 sm:$0xff] }
 0x203   : > { %1065 = vrot.lane.b32.xlu0 %v8534_v40, %s9687_s26 }
 0x204   : > { %v3073_v47 = vpop.permute.xlu1 %3072 }
 0x205   : > { %v2850_v48 = vpop.permute.xlu0 %2849  ;;  %3159 = vst.msk [vmem:[#allocation6 + $0x50] sm:$0xff] %vm13650_vm5, %v3073_v47  ;;  %v8913_v47 = vld [vmem:[%s9783_s23 + $0x2ab] ss:$2 sm:$0xff] }
 0x206   : > { %2935 = vst.msk [vmem:[#allocation6 + $0x58] sm:$0xff] %vm2923_vm11, %v2850_v48  ;;  %2184 = vrot.lane.b32.xlu1 %v8691_v45, %s9692_s12  ;;  %v8882_v48 = vld [vmem:[%s9783_s23 + $0x2ba] ss:$2 sm:$0xff] }
 0x207   : > { %1961 = vrot.lane.b32.xlu0 %v8660_v46, %s9691_s30 }
 0x208   : > { %v610_v51 = vpop.permute.xlu1 %609 }
 0x209   : > { %v3746_v52 = vpop.permute.xlu0 %3745  ;;  %690 = vst.msk [vmem:[#allocation6 + $0x80] sm:$0xff] %vm13651_vm0, %v610_v51  ;;  %v8567_v51 = vld [vmem:[%s9783_s23 + $0x348] ss:$2 sm:$0xff] }
 0x20a   : > { %3833 = vst.msk [vmem:[#allocation6 + $0x48] sm:$0xff] %vm3823_vm15, %v3746_v52  ;;  %3080 = vrot.lane.b32.xlu1 %v8817_v49, %s9696_s16  ;;  %v8536_v52 = vld [vmem:[%s9783_s23 + $0x333] ss:$2 sm:$0xff] }
 0x20b   : > { %2857 = vrot.lane.b32.xlu0 %v8786_v50, %s9695_s15 }
 0x20c   : > { %v1506_v55 = vpop.permute.xlu1 %1505 }
 0x20d   : > { %v1283_v56 = vpop.permute.xlu0 %1282  ;;  %1588 = vst.msk [vmem:[#allocation6 + $0x70] sm:$0xff] %vm13652_vm1, %v1506_v55 }
 0x20e   : > { %1364 = vst.msk [vmem:[#allocation6 + $0x78] sm:$0xff] %vm1348_vm4, %v1283_v56  ;;  %617 = vrot.lane.b32.xlu1 %v8471_v53, %s9686_s25  ;;  %v8441_v56 = vld [vmem:[%s9783_s23 + $0x370] ss:$2 sm:$0xff] }
 0x20f   : > { %3753 = vrot.lane.b32.xlu0 %v8912_v54, %s9699_s29 }
 0x210   : > { %v2402_v61 = vpop.permute.xlu1 %2401 }
 0x211   : > { %v2179_v63 = vpop.permute.xlu0 %2178  ;;  %v3865_v0 = vld [vmem:[#allocation6 + $0x48] sm:$0xff]  ;;  %2486 = vst.msk [vmem:[#allocation6 + $0x60] sm:$0xff] %vm2473_vm9, %v2402_v61 }
 0x212   : > { %2262 = vst.msk [vmem:[#allocation6 + $0x68] sm:$0xff] %vm2248_vm8, %v2179_v63  ;;  %9591 = vmatmul.mubr.msk.f32.gmra.mxu0 %vm13631_vm14, %v3865_v0  ;;  %1513 = vrot.lane.b32.xlu1 %v8597_v57, %s9689_s28  ;;  %v8693_v57 = vld [vmem:[%s9783_s23 + $0x320] ss:$2 sm:$0xff]  ;;  %v8788_v0 = vld [vmem:[%s9783_s23 + $0x2e3] ss:$2 sm:$0xff] }
 0x213   : > { %1290 = vrot.lane.b32.xlu0 %v8566_v58, %s9688_s27  ;;  %v8662_v58 = vld [vmem:[%s9783_s23 + $0x30b] ss:$2 sm:$0xff]  ;;  %v8819_v63 = vld [vmem:[%s9783_s23 + $0x2f8] ss:$2 sm:$0xff] }
 0x214   : > { %v3298_v3 = vpop.permute.xlu1 %3297 }
 0x215   : > { %v3075_v4 = vpop.permute.xlu0 %3074  ;;  %3384 = vst.msk [vmem:[#allocation6 + $0x50] sm:$0xff] %vm3373_vm13, %v3298_v3  ;;  %v8473_v3 = vld [vmem:[%s9783_s23 + $0x371] ss:$2 sm:$0xff] }
 0x216   : > { %3160 = vst.msk [vmem:[#allocation6 + $0x58] sm:$0xff] %vm13650_vm5, %v3075_v4  ;;  %2409 = vrot.lane.b32.xlu1 %v8723_v1, %s9693_s13  ;;  %v8914_v4 = vld [vmem:[%s9783_s23 + $0x2bb] ss:$2 sm:$0xff] }
 0x217   : > { %2186 = vrot.lane.b32.xlu0 %v8692_v2, %s9692_s12 }
 0x218   : > { %v835_v7 = vpop.permute.xlu1 %834 }
 0x219   : > { %v612_v8 = vpop.permute.xlu0 %611  ;;  %915 = vst.msk [vmem:[#allocation6 + $0x80] sm:$0xff] %vm898_vm2, %v835_v7  ;;  %v8599_v7 = vld [vmem:[%s9783_s23 + $0x349] ss:$2 sm:$0xff] }
 0x21a   : > { %691 = vst.msk [vmem:[#allocation6 + $0x88] sm:$0xff] %vm13651_vm0, %v612_v8  ;;  %3305 = vrot.lane.b32.xlu1 %v8849_v5, %s9697_s17  ;;  %vm13653_vm0 = vcmask 130048   ;;  %v8568_v8 = vld [vmem:[%s9783_s23 + $0x358] ss:$2 sm:$0xff] }
 0x21b   : > { %3082 = vrot.lane.b32.xlu0 %v8818_v6, %s9696_s16 }
 0x21c   : > { %v1731_v11 = vpop.permute.xlu1 %1730 }
 0x21d   : > { %v1508_v12 = vpop.permute.xlu0 %1507  ;;  %1813 = vst.msk [vmem:[#allocation6 + $0x70] sm:$0xff] %vm1798_vm6, %v1731_v11 }
 0x21e   : > { %1589 = vst.msk [vmem:[#allocation6 + $0x78] sm:$0xff] %vm13652_vm1, %v1508_v12  ;;  %v9583_v13 = vpop.f32.mrf.mxu0  ;;  %842 = vrot.lane.b32.xlu1 %v8503_v9, %s9685_s24  ;;  %vm13654_vm1 = vmmov %vm13653_vm0  ;;  %v8442_v9 = vld [vmem:[%s9783_s23 + $0x380] ss:$2 sm:$0xff] }
 0x21f   : > { %v4082_v14 = vadd.f32 %v9583_v13, %v10610_v62  ;;  %619 = vrot.lane.b32.xlu0 %v8472_v10, %s9686_s25  ;;  %v8725_v13 = vld [vmem:[%s9783_s23 + $0x321] ss:$2 sm:$0xff] }
 0x220   : > { %v4076_v15 = vpop.f32.mrf.mxu0  ;;  %v2627_v20 = vpop.permute.xlu1 %2626 }
 0x221   : > { %vm4228_vm12 = vcmp.ge.f32.partialorder %v4082_v14, 0.0  ;;  %v4260_v18 = vmul.f32 0.2, %v4082_v14  ;;  %v4077_v19 = vadd.f32 %v10610_v62, %v4076_v15  ;;  %v2404_v21 = vpop.permute.xlu0 %2403  ;;  %2711 = vst.msk [vmem:[#allocation6 + $0x60] sm:$0xff] %vm2698_vm10, %v2627_v20 }
 0x222   : > { %2487 = vst.msk [vmem:[#allocation6 + $0x68] sm:$0xff] %vm2473_vm9, %v2404_v21  ;;  %1738 = vrot.lane.b32.xlu1 %v8629_v16, %s13632_s10  ;;  %v8505_v21 = vld [vmem:[%s9783_s23 + $0x372] ss:$2 sm:$0xff] }
 0x223   : > { %v4292_v22 = vsel %vm4228_vm12, %v4082_v14, %v4260_v18  ;;  %vm4227_vm5 = vcmp.ge.f32.partialorder %v4077_v19, 0.0  ;;  %v4259_v23 = vmul.f32 0.2, %v4077_v19  ;;  %1515 = vrot.lane.b32.xlu0 %v8598_v17, %s9689_s28  ;;  %vm13655_vm12 = vcmask 490944   ;;  %v8694_v14 = vld [vmem:[%s9783_s23 + $0x330] ss:$2 sm:$0xff] }
 0x224   : > { %4381 = vst.msk [vmem:[#allocation2 + $0x39] sm:$0xff] %vm13653_vm0, %v4292_v22  ;;  %v3523_v27 = vpop.permute.xlu1 %3522  ;;  %v8851_v17 = vld [vmem:[%s9783_s23 + $0x2f9] ss:$2 sm:$0xff]  ;;  %v8820_v18 = vld [vmem:[%s9783_s23 + $0x308] ss:$2 sm:$0xff] }
 0x225   : > { %v4291_v26 = vsel %vm4227_vm5, %v4077_v19, %v4259_v23  ;;  %v3300_v28 = vpop.permute.xlu0 %3299  ;;  %3609 = vst.msk [vmem:[#allocation6 + $0x50] sm:$0xff] %vm13655_vm12, %v3523_v27  ;;  %vm13656_vm5 = vmmov %vm13653_vm0  ;;  %v8474_v22 = vld [vmem:[%s9783_s23 + $0x381] ss:$2 sm:$0xff] }
 0x226   : > { %4380 = vst.msk [vmem:[#allocation2 + $0x31] sm:$0xff] %vm13654_vm1, %v4291_v26  ;;  %2634 = vrot.lane.b32.xlu1 %v8755_v24, %s13633_s21  ;;  %vm13657_vm1 = vmmov %vm13655_vm12  ;;  %vm13658_vm12 = vcmask 31744  }
 0x227   : > { %3385 = vst.msk [vmem:[#allocation6 + $0x58] sm:$0xff] %vm3373_vm13, %v3300_v28  ;;  %2411 = vrot.lane.b32.xlu0 %v8724_v25, %s9693_s13  ;;  %v8631_v28 = vld [vmem:[%s9783_s23 + $0x34a] ss:$2 sm:$0xff] }
 0x228   : > { %v1060_v31 = vpop.permute.xlu1 %1059  ;;  %471 = vst.msk [vmem:[#allocation6 + $0xb0] sm:$0xff] %vm13658_vm12, %v8441_v56  ;;  %472 = vst.msk [vmem:[#allocation6 + $0xb8] sm:$0xff] %vm13658_vm12, %v8442_v9  ;;  %v8821_v9 = vld [vmem:[%s9783_s23 + $0x348] ss:$2 sm:$0xff] }
 0x229   : > { %v837_v32 = vpop.permute.xlu0 %836  ;;  %1140 = vst.msk [vmem:[#allocation6 + $0x80] sm:$0xff] %vm1123_vm3, %v1060_v31 }
 0x22a   : > { %916 = vst.msk [vmem:[#allocation6 + $0x88] sm:$0xff] %vm898_vm2, %v837_v32  ;;  %3530 = vrot.lane.b32.xlu1 %v8881_v29, %s9698_s18  ;;  %v8600_v29 = vld [vmem:[%s9783_s23 + $0x359] ss:$2 sm:$0xff] }
 0x22b   : > { %3307 = vrot.lane.b32.xlu0 %v8850_v30, %s9697_s17 }
 0x22c   : > { %v1956_v35 = vpop.permute.xlu1 %1955 }
 0x22d   : > { %v1733_v36 = vpop.permute.xlu0 %1732  ;;  %2038 = vst.msk [vmem:[#allocation6 + $0x70] sm:$0xff] %vm2023_vm7, %v1956_v35  ;;  %v4832_v37 = vld [vmem:[#allocation2 + $0x30] ss:$2 sm:$0xff] }
 0x22e   : > { %1814 = vst.msk [vmem:[#allocation6 + $0x78] sm:$0xff] %vm1798_vm6, %v1733_v36  ;;  %1067 = vrot.lane.b32.xlu1 %v8535_v33, %s9687_s26  ;;  %v4412_v40 = vld [vmem:[#allocation2 + $0x30] ss:$2 sm:$0xff] }
 0x22f   : > { %844 = vrot.lane.b32.xlu0 %v8504_v34, %s9685_s24  ;;  %4847 = vst.msk [vmem:[#allocation7 + $0x8] sm:$0xff] %vm13656_vm5, %v4832_v37  ;;  %vm13659_vm5 = vcmask 425344   ;;  %v8757_v36 = vld [vmem:[%s9783_s23 + $0x322] ss:$2 sm:$0xff]  ;;  %v8726_v37 = vld [vmem:[%s9783_s23 + $0x331] ss:$2 sm:$0xff] }
 0x230   : > { %v2852_v41 = vpop.permute.xlu1 %2851  ;;  %4426 = vst.msk [vmem:[#allocation7 + $0x10] sm:$0xff] %vm13653_vm0, %v4412_v40  ;;  %vm13660_vm0 = vcmask 64544  }
 0x231   : > { %v2629_v42 = vpop.permute.xlu0 %2628  ;;  %2936 = vst.msk [vmem:[#allocation6 + $0x60] sm:$0xff] %vm2923_vm11, %v2852_v41  ;;  %v8883_v41 = vld [vmem:[%s9783_s23 + $0x2fa] ss:$2 sm:$0xff] }
 0x232   : > { %2712 = vst.msk [vmem:[#allocation6 + $0x68] sm:$0xff] %vm2698_vm10, %v2629_v42  ;;  %1963 = vrot.lane.b32.xlu1 %v8661_v38, %s9691_s30  ;;  %v8852_v42 = vld [vmem:[%s9783_s23 + $0x309] ss:$2 sm:$0xff] }
 0x233   : > { %1740 = vrot.lane.b32.xlu0 %v8630_v39, %s13632_s10 }
 0x234   : > { %v3748_v45 = vpop.permute.xlu1 %3747 }
 0x235   : > { %v3525_v46 = vpop.permute.xlu0 %3524  ;;  %3834 = vst.msk [vmem:[#allocation6 + $0x50] sm:$0xff] %vm3823_vm15, %v3748_v45  ;;  %v8537_v45 = vld [vmem:[%s9783_s23 + $0x373] ss:$2 sm:$0xff] }
 0x236   : > { %3610 = vst.msk [vmem:[#allocation6 + $0x58] sm:$0xff] %vm13657_vm1, %v3525_v46  ;;  %2859 = vrot.lane.b32.xlu1 %v8787_v43, %s9695_s15  ;;  %vm13661_vm1 = vcmask 195744   ;;  %v8506_v46 = vld [vmem:[%s9783_s23 + $0x382] ss:$2 sm:$0xff] }
 0x237   : > { %2636 = vrot.lane.b32.xlu0 %v8756_v44, %s13633_s21 }
 0x238   : > { %v1285_v49 = vpop.permute.xlu1 %1284 }
 0x239   : > { %v1062_v50 = vpop.permute.xlu0 %1061  ;;  %1365 = vst.msk [vmem:[#allocation6 + $0x80] sm:$0xff] %vm1348_vm4, %v1285_v49  ;;  %v8663_v49 = vld [vmem:[%s9783_s23 + $0x34b] ss:$2 sm:$0xff] }
 0x23a   : > { %1141 = vst.msk [vmem:[#allocation6 + $0x88] sm:$0xff] %vm1123_vm3, %v1062_v50  ;;  %3755 = vrot.lane.b32.xlu1 %v8913_v47, %s9699_s29  ;;  %v8632_v50 = vld [vmem:[%s9783_s23 + $0x35a] ss:$2 sm:$0xff] }
 0x23b   : > { %3532 = vrot.lane.b32.xlu0 %v8882_v48, %s9698_s18 }
 0x23c   : > { %v2181_v53 = vpop.permute.xlu1 %2180  ;;  %v3866_v55 = vld [vmem:[#allocation6 + $0x50] sm:$0xff] }
 0x23d   : > { %v1958_v54 = vpop.permute.xlu0 %1957  ;;  %2263 = vst.msk [vmem:[#allocation6 + $0x70] sm:$0xff] %vm2248_vm8, %v2181_v53  ;;  %9593 = vmatprep.mubr.msk.f32.mxu0 %vm13631_vm14, %v3866_v55  ;;  %v8789_v53 = vld [vmem:[%s9783_s23 + $0x323] ss:$2 sm:$0xff] }
 0x23e   : > { %2039 = vst.msk [vmem:[#allocation6 + $0x78] sm:$0xff] %vm2023_vm7, %v1958_v54  ;;  %1292 = vrot.lane.b32.xlu1 %v8567_v51, %s9688_s27  ;;  %v8758_v54 = vld [vmem:[%s9783_s23 + $0x332] ss:$2 sm:$0xff] }
 0x23f   : > { %1069 = vrot.lane.b32.xlu0 %v8536_v52, %s9687_s26 }
 0x240   : > { %v3077_v60 = vpop.permute.xlu1 %3076 }
 0x241   : > { %v2854_v61 = vpop.permute.xlu0 %2853  ;;  %3161 = vst.msk [vmem:[#allocation6 + $0x60] sm:$0xff] %vm13659_vm5, %v3077_v60 }
 0x242   : > { %2937 = vst.msk [vmem:[#allocation6 + $0x68] sm:$0xff] %vm2923_vm11, %v2854_v61  ;;  %2188 = vrot.lane.b32.xlu1 %v8693_v57, %s9692_s12  ;;  %v8915_v57 = vld [vmem:[%s9783_s23 + $0x2fb] ss:$2 sm:$0xff] }
 0x243   : > { %1965 = vrot.lane.b32.xlu0 %v8662_v58, %s9691_s30  ;;  %v8884_v58 = vld [vmem:[%s9783_s23 + $0x30a] ss:$2 sm:$0xff] }
 0x244   : > { %v614_v1 = vpop.permute.xlu1 %613 }
 0x245   : > { %v3750_v2 = vpop.permute.xlu0 %3749  ;;  %692 = vst.msk [vmem:[#allocation6 + $0x90] sm:$0xff] %vm13660_vm0, %v614_v1 }
 0x246   : > { %3835 = vst.msk [vmem:[#allocation6 + $0x58] sm:$0xff] %vm3823_vm15, %v3750_v2  ;;  %3084 = vrot.lane.b32.xlu1 %v8819_v63, %s9696_s16  ;;  %v8569_v63 = vld [vmem:[%s9783_s23 + $0x398] ss:$2 sm:$0xff] }
 0x247   : > { %2861 = vrot.lane.b32.xlu0 %v8788_v0, %s9695_s15  ;;  %v8538_v0 = vld [vmem:[%s9783_s23 + $0x383] ss:$2 sm:$0xff] }
 0x248   : > { %v1510_v5 = vpop.permute.xlu1 %1509 }
 0x249   : > { %v1287_v6 = vpop.permute.xlu0 %1286  ;;  %1590 = vst.msk [vmem:[#allocation6 + $0x80] sm:$0xff] %vm13661_vm1, %v1510_v5  ;;  %v8695_v5 = vld [vmem:[%s9783_s23 + $0x370] ss:$2 sm:$0xff] }
 0x24a   : > { %1366 = vst.msk [vmem:[#allocation6 + $0x88] sm:$0xff] %vm1348_vm4, %v1287_v6  ;;  %621 = vrot.lane.b32.xlu1 %v8473_v3, %s9686_s25  ;;  %v8664_v6 = vld [vmem:[%s9783_s23 + $0x35b] ss:$2 sm:$0xff] }
 0x24b   : > { %3757 = vrot.lane.b32.xlu0 %v8914_v4, %s9699_s29  ;;  %v8443_v4 = vld [vmem:[%s9783_s23 + $0x3c0] ss:$2 sm:$0xff] }
 0x24c   : > { %v2406_v10 = vpop.permute.xlu1 %2405 }
 0x24d   : > { %v2183_v11 = vpop.permute.xlu0 %2182  ;;  %v3867_v12 = vld [vmem:[#allocation6 + $0x58] sm:$0xff]  ;;  %2488 = vst.msk [vmem:[#allocation6 + $0x70] sm:$0xff] %vm2473_vm9, %v2406_v10  ;;  %v8790_v10 = vld [vmem:[%s9783_s23 + $0x333] ss:$2 sm:$0xff] }
 0x24e   : > { %2264 = vst.msk [vmem:[#allocation6 + $0x78] sm:$0xff] %vm2248_vm8, %v2183_v11  ;;  %9594 = vmatmul.mubr.msk.f32.gmra.mxu0 %vm13631_vm14, %v3867_v12  ;;  %1517 = vrot.lane.b32.xlu1 %v8599_v7, %s9689_s28 }
 0x24f   : > { %1294 = vrot.lane.b32.xlu0 %v8568_v8, %s9688_s27 }
 0x250   : > { %v3302_v15 = vpop.permute.xlu1 %3301 }
 0x251   : > { %v3079_v16 = vpop.permute.xlu0 %3078  ;;  %3386 = vst.msk [vmem:[#allocation6 + $0x60] sm:$0xff] %vm3373_vm13, %v3302_v15 }
 0x252   : > { %3162 = vst.msk [vmem:[#allocation6 + $0x68] sm:$0xff] %vm13659_vm5, %v3079_v16  ;;  %2413 = vrot.lane.b32.xlu1 %v8725_v13, %s9693_s13  ;;  %v8475_v13 = vld [vmem:[%s9783_s23 + $0x3c1] ss:$2 sm:$0xff] }
 0x253   : > { %2190 = vrot.lane.b32.xlu0 %v8694_v14, %s9692_s12  ;;  %v8916_v14 = vld [vmem:[%s9783_s23 + $0x30b] ss:$2 sm:$0xff] }
 0x254   : > { %v839_v19 = vpop.permute.xlu1 %838 }
 0x255   : > { %v616_v20 = vpop.permute.xlu0 %615  ;;  %917 = vst.msk [vmem:[#allocation6 + $0x90] sm:$0xff] %vm898_vm2, %v839_v19  ;;  %v8444_v19 = vld [vmem:[%s9783_s23 + $0x3d0] ss:$2 sm:$0xff] }
 0x256   : > { %693 = vst.msk [vmem:[#allocation6 + $0x98] sm:$0xff] %vm13660_vm0, %v616_v20  ;;  %3309 = vrot.lane.b32.xlu1 %v8851_v17, %s9697_s17  ;;  %vm13662_vm0 = vcmask 130048   ;;  %v8601_v17 = vld [vmem:[%s9783_s23 + $0x399] ss:$2 sm:$0xff] }
 0x257   : > { %3086 = vrot.lane.b32.xlu0 %v8820_v18, %s9696_s16  ;;  %v8570_v18 = vld [vmem:[%s9783_s23 + $0x3a8] ss:$2 sm:$0xff] }
 0x258   : > { %v1735_v23 = vpop.permute.xlu1 %1734 }
 0x259   : > { %v1512_v24 = vpop.permute.xlu0 %1511  ;;  %1815 = vst.msk [vmem:[#allocation6 + $0x80] sm:$0xff] %vm1798_vm6, %v1735_v23  ;;  %v8727_v23 = vld [vmem:[%s9783_s23 + $0x371] ss:$2 sm:$0xff] }
 0x25a   : > { %1591 = vst.msk [vmem:[#allocation6 + $0x88] sm:$0xff] %vm13661_vm1, %v1512_v24  ;;  %v9586_v25 = vpop.f32.mrf.mxu0  ;;  %846 = vrot.lane.b32.xlu1 %v8505_v21, %s9685_s24  ;;  %vm13663_vm1 = vmmov %vm13662_vm0  ;;  %v8696_v24 = vld [vmem:[%s9783_s23 + $0x380] ss:$2 sm:$0xff] }
 0x25b   : > { %v4092_v26 = vadd.f32 %v9586_v25, %v10610_v62  ;;  %623 = vrot.lane.b32.xlu0 %v8474_v22, %s9686_s25 }
 0x25c   : > { %v4086_v27 = vpop.f32.mrf.mxu0  ;;  %v2631_v32 = vpop.permute.xlu1 %2630 }
 0x25d   : > { %vm4230_vm12 = vcmp.ge.f32.partialorder %v4092_v26, 0.0  ;;  %v4262_v30 = vmul.f32 0.2, %v4092_v26  ;;  %v4087_v31 = vadd.f32 %v10610_v62, %v4086_v27  ;;  %v2408_v33 = vpop.permute.xlu0 %2407  ;;  %2713 = vst.msk [vmem:[#allocation6 + $0x70] sm:$0xff] %vm2698_vm10, %v2631_v32  ;;  %v8853_v27 = vld [vmem:[%s9783_s23 + $0x349] ss:$2 sm:$0xff] }
 0x25e   : > { %2489 = vst.msk [vmem:[#allocation6 + $0x78] sm:$0xff] %vm2473_vm9, %v2408_v33  ;;  %1742 = vrot.lane.b32.xlu1 %v8631_v28, %s13632_s10  ;;  %v8822_v28 = vld [vmem:[%s9783_s23 + $0x358] ss:$2 sm:$0xff]  ;;  %v8476_v32 = vld [vmem:[%s9783_s23 + $0x3d1] ss:$2 sm:$0xff] }
 0x25f   : > { %v4294_v34 = vsel %vm4230_vm12, %v4092_v26, %v4262_v30  ;;  %vm4229_vm5 = vcmp.ge.f32.partialorder %v4087_v31, 0.0  ;;  %v4261_v35 = vmul.f32 0.2, %v4087_v31  ;;  %1519 = vrot.lane.b32.xlu0 %v8600_v29, %s9689_s28  ;;  %vm13664_vm12 = vcmask 490944  }
 0x260   : > { %4383 = vst.msk [vmem:[#allocation2 + $0x51] sm:$0xff] %vm13662_vm0, %v4294_v34  ;;  %v3527_v39 = vpop.permute.xlu1 %3526  ;;  %vm13666_vm0 = vcmask 31744  }
 0x261   : > { %v4293_v38 = vsel %vm4229_vm5, %v4087_v31, %v4261_v35  ;;  %v3304_v40 = vpop.permute.xlu0 %3303  ;;  %3611 = vst.msk [vmem:[#allocation6 + $0x60] sm:$0xff] %vm13664_vm12, %v3527_v39  ;;  %vm13665_vm5 = vmmov %vm13664_vm12  ;;  %vm13668_vm12 = vcmask 64544   ;;  %v8507_v31 = vld [vmem:[%s9783_s23 + $0x3c2] ss:$2 sm:$0xff]  ;;  %v8602_v39 = vld [vmem:[%s9783_s23 + $0x3a9] ss:$2 sm:$0xff] }
 0x262   : > { %4382 = vst.msk [vmem:[#allocation2 + $0x49] sm:$0xff] %vm13663_vm1, %v4293_v38  ;;  %2638 = vrot.lane.b32.xlu1 %v8757_v36, %s13633_s21  ;;  %vm13667_vm1 = vcmask 425344   ;;  %v8633_v38 = vld [vmem:[%s9783_s23 + $0x39a] ss:$2 sm:$0xff] }
 0x263   : > { %3387 = vst.msk [vmem:[#allocation6 + $0x68] sm:$0xff] %vm3373_vm13, %v3304_v40  ;;  %2415 = vrot.lane.b32.xlu0 %v8726_v37, %s9693_s13 }
 0x264   : > { %v1064_v43 = vpop.permute.xlu1 %1063  ;;  %473 = vst.msk [vmem:[#allocation6 + $0xc0] sm:$0xff] %vm13666_vm0, %v8443_v4  ;;  %474 = vst.msk [vmem:[#allocation6 + $0xc8] sm:$0xff] %vm13666_vm0, %v8444_v19 }
 0x265   : > { %v841_v44 = vpop.permute.xlu0 %840  ;;  %1142 = vst.msk [vmem:[#allocation6 + $0x90] sm:$0xff] %vm1123_vm3, %v1064_v43 }
 0x266   : > { %918 = vst.msk [vmem:[#allocation6 + $0x98] sm:$0xff] %vm898_vm2, %v841_v44  ;;  %3534 = vrot.lane.b32.xlu1 %v8883_v41, %s9698_s18 }
 0x267   : > { %3311 = vrot.lane.b32.xlu0 %v8852_v42, %s9697_s17 }
 0x268   : > { %v1960_v47 = vpop.permute.xlu1 %1959 }
 0x269   : > { %v1737_v48 = vpop.permute.xlu0 %1736  ;;  %2040 = vst.msk [vmem:[#allocation6 + $0x80] sm:$0xff] %vm2023_vm7, %v1960_v47  ;;  %v8728_v47 = vld [vmem:[%s9783_s23 + $0x381] ss:$2 sm:$0xff] }
 0x26a   : > { %1816 = vst.msk [vmem:[#allocation6 + $0x88] sm:$0xff] %vm1798_vm6, %v1737_v48  ;;  %1071 = vrot.lane.b32.xlu1 %v8537_v45, %s9687_s26 }
 0x26b   : > { %848 = vrot.lane.b32.xlu0 %v8506_v46, %s9685_s24  ;;  %v8759_v46 = vld [vmem:[%s9783_s23 + $0x372] ss:$2 sm:$0xff] }
 0x26c   : > { %v2856_v51 = vpop.permute.xlu1 %2855 }
 0x26d   : > { %v2633_v52 = vpop.permute.xlu0 %2632  ;;  %2938 = vst.msk [vmem:[#allocation6 + $0x70] sm:$0xff] %vm2923_vm11, %v2856_v51  ;;  %v8854_v51 = vld [vmem:[%s9783_s23 + $0x359] ss:$2 sm:$0xff] }
 0x26e   : > { %2714 = vst.msk [vmem:[#allocation6 + $0x78] sm:$0xff] %vm2698_vm10, %v2633_v52  ;;  %1967 = vrot.lane.b32.xlu1 %v8663_v49, %s9691_s30 }
 0x26f   : > { %1744 = vrot.lane.b32.xlu0 %v8632_v50, %s13632_s10  ;;  %v8885_v50 = vld [vmem:[%s9783_s23 + $0x34a] ss:$2 sm:$0xff] }
 0x270   : > { %v3752_v55 = vpop.permute.xlu1 %3751 }
 0x271   : > { %v3529_v56 = vpop.permute.xlu0 %3528  ;;  %3836 = vst.msk [vmem:[#allocation6 + $0x60] sm:$0xff] %vm3823_vm15, %v3752_v55  ;;  %v8508_v55 = vld [vmem:[%s9783_s23 + $0x3d2] ss:$2 sm:$0xff] }
 0x272   : > { %3612 = vst.msk [vmem:[#allocation6 + $0x68] sm:$0xff] %vm13665_vm5, %v3529_v56  ;;  %2863 = vrot.lane.b32.xlu1 %v8789_v53, %s9695_s15  ;;  %vm13669_vm5 = vcmask 195744  }
 0x273   : > { %2640 = vrot.lane.b32.xlu0 %v8758_v54, %s13633_s21  ;;  %v8539_v54 = vld [vmem:[%s9783_s23 + $0x3c3] ss:$2 sm:$0xff] }
 0x274   : > { %v1289_v60 = vpop.permute.xlu1 %1288 }
 0x275   : > { %v1066_v61 = vpop.permute.xlu0 %1065  ;;  %1367 = vst.msk [vmem:[#allocation6 + $0x90] sm:$0xff] %vm1348_vm4, %v1289_v60  ;;  %v8665_v60 = vld [vmem:[%s9783_s23 + $0x39b] ss:$2 sm:$0xff] }
 0x276   : > { %1143 = vst.msk [vmem:[#allocation6 + $0x98] sm:$0xff] %vm1123_vm3, %v1066_v61  ;;  %3759 = vrot.lane.b32.xlu1 %v8915_v57, %s9699_s29  ;;  %v8634_v61 = vld [vmem:[%s9783_s23 + $0x3aa] ss:$2 sm:$0xff] }
 0x277   : > { %3536 = vrot.lane.b32.xlu0 %v8884_v58, %s9698_s18 }
 0x278   : > { %v2185_v1 = vpop.permute.xlu1 %2184  ;;  %v3868_v3 = vld [vmem:[#allocation6 + $0x60] sm:$0xff] }
 0x279   : > { %v1962_v2 = vpop.permute.xlu0 %1961  ;;  %2265 = vst.msk [vmem:[#allocation6 + $0x80] sm:$0xff] %vm2248_vm8, %v2185_v1  ;;  %9596 = vmatprep.mubr.msk.f32.mxu0 %vm13631_vm14, %v3868_v3  ;;  %v8760_v3 = vld [vmem:[%s9783_s23 + $0x382] ss:$2 sm:$0xff] }
 0x27a   : > { %2041 = vst.msk [vmem:[#allocation6 + $0x88] sm:$0xff] %vm2023_vm7, %v1962_v2  ;;  %1296 = vrot.lane.b32.xlu1 %v8569_v63, %s9688_s27  ;;  %v8791_v2 = vld [vmem:[%s9783_s23 + $0x373] ss:$2 sm:$0xff] }
 0x27b   : > { %1073 = vrot.lane.b32.xlu0 %v8538_v0, %s9687_s26 }
 0x27c   : > { %v3081_v7 = vpop.permute.xlu1 %3080 }
 0x27d   : > { %v2858_v8 = vpop.permute.xlu0 %2857  ;;  %3163 = vst.msk [vmem:[#allocation6 + $0x70] sm:$0xff] %vm13667_vm1, %v3081_v7  ;;  %v8886_v7 = vld [vmem:[%s9783_s23 + $0x35a] ss:$2 sm:$0xff] }
 0x27e   : > { %2939 = vst.msk [vmem:[#allocation6 + $0x78] sm:$0xff] %vm2923_vm11, %v2858_v8  ;;  %2192 = vrot.lane.b32.xlu1 %v8695_v5, %s9692_s12 }
 0x27f   : > { %1969 = vrot.lane.b32.xlu0 %v8664_v6, %s9691_s30  ;;  %v8917_v6 = vld [vmem:[%s9783_s23 + $0x34b] ss:$2 sm:$0xff] }
 0x280   : > { %v618_v11 = vpop.permute.xlu1 %617 }
 0x281   : > { %v3754_v12 = vpop.permute.xlu0 %3753  ;;  %694 = vst.msk [vmem:[#allocation6 + $0xa0] sm:$0xff] %vm13668_vm12, %v618_v11  ;;  %v8540_v11 = vld [vmem:[%s9783_s23 + $0x3d3] ss:$2 sm:$0xff] }
 0x282   : > { %3837 = vst.msk [vmem:[#allocation6 + $0x68] sm:$0xff] %vm3823_vm15, %v3754_v12  ;;  %3088 = vrot.lane.b32.xlu1 %v8821_v9, %s9696_s16 }
 0x283   : > { %2865 = vrot.lane.b32.xlu0 %v8790_v10, %s9695_s15  ;;  %v8571_v10 = vld [vmem:[%s9783_s23 + $0x3e8] ss:$2 sm:$0xff] }
 0x284   : > { %v1514_v15 = vpop.permute.xlu1 %1513 }
 0x285   : > { %v1291_v16 = vpop.permute.xlu0 %1290  ;;  %1592 = vst.msk [vmem:[#allocation6 + $0x90] sm:$0xff] %vm13669_vm5, %v1514_v15  ;;  %v8445_v15 = vld [vmem:[%s9783_s23 + $0x410] ss:$2 sm:$0xff] }
 0x286   : > { %1368 = vst.msk [vmem:[#allocation6 + $0x98] sm:$0xff] %vm1348_vm4, %v1291_v16  ;;  %625 = vrot.lane.b32.xlu1 %v8475_v13, %s9686_s25  ;;  %v8697_v16 = vld [vmem:[%s9783_s23 + $0x3c0] ss:$2 sm:$0xff] }
 0x287   : > { %3761 = vrot.lane.b32.xlu0 %v8916_v14, %s9699_s29 }
 0x288   : > { %v2410_v20 = vpop.permute.xlu1 %2409 }
 0x289   : > { %v2187_v21 = vpop.permute.xlu0 %2186  ;;  %v3869_v22 = vld [vmem:[#allocation6 + $0x68] sm:$0xff]  ;;  %2490 = vst.msk [vmem:[#allocation6 + $0x80] sm:$0xff] %vm2473_vm9, %v2410_v20 }
 0x28a   : > { %2266 = vst.msk [vmem:[#allocation6 + $0x88] sm:$0xff] %vm2248_vm8, %v2187_v21  ;;  %9597 = vmatmul.mubr.msk.f32.gmra.mxu0 %vm13631_vm14, %v3869_v22  ;;  %1521 = vrot.lane.b32.xlu1 %v8601_v17, %s9689_s28  ;;  %v8666_v17 = vld [vmem:[%s9783_s23 + $0x3ab] ss:$2 sm:$0xff]  ;;  %v8823_v20 = vld [vmem:[%s9783_s23 + $0x398] ss:$2 sm:$0xff] }
 0x28b   : > { %1298 = vrot.lane.b32.xlu0 %v8570_v18, %s9688_s27  ;;  %v8792_v21 = vld [vmem:[%s9783_s23 + $0x383] ss:$2 sm:$0xff] }
 0x28c   : > { %v3306_v25 = vpop.permute.xlu1 %3305 }
 0x28d   : > { %v3083_v26 = vpop.permute.xlu0 %3082  ;;  %3388 = vst.msk [vmem:[#allocation6 + $0x70] sm:$0xff] %vm3373_vm13, %v3306_v25  ;;  %v8918_v25 = vld [vmem:[%s9783_s23 + $0x35b] ss:$2 sm:$0xff] }
 0x28e   : > { %3164 = vst.msk [vmem:[#allocation6 + $0x78] sm:$0xff] %vm13667_vm1, %v3083_v26  ;;  %2417 = vrot.lane.b32.xlu1 %v8727_v23, %s9693_s13 }
 0x28f   : > { %2194 = vrot.lane.b32.xlu0 %v8696_v24, %s9692_s12  ;;  %v8477_v24 = vld [vmem:[%s9783_s23 + $0x411] ss:$2 sm:$0xff] }
 0x290   : > { %v843_v29 = vpop.permute.xlu1 %842 }
 0x291   : > { %v620_v30 = vpop.permute.xlu0 %619  ;;  %919 = vst.msk [vmem:[#allocation6 + $0xa0] sm:$0xff] %vm898_vm2, %v843_v29  ;;  %v8572_v29 = vld [vmem:[%s9783_s23 + $0x3f8] ss:$2 sm:$0xff] }
 0x292   : > { %695 = vst.msk [vmem:[#allocation6 + $0xa8] sm:$0xff] %vm13668_vm12, %v620_v30  ;;  %3313 = vrot.lane.b32.xlu1 %v8853_v27, %s9697_s17  ;;  %vm13670_vm12 = vcmask 130048   ;;  %v8446_v30 = vld [vmem:[%s9783_s23 + $0x420] ss:$2 sm:$0xff] }
 0x293   : > { %3090 = vrot.lane.b32.xlu0 %v8822_v28, %s9696_s16  ;;  %v8603_v28 = vld [vmem:[%s9783_s23 + $0x3e9] ss:$2 sm:$0xff] }
 0x294   : > { %v1739_v33 = vpop.permute.xlu1 %1738 }
 0x295   : > { %v1516_v34 = vpop.permute.xlu0 %1515  ;;  %1817 = vst.msk [vmem:[#allocation6 + $0x90] sm:$0xff] %vm1798_vm6, %v1739_v33 }
 0x296   : > { %1593 = vst.msk [vmem:[#allocation6 + $0x98] sm:$0xff] %vm13669_vm5, %v1516_v34  ;;  %v9589_v35 = vpop.f32.mrf.mxu0  ;;  %850 = vrot.lane.b32.xlu1 %v8507_v31, %s9685_s24  ;;  %vm13671_vm5 = vmmov %vm13670_vm12  ;;  %v8729_v34 = vld [vmem:[%s9783_s23 + $0x3c1] ss:$2 sm:$0xff] }
 0x297   : > { %v4102_v36 = vadd.f32 %v9589_v35, %v10610_v62  ;;  %627 = vrot.lane.b32.xlu0 %v8476_v32, %s9686_s25  ;;  %v8698_v35 = vld [vmem:[%s9783_s23 + $0x3d0] ss:$2 sm:$0xff] }
 0x298   : > { %v4096_v37 = vpop.f32.mrf.mxu0  ;;  %v2635_v42 = vpop.permute.xlu1 %2634 }
 0x299   : > { %vm4232_vm0 = vcmp.ge.f32.partialorder %v4102_v36, 0.0  ;;  %v4264_v40 = vmul.f32 0.2, %v4102_v36  ;;  %v4097_v41 = vadd.f32 %v10610_v62, %v4096_v37  ;;  %v2412_v43 = vpop.permute.xlu0 %2411  ;;  %2715 = vst.msk [vmem:[#allocation6 + $0x80] sm:$0xff] %vm2698_vm10, %v2635_v42  ;;  %v8509_v42 = vld [vmem:[%s9783_s23 + $0x412] ss:$2 sm:$0xff] }
 0x29a   : > { %2491 = vst.msk [vmem:[#allocation6 + $0x88] sm:$0xff] %vm2473_vm9, %v2412_v43  ;;  %1746 = vrot.lane.b32.xlu1 %v8633_v38, %s13632_s10  ;;  %v8855_v38 = vld [vmem:[%s9783_s23 + $0x399] ss:$2 sm:$0xff] }
 0x29b   : > { %v4296_v44 = vsel %vm4232_vm0, %v4102_v36, %v4264_v40  ;;  %vm4231_vm1 = vcmp.ge.f32.partialorder %v4097_v41, 0.0  ;;  %v4263_v45 = vmul.f32 0.2, %v4097_v41  ;;  %1523 = vrot.lane.b32.xlu0 %v8602_v39, %s9689_s28  ;;  %vm13672_vm0 = vcmask 490944   ;;  %v8824_v39 = vld [vmem:[%s9783_s23 + $0x3a8] ss:$2 sm:$0xff] }
 0x29c   : > { %4385 = vst.msk [vmem:[#allocation2 + $0x69] sm:$0xff] %vm13670_vm12, %v4296_v44  ;;  %v3531_v48 = vpop.permute.xlu1 %3530  ;;  %v8478_v43 = vld [vmem:[%s9783_s23 + $0x421] ss:$2 sm:$0xff] }
 0x29d   : > { %v4295_v62 = vsel %vm4231_vm1, %v4097_v41, %v4263_v45  ;;  %v3308_v49 = vpop.permute.xlu0 %3307  ;;  %3613 = vst.msk [vmem:[#allocation6 + $0x70] sm:$0xff] %vm13672_vm0, %v3531_v48  ;;  %vm13673_vm1 = vmmov %vm13671_vm5 }
 0x29e   : > { %4384 = vst.msk [vmem:[#allocation2 + $0x61] sm:$0xff] %vm13671_vm5, %v4295_v62  ;;  %2642 = vrot.lane.b32.xlu1 %v8759_v46, %s13633_s21  ;;  %vm13674_vm12 = vmmov %vm13673_vm1 }
 0x29f   : > { %3389 = vst.msk [vmem:[#allocation6 + $0x78] sm:$0xff] %vm3373_vm13, %v3308_v49  ;;  %2419 = vrot.lane.b32.xlu0 %v8728_v47, %s9693_s13  ;;  %vm13675_vm5 = vmmov %vm13672_vm0  ;;  %vm13676_vm0 = vcmask 31744   ;;  %v11023_v47 = vld [vmem:[%s13611_s2] ss:$0 sm:$0xff]  ;;  %v8635_v49 = vld [vmem:[%s9783_s23 + $0x3ea] ss:$2 sm:$0xff] }
 0x2a0   : > { %v1068_v52 = vpop.permute.xlu1 %1067  ;;  %475 = vst.msk [vmem:[#allocation6 + $0xd0] sm:$0xff] %vm13676_vm0, %v8445_v15  ;;  %476 = vst.msk [vmem:[#allocation6 + $0xd8] sm:$0xff] %vm13676_vm0, %v8446_v30  ;;  %v8825_v30 = vld [vmem:[%s9783_s23 + $0x3e8] ss:$2 sm:$0xff] }
 0x2a1   : > { %v845_v53 = vpop.permute.xlu0 %844  ;;  %1144 = vst.msk [vmem:[#allocation6 + $0xa0] sm:$0xff] %vm1123_vm3, %v1068_v52 }
 0x2a2   : > { %920 = vst.msk [vmem:[#allocation6 + $0xa8] sm:$0xff] %vm898_vm2, %v845_v53  ;;  %3538 = vrot.lane.b32.xlu1 %v8885_v50, %s9698_s18  ;;  %v8604_v50 = vld [vmem:[%s9783_s23 + $0x3f9] ss:$2 sm:$0xff] }
 0x2a3   : > { %3315 = vrot.lane.b32.xlu0 %v8854_v51, %s9697_s17 }
 0x2a4   : > { %v1964_v56 = vpop.permute.xlu1 %1963 }
 0x2a5   : > { %v1741_v57 = vpop.permute.xlu0 %1740  ;;  %2042 = vst.msk [vmem:[#allocation6 + $0x90] sm:$0xff] %vm2023_vm7, %v1964_v56  ;;  %v4834_v58 = vld [vmem:[#allocation2 + $0x60] ss:$2 sm:$0xff] }
 0x2a6   : > { %1818 = vst.msk [vmem:[#allocation6 + $0x98] sm:$0xff] %vm1798_vm6, %v1741_v57  ;;  %1075 = vrot.lane.b32.xlu1 %v8539_v54, %s9687_s26  ;;  %v4414_v63 = vld [vmem:[#allocation2 + $0x60] ss:$2 sm:$0xff] }
 0x2a7   : > { %852 = vrot.lane.b32.xlu0 %v8508_v55, %s9685_s24  ;;  %4848 = vst.msk [vmem:[#allocation7 + $0x18] sm:$0xff] %vm13673_vm1, %v4834_v58  ;;  %vm13677_vm1 = vcmask 425344   ;;  %v8761_v57 = vld [vmem:[%s9783_s23 + $0x3c2] ss:$2 sm:$0xff]  ;;  %v8730_v58 = vld [vmem:[%s9783_s23 + $0x3d1] ss:$2 sm:$0xff] }
 0x2a8   : > { %v2860_v0 = vpop.permute.xlu1 %2859  ;;  %4427 = vst.msk [vmem:[#allocation7 + $0x20] sm:$0xff] %vm13674_vm12, %v4414_v63  ;;  %vm13678_vm12 = vcmask 64544  }
 0x2a9   : > { %v2637_v1 = vpop.permute.xlu0 %2636  ;;  %2940 = vst.msk [vmem:[#allocation6 + $0x80] sm:$0xff] %vm2923_vm11, %v2860_v0  ;;  %v8887_v0 = vld [vmem:[%s9783_s23 + $0x39a] ss:$2 sm:$0xff] }
 0x2aa   : > { %2716 = vst.msk [vmem:[#allocation6 + $0x88] sm:$0xff] %vm2698_vm10, %v2637_v1  ;;  %1971 = vrot.lane.b32.xlu1 %v8665_v60, %s9691_s30  ;;  %v8856_v1 = vld [vmem:[%s9783_s23 + $0x3a9] ss:$2 sm:$0xff] }
 0x2ab   : > { %1748 = vrot.lane.b32.xlu0 %v8634_v61, %s13632_s10 }
 0x2ac   : > { %v3756_v4 = vpop.permute.xlu1 %3755 }
 0x2ad   : > { %v3533_v5 = vpop.permute.xlu0 %3532  ;;  %3838 = vst.msk [vmem:[#allocation6 + $0x70] sm:$0xff] %vm3823_vm15, %v3756_v4  ;;  %v8541_v4 = vld [vmem:[%s9783_s23 + $0x413] ss:$2 sm:$0xff] }
 0x2ae   : > { %3614 = vst.msk [vmem:[#allocation6 + $0x78] sm:$0xff] %vm13675_vm5, %v3533_v5  ;;  %2867 = vrot.lane.b32.xlu1 %v8791_v2, %s9695_s15  ;;  %vm13679_vm5 = vcmask 195744   ;;  %v8510_v5 = vld [vmem:[%s9783_s23 + $0x422] ss:$2 sm:$0xff] }
 0x2af   : > { %2644 = vrot.lane.b32.xlu0 %v8760_v3, %s13633_s21 }
 0x2b0   : > { %v1293_v8 = vpop.permute.xlu1 %1292 }
 0x2b1   : > { %v1070_v9 = vpop.permute.xlu0 %1069  ;;  %1369 = vst.msk [vmem:[#allocation6 + $0xa0] sm:$0xff] %vm1348_vm4, %v1293_v8  ;;  %v8667_v8 = vld [vmem:[%s9783_s23 + $0x3eb] ss:$2 sm:$0xff] }
 0x2b2   : > { %1145 = vst.msk [vmem:[#allocation6 + $0xa8] sm:$0xff] %vm1123_vm3, %v1070_v9  ;;  %3763 = vrot.lane.b32.xlu1 %v8917_v6, %s9699_s29  ;;  %v8636_v9 = vld [vmem:[%s9783_s23 + $0x3fa] ss:$2 sm:$0xff] }
 0x2b3   : > { %3540 = vrot.lane.b32.xlu0 %v8886_v7, %s9698_s18 }
 0x2b4   : > { %v2189_v12 = vpop.permute.xlu1 %2188  ;;  %v3870_v14 = vld [vmem:[#allocation6 + $0x70] sm:$0xff] }
 0x2b5   : > { %v1966_v13 = vpop.permute.xlu0 %1965  ;;  %2267 = vst.msk [vmem:[#allocation6 + $0x90] sm:$0xff] %vm2248_vm8, %v2189_v12  ;;  %9599 = vmatprep.mubr.msk.f32.mxu0 %vm13631_vm14, %v3870_v14  ;;  %v8793_v12 = vld [vmem:[%s9783_s23 + $0x3c3] ss:$2 sm:$0xff] }
 0x2b6   : > { %2043 = vst.msk [vmem:[#allocation6 + $0x98] sm:$0xff] %vm2023_vm7, %v1966_v13  ;;  %1300 = vrot.lane.b32.xlu1 %v8571_v10, %s9688_s27  ;;  %v8762_v13 = vld [vmem:[%s9783_s23 + $0x3d2] ss:$2 sm:$0xff] }
 0x2b7   : > { %1077 = vrot.lane.b32.xlu0 %v8540_v11, %s9687_s26 }
 0x2b8   : > { %v3085_v18 = vpop.permute.xlu1 %3084 }
 0x2b9   : > { %v2862_v19 = vpop.permute.xlu0 %2861  ;;  %3165 = vst.msk [vmem:[#allocation6 + $0x80] sm:$0xff] %vm13677_vm1, %v3085_v18 }
 0x2ba   : > { %2941 = vst.msk [vmem:[#allocation6 + $0x88] sm:$0xff] %vm2923_vm11, %v2862_v19  ;;  %2196 = vrot.lane.b32.xlu1 %v8697_v16, %s9692_s12  ;;  %v8919_v16 = vld [vmem:[%s9783_s23 + $0x39b] ss:$2 sm:$0xff] }
 0x2bb   : > { %1973 = vrot.lane.b32.xlu0 %v8666_v17, %s9691_s30  ;;  %v8888_v17 = vld [vmem:[%s9783_s23 + $0x3aa] ss:$2 sm:$0xff] }
 0x2bc   : > { %v622_v22 = vpop.permute.xlu1 %621 }
 0x2bd   : > { %v3758_v23 = vpop.permute.xlu0 %3757  ;;  %696 = vst.msk [vmem:[#allocation6 + $0xb0] sm:$0xff] %vm13678_vm12, %v622_v22 }
 0x2be   : > { %3839 = vst.msk [vmem:[#allocation6 + $0x78] sm:$0xff] %vm3823_vm15, %v3758_v23  ;;  %3092 = vrot.lane.b32.xlu1 %v8823_v20, %s9696_s16  ;;  %v8573_v20 = vld [vmem:[%s9783_s23 + $0x438] ss:$2 sm:$0xff] }
 0x2bf   : > { %2869 = vrot.lane.b32.xlu0 %v8792_v21, %s9695_s15  ;;  %v8542_v21 = vld [vmem:[%s9783_s23 + $0x423] ss:$2 sm:$0xff] }
 0x2c0   : > { %v1518_v26 = vpop.permute.xlu1 %1517 }
 0x2c1   : > { %v1295_v27 = vpop.permute.xlu0 %1294  ;;  %1594 = vst.msk [vmem:[#allocation6 + $0xa0] sm:$0xff] %vm13679_vm5, %v1518_v26  ;;  %v8699_v26 = vld [vmem:[%s9783_s23 + $0x410] ss:$2 sm:$0xff] }
 0x2c2   : > { %1370 = vst.msk [vmem:[#allocation6 + $0xa8] sm:$0xff] %vm1348_vm4, %v1295_v27  ;;  %629 = vrot.lane.b32.xlu1 %v8477_v24, %s9686_s25  ;;  %v8668_v27 = vld [vmem:[%s9783_s23 + $0x3fb] ss:$2 sm:$0xff] }
 0x2c3   : > { %3765 = vrot.lane.b32.xlu0 %v8918_v25, %s9699_s29  ;;  %v8447_v25 = vld [vmem:[%s9783_s23 + $0x460] ss:$2 sm:$0xff] }
 0x2c4   : > { %v2414_v31 = vpop.permute.xlu1 %2413 }
 0x2c5   : > { %v2191_v32 = vpop.permute.xlu0 %2190  ;;  %v3871_v33 = vld [vmem:[#allocation6 + $0x78] sm:$0xff]  ;;  %2492 = vst.msk [vmem:[#allocation6 + $0x90] sm:$0xff] %vm2473_vm9, %v2414_v31  ;;  %v8794_v31 = vld [vmem:[%s9783_s23 + $0x3d3] ss:$2 sm:$0xff] }
 0x2c6   : > { %2268 = vst.msk [vmem:[#allocation6 + $0x98] sm:$0xff] %vm2248_vm8, %v2191_v32  ;;  %9600 = vmatmul.mubr.msk.f32.gmra.mxu0 %vm13631_vm14, %v3871_v33  ;;  %1525 = vrot.lane.b32.xlu1 %v8603_v28, %s9689_s28 }
 0x2c7   : > { %1302 = vrot.lane.b32.xlu0 %v8572_v29, %s9688_s27 }
 0x2c8   : > { %v3310_v36 = vpop.permute.xlu1 %3309 }
 0x2c9   : > { %v3087_v37 = vpop.permute.xlu0 %3086  ;;  %3390 = vst.msk [vmem:[#allocation6 + $0x80] sm:$0xff] %vm3373_vm13, %v3310_v36 }
 0x2ca   : > { %3166 = vst.msk [vmem:[#allocation6 + $0x88] sm:$0xff] %vm13677_vm1, %v3087_v37  ;;  %2421 = vrot.lane.b32.xlu1 %v8729_v34, %s9693_s13  ;;  %v8479_v34 = vld [vmem:[%s9783_s23 + $0x461] ss:$2 sm:$0xff] }
 0x2cb   : > { %2198 = vrot.lane.b32.xlu0 %v8698_v35, %s9692_s12  ;;  %v8920_v35 = vld [vmem:[%s9783_s23 + $0x3ab] ss:$2 sm:$0xff] }
 0x2cc   : > { %v847_v40 = vpop.permute.xlu1 %846 }
 0x2cd   : > { %v624_v41 = vpop.permute.xlu0 %623  ;;  %921 = vst.msk [vmem:[#allocation6 + $0xb0] sm:$0xff] %vm898_vm2, %v847_v40  ;;  %v8448_v40 = vld [vmem:[%s9783_s23 + $0x470] ss:$2 sm:$0xff] }
 0x2ce   : > { %697 = vst.msk [vmem:[#allocation6 + $0xb8] sm:$0xff] %vm13678_vm12, %v624_v41  ;;  %3317 = vrot.lane.b32.xlu1 %v8855_v38, %s9697_s17  ;;  %vm13680_vm12 = vcmask 130048   ;;  %v8605_v38 = vld [vmem:[%s9783_s23 + $0x439] ss:$2 sm:$0xff] }
 0x2cf   : > { %3094 = vrot.lane.b32.xlu0 %v8824_v39, %s9696_s16  ;;  %v8574_v39 = vld [vmem:[%s9783_s23 + $0x448] ss:$2 sm:$0xff] }
 0x2d0   : > { %v1743_v44 = vpop.permute.xlu1 %1742 }
 0x2d1   : > { %v1520_v45 = vpop.permute.xlu0 %1519  ;;  %1819 = vst.msk [vmem:[#allocation6 + $0xa0] sm:$0xff] %vm1798_vm6, %v1743_v44  ;;  %v8731_v44 = vld [vmem:[%s9783_s23 + $0x411] ss:$2 sm:$0xff] }
 0x2d2   : > { %1595 = vst.msk [vmem:[#allocation6 + $0xa8] sm:$0xff] %vm13679_vm5, %v1520_v45  ;;  %v9592_v46 = vpop.f32.mrf.mxu0  ;;  %854 = vrot.lane.b32.xlu1 %v8509_v42, %s9685_s24  ;;  %vm13681_vm5 = vmmov %vm13680_vm12  ;;  %v8700_v45 = vld [vmem:[%s9783_s23 + $0x420] ss:$2 sm:$0xff] }
 0x2d3   : > { %v4112_v62 = vadd.f32 %v11023_v47, %v9592_v46  ;;  %631 = vrot.lane.b32.xlu0 %v8478_v43, %s9686_s25 }
 0x2d4   : > { %v4106_v48 = vpop.f32.mrf.mxu0  ;;  %v2639_v53 = vpop.permute.xlu1 %2638 }
 0x2d5   : > { %vm4234_vm0 = vcmp.ge.f32.partialorder %v4112_v62, 0.0  ;;  %v4266_v51 = vmul.f32 0.2, %v4112_v62  ;;  %v4107_v52 = vadd.f32 %v11023_v47, %v4106_v48  ;;  %v2416_v54 = vpop.permute.xlu0 %2415  ;;  %2717 = vst.msk [vmem:[#allocation6 + $0x90] sm:$0xff] %vm2698_vm10, %v2639_v53  ;;  %v8857_v48 = vld [vmem:[%s9783_s23 + $0x3e9] ss:$2 sm:$0xff] }
 0x2d6   : > { %2493 = vst.msk [vmem:[#allocation6 + $0x98] sm:$0xff] %vm2473_vm9, %v2416_v54  ;;  %1750 = vrot.lane.b32.xlu1 %v8635_v49, %s13632_s10  ;;  %v8826_v49 = vld [vmem:[%s9783_s23 + $0x3f8] ss:$2 sm:$0xff]  ;;  %v8480_v53 = vld [vmem:[%s9783_s23 + $0x471] ss:$2 sm:$0xff] }
 0x2d7   : > { %v4298_v55 = vsel %vm4234_vm0, %v4112_v62, %v4266_v51  ;;  %vm4233_vm1 = vcmp.ge.f32.partialorder %v4107_v52, 0.0  ;;  %v4265_v56 = vmul.f32 0.2, %v4107_v52  ;;  %1527 = vrot.lane.b32.xlu0 %v8604_v50, %s9689_s28  ;;  %vm13682_vm0 = vcmask 490944  }
 0x2d8   : > { %4387 = vst.msk [vmem:[#allocation2 + $0x81] sm:$0xff] %vm13680_vm12, %v4298_v55  ;;  %v3535_v61 = vpop.permute.xlu1 %3534  ;;  %vm13684_vm12 = vcmask 31744  }
 0x2d9   : > { %v4297_v60 = vsel %vm4233_vm1, %v4107_v52, %v4265_v56  ;;  %v3312_v63 = vpop.permute.xlu0 %3311  ;;  %3615 = vst.msk [vmem:[#allocation6 + $0x80] sm:$0xff] %vm13682_vm0, %v3535_v61  ;;  %vm13683_vm1 = vmmov %vm13682_vm0  ;;  %vm13686_vm0 = vcmask 64544   ;;  %v8511_v52 = vld [vmem:[%s9783_s23 + $0x462] ss:$2 sm:$0xff]  ;;  %v8606_v61 = vld [vmem:[%s9783_s23 + $0x449] ss:$2 sm:$0xff] }
 0x2da   : > { %4386 = vst.msk [vmem:[#allocation2 + $0x79] sm:$0xff] %vm13681_vm5, %v4297_v60  ;;  %2646 = vrot.lane.b32.xlu1 %v8761_v57, %s13633_s21  ;;  %vm13685_vm5 = vcmask 425344   ;;  %v8637_v60 = vld [vmem:[%s9783_s23 + $0x43a] ss:$2 sm:$0xff] }
 0x2db   : > { %3391 = vst.msk [vmem:[#allocation6 + $0x88] sm:$0xff] %vm3373_vm13, %v3312_v63  ;;  %2423 = vrot.lane.b32.xlu0 %v8730_v58, %s9693_s13 }
 0x2dc   : > { %v1072_v2 = vpop.permute.xlu1 %1071  ;;  %477 = vst.msk [vmem:[#allocation6 + $0xe0] sm:$0xff] %vm13684_vm12, %v8447_v25  ;;  %478 = vst.msk [vmem:[#allocation6 + $0xe8] sm:$0xff] %vm13684_vm12, %v8448_v40  ;;  %v8764_v25 = vld [vmem:[%s9783_s23 + $0x422] ss:$2 sm:$0xff] }
 0x2dd   : > { %v849_v3 = vpop.permute.xlu0 %848  ;;  %1146 = vst.msk [vmem:[#allocation6 + $0xb0] sm:$0xff] %vm1123_vm3, %v1072_v2 }
 0x2de   : > { %922 = vst.msk [vmem:[#allocation6 + $0xb8] sm:$0xff] %vm898_vm2, %v849_v3  ;;  %3542 = vrot.lane.b32.xlu1 %v8887_v0, %s9698_s18 }
 0x2df   : > { %3319 = vrot.lane.b32.xlu0 %v8856_v1, %s9697_s17 }
 0x2e0   : > { %v1968_v6 = vpop.permute.xlu1 %1967 }
 0x2e1   : > { %v1745_v7 = vpop.permute.xlu0 %1744  ;;  %2044 = vst.msk [vmem:[#allocation6 + $0xa0] sm:$0xff] %vm2023_vm7, %v1968_v6  ;;  %v8732_v6 = vld [vmem:[%s9783_s23 + $0x421] ss:$2 sm:$0xff] }
 0x2e2   : > { %1820 = vst.msk [vmem:[#allocation6 + $0xa8] sm:$0xff] %vm1798_vm6, %v1745_v7  ;;  %1079 = vrot.lane.b32.xlu1 %v8541_v4, %s9687_s26 }
 0x2e3   : > { %856 = vrot.lane.b32.xlu0 %v8510_v5, %s9685_s24  ;;  %v8763_v5 = vld [vmem:[%s9783_s23 + $0x412] ss:$2 sm:$0xff] }
 0x2e4   : > { %v2864_v10 = vpop.permute.xlu1 %2863 }
 0x2e5   : > { %v2641_v11 = vpop.permute.xlu0 %2640  ;;  %2942 = vst.msk [vmem:[#allocation6 + $0x90] sm:$0xff] %vm2923_vm11, %v2864_v10  ;;  %v8889_v10 = vld [vmem:[%s9783_s23 + $0x3ea] ss:$2 sm:$0xff] }
 0x2e6   : > { %2718 = vst.msk [vmem:[#allocation6 + $0x98] sm:$0xff] %vm2698_vm10, %v2641_v11  ;;  %1975 = vrot.lane.b32.xlu1 %v8667_v8, %s9691_s30  ;;  %v8858_v11 = vld [vmem:[%s9783_s23 + $0x3f9] ss:$2 sm:$0xff] }
 0x2e7   : > { %1752 = vrot.lane.b32.xlu0 %v8636_v9, %s13632_s10 }
 0x2e8   : > { %v3760_v14 = vpop.permute.xlu1 %3759 }
 0x2e9   : > { %v3537_v15 = vpop.permute.xlu0 %3536  ;;  %3840 = vst.msk [vmem:[#allocation6 + $0x80] sm:$0xff] %vm3823_vm15, %v3760_v14  ;;  %v8543_v14 = vld [vmem:[%s9783_s23 + $0x463] ss:$2 sm:$0xff] }
 0x2ea   : > { %3616 = vst.msk [vmem:[#allocation6 + $0x88] sm:$0xff] %vm13683_vm1, %v3537_v15  ;;  %2871 = vrot.lane.b32.xlu1 %v8793_v12, %s9695_s15  ;;  %vm13687_vm1 = vcmask 195744   ;;  %v8512_v15 = vld [vmem:[%s9783_s23 + $0x472] ss:$2 sm:$0xff] }
 0x2eb   : > { %2648 = vrot.lane.b32.xlu0 %v8762_v13, %s13633_s21 }
 0x2ec   : > { %v1297_v18 = vpop.permute.xlu1 %1296 }
 0x2ed   : > { %v1074_v19 = vpop.permute.xlu0 %1073  ;;  %1371 = vst.msk [vmem:[#allocation6 + $0xb0] sm:$0xff] %vm1348_vm4, %v1297_v18 }
 0x2ee   : > { %1147 = vst.msk [vmem:[#allocation6 + $0xb8] sm:$0xff] %vm1123_vm3, %v1074_v19  ;;  %3767 = vrot.lane.b32.xlu1 %v8919_v16, %s9699_s29  ;;  %v8669_v19 = vld [vmem:[%s9783_s23 + $0x43b] ss:$2 sm:$0xff] }
 0x2ef   : > { %3544 = vrot.lane.b32.xlu0 %v8888_v17, %s9698_s18 }
 0x2f0   : > { %v2193_v22 = vpop.permute.xlu1 %2192  ;;  %v3872_v24 = vld [vmem:[#allocation6 + $0x80] sm:$0xff] }
 0x2f1   : > { %v1970_v23 = vpop.permute.xlu0 %1969  ;;  %2269 = vst.msk [vmem:[#allocation6 + $0xa0] sm:$0xff] %vm2248_vm8, %v2193_v22  ;;  %9602 = vmatprep.mubr.msk.f32.mxu0 %vm13631_vm14, %v3872_v24  ;;  %v8795_v24 = vld [vmem:[%s9783_s23 + $0x413] ss:$2 sm:$0xff] }
 0x2f2   : > { %2045 = vst.msk [vmem:[#allocation6 + $0xa8] sm:$0xff] %vm2023_vm7, %v1970_v23  ;;  %1304 = vrot.lane.b32.xlu1 %v8573_v20, %s9688_s27  ;;  %v8638_v20 = vld [vmem:[%s9783_s23 + $0x44a] ss:$2 sm:$0xff] }
 0x2f3   : > { %1081 = vrot.lane.b32.xlu0 %v8542_v21, %s9687_s26 }
 0x2f4   : > { %v3089_v28 = vpop.permute.xlu1 %3088 }
 0x2f5   : > { %v2866_v29 = vpop.permute.xlu0 %2865  ;;  %3167 = vst.msk [vmem:[#allocation6 + $0x90] sm:$0xff] %vm13685_vm5, %v3089_v28  ;;  %v8921_v28 = vld [vmem:[%s9783_s23 + $0x3eb] ss:$2 sm:$0xff] }
 0x2f6   : > { %2943 = vst.msk [vmem:[#allocation6 + $0x98] sm:$0xff] %vm2923_vm11, %v2866_v29  ;;  %2200 = vrot.lane.b32.xlu1 %v8699_v26, %s9692_s12  ;;  %v8890_v29 = vld [vmem:[%s9783_s23 + $0x3fa] ss:$2 sm:$0xff] }
 0x2f7   : > { %1977 = vrot.lane.b32.xlu0 %v8668_v27, %s9691_s30 }
 0x2f8   : > { %v626_v32 = vpop.permute.xlu1 %625 }
 0x2f9   : > { %v3762_v33 = vpop.permute.xlu0 %3761  ;;  %698 = vst.msk [vmem:[#allocation6 + $0xc0] sm:$0xff] %vm13686_vm0, %v626_v32  ;;  %v8575_v32 = vld [vmem:[%s9783_s23 + $0x488] ss:$2 sm:$0xff] }
 0x2fa   : > { %3841 = vst.msk [vmem:[#allocation6 + $0x88] sm:$0xff] %vm3823_vm15, %v3762_v33  ;;  %3096 = vrot.lane.b32.xlu1 %v8825_v30, %s9696_s16  ;;  %v8544_v33 = vld [vmem:[%s9783_s23 + $0x473] ss:$2 sm:$0xff] }
 0x2fb   : > { %2873 = vrot.lane.b32.xlu0 %v8794_v31, %s9695_s15 }
 0x2fc   : > { %v1522_v36 = vpop.permute.xlu1 %1521 }
 0x2fd   : > { %v1299_v37 = vpop.permute.xlu0 %1298  ;;  %1596 = vst.msk [vmem:[#allocation6 + $0xb0] sm:$0xff] %vm13687_vm1, %v1522_v36 }
 0x2fe   : > { %1372 = vst.msk [vmem:[#allocation6 + $0xb8] sm:$0xff] %vm1348_vm4, %v1299_v37  ;;  %633 = vrot.lane.b32.xlu1 %v8479_v34, %s9686_s25  ;;  %v8449_v37 = vld [vmem:[%s9783_s23 + $0x4b0] ss:$2 sm:$0xff] }
 0x2ff   : > { %3769 = vrot.lane.b32.xlu0 %v8920_v35, %s9699_s29 }
 0x300   : > { %v2418_v41 = vpop.permute.xlu1 %2417 }
 0x301   : > { %v2195_v42 = vpop.permute.xlu0 %2194  ;;  %v3873_v43 = vld [vmem:[#allocation6 + $0x88] sm:$0xff]  ;;  %2494 = vst.msk [vmem:[#allocation6 + $0xa0] sm:$0xff] %vm2473_vm9, %v2418_v41 }
 0x302   : > { %2270 = vst.msk [vmem:[#allocation6 + $0xa8] sm:$0xff] %vm2248_vm8, %v2195_v42  ;;  %9603 = vmatmul.mubr.msk.f32.gmra.mxu0 %vm13631_vm14, %v3873_v43  ;;  %1529 = vrot.lane.b32.xlu1 %v8605_v38, %s9689_s28  ;;  %v8701_v38 = vld [vmem:[%s9783_s23 + $0x460] ss:$2 sm:$0xff]  ;;  %v8796_v43 = vld [vmem:[%s9783_s23 + $0x423] ss:$2 sm:$0xff] }
 0x303   : > { %1306 = vrot.lane.b32.xlu0 %v8574_v39, %s9688_s27  ;;  %v8670_v39 = vld [vmem:[%s9783_s23 + $0x44b] ss:$2 sm:$0xff]  ;;  %v8827_v42 = vld [vmem:[%s9783_s23 + $0x438] ss:$2 sm:$0xff] }
 0x304   : > { %v3314_v46 = vpop.permute.xlu1 %3313 }
 0x305   : > { %v3091_v62 = vpop.permute.xlu0 %3090  ;;  %3392 = vst.msk [vmem:[#allocation6 + $0x90] sm:$0xff] %vm3373_vm13, %v3314_v46  ;;  %v8481_v46 = vld [vmem:[%s9783_s23 + $0x4b1] ss:$2 sm:$0xff] }
 0x306   : > { %3168 = vst.msk [vmem:[#allocation6 + $0x98] sm:$0xff] %vm13685_vm5, %v3091_v62  ;;  %2425 = vrot.lane.b32.xlu1 %v8731_v44, %s9693_s13  ;;  %v8922_v62 = vld [vmem:[%s9783_s23 + $0x3fb] ss:$2 sm:$0xff] }
 0x307   : > { %2202 = vrot.lane.b32.xlu0 %v8700_v45, %s9692_s12 }
 0x308   : > { %v851_v50 = vpop.permute.xlu1 %850 }
 0x309   : > { %v628_v51 = vpop.permute.xlu0 %627  ;;  %923 = vst.msk [vmem:[#allocation6 + $0xc0] sm:$0xff] %vm898_vm2, %v851_v50  ;;  %v8607_v50 = vld [vmem:[%s9783_s23 + $0x489] ss:$2 sm:$0xff] }
 0x30a   : > { %699 = vst.msk [vmem:[#allocation6 + $0xc8] sm:$0xff] %vm13686_vm0, %v628_v51  ;;  %3321 = vrot.lane.b32.xlu1 %v8857_v48, %s9697_s17  ;;  %vm13688_vm0 = vcmask 130048   ;;  %v8576_v51 = vld [vmem:[%s9783_s23 + $0x498] ss:$2 sm:$0xff] }
 0x30b   : > { %3098 = vrot.lane.b32.xlu0 %v8826_v49, %s9696_s16 }
 0x30c   : > { %v1747_v54 = vpop.permute.xlu1 %1746 }
 0x30d   : > { %v1524_v55 = vpop.permute.xlu0 %1523  ;;  %1821 = vst.msk [vmem:[#allocation6 + $0xb0] sm:$0xff] %vm1798_vm6, %v1747_v54 }
 0x30e   : > { %1597 = vst.msk [vmem:[#allocation6 + $0xb8] sm:$0xff] %vm13687_vm1, %v1524_v55  ;;  %v9595_v56 = vpop.f32.mrf.mxu0  ;;  %858 = vrot.lane.b32.xlu1 %v8511_v52, %s9685_s24  ;;  %vm13689_vm1 = vmmov %vm13688_vm0  ;;  %v8450_v52 = vld [vmem:[%s9783_s23 + $0x4c0] ss:$2 sm:$0xff] }
 0x30f   : > { %v4122_v57 = vadd.f32 %v11023_v47, %v9595_v56  ;;  %635 = vrot.lane.b32.xlu0 %v8480_v53, %s9686_s25  ;;  %v8733_v56 = vld [vmem:[%s9783_s23 + $0x461] ss:$2 sm:$0xff] }
 0x310   : > { %v4116_v58 = vpop.f32.mrf.mxu0  ;;  %v2643_v1 = vpop.permute.xlu1 %2642 }
 0x311   : > { %vm4236_vm12 = vcmp.ge.f32.partialorder %v4122_v57, 0.0  ;;  %v4268_v63 = vmul.f32 0.2, %v4122_v57  ;;  %v4117_v0 = vadd.f32 %v11023_v47, %v4116_v58  ;;  %v2420_v2 = vpop.permute.xlu0 %2419  ;;  %2719 = vst.msk [vmem:[#allocation6 + $0xa0] sm:$0xff] %vm2698_vm10, %v2643_v1 }
 0x312   : > { %2495 = vst.msk [vmem:[#allocation6 + $0xa8] sm:$0xff] %vm2473_vm9, %v2420_v2  ;;  %1754 = vrot.lane.b32.xlu1 %v8637_v60, %s13632_s10  ;;  %v8513_v2 = vld [vmem:[%s9783_s23 + $0x4b2] ss:$2 sm:$0xff] }
 0x313   : > { %v4300_v3 = vsel %vm4236_vm12, %v4122_v57, %v4268_v63  ;;  %vm4235_vm5 = vcmp.ge.f32.partialorder %v4117_v0, 0.0  ;;  %v4267_v4 = vmul.f32 0.2, %v4117_v0  ;;  %1531 = vrot.lane.b32.xlu0 %v8606_v61, %s9689_s28  ;;  %vm13690_vm12 = vcmask 490944   ;;  %v8702_v57 = vld [vmem:[%s9783_s23 + $0x470] ss:$2 sm:$0xff] }
 0x314   : > { %4389 = vst.msk [vmem:[#allocation2 + $0x99] sm:$0xff] %vm13688_vm0, %v4300_v3  ;;  %v3539_v8 = vpop.permute.xlu1 %3538  ;;  %v8859_v61 = vld [vmem:[%s9783_s23 + $0x439] ss:$2 sm:$0xff]  ;;  %v8828_v63 = vld [vmem:[%s9783_s23 + $0x448] ss:$2 sm:$0xff] }
 0x315   : > { %v4299_v7 = vsel %vm4235_vm5, %v4117_v0, %v4267_v4  ;;  %v3316_v9 = vpop.permute.xlu0 %3315  ;;  %3617 = vst.msk [vmem:[#allocation6 + $0x90] sm:$0xff] %vm13690_vm12, %v3539_v8  ;;  %vm13691_vm5 = vmmov %vm13688_vm0  ;;  %v8482_v3 = vld [vmem:[%s9783_s23 + $0x4c1] ss:$2 sm:$0xff] }
 0x316   : > { %4388 = vst.msk [vmem:[#allocation2 + $0x91] sm:$0xff] %vm13689_vm1, %v4299_v7  ;;  %2650 = vrot.lane.b32.xlu1 %v8763_v5, %s13633_s21  ;;  %vm13692_vm1 = vmmov %vm13690_vm12  ;;  %vm13693_vm12 = vcmask 31744  }
 0x317   : > { %3393 = vst.msk [vmem:[#allocation6 + $0x98] sm:$0xff] %vm3373_vm13, %v3316_v9  ;;  %2427 = vrot.lane.b32.xlu0 %v8732_v6, %s9693_s13  ;;  %v8639_v9 = vld [vmem:[%s9783_s23 + $0x48a] ss:$2 sm:$0xff] }
 0x318   : > { %v1076_v12 = vpop.permute.xlu1 %1075  ;;  %479 = vst.msk [vmem:[#allocation6 + $0xf0] sm:$0xff] %vm13693_vm12, %v8449_v37  ;;  %480 = vst.msk [vmem:[#allocation6 + $0xf8] sm:$0xff] %vm13693_vm12, %v8450_v52  ;;  %v8798_v52 = vld [vmem:[%s9783_s23 + $0x473] ss:$2 sm:$0xff] }
 0x319   : > { %v853_v13 = vpop.permute.xlu0 %852  ;;  %1148 = vst.msk [vmem:[#allocation6 + $0xc0] sm:$0xff] %vm1123_vm3, %v1076_v12 }
 0x31a   : > { %924 = vst.msk [vmem:[#allocation6 + $0xc8] sm:$0xff] %vm898_vm2, %v853_v13  ;;  %3546 = vrot.lane.b32.xlu1 %v8889_v10, %s9698_s18  ;;  %v8608_v10 = vld [vmem:[%s9783_s23 + $0x499] ss:$2 sm:$0xff] }
 0x31b   : > { %3323 = vrot.lane.b32.xlu0 %v8858_v11, %s9697_s17 }
 0x31c   : > { %v1972_v16 = vpop.permute.xlu1 %1971 }
 0x31d   : > { %v1749_v17 = vpop.permute.xlu0 %1748  ;;  %2046 = vst.msk [vmem:[#allocation6 + $0xb0] sm:$0xff] %vm2023_vm7, %v1972_v16  ;;  %v4836_v18 = vld [vmem:[#allocation2 + $0x90] ss:$2 sm:$0xff] }
 0x31e   : > { %1822 = vst.msk [vmem:[#allocation6 + $0xb8] sm:$0xff] %vm1798_vm6, %v1749_v17  ;;  %1083 = vrot.lane.b32.xlu1 %v8543_v14, %s9687_s26  ;;  %v4416_v21 = vld [vmem:[#allocation2 + $0x90] ss:$2 sm:$0xff] }
 0x31f   : > { %860 = vrot.lane.b32.xlu0 %v8512_v15, %s9685_s24  ;;  %4849 = vst.msk [vmem:[#allocation7 + $0x28] sm:$0xff] %vm13691_vm5, %v4836_v18  ;;  %vm13694_vm5 = vcmask 425344   ;;  %v8765_v17 = vld [vmem:[%s9783_s23 + $0x462] ss:$2 sm:$0xff]  ;;  %v8734_v18 = vld [vmem:[%s9783_s23 + $0x471] ss:$2 sm:$0xff] }
 0x320   : > { %v2868_v22 = vpop.permute.xlu1 %2867  ;;  %4428 = vst.msk [vmem:[#allocation7 + $0x30] sm:$0xff] %vm13688_vm0, %v4416_v21  ;;  %vm13695_vm0 = vcmask 64544  }
 0x321   : > { %v2645_v23 = vpop.permute.xlu0 %2644  ;;  %2944 = vst.msk [vmem:[#allocation6 + $0xa0] sm:$0xff] %vm2923_vm11, %v2868_v22  ;;  %v8891_v22 = vld [vmem:[%s9783_s23 + $0x43a] ss:$2 sm:$0xff] }
 0x322   : > { %2720 = vst.msk [vmem:[#allocation6 + $0xa8] sm:$0xff] %vm2698_vm10, %v2645_v23  ;;  %1979 = vrot.lane.b32.xlu1 %v8669_v19, %s9691_s30  ;;  %v8860_v23 = vld [vmem:[%s9783_s23 + $0x449] ss:$2 sm:$0xff] }
 0x323   : > { %1756 = vrot.lane.b32.xlu0 %v8638_v20, %s13632_s10 }
 0x324   : > { %v3764_v26 = vpop.permute.xlu1 %3763 }
 0x325   : > { %v3541_v27 = vpop.permute.xlu0 %3540  ;;  %3842 = vst.msk [vmem:[#allocation6 + $0x90] sm:$0xff] %vm3823_vm15, %v3764_v26  ;;  %v8545_v26 = vld [vmem:[%s9783_s23 + $0x4b3] ss:$2 sm:$0xff] }
 0x326   : > { %3618 = vst.msk [vmem:[#allocation6 + $0x98] sm:$0xff] %vm13692_vm1, %v3541_v27  ;;  %2875 = vrot.lane.b32.xlu1 %v8795_v24, %s9695_s15  ;;  %vm13696_vm1 = vcmask 195744   ;;  %v8514_v27 = vld [vmem:[%s9783_s23 + $0x4c2] ss:$2 sm:$0xff] }
 0x327   : > { %2652 = vrot.lane.b32.xlu0 %v8764_v25, %s13633_s21 }
 0x328   : > { %v1301_v30 = vpop.permute.xlu1 %1300 }
 0x329   : > { %v1078_v31 = vpop.permute.xlu0 %1077  ;;  %1373 = vst.msk [vmem:[#allocation6 + $0xc0] sm:$0xff] %vm1348_vm4, %v1301_v30  ;;  %v8671_v30 = vld [vmem:[%s9783_s23 + $0x48b] ss:$2 sm:$0xff] }
 0x32a   : > { %1149 = vst.msk [vmem:[#allocation6 + $0xc8] sm:$0xff] %vm1123_vm3, %v1078_v31  ;;  %3771 = vrot.lane.b32.xlu1 %v8921_v28, %s9699_s29  ;;  %v8640_v31 = vld [vmem:[%s9783_s23 + $0x49a] ss:$2 sm:$0xff] }
 0x32b   : > { %3548 = vrot.lane.b32.xlu0 %v8890_v29, %s9698_s18 }
 0x32c   : > { %v2197_v34 = vpop.permute.xlu1 %2196  ;;  %v3874_v36 = vld [vmem:[#allocation6 + $0x90] sm:$0xff] }
 0x32d   : > { %v1974_v35 = vpop.permute.xlu0 %1973  ;;  %2271 = vst.msk [vmem:[#allocation6 + $0xb0] sm:$0xff] %vm2248_vm8, %v2197_v34  ;;  %9605 = vmatprep.mubr.msk.f32.mxu0 %vm13631_vm14, %v3874_v36  ;;  %v8797_v34 = vld [vmem:[%s9783_s23 + $0x463] ss:$2 sm:$0xff] }
 0x32e   : > { %2047 = vst.msk [vmem:[#allocation6 + $0xb8] sm:$0xff] %vm2023_vm7, %v1974_v35  ;;  %1308 = vrot.lane.b32.xlu1 %v8575_v32, %s9688_s27  ;;  %v8766_v35 = vld [vmem:[%s9783_s23 + $0x472] ss:$2 sm:$0xff] }
 0x32f   : > { %1085 = vrot.lane.b32.xlu0 %v8544_v33, %s9687_s26 }
 0x330   : > { %v3093_v40 = vpop.permute.xlu1 %3092 }
 0x331   : > { %v2870_v41 = vpop.permute.xlu0 %2869  ;;  %3169 = vst.msk [vmem:[#allocation6 + $0xa0] sm:$0xff] %vm13694_vm5, %v3093_v40 }
 0x332   : > { %2945 = vst.msk [vmem:[#allocation6 + $0xa8] sm:$0xff] %vm2923_vm11, %v2870_v41  ;;  %2204 = vrot.lane.b32.xlu1 %v8701_v38, %s9692_s12  ;;  %v8923_v38 = vld [vmem:[%s9783_s23 + $0x43b] ss:$2 sm:$0xff] }
 0x333   : > { %1981 = vrot.lane.b32.xlu0 %v8670_v39, %s9691_s30  ;;  %v8892_v39 = vld [vmem:[%s9783_s23 + $0x44a] ss:$2 sm:$0xff] }
 0x334   : > { %v630_v44 = vpop.permute.xlu1 %629 }
 0x335   : > { %v3766_v45 = vpop.permute.xlu0 %3765  ;;  %700 = vst.msk [vmem:[#allocation6 + $0xd0] sm:$0xff] %vm13695_vm0, %v630_v44 }
 0x336   : > { %3843 = vst.msk [vmem:[#allocation6 + $0x98] sm:$0xff] %vm3823_vm15, %v3766_v45  ;;  %3100 = vrot.lane.b32.xlu1 %v8827_v42, %s9696_s16  ;;  %v8577_v42 = vld [vmem:[%s9783_s23 + $0x4d8] ss:$2 sm:$0xff] }
 0x337   : > { %2877 = vrot.lane.b32.xlu0 %v8796_v43, %s9695_s15  ;;  %v8546_v43 = vld [vmem:[%s9783_s23 + $0x4c3] ss:$2 sm:$0xff] }
 0x338   : > { %v1526_v48 = vpop.permute.xlu1 %1525 }
 0x339   : > { %v1303_v49 = vpop.permute.xlu0 %1302  ;;  %1598 = vst.msk [vmem:[#allocation6 + $0xc0] sm:$0xff] %vm13696_vm1, %v1526_v48  ;;  %v8672_v48 = vld [vmem:[%s9783_s23 + $0x49b] ss:$2 sm:$0xff] }
 0x33a   : > { %1374 = vst.msk [vmem:[#allocation6 + $0xc8] sm:$0xff] %vm1348_vm4, %v1303_v49  ;;  %637 = vrot.lane.b32.xlu1 %v8481_v46, %s9686_s25 }
 0x33b   : > { %3773 = vrot.lane.b32.xlu0 %v8922_v62, %s9699_s29  ;;  %v8703_v62 = vld [vmem:[%s9783_s23 + $0x4b0] ss:$2 sm:$0xff] }
 0x33c   : > { %v2422_v53 = vpop.permute.xlu1 %2421 }
 0x33d   : > { %v2199_v54 = vpop.permute.xlu0 %2198  ;;  %v3875_v55 = vld [vmem:[#allocation6 + $0x98] sm:$0xff]  ;;  %2496 = vst.msk [vmem:[#allocation6 + $0xb0] sm:$0xff] %vm2473_vm9, %v2422_v53 }
 0x33e   : > { %2272 = vst.msk [vmem:[#allocation6 + $0xb8] sm:$0xff] %vm2248_vm8, %v2199_v54  ;;  %9606 = vmatmul.mubr.msk.f32.gmra.mxu0 %vm13631_vm14, %v3875_v55  ;;  %1533 = vrot.lane.b32.xlu1 %v8607_v50, %s9689_s28  ;;  %v8578_v55 = vld [vmem:[%s9783_s23 + $0x4e8] ss:$2 sm:$0xff] }
 0x33f   : > { %1310 = vrot.lane.b32.xlu0 %v8576_v51, %s9688_s27  ;;  %v8829_v51 = vld [vmem:[%s9783_s23 + $0x488] ss:$2 sm:$0xff] }
 0x340   : > { %v3318_v58 = vpop.permute.xlu1 %3317 }
 0x341   : > { %v3095_v60 = vpop.permute.xlu0 %3094  ;;  %3394 = vst.msk [vmem:[#allocation6 + $0xa0] sm:$0xff] %vm3373_vm13, %v3318_v58 }
 0x342   : > { %3170 = vst.msk [vmem:[#allocation6 + $0xa8] sm:$0xff] %vm13694_vm5, %v3095_v60  ;;  %2429 = vrot.lane.b32.xlu1 %v8733_v56, %s9693_s13  ;;  %v8924_v56 = vld [vmem:[%s9783_s23 + $0x44b] ss:$2 sm:$0xff]  ;;  %v8704_v60 = vld [vmem:[%s9783_s23 + $0x4c0] ss:$2 sm:$0xff] }
 0x343   : > { %2206 = vrot.lane.b32.xlu0 %v8702_v57, %s9692_s12 }
 0x344   : > { %v855_v0 = vpop.permute.xlu1 %854 }
 0x345   : > { %v632_v1 = vpop.permute.xlu0 %631  ;;  %925 = vst.msk [vmem:[#allocation6 + $0xd0] sm:$0xff] %vm898_vm2, %v855_v0 }
 0x346   : > { %701 = vst.msk [vmem:[#allocation6 + $0xd8] sm:$0xff] %vm13695_vm0, %v632_v1  ;;  %3325 = vrot.lane.b32.xlu1 %v8859_v61, %s9697_s17  ;;  %vm13697_vm0 = vcmask 130048   ;;  %v8609_v61 = vld [vmem:[%s9783_s23 + $0x4d9] ss:$2 sm:$0xff] }
 0x347   : > { %3102 = vrot.lane.b32.xlu0 %v8828_v63, %s9696_s16 }
 0x348   : > { %v1751_v4 = vpop.permute.xlu1 %1750 }
 0x349   : > { %v1528_v5 = vpop.permute.xlu0 %1527  ;;  %1823 = vst.msk [vmem:[#allocation6 + $0xc0] sm:$0xff] %vm1798_vm6, %v1751_v4 }
 0x34a   : > { %1599 = vst.msk [vmem:[#allocation6 + $0xc8] sm:$0xff] %vm13696_vm1, %v1528_v5  ;;  %v9598_v6 = vpop.f32.mrf.mxu0  ;;  %862 = vrot.lane.b32.xlu1 %v8513_v2, %s9685_s24  ;;  %vm13698_vm1 = vmmov %vm13697_vm0  ;;  %v8830_v2 = vld [vmem:[%s9783_s23 + $0x498] ss:$2 sm:$0xff] }
 0x34b   : > { %v4132_v7 = vadd.f32 %v11023_v47, %v9598_v6  ;;  %639 = vrot.lane.b32.xlu0 %v8482_v3, %s9686_s25  ;;  %v8735_v3 = vld [vmem:[%s9783_s23 + $0x4b1] ss:$2 sm:$0xff]  ;;  %s9702_s25 = smov 80  }
 0x34c   : > { %v4126_v8 = vpop.f32.mrf.mxu0  ;;  %v2647_v13 = vpop.permute.xlu1 %2646  ;;  %v8610_v6 = vld [vmem:[%s9783_s23 + $0x4e9] ss:$2 sm:$0xff] }
 0x34d   : > { %vm4238_vm12 = vcmp.ge.f32.partialorder %v4132_v7, 0.0  ;;  %v4270_v11 = vmul.f32 0.2, %v4132_v7  ;;  %v4127_v12 = vadd.f32 %v11023_v47, %v4126_v8  ;;  %v2424_v14 = vpop.permute.xlu0 %2423  ;;  %2721 = vst.msk [vmem:[#allocation6 + $0xb0] sm:$0xff] %vm2698_vm10, %v2647_v13 }
 0x34e   : > { %2497 = vst.msk [vmem:[#allocation6 + $0xb8] sm:$0xff] %vm2473_vm9, %v2424_v14  ;;  %1758 = vrot.lane.b32.xlu1 %v8639_v9, %s13632_s10 }
 0x34f   : > { %v4302_v15 = vsel %vm4238_vm12, %v4132_v7, %v4270_v11  ;;  %vm4237_vm5 = vcmp.ge.f32.partialorder %v4127_v12, 0.0  ;;  %v4269_v16 = vmul.f32 0.2, %v4127_v12  ;;  %1535 = vrot.lane.b32.xlu0 %v8608_v10, %s9689_s28  ;;  %vm13699_vm12 = vcmask 490944   ;;  %v8861_v7 = vld [vmem:[%s9783_s23 + $0x489] ss:$2 sm:$0xff] }
 0x350   : > { %4391 = vst.msk [vmem:[#allocation2 + $0xb1] sm:$0xff] %vm13697_vm0, %v4302_v15  ;;  %v3543_v20 = vpop.permute.xlu1 %3542  ;;  %vm13701_vm0 = vcmask 425344   ;;  %v8736_v10 = vld [vmem:[%s9783_s23 + $0x4c1] ss:$2 sm:$0xff]  ;;  %v8641_v11 = vld [vmem:[%s9783_s23 + $0x4da] ss:$2 sm:$0xff] }
 0x351   : > { %v4301_v19 = vsel %vm4237_vm5, %v4127_v12, %v4269_v16  ;;  %v3320_v21 = vpop.permute.xlu0 %3319  ;;  %3619 = vst.msk [vmem:[#allocation6 + $0xa0] sm:$0xff] %vm13699_vm12, %v3543_v20  ;;  %vm13700_vm5 = vmmov %vm13699_vm12  ;;  %vm13703_vm12 = vcmask 195744  }
 0x352   : > { %4390 = vst.msk [vmem:[#allocation2 + $0xa9] sm:$0xff] %vm13698_vm1, %v4301_v19  ;;  %2654 = vrot.lane.b32.xlu1 %v8765_v17, %s13633_s21  ;;  %vm13702_vm1 = vcmask 64544   ;;  %v8862_v17 = vld [vmem:[%s9783_s23 + $0x499] ss:$2 sm:$0xff] }
 0x353   : > { %3395 = vst.msk [vmem:[#allocation6 + $0xa8] sm:$0xff] %vm3373_vm13, %v3320_v21  ;;  %2431 = vrot.lane.b32.xlu0 %v8734_v18, %s9693_s13  ;;  %v8767_v18 = vld [vmem:[%s9783_s23 + $0x4b2] ss:$2 sm:$0xff] }
 0x354   : > { %v1080_v24 = vpop.permute.xlu1 %1079 }
 0x355   : > { %v857_v25 = vpop.permute.xlu0 %856  ;;  %1150 = vst.msk [vmem:[#allocation6 + $0xd0] sm:$0xff] %vm1123_vm3, %v1080_v24 }
 0x356   : > { %926 = vst.msk [vmem:[#allocation6 + $0xd8] sm:$0xff] %vm898_vm2, %v857_v25  ;;  %3550 = vrot.lane.b32.xlu1 %v8891_v22, %s9698_s18  ;;  %v8642_v25 = vld [vmem:[%s9783_s23 + $0x4ea] ss:$2 sm:$0xff] }
 0x357   : > { %3327 = vrot.lane.b32.xlu0 %v8860_v23, %s9697_s17 }
 0x358   : > { %v1976_v28 = vpop.permute.xlu1 %1975 }
 0x359   : > { %v1753_v29 = vpop.permute.xlu0 %1752  ;;  %2048 = vst.msk [vmem:[#allocation6 + $0xc0] sm:$0xff] %vm2023_vm7, %v1976_v28 }
 0x35a   : > { %1824 = vst.msk [vmem:[#allocation6 + $0xc8] sm:$0xff] %vm1798_vm6, %v1753_v29  ;;  %1087 = vrot.lane.b32.xlu1 %v8545_v26, %s9687_s26  ;;  %v8893_v26 = vld [vmem:[%s9783_s23 + $0x48a] ss:$2 sm:$0xff] }
 0x35b   : > { %864 = vrot.lane.b32.xlu0 %v8514_v27, %s9685_s24  ;;  %v8768_v29 = vld [vmem:[%s9783_s23 + $0x4c2] ss:$2 sm:$0xff]  ;;  %s9703_s24 = smov 96  }
 0x35c   : > { %v2872_v32 = vpop.permute.xlu1 %2871 }
 0x35d   : > { %v2649_v33 = vpop.permute.xlu0 %2648  ;;  %2946 = vst.msk [vmem:[#allocation6 + $0xb0] sm:$0xff] %vm2923_vm11, %v2872_v32 }
 0x35e   : > { %2722 = vst.msk [vmem:[#allocation6 + $0xb8] sm:$0xff] %vm2698_vm10, %v2649_v33  ;;  %1983 = vrot.lane.b32.xlu1 %v8671_v30, %s9691_s30  ;;  %v8673_v30 = vld [vmem:[%s9783_s23 + $0x4db] ss:$2 sm:$0xff]  ;;  %v8894_v33 = vld [vmem:[%s9783_s23 + $0x49a] ss:$2 sm:$0xff] }
 0x35f   : > { %1760 = vrot.lane.b32.xlu0 %v8640_v31, %s13632_s10 }
 0x360   : > { %v3768_v36 = vpop.permute.xlu1 %3767 }
 0x361   : > { %v3545_v37 = vpop.permute.xlu0 %3544  ;;  %3844 = vst.msk [vmem:[#allocation6 + $0xa0] sm:$0xff] %vm3823_vm15, %v3768_v36 }
 0x362   : > { %3620 = vst.msk [vmem:[#allocation6 + $0xa8] sm:$0xff] %vm13700_vm5, %v3545_v37  ;;  %2879 = vrot.lane.b32.xlu1 %v8797_v34, %s9695_s15  ;;  %vm13704_vm5 = vmmov %vm13701_vm0  ;;  %v8799_v34 = vld [vmem:[%s9783_s23 + $0x4b3] ss:$2 sm:$0xff] }
 0x363   : > { %2656 = vrot.lane.b32.xlu0 %v8766_v35, %s13633_s21 }
 0x364   : > { %v1305_v40 = vpop.permute.xlu1 %1304 }
 0x365   : > { %v1082_v41 = vpop.permute.xlu0 %1081  ;;  %1375 = vst.msk [vmem:[#allocation6 + $0xd0] sm:$0xff] %vm1348_vm4, %v1305_v40  ;;  %v8925_v40 = vld [vmem:[%s9783_s23 + $0x48b] ss:$2 sm:$0xff] }
 0x366   : > { %1151 = vst.msk [vmem:[#allocation6 + $0xd8] sm:$0xff] %vm1123_vm3, %v1082_v41  ;;  %3775 = vrot.lane.b32.xlu1 %v8923_v38, %s9699_s29 }
 0x367   : > { %3552 = vrot.lane.b32.xlu0 %v8892_v39, %s9698_s18  ;;  %v8674_v39 = vld [vmem:[%s9783_s23 + $0x4eb] ss:$2 sm:$0xff] }
 0x368   : > { %v2201_v44 = vpop.permute.xlu1 %2200  ;;  %v3876_v46 = vld [vmem:[#allocation6 + $0xa0] sm:$0xff] }
 0x369   : > { %v1978_v45 = vpop.permute.xlu0 %1977  ;;  %2273 = vst.msk [vmem:[#allocation6 + $0xc0] sm:$0xff] %vm2248_vm8, %v2201_v44  ;;  %9608 = vmatprep.mubr.msk.f32.mxu0 %vm13631_vm14, %v3876_v46  ;;  %v8705_v44 = vld [vmem:[%s9783_s23 + $0x500] ss:$2 sm:$0xff] }
 0x36a   : > { %2049 = vst.msk [vmem:[#allocation6 + $0xc8] sm:$0xff] %vm2023_vm7, %v1978_v45  ;;  %1312 = vrot.lane.b32.xlu1 %v8577_v42, %s9688_s27 }
 0x36b   : > { %1089 = vrot.lane.b32.xlu0 %v8546_v43, %s9687_s26  ;;  %v8800_v43 = vld [vmem:[%s9783_s23 + $0x4c3] ss:$2 sm:$0xff]  ;;  %s9704_s26 = smov 112  }
 0x36c   : > { %v3097_v49 = vpop.permute.xlu1 %3096 }
 0x36d   : > { %v2874_v50 = vpop.permute.xlu0 %2873  ;;  %3171 = vst.msk [vmem:[#allocation6 + $0xb0] sm:$0xff] %vm13701_vm0, %v3097_v49  ;;  %vm13705_vm0 = vmmov %vm13702_vm1 }
 0x36e   : > { %2947 = vst.msk [vmem:[#allocation6 + $0xb8] sm:$0xff] %vm2923_vm11, %v2874_v50  ;;  %2208 = vrot.lane.b32.xlu1 %v8703_v62, %s9692_s12  ;;  %v8926_v62 = vld [vmem:[%s9783_s23 + $0x49b] ss:$2 sm:$0xff] }
 0x36f   : > { %1985 = vrot.lane.b32.xlu0 %v8672_v48, %s9691_s30  ;;  %v8831_v48 = vld [vmem:[%s9783_s23 + $0x4d8] ss:$2 sm:$0xff] }
 0x370   : > { %v634_v53 = vpop.permute.xlu1 %633 }
 0x371   : > { %v3770_v54 = vpop.permute.xlu0 %3769  ;;  %702 = vst.msk [vmem:[#allocation6 + $0xe0] sm:$0xff] %vm13702_vm1, %v634_v53  ;;  %vm13706_vm1 = vmmov %vm13703_vm12 }
 0x372   : > { %3845 = vst.msk [vmem:[#allocation6 + $0xa8] sm:$0xff] %vm3823_vm15, %v3770_v54  ;;  %3104 = vrot.lane.b32.xlu1 %v8829_v51, %s9696_s16  ;;  %v8737_v51 = vld [vmem:[%s9783_s23 + $0x501] ss:$2 sm:$0xff] }
 0x373   : > { %2881 = vrot.lane.b32.xlu0 %v8798_v52, %s9695_s15  ;;  %v8706_v52 = vld [vmem:[%s9783_s23 + $0x510] ss:$2 sm:$0xff] }
 0x374   : > { %v1530_v57 = vpop.permute.xlu1 %1529 }
 0x375   : > { %v1307_v58 = vpop.permute.xlu0 %1306  ;;  %1600 = vst.msk [vmem:[#allocation6 + $0xd0] sm:$0xff] %vm13703_vm12, %v1530_v57  ;;  %v8832_v57 = vld [vmem:[%s9783_s23 + $0x4e8] ss:$2 sm:$0xff] }
 0x376   : > { %1376 = vst.msk [vmem:[#allocation6 + $0xd8] sm:$0xff] %vm1348_vm4, %v1307_v58  ;;  %1314 = vrot.lane.b32.xlu1 %v8578_v55, %s9688_s27 }
 0x377   : > { %3777 = vrot.lane.b32.xlu0 %v8924_v56, %s9699_s29  ;;  %v8863_v56 = vld [vmem:[%s9783_s23 + $0x4d9] ss:$2 sm:$0xff] }
 0x378   : > { %v2426_v63 = vpop.permute.xlu1 %2425 }
 0x379   : > { %v2203_v0 = vpop.permute.xlu0 %2202  ;;  %v3877_v1 = vld [vmem:[#allocation6 + $0xa8] sm:$0xff]  ;;  %2498 = vst.msk [vmem:[#allocation6 + $0xc0] sm:$0xff] %vm2473_vm9, %v2426_v63 }
 0x37a   : > { %2274 = vst.msk [vmem:[#allocation6 + $0xc8] sm:$0xff] %vm2248_vm8, %v2203_v0  ;;  %9609 = vmatmul.mubr.msk.f32.gmra.mxu0 %vm13631_vm14, %v3877_v1  ;;  %2210 = vrot.lane.b32.xlu1 %v8704_v60, %s9692_s12  ;;  %v8738_v63 = vld [vmem:[%s9783_s23 + $0x511] ss:$2 sm:$0xff] }
 0x37b   : > { %1537 = vrot.lane.b32.xlu0 %v8609_v61, %s9689_s28  ;;  %v8769_v61 = vld [vmem:[%s9783_s23 + $0x502] ss:$2 sm:$0xff] }
 0x37c   : > { %v3322_v4 = vpop.permute.xlu1 %3321 }
 0x37d   : > { %v3099_v5 = vpop.permute.xlu0 %3098  ;;  %3396 = vst.msk [vmem:[#allocation6 + $0xb0] sm:$0xff] %vm3373_vm13, %v3322_v4 }
 0x37e   : > { %3172 = vst.msk [vmem:[#allocation6 + $0xb8] sm:$0xff] %vm13704_vm5, %v3099_v5  ;;  %3106 = vrot.lane.b32.xlu1 %v8830_v2, %s9696_s16  ;;  %v8895_v2 = vld [vmem:[%s9783_s23 + $0x4da] ss:$2 sm:$0xff] }
 0x37f   : > { %2433 = vrot.lane.b32.xlu0 %v8735_v3, %s9693_s13  ;;  %v8864_v3 = vld [vmem:[%s9783_s23 + $0x4e9] ss:$2 sm:$0xff] }
 0x380   : > { %v859_v8 = vpop.permute.xlu1 %858 }
 0x381   : > { %v636_v9 = vpop.permute.xlu0 %635  ;;  %927 = vst.msk [vmem:[#allocation6 + $0xe0] sm:$0xff] %vm898_vm2, %v859_v8 }
 0x382   : > { %703 = vst.msk [vmem:[#allocation6 + $0xe8] sm:$0xff] %vm13705_vm0, %v636_v9  ;;  %1539 = vrot.lane.b32.xlu1 %v8610_v6, %s9689_s28  ;;  %vm13707_vm0 = vcmask 130048   ;;  %v8801_v6 = vld [vmem:[%s9783_s23 + $0x503] ss:$2 sm:$0xff] }
 0x383   : > { %3329 = vrot.lane.b32.xlu0 %v8861_v7, %s9697_s17  ;;  %v8770_v7 = vld [vmem:[%s9783_s23 + $0x512] ss:$2 sm:$0xff] }
 0x384   : > { %v1755_v12 = vpop.permute.xlu1 %1754 }
 0x385   : > { %v1532_v13 = vpop.permute.xlu0 %1531  ;;  %1825 = vst.msk [vmem:[#allocation6 + $0xd0] sm:$0xff] %vm1798_vm6, %v1755_v12  ;;  %v8896_v12 = vld [vmem:[%s9783_s23 + $0x4ea] ss:$2 sm:$0xff] }
 0x386   : > { %1601 = vst.msk [vmem:[#allocation6 + $0xd8] sm:$0xff] %vm13706_vm1, %v1532_v13  ;;  %v9601_v14 = vpop.f32.mrf.mxu0  ;;  %2435 = vrot.lane.b32.xlu1 %v8736_v10, %s9693_s13  ;;  %vm13708_vm1 = vmmov %vm13707_vm0 }
 0x387   : > { %v4142_v15 = vadd.f32 %v11023_v47, %v9601_v14  ;;  %1762 = vrot.lane.b32.xlu0 %v8641_v11, %s13632_s10  ;;  %v8927_v11 = vld [vmem:[%s9783_s23 + $0x4db] ss:$2 sm:$0xff] }
 0x388   : > { %v4136_v16 = vpop.f32.mrf.mxu0  ;;  %v2651_v21 = vpop.permute.xlu1 %2650 }
 0x389   : > { %vm4240_vm12 = vcmp.ge.f32.partialorder %v4142_v15, 0.0  ;;  %v4272_v19 = vmul.f32 0.2, %v4142_v15  ;;  %v4137_v20 = vadd.f32 %v11023_v47, %v4136_v16  ;;  %v2428_v22 = vpop.permute.xlu0 %2427  ;;  %2723 = vst.msk [vmem:[#allocation6 + $0xc0] sm:$0xff] %vm2698_vm10, %v2651_v21  ;;  %v8802_v16 = vld [vmem:[%s9783_s23 + $0x513] ss:$2 sm:$0xff] }
 0x38a   : > { %2499 = vst.msk [vmem:[#allocation6 + $0xc8] sm:$0xff] %vm2473_vm9, %v2428_v22  ;;  %3331 = vrot.lane.b32.xlu1 %v8862_v17, %s9697_s17 }
 0x38b   : > { %v4304_v23 = vsel %vm4240_vm12, %v4142_v15, %v4272_v19  ;;  %vm4239_vm5 = vcmp.ge.f32.partialorder %v4137_v20, 0.0  ;;  %v4271_v24 = vmul.f32 0.2, %v4137_v20  ;;  %2658 = vrot.lane.b32.xlu0 %v8767_v18, %s13633_s21  ;;  %vm13709_vm12 = vcmask 490944   ;;  %v8833_v15 = vld [vmem:[%s9783_s23 + $0x528] ss:$2 sm:$0xff] }
 0x38c   : > { %4393 = vst.msk [vmem:[#allocation2 + $0xc9] sm:$0xff] %vm13707_vm0, %v4304_v23  ;;  %v3547_v27 = vpop.permute.xlu1 %3546  ;;  %v8834_v19 = vld [vmem:[%s9783_s23 + $0x538] ss:$2 sm:$0xff] }
 0x38d   : > { %v4303_v47 = vsel %vm4239_vm5, %v4137_v20, %v4271_v24  ;;  %v3324_v28 = vpop.permute.xlu0 %3323  ;;  %3621 = vst.msk [vmem:[#allocation6 + $0xb0] sm:$0xff] %vm13709_vm12, %v3547_v27  ;;  %vm13710_vm5 = vmmov %vm13707_vm0  ;;  %v8928_v20 = vld [vmem:[%s9783_s23 + $0x4eb] ss:$2 sm:$0xff]  ;;  %v11424_v24 = vld [vmem:[%s13611_s2] ss:$0 sm:$0xff] }
 0x38e   : > { %4392 = vst.msk [vmem:[#allocation2 + $0xc1] sm:$0xff] %vm13708_vm1, %v4303_v47  ;;  %1764 = vrot.lane.b32.xlu1 %v8642_v25, %s13632_s10  ;;  %vm13711_vm1 = vmmov %vm13709_vm12  ;;  %vm13712_vm12 = vcmask 425344   ;;  %v8866_v27 = vld [vmem:[%s9783_s23 + $0x539] ss:$2 sm:$0xff] }
 0x38f   : > { %3397 = vst.msk [vmem:[#allocation6 + $0xb8] sm:$0xff] %vm3373_vm13, %v3324_v28  ;;  %3554 = vrot.lane.b32.xlu0 %v8893_v26, %s9698_s18  ;;  %v4410_v26 = vld [vmem:[#allocation2] ss:$2 sm:$0xff]  ;;  %v8865_v28 = vld [vmem:[%s9783_s23 + $0x529] ss:$2 sm:$0xff] }
 0x390   : > { %v1084_v31 = vpop.permute.xlu1 %1083 }
 0x391   : > { %v861_v32 = vpop.permute.xlu0 %860  ;;  %1152 = vst.msk [vmem:[#allocation6 + $0xe0] sm:$0xff] %vm1123_vm3, %v1084_v31 }
 0x392   : > { %928 = vst.msk [vmem:[#allocation6 + $0xe8] sm:$0xff] %vm898_vm2, %v861_v32  ;;  %2660 = vrot.lane.b32.xlu1 %v8768_v29, %s13633_s21 }
 0x393   : > { %1987 = vrot.lane.b32.xlu0 %v8673_v30, %s9691_s30 }
 0x394   : > { %v1980_v35 = vpop.permute.xlu1 %1979 }
 0x395   : > { %v1757_v36 = vpop.permute.xlu0 %1756  ;;  %2050 = vst.msk [vmem:[#allocation6 + $0xd0] sm:$0xff] %vm2023_vm7, %v1980_v35  ;;  %v4838_v37 = vld [vmem:[#allocation2 + $0xc0] ss:$2 sm:$0xff] }
 0x396   : > { %1826 = vst.msk [vmem:[#allocation6 + $0xd8] sm:$0xff] %vm1798_vm6, %v1757_v36  ;;  %3556 = vrot.lane.b32.xlu1 %v8894_v33, %s9698_s18  ;;  %v4418_v38 = vld [vmem:[#allocation2 + $0xc0] ss:$2 sm:$0xff] }
 0x397   : > { %2883 = vrot.lane.b32.xlu0 %v8799_v34, %s9695_s15  ;;  %4850 = vst.msk [vmem:[#allocation7 + $0x38] sm:$0xff] %vm13710_vm5, %v4838_v37  ;;  %vm13713_vm5 = vcmask 64544   ;;  %v8898_v35 = vld [vmem:[%s9783_s23 + $0x53a] ss:$2 sm:$0xff]  ;;  %v8897_v36 = vld [vmem:[%s9783_s23 + $0x52a] ss:$2 sm:$0xff] }
 0x398   : > { %4429 = vst.msk [vmem:[#allocation7 + $0x40] sm:$0xff] %vm13707_vm0, %v4418_v38  ;;  %v2876_v41 = vpop.permute.xlu1 %2875  ;;  %vm13714_vm0 = vcmask 195744  }
 0x399   : > { %v2653_v42 = vpop.permute.xlu0 %2652  ;;  %2948 = vst.msk [vmem:[#allocation6 + $0xc0] sm:$0xff] %vm2923_vm11, %v2876_v41  ;;  %v8929_v41 = vld [vmem:[%s9783_s23 + $0x52b] ss:$2 sm:$0xff] }
 0x39a   : > { %2724 = vst.msk [vmem:[#allocation6 + $0xc8] sm:$0xff] %vm2698_vm10, %v2653_v42  ;;  %1989 = vrot.lane.b32.xlu1 %v8674_v39, %s9691_s30 }
 0x39b   : > { %3779 = vrot.lane.b32.xlu0 %v8925_v40, %s9699_s29  ;;  %v8930_v40 = vld [vmem:[%s9783_s23 + $0x53b] ss:$2 sm:$0xff] }
 0x39c   : > { %v3772_v45 = vpop.permute.xlu1 %3771 }
 0x39d   : > { %v3549_v46 = vpop.permute.xlu0 %3548  ;;  %3846 = vst.msk [vmem:[#allocation6 + $0xb0] sm:$0xff] %vm3823_vm15, %v3772_v45 }
 0x39e   : > { %3622 = vst.msk [vmem:[#allocation6 + $0xb8] sm:$0xff] %vm13711_vm1, %v3549_v46  ;;  %2885 = vrot.lane.b32.xlu1 %v8800_v43, %s9695_s15  ;;  %vm13715_vm1 = vmmov %vm13712_vm12 }
 0x39f   : > { %2212 = vrot.lane.b32.xlu0 %v8705_v44, %s9692_s12  ;;  %v4434_v44 = vld [vmem:[#allocation2 + $0x1] ss:$2 sm:$0xff] }
 0x3a0   : > { %v1309_v49 = vpop.permute.xlu1 %1308 }
 0x3a1   : > { %v1086_v50 = vpop.permute.xlu0 %1085  ;;  %1377 = vst.msk [vmem:[#allocation6 + $0xe0] sm:$0xff] %vm1348_vm4, %v1309_v49  ;;  %v5278_v49 = vld [vmem:[%s13612_s3 + $0x78] sm:$0xff] }
 0x3a2   : > { %1153 = vst.msk [vmem:[#allocation6 + $0xe8] sm:$0xff] %vm1123_vm3, %v1086_v50  ;;  %3781 = vrot.lane.b32.xlu1 %v8926_v62, %s9699_s29  ;;  %v4856_v62 = vld [vmem:[#allocation2 + $0x31] ss:$2 sm:$0xff]  ;;  %v4491_v50 = vld [vmem:[#allocation2 + $0x2] ss:$2 sm:$0xff] }
 0x3a3   : > { %3108 = vrot.lane.b32.xlu0 %v8831_v48, %s9696_s16  ;;  %v5294_v48 = vld [vmem:[%s13612_s3 + $0xf8] sm:$0xff] }
 0x3a4   : > { %v2205_v53 = vpop.permute.xlu1 %2204  ;;  %v3878_v55 = vld [vmem:[#allocation6 + $0xb0] sm:$0xff]  ;;  %9010 = vmatprep.subr.mxu1 %v5294_v48 }
 0x3a5   : > { %v1982_v54 = vpop.permute.xlu0 %1981  ;;  %2275 = vst.msk [vmem:[#allocation6 + $0xd0] sm:$0xff] %vm2248_vm8, %v2205_v53  ;;  %9611 = vmatprep.mubr.msk.f32.mxu0 %vm13631_vm14, %v3878_v55  ;;  %9011 = vmatpush3.msra.mxu1 %v5278_v49  ;;  %v4912_v55 = vld [vmem:[#allocation2 + $0x32] ss:$2 sm:$0xff] }
 0x3a6   : > { %2051 = vst.msk [vmem:[#allocation6 + $0xd8] sm:$0xff] %vm2023_vm7, %v1982_v54  ;;  %2437 = vrot.lane.b32.xlu1 %v8737_v51, %s9693_s13  ;;  %v5293_v51 = vld [vmem:[%s13612_s3 + $0xf0] sm:$0xff] }
 0x3a7   : > { %2214 = vrot.lane.b32.xlu0 %v8706_v52, %s9692_s12  ;;  %v5277_v54 = vld [vmem:[%s13612_s3 + $0x70] sm:$0xff]  ;;  %9012 = vmatprep.subr.mxu1 %v5293_v51  ;;  %v4775_v51 = vld [vmem:[#allocation2 + $0x1b] ss:$2 sm:$0xff] }
 0x3a8   : > { %v3101_v58 = vpop.permute.xlu1 %3100  ;;  %9013 = vmatpush3.msra.mxu1 %v5277_v54  ;;  %v5265_v49 = vld [vmem:[%s13612_s3 + $0x10] sm:$0xff] }
 0x3a9   : > { %v2878_v60 = vpop.permute.xlu0 %2877  ;;  %3173 = vst.msk [vmem:[#allocation6 + $0xc0] sm:$0xff] %vm13712_vm12, %v3101_v58  ;;  %vm13716_vm12 = vmmov %vm13713_vm5  ;;  %v4548_v58 = vld [vmem:[#allocation2 + $0x3] ss:$2 sm:$0xff] }
 0x3aa   : > { %2949 = vst.msk [vmem:[#allocation6 + $0xc8] sm:$0xff] %vm2923_vm11, %v2878_v60  ;;  %3333 = vrot.lane.b32.xlu1 %v8863_v56, %s9697_s17  ;;  %v5292_v56 = vld [vmem:[%s13612_s3 + $0xe8] sm:$0xff] }
 0x3ab   : > { %3110 = vrot.lane.b32.xlu0 %v8832_v57, %s9696_s16  ;;  %v5276_v57 = vld [vmem:[%s13612_s3 + $0x68] sm:$0xff]  ;;  %9014 = vmatprep.subr.mxu1 %v5292_v56  ;;  %v5279_v56 = vld [vmem:[%s13612_s3 + $0x80] sm:$0xff] }
 0x3ac   : > { %v638_v0 = vpop.permute.xlu1 %637  ;;  %9015 = vmatpush3.msra.mxu1 %v5276_v57  ;;  %v5026_v57 = vld [vmem:[#allocation2 + $0x78] ss:$2 sm:$0xff] }
 0x3ad   : > { %v3774_v1 = vpop.permute.xlu0 %3773  ;;  %704 = vst.msk [vmem:[#allocation6 + $0xf0] sm:$0xff] %vm13713_vm5, %v638_v0  ;;  %vm13717_vm5 = vmmov %vm13714_vm0  ;;  %v4968_v0 = vld [vmem:[#allocation2 + $0x33] ss:$2 sm:$0xff] }
 0x3ae   : > { %3847 = vst.msk [vmem:[#allocation6 + $0xb8] sm:$0xff] %vm3823_vm15, %v3774_v1  ;;  %2662 = vrot.lane.b32.xlu1 %v8769_v61, %s13633_s21  ;;  %v5275_v1 = vld [vmem:[%s13612_s3 + $0x60] sm:$0xff] }
 0x3af   : > { %2439 = vrot.lane.b32.xlu0 %v8738_v63, %s9693_s13  ;;  %v5291_v63 = vld [vmem:[%s13612_s3 + $0xe0] sm:$0xff] }
 0x3b0   : > { %v1534_v4 = vpop.permute.xlu1 %1533  ;;  %9016 = vmatprep.subr.mxu1 %v5291_v63 }
 0x3b1   : > { %v1311_v5 = vpop.permute.xlu0 %1310  ;;  %1602 = vst.msk [vmem:[#allocation6 + $0xe0] sm:$0xff] %vm13714_vm0, %v1534_v4  ;;  %vm13718_vm0 = vcmask 130048   ;;  %9017 = vmatpush3.msra.mxu1 %v5275_v1  ;;  %v4860_v1 = vld [vmem:[#allocation2 + $0x91] ss:$2 sm:$0xff] }
 0x3b2   : > { %1378 = vst.msk [vmem:[#allocation6 + $0xe8] sm:$0xff] %vm1348_vm4, %v1311_v5  ;;  %3558 = vrot.lane.b32.xlu1 %v8895_v2, %s9698_s18  ;;  %v5290_v2 = vld [vmem:[%s13612_s3 + $0xd8] sm:$0xff] }
 0x3b3   : > { %3335 = vrot.lane.b32.xlu0 %v8864_v3, %s9697_s17  ;;  %4425 = vst.msk [vmem:[#allocation7] sm:$0xff] %vm13718_vm0, %v4410_v26  ;;  %v5274_v5 = vld [vmem:[%s13612_s3 + $0x58] sm:$0xff]  ;;  %9018 = vmatprep.subr.mxu1 %v5290_v2 }
 0x3b4   : > { %v2430_v8 = vpop.permute.xlu1 %2429  ;;  %9019 = vmatpush3.msra.mxu1 %v5274_v5  ;;  %v5082_v2 = vld [vmem:[#allocation2 + $0x79] ss:$2 sm:$0xff] }
 0x3b5   : > { %v2207_v9 = vpop.permute.xlu0 %2206  ;;  %v3879_v10 = vld [vmem:[#allocation6 + $0xb8] sm:$0xff]  ;;  %2500 = vst.msk [vmem:[#allocation6 + $0xd0] sm:$0xff] %vm2473_vm9, %v2430_v8  ;;  %v5289_v8 = vld [vmem:[%s13612_s3 + $0xd0] sm:$0xff] }
 0x3b6   : > { %2276 = vst.msk [vmem:[#allocation6 + $0xd8] sm:$0xff] %vm2248_vm8, %v2207_v9  ;;  %9612 = vmatmul.mubr.msk.f32.gmra.mxu0 %vm13631_vm14, %v3879_v10  ;;  %2887 = vrot.lane.b32.xlu1 %v8801_v6, %s9695_s15  ;;  %vm13720_vm14 = vcmask 490944   ;;  %v5024_v6 = vld [vmem:[#allocation2 + $0x48] ss:$2 sm:$0xff] }
 0x3b7   : > { %2664 = vrot.lane.b32.xlu0 %v8770_v7, %s13633_s21  ;;  %v4604_v7 = vld [vmem:[#allocation2 + $0x18] ss:$2 sm:$0xff]  ;;  %v5273_v9 = vld [vmem:[%s13612_s3 + $0x50] sm:$0xff]  ;;  %9020 = vmatprep.subr.mxu1 %v5289_v8 }
 0x3b8   : > { %v3326_v13 = vpop.permute.xlu1 %3325  ;;  %9021 = vmatpush3.msra.mxu1 %v5273_v9  ;;  %v4438_v9 = vld [vmem:[#allocation2 + $0x61] ss:$2 sm:$0xff] }
 0x3b9   : > { %v3103_v14 = vpop.permute.xlu0 %3102  ;;  %3398 = vst.msk [vmem:[#allocation6 + $0xc0] sm:$0xff] %vm3373_vm13, %v3326_v13  ;;  %v5288_v13 = vld [vmem:[%s13612_s3 + $0xc8] sm:$0xff] }
 0x3ba   : > { %3174 = vst.msk [vmem:[#allocation6 + $0xc8] sm:$0xff] %vm13715_vm1, %v3103_v14  ;;  %3783 = vrot.lane.b32.xlu1 %v8927_v11, %s9699_s29  ;;  %v4858_v14 = vld [vmem:[#allocation2 + $0x61] ss:$2 sm:$0xff]  ;;  %9022 = vmatprep.subr.mxu1 %v5288_v13 }
 0x3bb   : > { %3560 = vrot.lane.b32.xlu0 %v8896_v12, %s9698_s18 }
 0x3bc   : > { %v863_v17 = vpop.permute.xlu1 %862 }
 0x3bd   : > { %v640_v18 = vpop.permute.xlu0 %639  ;;  %929 = vst.msk [vmem:[#allocation6 + $0xf0] sm:$0xff] %vm898_vm2, %v863_v17  ;;  %v5287_v17 = vld [vmem:[%s13612_s3 + $0xc0] sm:$0xff] }
 0x3be   : > { %705 = vst.msk [vmem:[#allocation6 + $0xf8] sm:$0xff] %vm13716_vm12, %v640_v18  ;;  %3112 = vrot.lane.b32.xlu1 %v8833_v15, %s9696_s16  ;;  %v5080_v15 = vld [vmem:[#allocation2 + $0x49] ss:$2 sm:$0xff] }
 0x3bf   : > { %2889 = vrot.lane.b32.xlu0 %v8802_v16, %s9695_s15  ;;  %v5272_v16 = vld [vmem:[%s13612_s3 + $0x48] sm:$0xff] }
 0x3c0   : > { %v1759_v21 = vpop.permute.xlu1 %1758  ;;  %9023 = vmatpush3.msra.mxu1 %v5272_v16  ;;  %v4916_v16 = vld [vmem:[#allocation2 + $0x92] ss:$2 sm:$0xff] }
 0x3c1   : > { %v1536_v22 = vpop.permute.xlu0 %1535  ;;  %1827 = vst.msk [vmem:[#allocation6 + $0xe0] sm:$0xff] %vm1798_vm6, %v1759_v21  ;;  %v4436_v21 = vld [vmem:[#allocation2 + $0x31] ss:$2 sm:$0xff]  ;;  %9024 = vmatprep.subr.mxu1 %v5287_v17  ;;  %v5138_v17 = vld [vmem:[#allocation2 + $0x7a] ss:$2 sm:$0xff] }
 0x3c2   : > { %1603 = vst.msk [vmem:[#allocation6 + $0xe8] sm:$0xff] %vm13717_vm5, %v1536_v22  ;;  %v9604_v23 = vpop.f32.mrf.mxu0  ;;  %3114 = vrot.lane.b32.xlu1 %v8834_v19, %s9696_s16  ;;  %vm13719_vm5 = vmmov %vm13718_vm0  ;;  %v4661_v22 = vld [vmem:[#allocation2 + $0x19] ss:$2 sm:$0xff] }
 0x3c3   : > { %v4152_v25 = vadd.f32 %v11424_v24, %v9604_v23  ;;  %3785 = vrot.lane.b32.xlu0 %v8928_v20, %s9699_s29  ;;  %v5271_v20 = vld [vmem:[%s13612_s3 + $0x40] sm:$0xff]  ;;  %v5286_v23 = vld [vmem:[%s13612_s3 + $0xb8] sm:$0xff] }
 0x3c4   : > { %v4146_v47 = vpop.f32.mrf.mxu0  ;;  %v2655_v31 = vpop.permute.xlu1 %2654  ;;  %9025 = vmatpush3.msra.mxu1 %v5271_v20  ;;  %v4495_v20 = vld [vmem:[#allocation2 + $0x62] ss:$2 sm:$0xff] }
 0x3c5   : > { %vm4242_vm1 = vcmp.ge.f32.partialorder %v4152_v25, 0.0  ;;  %v4274_v29 = vmul.f32 0.2, %v4152_v25  ;;  %v4147_v30 = vadd.f32 %v11424_v24, %v4146_v47  ;;  %v2432_v32 = vpop.permute.xlu0 %2431  ;;  %2725 = vst.msk [vmem:[#allocation6 + $0xd0] sm:$0xff] %vm2698_vm10, %v2655_v31  ;;  %9026 = vmatprep.subr.mxu1 %v5286_v23  ;;  %v5284_v31 = vld [vmem:[%s13612_s3 + $0xa8] sm:$0xff] }
 0x3c6   : > { %2501 = vst.msk [vmem:[#allocation6 + $0xd8] sm:$0xff] %vm2473_vm9, %v2432_v32  ;;  %3339 = vrot.lane.b32.xlu1 %v8866_v27, %s9697_s17  ;;  %v5285_v27 = vld [vmem:[%s13612_s3 + $0xb0] sm:$0xff] }
 0x3c7   : > { %v4306_v33 = vsel %vm4242_vm1, %v4152_v25, %v4274_v29  ;;  %vm4241_vm12 = vcmp.ge.f32.partialorder %v4147_v30, 0.0  ;;  %v4273_v34 = vmul.f32 0.2, %v4147_v30  ;;  %3337 = vrot.lane.b32.xlu0 %v8865_v28, %s9697_s17  ;;  %v5270_v25 = vld [vmem:[%s13612_s3 + $0x38] sm:$0xff]  ;;  %v4914_v28 = vld [vmem:[#allocation2 + $0x62] ss:$2 sm:$0xff] }
 0x3c8   : > { %4395 = vst.msk [vmem:[#allocation2 + $0xe1] sm:$0xff] %vm13719_vm5, %v4306_v33  ;;  %v3551_v38 = vpop.permute.xlu1 %3550  ;;  %v5136_v29 = vld [vmem:[#allocation2 + $0x4a] ss:$2 sm:$0xff]  ;;  %9027 = vmatpush3.msra.mxu1 %v5270_v25  ;;  %v4972_v25 = vld [vmem:[#allocation2 + $0x93] ss:$2 sm:$0xff] }
 0x3c9   : > { %v4305_v37 = vsel %vm4241_vm12, %v4147_v30, %v4273_v34  ;;  %v3328_v39 = vpop.permute.xlu0 %3327  ;;  %3623 = vst.msk [vmem:[#allocation6 + $0xc0] sm:$0xff] %vm13720_vm14, %v3551_v38  ;;  %v5269_v30 = vld [vmem:[%s13612_s3 + $0x30] sm:$0xff]  ;;  %9028 = vmatprep.subr.mxu1 %v5285_v27  ;;  %v5268_v34 = vld [vmem:[%s13612_s3 + $0x28] sm:$0xff]  ;;  %v5267_v38 = vld [vmem:[%s13612_s3 + $0x20] sm:$0xff] }
 0x3ca   : > { %4394 = vst.msk [vmem:[#allocation2 + $0xd9] sm:$0xff] %vm13718_vm0, %v4305_v37  ;;  %3564 = vrot.lane.b32.xlu1 %v8898_v35, %s9698_s18  ;;  %9029 = vmatpush3.msra.mxu1 %v5269_v30  ;;  %v4493_v35 = vld [vmem:[#allocation2 + $0x32] ss:$2 sm:$0xff]  ;;  %v4552_v30 = vld [vmem:[#allocation2 + $0x63] ss:$2 sm:$0xff] }
 0x3cb   : > { %3399 = vst.msk [vmem:[#allocation6 + $0xc8] sm:$0xff] %vm3373_vm13, %v3328_v39  ;;  %3562 = vrot.lane.b32.xlu0 %v8897_v36, %s9698_s18  ;;  %s9701_s18 = smov 64   ;;  %v4718_v36 = vld [vmem:[#allocation2 + $0x1a] ss:$2 sm:$0xff]  ;;  %9030 = vmatprep.subr.mxu1 %v5284_v31  ;;  %v4777_v31 = vld [vmem:[#allocation2 + $0x4b] ss:$2 sm:$0xff] }
 0x3cc   : > { %v1088_v42 = vpop.permute.xlu1 %1087  ;;  %v5283_v37 = vld [vmem:[%s13612_s3 + $0xa0] sm:$0xff]  ;;  %9031 = vmatpush3.msra.mxu1 %v5268_v34 }
 0x3cd   : > { %v865_v43 = vpop.permute.xlu0 %864  ;;  %1154 = vst.msk [vmem:[#allocation6 + $0xf0] sm:$0xff] %vm1123_vm3, %v1088_v42  ;;  %9032 = vmatprep.subr.mxu1 %v5283_v37  ;;  %v5282_v42 = vld [vmem:[%s13612_s3 + $0x98] sm:$0xff] }
 0x3ce   : > { %930 = vst.msk [vmem:[#allocation6 + $0xf8] sm:$0xff] %vm898_vm2, %v865_v43  ;;  %3789 = vrot.lane.b32.xlu1 %v8930_v40, %s9699_s29  ;;  %vm13721_vm2 = vmmov %vm13720_vm14  ;;  %vm13723_vm14 = vcmask 425344   ;;  %v4970_v43 = vld [vmem:[#allocation2 + $0x63] ss:$2 sm:$0xff]  ;;  %9033 = vmatpush3.msra.mxu1 %v5267_v38 }
 0x3cf   : > { %3787 = vrot.lane.b32.xlu0 %v8929_v41, %s9699_s29  ;;  %vm13725_vm1 = vmmov %vm13723_vm14  ;;  %9034 = vmatprep.subr.mxu1 %v5282_v42 }
 0x3d0   : > { %v1984_v45 = vpop.permute.xlu1 %1983 }
 0x3d1   : > { %v1761_v46 = vpop.permute.xlu0 %1760  ;;  %2052 = vst.msk [vmem:[#allocation6 + $0xe0] sm:$0xff] %vm2023_vm7, %v1984_v45  ;;  %v5266_v45 = vld [vmem:[%s13612_s3 + $0x18] sm:$0xff] }
 0x3d2   : > { %1828 = vst.msk [vmem:[#allocation6 + $0xe8] sm:$0xff] %vm1798_vm6, %v1761_v46  ;;  %4457 = vrot.lane.b32.xlu1 %v4434_v44, %s9688_s27  ;;  %v5192_v44 = vld [vmem:[#allocation2 + $0x4b] ss:$2 sm:$0xff]  ;;  %9035 = vmatpush3.msra.mxu1 %v5266_v45 }
 0x3d3   : > { %4879 = vrot.lane.b32.xlu0 %v4856_v62, %s9688_s27  ;;  %v5281_v46 = vld [vmem:[%s13612_s3 + $0x90] sm:$0xff]  ;;  %v4665_v45 = vld [vmem:[#allocation2 + $0x79] ss:$2 sm:$0xff] }
 0x3d4   : > { %v2880_v52 = vpop.permute.xlu1 %2879  ;;  %9036 = vmatprep.subr.mxu1 %v5281_v46 }
 0x3d5   : > { %v2657_v53 = vpop.permute.xlu0 %2656  ;;  %2950 = vst.msk [vmem:[#allocation6 + $0xd0] sm:$0xff] %vm2923_vm11, %v2880_v52  ;;  %v5280_v52 = vld [vmem:[%s13612_s3 + $0x88] sm:$0xff]  ;;  %9037 = vmatpush3.msra.mxu1 %v5265_v49 }
 0x3d6   : > { %2726 = vst.msk [vmem:[#allocation6 + $0xd8] sm:$0xff] %vm2698_vm10, %v2657_v53  ;;  %4514 = vrot.lane.b32.xlu1 %v4491_v50, %s9692_s12  ;;  %v4550_v50 = vld [vmem:[#allocation2 + $0x33] ss:$2 sm:$0xff]  ;;  %v5264_v53 = vld [vmem:[%s13612_s3 + $0x8] sm:$0xff]  ;;  %9038 = vmatprep.subr.mxu1 %v5280_v52  ;;  %v4497_v52 = vld [vmem:[#allocation2 + $0x92] ss:$2 sm:$0xff] }
 0x3d7   : > { %4935 = vrot.lane.b32.xlu0 %v4912_v55, %s9692_s12  ;;  %9039 = vmatpush3.msra.mxu1 %v5264_v53  ;;  %v5140_v49 = vld [vmem:[#allocation2 + $0xaa] ss:$2 sm:$0xff]  ;;  %v4722_v53 = vld [vmem:[#allocation2 + $0x7a] ss:$2 sm:$0xff] }
 0x3d8   : > { %v3776_v60 = vpop.permute.xlu1 %3775  ;;  %9040 = vmatprep.subr.mxu1 %v5279_v56  ;;  %v4974_v56 = vld [vmem:[#allocation2 + $0xc3] ss:$2 sm:$0xff] }
 0x3d9   : > { %v3553_v61 = vpop.permute.xlu0 %3552  ;;  %3848 = vst.msk [vmem:[#allocation6 + $0xc0] sm:$0xff] %vm3823_vm15, %v3776_v60  ;;  %v5263_v60 = vld [vmem:[%s13612_s3] sm:$0xff] }
 0x3da   : > { %3624 = vst.msk [vmem:[#allocation6 + $0xc8] sm:$0xff] %vm13721_vm2, %v3553_v61  ;;  %4571 = vrot.lane.b32.xlu1 %v4548_v58, %s9696_s16  ;;  %v4606_v58 = vld [vmem:[#allocation2 + $0x48] ss:$2 sm:$0xff]  ;;  %9041 = vmatpush3.msra.mxu1 %v5263_v60 }
 0x3db   : > { %4991 = vrot.lane.b32.xlu0 %v4968_v0, %s9696_s16 }
 0x3dc   : > { %v1313_v3 = vpop.permute.xlu1 %1312 }
 0x3dd   : > { %v1090_v4 = vpop.permute.xlu0 %1089  ;;  %1379 = vst.msk [vmem:[#allocation6 + $0xf0] sm:$0xff] %vm1348_vm4, %v1313_v3 }
 0x3de   : > { %1155 = vst.msk [vmem:[#allocation6 + $0xf8] sm:$0xff] %vm1123_vm3, %v1090_v4  ;;  %4627 = vrot.lane.b32.xlu1 %v4604_v7, %s9701_s18  ;;  %vm13722_vm3 = vcmask 523264  }
 0x3df   : > { %5047 = vrot.lane.b32.xlu0 %v5024_v6, %s9701_s18  ;;  %vm13726_vm12 = vmmov %vm13722_vm3 }
 0x3e0   : > { %v2209_v10 = vpop.permute.xlu1 %2208  ;;  %v3880_v12 = vld [vmem:[#allocation6 + $0xc0] sm:$0xff] }
 0x3e1   : > { %v1986_v11 = vpop.permute.xlu0 %1985  ;;  %2277 = vst.msk [vmem:[#allocation6 + $0xe0] sm:$0xff] %vm2248_vm8, %v2209_v10  ;;  %9614 = vmatprep.mubr.msk.f32.mxu0 %vm13722_vm3, %v3880_v12  ;;  %v4663_v10 = vld [vmem:[#allocation2 + $0x49] ss:$2 sm:$0xff] }
 0x3e2   : > { %2053 = vst.msk [vmem:[#allocation6 + $0xe8] sm:$0xff] %vm2023_vm7, %v1986_v11  ;;  %5103 = vrot.lane.b32.xlu1 %v5080_v15, %s9702_s25 }
 0x3e3   : > { %4881 = vrot.lane.b32.xlu0 %v4858_v14, %s9688_s27 }
 0x3e4   : > { %v3105_v18 = vpop.permute.xlu1 %3104 }
 0x3e5   : > { %v2882_v19 = vpop.permute.xlu0 %2881  ;;  %3175 = vst.msk [vmem:[#allocation6 + $0xd0] sm:$0xff] %vm13723_vm14, %v3105_v18  ;;  %vm13728_vm14 = vcmask 130048  }
 0x3e6   : > { %2951 = vst.msk [vmem:[#allocation6 + $0xd8] sm:$0xff] %vm2923_vm11, %v2882_v19  ;;  %4684 = vrot.lane.b32.xlu1 %v4661_v22, %s9702_s25 }
 0x3e7   : > { %4459 = vrot.lane.b32.xlu0 %v4436_v21, %s9688_s27  ;;  %v4720_v21 = vld [vmem:[#allocation2 + $0x4a] ss:$2 sm:$0xff] }
 0x3e8   : > { %v1315_v26 = vpop.permute.xlu1 %1314 }
 0x3e9   : > { %v3778_v47 = vpop.permute.xlu0 %3777  ;;  %1380 = vst.msk [vmem:[#allocation6 + $0xf8] sm:$0xff] %vm1348_vm4, %v1315_v26  ;;  %vm13724_vm4 = vcmask 195744   ;;  %v5194_v26 = vld [vmem:[#allocation2 + $0x7b] ss:$2 sm:$0xff] }
 0x3ea   : > { %3849 = vst.msk [vmem:[#allocation6 + $0xc8] sm:$0xff] %vm3823_vm15, %v3778_v47  ;;  %5159 = vrot.lane.b32.xlu1 %v5136_v29, %s9703_s24  ;;  %vm13727_vm5 = vmmov %vm13724_vm4 }
 0x3eb   : > { %4937 = vrot.lane.b32.xlu0 %v4914_v28, %s9692_s12 }
 0x3ec   : > { %v2211_v32 = vpop.permute.xlu1 %2210 }
 0x3ed   : > { %v1538_v33 = vpop.permute.xlu0 %1537  ;;  %2278 = vst.msk [vmem:[#allocation6 + $0xe8] sm:$0xff] %vm2248_vm8, %v2211_v32 }
 0x3ee   : > { %1604 = vst.msk [vmem:[#allocation6 + $0xf0] sm:$0xff] %vm13724_vm4, %v1538_v33  ;;  %4741 = vrot.lane.b32.xlu1 %v4718_v36, %s9703_s24  ;;  %vm13729_vm4 = vmmov %vm13728_vm14  ;;  %v4608_v36 = vld [vmem:[#allocation2 + $0x78] ss:$2 sm:$0xff] }
 0x3ef   : > { %4516 = vrot.lane.b32.xlu0 %v4493_v35, %s9692_s12  ;;  %v5028_v35 = vld [vmem:[#allocation2 + $0xa8] ss:$2 sm:$0xff] }
 0x3f0   : > { %v3107_v39 = vpop.permute.xlu1 %3106 }
 0x3f1   : > { %v2434_v40 = vpop.permute.xlu0 %2433  ;;  %v3881_v41 = vld [vmem:[#allocation6 + $0xc8] sm:$0xff]  ;;  %3176 = vst.msk [vmem:[#allocation6 + $0xd8] sm:$0xff] %vm13725_vm1, %v3107_v39  ;;  %vm13731_vm1 = vmmov %vm13729_vm4  ;;  %v4862_v39 = vld [vmem:[#allocation2 + $0xc1] ss:$2 sm:$0xff] }
 0x3f2   : > { %2502 = vst.msk [vmem:[#allocation6 + $0xe0] sm:$0xff] %vm2473_vm9, %v2434_v40  ;;  %9615 = vmatmul.mubr.msk.f32.gmra.mxu0 %vm13726_vm12, %v3881_v41  ;;  %5215 = vrot.lane.b32.xlu1 %v5192_v44, %s9704_s26  ;;  %vm13732_vm12 = vmmov %vm13731_vm1  ;;  %v5084_v40 = vld [vmem:[#allocation2 + $0xa9] ss:$2 sm:$0xff] }
 0x3f3   : > { %4993 = vrot.lane.b32.xlu0 %v4970_v43, %s9696_s16  ;;  %v4440_v44 = vld [vmem:[#allocation2 + $0x91] ss:$2 sm:$0xff] }
 0x3f4   : > { %v1540_v62 = vpop.permute.xlu1 %1539 }
 0x3f5   : > { %v3330_v48 = vpop.permute.xlu0 %3329  ;;  %1605 = vst.msk [vmem:[#allocation6 + $0xf8] sm:$0xff] %vm13727_vm5, %v1540_v62  ;;  %vm13734_vm5 = vcmask 523264  }
 0x3f6   : > { %3400 = vst.msk [vmem:[#allocation6 + $0xd0] sm:$0xff] %vm3373_vm13, %v3330_v48  ;;  %4798 = vrot.lane.b32.xlu1 %v4775_v51, %s9704_s26  ;;  %v4918_v48 = vld [vmem:[#allocation2 + $0xc2] ss:$2 sm:$0xff] }
 0x3f7   : > { %4573 = vrot.lane.b32.xlu0 %v4550_v50, %s9696_s16 }
 0x3f8   : > { %v2436_v54 = vpop.permute.xlu1 %2435 }
 0x3f9   : > { %v1763_v55 = vpop.permute.xlu0 %1762  ;;  %2503 = vst.msk [vmem:[#allocation6 + $0xe8] sm:$0xff] %vm2473_vm9, %v2436_v54 }
 0x3fa   : > { %1829 = vst.msk [vmem:[#allocation6 + $0xf0] sm:$0xff] %vm1798_vm6, %v1763_v55  ;;  %4629 = vrot.lane.b32.xlu1 %v4606_v58, %s9701_s18 }
 0x3fb   : > { %5049 = vrot.lane.b32.xlu0 %v5026_v57, %s9701_s18  ;;  %v5196_v57 = vld [vmem:[#allocation2 + $0xab] ss:$2 sm:$0xff] }
 0x3fc   : > { %v3332_v61 = vpop.permute.xlu1 %3331 }
 0x3fd   : > { %v2659_v63 = vpop.permute.xlu0 %2658  ;;  %3401 = vst.msk [vmem:[#allocation6 + $0xd8] sm:$0xff] %vm3373_vm13, %v3332_v61  ;;  %v4554_v61 = vld [vmem:[#allocation2 + $0x93] ss:$2 sm:$0xff] }
 0x3fe   : > { %2727 = vst.msk [vmem:[#allocation6 + $0xe0] sm:$0xff] %vm2698_vm10, %v2659_v63  ;;  %v9607_v0 = vpop.f32.mrf.mxu0  ;;  %5105 = vrot.lane.b32.xlu1 %v5082_v2, %s9702_s25  ;;  %v4779_v63 = vld [vmem:[#allocation2 + $0x7b] ss:$2 sm:$0xff]  ;;  %v5030_v2 = vld [vmem:[#allocation2 + $0xd8] ss:$2 sm:$0xff] }
 0x3ff   : > { %v4162_v3 = vadd.f32 %v11424_v24, %v9607_v0  ;;  %4883 = vrot.lane.b32.xlu0 %v4860_v1, %s9688_s27 }
 0x400   : > { %v4156_v4 = vpop.f32.mrf.mxu0  ;;  %v1765_v7 = vpop.permute.xlu1 %1764 }
 0x401   : > { %vm4244_vm0 = vcmp.ge.f32.partialorder %v4162_v3, 0.0  ;;  %v4276_v5 = vmul.f32 0.2, %v4162_v3  ;;  %v4157_v6 = vadd.f32 %v11424_v24, %v4156_v4  ;;  %v3555_v8 = vpop.permute.xlu0 %3554  ;;  %1830 = vst.msk [vmem:[#allocation6 + $0xf8] sm:$0xff] %vm1798_vm6, %v1765_v7  ;;  %vm13730_vm6 = vmmov %vm13721_vm2 }
 0x402   : > { %3625 = vst.msk [vmem:[#allocation6 + $0xd0] sm:$0xff] %vm13721_vm2, %v3555_v8  ;;  %4686 = vrot.lane.b32.xlu1 %v4663_v10, %s9702_s25  ;;  %vm13736_vm2 = vmmov %vm13734_vm5  ;;  %v5086_v8 = vld [vmem:[#allocation2 + $0xd9] ss:$2 sm:$0xff] }
 0x403   : > { %v4308_v11 = vsel %vm4244_vm0, %v4162_v3, %v4276_v5  ;;  %vm4243_vm3 = vcmp.ge.f32.partialorder %v4157_v6, 0.0  ;;  %v4275_v12 = vmul.f32 0.2, %v4157_v6  ;;  %4461 = vrot.lane.b32.xlu0 %v4438_v9, %s9688_s27  ;;  %v4610_v3 = vld [vmem:[#allocation2 + $0xa8] ss:$2 sm:$0xff] }
 0x404   : > { %4397 = vst.msk [vmem:[#allocation2 + $0xf9] sm:$0xff] %vm13728_vm14, %v4308_v11  ;;  %v2661_v14 = vpop.permute.xlu1 %2660  ;;  %vm13741_vm14 = vmmov %vm13736_vm2 }
 0x405   : > { %v4307_v13 = vsel %vm4243_vm3, %v4157_v6, %v4275_v12  ;;  %v1988_v15 = vpop.permute.xlu0 %1987  ;;  %2728 = vst.msk [vmem:[#allocation6 + $0xe8] sm:$0xff] %vm2698_vm10, %v2661_v14  ;;  %v4442_v12 = vld [vmem:[#allocation2 + $0xc1] ss:$2 sm:$0xff] }
 0x406   : > { %4396 = vst.msk [vmem:[#allocation2 + $0xf1] sm:$0xff] %vm13729_vm4, %v4307_v13  ;;  %5161 = vrot.lane.b32.xlu1 %v5138_v17, %s9703_s24  ;;  %v4667_v13 = vld [vmem:[#allocation2 + $0xa9] ss:$2 sm:$0xff]  ;;  %vm13742_vm4 = vmmov %vm13730_vm6 }
 0x407   : > { %2054 = vst.msk [vmem:[#allocation6 + $0xf0] sm:$0xff] %vm2023_vm7, %v1988_v15  ;;  %4939 = vrot.lane.b32.xlu0 %v4916_v16, %s9692_s12 }
 0x408   : > { %v3557_v18 = vpop.permute.xlu1 %3556 }
 0x409   : > { %v2884_v19 = vpop.permute.xlu0 %2883  ;;  %3626 = vst.msk [vmem:[#allocation6 + $0xd8] sm:$0xff] %vm13730_vm6, %v3557_v18 }
 0x40a   : > { %2952 = vst.msk [vmem:[#allocation6 + $0xe0] sm:$0xff] %vm2923_vm11, %v2884_v19  ;;  %4743 = vrot.lane.b32.xlu1 %v4720_v21, %s9703_s24 }
 0x40b   : > { %4518 = vrot.lane.b32.xlu0 %v4495_v20, %s9692_s12 }
 0x40c   : > { %v1990_v22 = vpop.permute.xlu1 %1989 }
 0x40d   : > { %v3780_v23 = vpop.permute.xlu0 %3779  ;;  %2055 = vst.msk [vmem:[#allocation6 + $0xf8] sm:$0xff] %vm2023_vm7, %v1990_v22  ;;  %v4840_v47 = vld [vmem:[#allocation2 + $0xf0] ss:$2 sm:$0xff]  ;;  %vm13733_vm7 = vcmask 425344   ;;  %v4864_v7 = vld [vmem:[#allocation2 + $0xf1] ss:$2 sm:$0xff] }
 0x40e   : > { %3850 = vst.msk [vmem:[#allocation6 + $0xd0] sm:$0xff] %vm3823_vm15, %v3780_v23  ;;  %5217 = vrot.lane.b32.xlu1 %v5194_v26, %s9704_s26  ;;  %v4420_v27 = vld [vmem:[#allocation2 + $0xf0] ss:$2 sm:$0xff]  ;;  %vm13735_vm0 = vmmov %vm13733_vm7 }
 0x40f   : > { %4995 = vrot.lane.b32.xlu0 %v4972_v25, %s9696_s16  ;;  %4851 = vst.msk [vmem:[#allocation7 + $0x48] sm:$0xff] %vm13731_vm1, %v4840_v47  ;;  %vm13740_vm3 = vmmov %vm13735_vm0  ;;  %v4920_v21 = vld [vmem:[#allocation2 + $0xf2] ss:$2 sm:$0xff] }
 0x410   : > { %4430 = vst.msk [vmem:[#allocation7 + $0x50] sm:$0xff] %vm13732_vm12, %v4420_v27  ;;  %v2886_v28 = vpop.permute.xlu1 %2885  ;;  %v5142_v22 = vld [vmem:[#allocation2 + $0xda] ss:$2 sm:$0xff] }
 0x411   : > { %v2213_v29 = vpop.permute.xlu0 %2212  ;;  %2953 = vst.msk [vmem:[#allocation6 + $0xe8] sm:$0xff] %vm2923_vm11, %v2886_v28  ;;  %v4499_v28 = vld [vmem:[#allocation2 + $0xc2] ss:$2 sm:$0xff] }
 0x412   : > { %2279 = vst.msk [vmem:[#allocation6 + $0xf0] sm:$0xff] %vm2248_vm8, %v2213_v29  ;;  %4800 = vrot.lane.b32.xlu1 %v4777_v31, %s9704_s26  ;;  %v4724_v29 = vld [vmem:[#allocation2 + $0xaa] ss:$2 sm:$0xff] }
 0x413   : > { %4575 = vrot.lane.b32.xlu0 %v4552_v30, %s9696_s16 }
 0x414   : > { %v3782_v32 = vpop.permute.xlu1 %3781 }
 0x415   : > { %v3109_v33 = vpop.permute.xlu0 %3108  ;;  %v3882_v34 = vld [vmem:[#allocation6 + $0xd0] sm:$0xff]  ;;  %3851 = vst.msk [vmem:[#allocation6 + $0xd8] sm:$0xff] %vm3823_vm15, %v3782_v32 }
 0x416   : > { %3177 = vst.msk [vmem:[#allocation6 + $0xe0] sm:$0xff] %vm13733_vm7, %v3109_v33  ;;  %9617 = vmatprep.mubr.msk.f32.mxu0 %vm13734_vm5, %v3882_v34  ;;  %4631 = vrot.lane.b32.xlu1 %v4608_v36, %s9701_s18  ;;  %vm13745_vm7 = vmmov %vm13732_vm12  ;;  %vm4481_vm5 = vcmask 261248   ;;  %v4976_v32 = vld [vmem:[#allocation2 + $0xf3] ss:$2 sm:$0xff] }
 0x417   : > { %5051 = vrot.lane.b32.xlu0 %v5028_v35, %s9701_s18  ;;  %v5198_v33 = vld [vmem:[#allocation2 + $0xdb] ss:$2 sm:$0xff] }
 0x418   : > { %v2438_v37 = vpop.permute.xlu1 %2437 }
 0x419   : > { %v2215_v38 = vpop.permute.xlu0 %2214  ;;  %2504 = vst.msk [vmem:[#allocation6 + $0xf0] sm:$0xff] %vm2473_vm9, %v2438_v37 }
 0x41a   : > { %2280 = vst.msk [vmem:[#allocation6 + $0xf8] sm:$0xff] %vm2248_vm8, %v2215_v38  ;;  %5107 = vrot.lane.b32.xlu1 %v5084_v40, %s9702_s25  ;;  %vm13737_vm8 = vmmov %vm13730_vm6  ;;  %v4556_v38 = vld [vmem:[#allocation2 + $0xc3] ss:$2 sm:$0xff] }
 0x41b   : > { %4885 = vrot.lane.b32.xlu0 %v4862_v39, %s9688_s27  ;;  %v4781_v39 = vld [vmem:[#allocation2 + $0xab] ss:$2 sm:$0xff] }
 0x41c   : > { %v3334_v41 = vpop.permute.xlu1 %3333  ;;  %v3883_v43 = vld [vmem:[#allocation6 + $0xd8] sm:$0xff] }
 0x41d   : > { %v3111_v42 = vpop.permute.xlu0 %3110  ;;  %3402 = vst.msk [vmem:[#allocation6 + $0xe0] sm:$0xff] %vm3373_vm13, %v3334_v41  ;;  %9618 = vmatmul.mubr.msk.f32.gmra.mxu0 %vm13736_vm2, %v3883_v43  ;;  %v4612_v43 = vld [vmem:[#allocation2 + $0xd8] ss:$2 sm:$0xff] }
 0x41e   : > { %3178 = vst.msk [vmem:[#allocation6 + $0xe8] sm:$0xff] %vm13735_vm0, %v3111_v42  ;;  %4688 = vrot.lane.b32.xlu1 %v4665_v45, %s9702_s25 }
 0x41f   : > { %4463 = vrot.lane.b32.xlu0 %v4440_v44, %s9688_s27 }
 0x420   : > { %v2663_v46 = vpop.permute.xlu1 %2662 }
 0x421   : > { %v2440_v62 = vpop.permute.xlu0 %2439  ;;  %2729 = vst.msk [vmem:[#allocation6 + $0xf0] sm:$0xff] %vm2698_vm10, %v2663_v46 }
 0x422   : > { %2505 = vst.msk [vmem:[#allocation6 + $0xf8] sm:$0xff] %vm2473_vm9, %v2440_v62  ;;  %5163 = vrot.lane.b32.xlu1 %v5140_v49, %s9703_s24  ;;  %vm13738_vm9 = vmmov %vm13730_vm6  ;;  %v4669_v49 = vld [vmem:[#allocation2 + $0xd9] ss:$2 sm:$0xff] }
 0x423   : > { %4941 = vrot.lane.b32.xlu0 %v4918_v48, %s9692_s12  ;;  %vm13744_vm6 = vmmov %vm13736_vm2 }
 0x424   : > { %v3559_v50 = vpop.permute.xlu1 %3558 }
 0x425   : > { %v3336_v51 = vpop.permute.xlu0 %3335  ;;  %3627 = vst.msk [vmem:[#allocation6 + $0xe0] sm:$0xff] %vm13737_vm8, %v3559_v50  ;;  %vm4595_vm8 = vcmask 523648  }
 0x426   : > { %3403 = vst.msk [vmem:[#allocation6 + $0xe8] sm:$0xff] %vm3373_vm13, %v3336_v51  ;;  %4745 = vrot.lane.b32.xlu1 %v4722_v53, %s9703_s24 }
 0x427   : > { %4520 = vrot.lane.b32.xlu0 %v4497_v52, %s9692_s12 }
 0x428   : > { %v2888_v54 = vpop.permute.xlu1 %2887 }
 0x429   : > { %v2665_v55 = vpop.permute.xlu0 %2664  ;;  %2954 = vst.msk [vmem:[#allocation6 + $0xf0] sm:$0xff] %vm2923_vm11, %v2888_v54 }
 0x42a   : > { %2730 = vst.msk [vmem:[#allocation6 + $0xf8] sm:$0xff] %vm2698_vm10, %v2665_v55  ;;  %5219 = vrot.lane.b32.xlu1 %v5196_v57, %s9704_s26  ;;  %vm13739_vm10 = vmmov %vm13735_vm0  ;;  %v4726_v55 = vld [vmem:[#allocation2 + $0xda] ss:$2 sm:$0xff] }
 0x42b   : > { %4997 = vrot.lane.b32.xlu0 %v4974_v56, %s9696_s16  ;;  %vm13746_vm0 = vmmov %vm13736_vm2 }
 0x42c   : > { %v3784_v58 = vpop.permute.xlu1 %3783  ;;  %vm13747_vm2 = vmmov %vm13746_vm0 }
 0x42d   : > { %v3561_v60 = vpop.permute.xlu0 %3560  ;;  %3852 = vst.msk [vmem:[#allocation6 + $0xe0] sm:$0xff] %vm3823_vm15, %v3784_v58 }
 0x42e   : > { %3628 = vst.msk [vmem:[#allocation6 + $0xe8] sm:$0xff] %vm13738_vm9, %v3561_v60  ;;  %4802 = vrot.lane.b32.xlu1 %v4779_v63, %s9704_s26  ;;  %vm4651_vm9 = vcmask 654848   ;;  %v4783_v63 = vld [vmem:[#allocation2 + $0xdb] ss:$2 sm:$0xff] }
 0x42f   : > { %4577 = vrot.lane.b32.xlu0 %v4554_v61, %s9696_s16 }
 0x430   : > { %v3113_v0 = vpop.permute.xlu1 %3112 }
 0x431   : > { %v2890_v1 = vpop.permute.xlu0 %2889  ;;  %3179 = vst.msk [vmem:[#allocation6 + $0xf0] sm:$0xff] %vm13739_vm10, %v3113_v0  ;;  %vm4708_vm10 = vcmask 786048  }
 0x432   : > { %2955 = vst.msk [vmem:[#allocation6 + $0xf8] sm:$0xff] %vm2923_vm11, %v2890_v1  ;;  %4633 = vrot.lane.b32.xlu1 %v4610_v3, %s9701_s18 }
 0x433   : > { %5053 = vrot.lane.b32.xlu0 %v5030_v2, %s9701_s18 }
 0x434   : > { %v3115_v4 = vpop.permute.xlu1 %3114  ;;  %v3884_v6 = vld [vmem:[#allocation6 + $0xe0] sm:$0xff] }
 0x435   : > { %v3786_v5 = vpop.permute.xlu0 %3785  ;;  %3180 = vst.msk [vmem:[#allocation6 + $0xf8] sm:$0xff] %vm13740_vm3, %v3115_v4  ;;  %9620 = vmatprep.mubr.msk.f32.mxu0 %vm13741_vm14, %v3884_v6  ;;  %vm4765_vm3 = vcmask 917248   ;;  %vm4822_vm14 = vcmask 1048448  }
 0x436   : > { %3853 = vst.msk [vmem:[#allocation6 + $0xe8] sm:$0xff] %vm3823_vm15, %v3786_v5  ;;  %5109 = vrot.lane.b32.xlu1 %v5086_v8, %s9702_s25 }
 0x437   : > { %4887 = vrot.lane.b32.xlu0 %v4864_v7, %s9688_s27 }
 0x438   : > { %v3340_v9 = vpop.permute.xlu1 %3339 }
 0x439   : > { %v3338_v10 = vpop.permute.xlu0 %3337  ;;  %3405 = vst.msk [vmem:[#allocation6 + $0xf8] sm:$0xff] %vm3373_vm13, %v3340_v9 }
 0x43a   : > { %3404 = vst.msk [vmem:[#allocation6 + $0xf0] sm:$0xff] %vm3373_vm13, %v3338_v10  ;;  %v9610_v11 = vpop.f32.mrf.mxu0  ;;  %4690 = vrot.lane.b32.xlu1 %v4667_v13, %s9702_s25  ;;  %vm13743_vm13 = vmmov %vm13742_vm4 }
 0x43b   : > { %v4172_v14 = vadd.f32 %v11424_v24, %v9610_v11  ;;  %4465 = vrot.lane.b32.xlu0 %v4442_v12, %s9688_s27 }
 0x43c   : > { %v4166_v15 = vpop.f32.mrf.mxu0  ;;  %v3565_v18 = vpop.permute.xlu1 %3564 }
 0x43d   : > { %vm4246_vm11 = vcmp.ge.f32.partialorder %v4172_v14, 0.0  ;;  %v4278_v16 = vmul.f32 0.2, %v4172_v14  ;;  %v4167_v17 = vadd.f32 %v11424_v24, %v4166_v15  ;;  %v3563_v19 = vpop.permute.xlu0 %3562  ;;  %v3885_v20 = vld [vmem:[#allocation6 + $0xe8] sm:$0xff]  ;;  %3630 = vst.msk [vmem:[#allocation6 + $0xf8] sm:$0xff] %vm13742_vm4, %v3565_v18 }
 0x43e   : > { %3629 = vst.msk [vmem:[#allocation6 + $0xf0] sm:$0xff] %vm13743_vm13, %v3563_v19  ;;  %9621 = vmatmul.mubr.msk.f32.gmra.mxu0 %vm13744_vm6, %v3885_v20  ;;  %5165 = vrot.lane.b32.xlu1 %v5142_v22, %s9703_s24  ;;  %vm13748_vm13 = vmmov %vm13745_vm7 }
 0x43f   : > { %v4310_v23 = vsel %vm4246_vm11, %v4172_v14, %v4278_v16  ;;  %vm4245_vm1 = vcmp.ge.f32.partialorder %v4167_v17, 0.0  ;;  %v4277_v25 = vmul.f32 0.2, %v4167_v17  ;;  %4943 = vrot.lane.b32.xlu0 %v4920_v21, %s9692_s12  ;;  %vm13749_vm6 = vmmov %vm13745_vm7 }
 0x440   : > { %4399 = vst.msk [vmem:[#allocation2 + $0x111] sm:$0xff] %vm13732_vm12, %v4310_v23  ;;  %v3790_v47 = vpop.permute.xlu1 %3789 }
 0x441   : > { %v4309_v26 = vsel %vm4245_vm1, %v4167_v17, %v4277_v25  ;;  %v3788_v27 = vpop.permute.xlu0 %3787  ;;  %3855 = vst.msk [vmem:[#allocation6 + $0xf8] sm:$0xff] %vm3823_vm15, %v3790_v47  ;;  %vm13750_vm1 = vmmov %vm13749_vm6 }
 0x442   : > { %4398 = vst.msk [vmem:[#allocation2 + $0x109] sm:$0xff] %vm13745_vm7, %v4309_v26  ;;  %4747 = vrot.lane.b32.xlu1 %v4724_v29, %s9703_s24  ;;  %vm13751_vm12 = vmmov %vm13750_vm1 }
 0x443   : > { %3854 = vst.msk [vmem:[#allocation6 + $0xf0] sm:$0xff] %vm3823_vm15, %v3788_v27  ;;  %4522 = vrot.lane.b32.xlu0 %v4499_v28, %s9692_s12  ;;  %vm4538_vm15 = vcmask 392448  }
 0x444   : > { %v4458_v30 = vpop.permute.xlu1 %4457 }
 0x445   : > { %v4880_v31 = vpop.permute.xlu0 %4879  ;;  %4482 = vst.msk [vmem:[#allocation7] sm:$0xff] %vm4481_vm5, %v4458_v30 }
 0x446   : > { %4903 = vst.msk [vmem:[#allocation7 + $0x8] sm:$0xff] %vm4481_vm5, %v4880_v31  ;;  %5221 = vrot.lane.b32.xlu1 %v5198_v33, %s9704_s26  ;;  %v4444_v31 = vld [vmem:[#allocation2 + $0xf1] ss:$2 sm:$0xff] }
 0x447   : > { %4999 = vrot.lane.b32.xlu0 %v4976_v32, %s9696_s16 }
 0x448   : > { %v4515_v34 = vpop.permute.xlu1 %4514  ;;  %v3887_v37 = vld [vmem:[#allocation6 + $0xf8] sm:$0xff] }
 0x449   : > { %v4936_v35 = vpop.permute.xlu0 %4935  ;;  %4539 = vst.msk [vmem:[#allocation7] sm:$0xff] %vm4538_vm15, %v4515_v34  ;;  %v5032_v42 = vld [vmem:[#allocation2 + $0x108] ss:$2 sm:$0xff]  ;;  %v5088_v46 = vld [vmem:[#allocation2 + $0x109] ss:$2 sm:$0xff] }
 0x44a   : > { %v3886_v36 = vld [vmem:[#allocation6 + $0xf0] sm:$0xff]  ;;  %4959 = vst.msk [vmem:[#allocation7 + $0x8] sm:$0xff] %vm4538_vm15, %v4936_v35  ;;  %4804 = vrot.lane.b32.xlu1 %v4781_v39, %s9704_s26  ;;  %v5144_v52 = vld [vmem:[#allocation2 + $0x10a] ss:$2 sm:$0xff]  ;;  %v5200_v58 = vld [vmem:[#allocation2 + $0x10b] ss:$2 sm:$0xff] }
 0x44b   : > { %9623 = vmatprep.mubr.msk.f32.mxu0 %vm13746_vm0, %v3886_v36  ;;  %4579 = vrot.lane.b32.xlu0 %v4556_v38, %s9696_s16  ;;  %v4614_v2 = vld [vmem:[#allocation2 + $0x108] ss:$2 sm:$0xff] }
 0x44c   : > { %9624 = vmatmul.mubr.msk.f32.gmra.mxu0 %vm13747_vm2, %v3887_v37  ;;  %v4572_v40 = vpop.permute.xlu1 %4571  ;;  %v4501_v39 = vld [vmem:[#allocation2 + $0xf2] ss:$2 sm:$0xff]  ;;  %vm13752_vm2 = vmmov %vm13750_vm1 }
 0x44d   : > { %v4992_v41 = vpop.permute.xlu0 %4991  ;;  %4596 = vst.msk [vmem:[#allocation7] sm:$0xff] %vm4595_vm8, %v4572_v40 }
 0x44e   : > { %5015 = vst.msk [vmem:[#allocation7 + $0x8] sm:$0xff] %vm4595_vm8, %v4992_v41  ;;  %4635 = vrot.lane.b32.xlu1 %v4612_v43, %s9701_s18 }
 0x44f   : > { %5055 = vrot.lane.b32.xlu0 %v5032_v42, %s9701_s18 }
 0x450   : > { %v4628_v45 = vpop.permute.xlu1 %4627 }
 0x451   : > { %v5048_v44 = vpop.permute.xlu0 %5047  ;;  %4652 = vst.msk [vmem:[#allocation7] sm:$0xff] %vm4651_vm9, %v4628_v45  ;;  %v4558_v45 = vld [vmem:[#allocation2 + $0xf3] ss:$2 sm:$0xff] }
 0x452   : > { %5071 = vst.msk [vmem:[#allocation7 + $0x8] sm:$0xff] %vm4651_vm9, %v5048_v44  ;;  %5111 = vrot.lane.b32.xlu1 %v5088_v46, %s9702_s25 }
 0x454   : > { %v5104_v48 = vpop.permute.xlu1 %5103 }
 0x455   : > { %v4882_v62 = vpop.permute.xlu0 %4881  ;;  %5127 = vst.msk [vmem:[#allocation7 + $0x8] sm:$0xff] %vm4708_vm10, %v5104_v48 }
 0x456   : > { %4904 = vst.msk [vmem:[#allocation7 + $0x18] sm:$0xff] %vm4481_vm5, %v4882_v62  ;;  %4692 = vrot.lane.b32.xlu1 %v4669_v49, %s9702_s25 }
 0x458   : > { %v4685_v51 = vpop.permute.xlu1 %4684 }
 0x459   : > { %v4460_v50 = vpop.permute.xlu0 %4459  ;;  %4709 = vst.msk [vmem:[#allocation7] sm:$0xff] %vm4708_vm10, %v4685_v51 }
 0x45a   : > { %4483 = vst.msk [vmem:[#allocation7 + $0x10] sm:$0xff] %vm4481_vm5, %v4460_v50  ;;  %5167 = vrot.lane.b32.xlu1 %v5144_v52, %s9703_s24 }
 0x45c   : > { %v5160_v54 = vpop.permute.xlu1 %5159 }
 0x45d   : > { %v4938_v53 = vpop.permute.xlu0 %4937  ;;  %5183 = vst.msk [vmem:[#allocation7 + $0x8] sm:$0xff] %vm4765_vm3, %v5160_v54 }
 0x45e   : > { %4960 = vst.msk [vmem:[#allocation7 + $0x18] sm:$0xff] %vm4538_vm15, %v4938_v53  ;;  %4749 = vrot.lane.b32.xlu1 %v4726_v55, %s9703_s24 }
 0x460   : > { %v4742_v57 = vpop.permute.xlu1 %4741 }
 0x461   : > { %v4517_v56 = vpop.permute.xlu0 %4516  ;;  %4766 = vst.msk [vmem:[#allocation7] sm:$0xff] %vm4765_vm3, %v4742_v57 }
 0x462   : > { %4540 = vst.msk [vmem:[#allocation7 + $0x10] sm:$0xff] %vm4538_vm15, %v4517_v56  ;;  %5223 = vrot.lane.b32.xlu1 %v5200_v58, %s9704_s26 }
 0x464   : > { %v5216_v61 = vpop.permute.xlu1 %5215 }
 0x465   : > { %v4994_v60 = vpop.permute.xlu0 %4993  ;;  %5239 = vst.msk [vmem:[#allocation7 + $0x8] sm:$0xff] %vm4822_vm14, %v5216_v61 }
 0x466   : > { %5016 = vst.msk [vmem:[#allocation7 + $0x18] sm:$0xff] %vm4595_vm8, %v4994_v60  ;;  %4806 = vrot.lane.b32.xlu1 %v4783_v63, %s9704_s26  ;;  %v11765_v63 = vld [vmem:[%s13611_s2] ss:$0 sm:$0xff] }
 0x468   : > { %v4799_v1 = vpop.permute.xlu1 %4798 }
 0x469   : > { %v4574_v0 = vpop.permute.xlu0 %4573  ;;  %4823 = vst.msk [vmem:[#allocation7] sm:$0xff] %vm4822_vm14, %v4799_v1 }
 0x46a   : > { %4597 = vst.msk [vmem:[#allocation7 + $0x10] sm:$0xff] %vm4595_vm8, %v4574_v0  ;;  %4637 = vrot.lane.b32.xlu1 %v4614_v2, %s9701_s18 }
 0x46c   : > { %v4630_v4 = vpop.permute.xlu1 %4629  ;;  %v5248_v5 = vld [vmem:[#allocation7 + $0x8] sm:$0xff] }
 0x46d   : > { %v5050_v3 = vpop.permute.xlu0 %5049  ;;  %4653 = vst.msk [vmem:[#allocation7 + $0x10] sm:$0xff] %vm4651_vm9, %v4630_v4  ;;  %5366 = vmatprep.mubr.f32.mxu1 %v5248_v5 }
 0x46e   : > { %5072 = vst.msk [vmem:[#allocation7 + $0x18] sm:$0xff] %vm4651_vm9, %v5050_v3 }
 0x470   : > { %v5106_v7 = vpop.permute.xlu1 %5105  ;;  %v5247_v8 = vld [vmem:[#allocation7] sm:$0xff] }
 0x471   : > { %v4884_v6 = vpop.permute.xlu0 %4883  ;;  %5128 = vst.msk [vmem:[#allocation7 + $0x18] sm:$0xff] %vm4708_vm10, %v5106_v7  ;;  %5367 = vmatmul.mubr.f32.vlgmr.msra.gmra.mxu1 %v5247_v8 }
 0x472   : > { %4905 = vst.msk [vmem:[#allocation7 + $0x28] sm:$0xff] %vm4481_vm5, %v4884_v6 }
 0x474   : > { %v4687_v10 = vpop.permute.xlu1 %4686 }
 0x475   : > { %v4462_v9 = vpop.permute.xlu0 %4461  ;;  %4710 = vst.msk [vmem:[#allocation7 + $0x10] sm:$0xff] %vm4708_vm10, %v4687_v10 }
 0x476   : > { %4484 = vst.msk [vmem:[#allocation7 + $0x20] sm:$0xff] %vm4481_vm5, %v4462_v9  ;;  %v9613_v11 = vpop.f32.mrf.mxu0 }
 0x477   : > { %v4182_v12 = vadd.f32 %v11424_v24, %v9613_v11 }
 0x478   : > { %v4176_v13 = vpop.f32.mrf.mxu0  ;;  %v5162_v17 = vpop.permute.xlu1 %5161 }
 0x479   : > { %vm4248_vm11 = vcmp.ge.f32.partialorder %v4182_v12, 0.0  ;;  %v4280_v14 = vmul.f32 0.2, %v4182_v12  ;;  %v4177_v15 = vadd.f32 %v11424_v24, %v4176_v13  ;;  %v4940_v16 = vpop.permute.xlu0 %4939  ;;  %5184 = vst.msk [vmem:[#allocation7 + $0x18] sm:$0xff] %vm4765_vm3, %v5162_v17 }
 0x47a   : > { %4961 = vst.msk [vmem:[#allocation7 + $0x28] sm:$0xff] %vm4538_vm15, %v4940_v16 }
 0x47b   : > { %v4312_v18 = vsel %vm4248_vm11, %v4182_v12, %v4280_v14  ;;  %vm4247_vm4 = vcmp.ge.f32.partialorder %v4177_v15, 0.0  ;;  %v4279_v19 = vmul.f32 0.2, %v4177_v15  ;;  %vm13753_vm11 = vmmov %vm13750_vm1 }
 0x47c   : > { %4401 = vst.msk [vmem:[#allocation2 + $0x129] sm:$0xff] %vm13748_vm13, %v4312_v18  ;;  %v4744_v22 = vpop.permute.xlu1 %4743  ;;  %vm5433_vm13 = vcmask 254976   ;;  %v4671_v18 = vld [vmem:[#allocation2 + $0x109] ss:$2 sm:$0xff] }
 0x47d   : > { %v4311_v20 = vsel %vm4247_vm4, %v4177_v15, %v4279_v19  ;;  %v4519_v21 = vpop.permute.xlu0 %4518  ;;  %4767 = vst.msk [vmem:[#allocation7 + $0x10] sm:$0xff] %vm4765_vm3, %v4744_v22  ;;  %vm5431_vm4 = vcmask 261120  }
 0x47e   : > { %4400 = vst.msk [vmem:[#allocation2 + $0x121] sm:$0xff] %vm13749_vm6, %v4311_v20 }
 0x47f   : > { %4541 = vst.msk [vmem:[#allocation7 + $0x20] sm:$0xff] %vm4538_vm15, %v4519_v21 }
 0x480   : > { %v5218_v23 = vpop.permute.xlu1 %5217  ;;  %5435 = vst.msk [vmem:[#allocation3 + $0x10] sm:$0xff] %vm5431_vm4, %v9700_v59  ;;  %5432 = vst.msk [vmem:[#allocation3] sm:$0xff] %vm5431_vm4, %v9700_v59 }
 0x481   : > { %v4996_v24 = vpop.permute.xlu0 %4995  ;;  %5240 = vst.msk [vmem:[#allocation7 + $0x18] sm:$0xff] %vm4822_vm14, %v5218_v23 }
 0x482   : > { %5017 = vst.msk [vmem:[#allocation7 + $0x28] sm:$0xff] %vm4595_vm8, %v4996_v24  ;;  %v4728_v24 = vld [vmem:[#allocation2 + $0x10a] ss:$2 sm:$0xff] }
 0x483   : > { %5436 = vst.msk [vmem:[#allocation3 + $0x18] sm:$0x3] %vm5433_vm13, %v9700_v59  ;;  %5434 = vst.msk [vmem:[#allocation3 + $0x8] sm:$0x3] %vm5433_vm13, %v9700_v59 }
 0x484   : > { %v4801_v26 = vpop.permute.xlu1 %4800  ;;  %5437 = vst.msk [vmem:[#allocation3 + $0x20] sm:$0xff] %vm5431_vm4, %v9700_v59  ;;  %5439 = vst.msk [vmem:[#allocation3 + $0x30] sm:$0xff] %vm5431_vm4, %v9700_v59 }
 0x485   : > { %v4576_v25 = vpop.permute.xlu0 %4575  ;;  %v4866_v47 = vld [vmem:[#allocation2 + $0x121] ss:$2 sm:$0xff]  ;;  %4824 = vst.msk [vmem:[#allocation7 + $0x10] sm:$0xff] %vm4822_vm14, %v4801_v26  ;;  %v4842_v27 = vld [vmem:[#allocation2 + $0x120] ss:$2 sm:$0xff] }
 0x486   : > { %4598 = vst.msk [vmem:[#allocation7 + $0x20] sm:$0xff] %vm4595_vm8, %v4576_v25  ;;  %4889 = vrot.lane.b32.xlu0 %v4866_v47, %s9688_s27  ;;  %v4422_v28 = vld [vmem:[#allocation2 + $0x120] ss:$2 sm:$0xff]  ;;  %v4978_v42 = vld [vmem:[#allocation2 + $0x123] ss:$2 sm:$0xff] }
 0x487   : > { %4852 = vst.msk [vmem:[#allocation7 + $0x58] sm:$0xff] %vm13750_vm1, %v4842_v27  ;;  %v4922_v35 = vld [vmem:[#allocation2 + $0x122] ss:$2 sm:$0xff]  ;;  %v4785_v47 = vld [vmem:[#allocation2 + $0x10b] ss:$2 sm:$0xff] }
 0x488   : > { %4431 = vst.msk [vmem:[#allocation7 + $0x60] sm:$0xff] %vm13751_vm12, %v4422_v28  ;;  %v4632_v30 = vpop.permute.xlu1 %4631  ;;  %v5250_v32 = vld [vmem:[#allocation7 + $0x18] sm:$0xff]  ;;  %vm13754_vm12 = vmmov %vm13752_vm2 }
 0x489   : > { %v5052_v29 = vpop.permute.xlu0 %5051  ;;  %4654 = vst.msk [vmem:[#allocation7 + $0x20] sm:$0xff] %vm4651_vm9, %v4632_v30  ;;  %5371 = vmatprep.mubr.f32.mxu1 %v5250_v32 }
 0x48a   : > { %5073 = vst.msk [vmem:[#allocation7 + $0x28] sm:$0xff] %vm4651_vm9, %v5052_v29  ;;  %4467 = vrot.lane.b32.xlu0 %v4444_v31, %s9688_s27 }
 0x48b   : > { %5438 = vst.msk [vmem:[#allocation3 + $0x28] sm:$0x3] %vm5433_vm13, %v9700_v59  ;;  %5440 = vst.msk [vmem:[#allocation3 + $0x38] sm:$0x3] %vm5433_vm13, %v9700_v59 }
 0x48c   : > { %v5108_v34 = vpop.permute.xlu1 %5107  ;;  %v5249_v36 = vld [vmem:[#allocation7 + $0x10] sm:$0xff]  ;;  %5441 = vst.msk [vmem:[#allocation3 + $0x40] sm:$0xff] %vm5431_vm4, %v9700_v59  ;;  %5443 = vst.msk [vmem:[#allocation3 + $0x50] sm:$0xff] %vm5431_vm4, %v9700_v59 }
 0x48d   : > { %v4886_v33 = vpop.permute.xlu0 %4885  ;;  %5129 = vst.msk [vmem:[#allocation7 + $0x28] sm:$0xff] %vm4708_vm10, %v5108_v34  ;;  %5372 = vmatmul.mubr.f32.gmra.mxu1 %v5249_v36 }
 0x48e   : > { %4906 = vst.msk [vmem:[#allocation7 + $0x38] sm:$0xff] %vm4481_vm5, %v4886_v33  ;;  %4945 = vrot.lane.b32.xlu0 %v4922_v35, %s9692_s12 }
 0x48f   : > { %5442 = vst.msk [vmem:[#allocation3 + $0x48] sm:$0x3] %vm5433_vm13, %v9700_v59  ;;  %5444 = vst.msk [vmem:[#allocation3 + $0x58] sm:$0x3] %vm5433_vm13, %v9700_v59 }
 0x490   : > { %v4689_v38 = vpop.permute.xlu1 %4688  ;;  %5445 = vst.msk [vmem:[#allocation3 + $0x60] sm:$0xff] %vm5431_vm4, %v9700_v59  ;;  %5447 = vst.msk [vmem:[#allocation3 + $0x70] sm:$0xff] %vm5431_vm4, %v9700_v59 }
 0x491   : > { %v4464_v37 = vpop.permute.xlu0 %4463  ;;  %4711 = vst.msk [vmem:[#allocation7 + $0x20] sm:$0xff] %vm4708_vm10, %v4689_v38 }
 0x492   : > { %4485 = vst.msk [vmem:[#allocation7 + $0x30] sm:$0xff] %vm4481_vm5, %v4464_v37  ;;  %4524 = vrot.lane.b32.xlu0 %v4501_v39, %s9692_s12 }
 0x493   : > { %5446 = vst.msk [vmem:[#allocation3 + $0x68] sm:$0x3] %vm5433_vm13, %v9700_v59  ;;  %5448 = vst.msk [vmem:[#allocation3 + $0x78] sm:$0x3] %vm5433_vm13, %v9700_v59 }
 0x494   : > { %v5164_v41 = vpop.permute.xlu1 %5163  ;;  %5449 = vst.msk [vmem:[#allocation3 + $0x80] sm:$0xff] %vm5431_vm4, %v9700_v59  ;;  %5451 = vst.msk [vmem:[#allocation3 + $0x90] sm:$0xff] %vm5431_vm4, %v9700_v59 }
 0x495   : > { %v4942_v40 = vpop.permute.xlu0 %4941  ;;  %5185 = vst.msk [vmem:[#allocation7 + $0x28] sm:$0xff] %vm4765_vm3, %v5164_v41 }
 0x496   : > { %4962 = vst.msk [vmem:[#allocation7 + $0x38] sm:$0xff] %vm4538_vm15, %v4942_v40  ;;  %5001 = vrot.lane.b32.xlu0 %v4978_v42, %s9696_s16 }
 0x497   : > { %5450 = vst.msk [vmem:[#allocation3 + $0x88] sm:$0x3] %vm5433_vm13, %v9700_v59  ;;  %5452 = vst.msk [vmem:[#allocation3 + $0x98] sm:$0x3] %vm5433_vm13, %v9700_v59 }
 0x498   : > { %v4746_v44 = vpop.permute.xlu1 %4745 }
 0x499   : > { %v4521_v43 = vpop.permute.xlu0 %4520  ;;  %4768 = vst.msk [vmem:[#allocation7 + $0x20] sm:$0xff] %vm4765_vm3, %v4746_v44 }
 0x49a   : > { %4542 = vst.msk [vmem:[#allocation7 + $0x30] sm:$0xff] %vm4538_vm15, %v4521_v43  ;;  %4581 = vrot.lane.b32.xlu0 %v4558_v45, %s9696_s16  ;;  %v4446_v43 = vld [vmem:[#allocation2 + $0x121] ss:$2 sm:$0xff] }
 0x49c   : > { %v5220_v62 = vpop.permute.xlu1 %5219 }
 0x49d   : > { %v4998_v46 = vpop.permute.xlu0 %4997  ;;  %5241 = vst.msk [vmem:[#allocation7 + $0x28] sm:$0xff] %vm4822_vm14, %v5220_v62 }
 0x49e   : > { %5018 = vst.msk [vmem:[#allocation7 + $0x38] sm:$0xff] %vm4595_vm8, %v4998_v46  ;;  %v4503_v46 = vld [vmem:[#allocation2 + $0x122] ss:$2 sm:$0xff] }
 0x4a0   : > { %v4803_v49 = vpop.permute.xlu1 %4802 }
 0x4a1   : > { %v4578_v48 = vpop.permute.xlu0 %4577  ;;  %4825 = vst.msk [vmem:[#allocation7 + $0x20] sm:$0xff] %vm4822_vm14, %v4803_v49 }
 0x4a2   : > { %4599 = vst.msk [vmem:[#allocation7 + $0x30] sm:$0xff] %vm4595_vm8, %v4578_v48 }
 0x4a4   : > { %v4634_v51 = vpop.permute.xlu1 %4633  ;;  %v5252_v52 = vld [vmem:[#allocation7 + $0x28] sm:$0xff] }
 0x4a5   : > { %v5054_v50 = vpop.permute.xlu0 %5053  ;;  %4655 = vst.msk [vmem:[#allocation7 + $0x30] sm:$0xff] %vm4651_vm9, %v4634_v51  ;;  %5376 = vmatprep.mubr.f32.mxu1 %v5252_v52 }
 0x4a6   : > { %5074 = vst.msk [vmem:[#allocation7 + $0x38] sm:$0xff] %vm4651_vm9, %v5054_v50 }
 0x4a8   : > { %v5110_v54 = vpop.permute.xlu1 %5109  ;;  %v5251_v55 = vld [vmem:[#allocation7 + $0x20] sm:$0xff] }
 0x4a9   : > { %v4888_v53 = vpop.permute.xlu0 %4887  ;;  %5130 = vst.msk [vmem:[#allocation7 + $0x38] sm:$0xff] %vm4708_vm10, %v5110_v54  ;;  %5377 = vmatmul.mubr.f32.gmra.mxu1 %v5251_v55  ;;  %v4560_v55 = vld [vmem:[#allocation2 + $0x123] ss:$2 sm:$0xff] }
 0x4aa   : > { %4907 = vst.msk [vmem:[#allocation7 + $0x48] sm:$0xff] %vm4481_vm5, %v4888_v53 }
 0x4ac   : > { %v4691_v57 = vpop.permute.xlu1 %4690 }
 0x4ad   : > { %v4466_v56 = vpop.permute.xlu0 %4465  ;;  %4712 = vst.msk [vmem:[#allocation7 + $0x30] sm:$0xff] %vm4708_vm10, %v4691_v57 }
 0x4ae   : > { %4486 = vst.msk [vmem:[#allocation7 + $0x40] sm:$0xff] %vm4481_vm5, %v4466_v56 }
 0x4b0   : > { %v5166_v60 = vpop.permute.xlu1 %5165 }
 0x4b1   : > { %v4944_v58 = vpop.permute.xlu0 %4943  ;;  %5186 = vst.msk [vmem:[#allocation7 + $0x38] sm:$0xff] %vm4765_vm3, %v5166_v60 }
 0x4b2   : > { %4963 = vst.msk [vmem:[#allocation7 + $0x48] sm:$0xff] %vm4538_vm15, %v4944_v58  ;;  %v9616_v61 = vpop.f32.mrf.mxu0 }
 0x4b3   : > { %v4192_v0 = vadd.f32 %v11765_v63, %v9616_v61 }
 0x4b4   : > { %v4186_v1 = vpop.f32.mrf.mxu0  ;;  %v4748_v5 = vpop.permute.xlu1 %4747 }
 0x4b5   : > { %vm4250_vm7 = vcmp.ge.f32.partialorder %v4192_v0, 0.0  ;;  %v4282_v2 = vmul.f32 0.2, %v4192_v0  ;;  %v4187_v3 = vadd.f32 %v11765_v63, %v4186_v1  ;;  %v4523_v4 = vpop.permute.xlu0 %4522  ;;  %4769 = vst.msk [vmem:[#allocation7 + $0x30] sm:$0xff] %vm4765_vm3, %v4748_v5 }
 0x4b6   : > { %4543 = vst.msk [vmem:[#allocation7 + $0x40] sm:$0xff] %vm4538_vm15, %v4523_v4 }
 0x4b7   : > { %v4314_v6 = vsel %vm4250_vm7, %v4192_v0, %v4282_v2  ;;  %vm4249_vm0 = vcmp.ge.f32.partialorder %v4187_v3, 0.0  ;;  %v4281_v7 = vmul.f32 0.2, %v4187_v3  ;;  %vm13755_vm7 = vmmov %vm13752_vm2 }
 0x4b8   : > { %4403 = vst.msk [vmem:[#allocation2 + $0x141] sm:$0xff] %vm13752_vm2, %v4314_v6  ;;  %v5222_v10 = vpop.permute.xlu1 %5221 }
 0x4b9   : > { %v4313_v8 = vsel %vm4249_vm0, %v4187_v3, %v4281_v7  ;;  %v5000_v9 = vpop.permute.xlu0 %4999  ;;  %5242 = vst.msk [vmem:[#allocation7 + $0x38] sm:$0xff] %vm4822_vm14, %v5222_v10  ;;  %vm13756_vm0 = vmmov %vm13752_vm2 }
 0x4ba   : > { %4402 = vst.msk [vmem:[#allocation2 + $0x139] sm:$0xff] %vm13753_vm11, %v4313_v8  ;;  %vm13757_vm2 = vmmov %vm13756_vm0 }
 0x4bb   : > { %5019 = vst.msk [vmem:[#allocation7 + $0x48] sm:$0xff] %vm4595_vm8, %v5000_v9 }
 0x4bc   : > { %v4805_v12 = vpop.permute.xlu1 %4804 }
 0x4bd   : > { %v4580_v11 = vpop.permute.xlu0 %4579  ;;  %4826 = vst.msk [vmem:[#allocation7 + $0x30] sm:$0xff] %vm4822_vm14, %v4805_v12 }
 0x4be   : > { %4600 = vst.msk [vmem:[#allocation7 + $0x40] sm:$0xff] %vm4595_vm8, %v4580_v11 }
 0x4c0   : > { %v5254_v16 = vld [vmem:[#allocation7 + $0x38] sm:$0xff]  ;;  %v4636_v17 = vpop.permute.xlu1 %4635 }
 0x4c1   : > { %v5056_v13 = vpop.permute.xlu0 %5055  ;;  %v5034_v14 = vld [vmem:[#allocation2 + $0x138] ss:$2 sm:$0xff]  ;;  %v5090_v15 = vld [vmem:[#allocation2 + $0x139] ss:$2 sm:$0xff]  ;;  %4656 = vst.msk [vmem:[#allocation7 + $0x40] sm:$0xff] %vm4651_vm9, %v4636_v17  ;;  %5381 = vmatprep.mubr.f32.mxu1 %v5254_v16 }
 0x4c2   : > { %5075 = vst.msk [vmem:[#allocation7 + $0x48] sm:$0xff] %vm4651_vm9, %v5056_v13  ;;  %5057 = vrot.lane.b32.xlu0 %v5034_v14, %s9701_s18  ;;  %5113 = vrot.lane.b32.xlu1 %v5090_v15, %s9702_s25  ;;  %v5146_v21 = vld [vmem:[#allocation2 + $0x13a] ss:$2 sm:$0xff]  ;;  %v5202_v25 = vld [vmem:[#allocation2 + $0x13b] ss:$2 sm:$0xff] }
 0x4c3   : > { %v4616_v28 = vld [vmem:[#allocation2 + $0x138] ss:$2 sm:$0xff]  ;;  %v4673_v11 = vld [vmem:[#allocation2 + $0x139] ss:$2 sm:$0xff] }
 0x4c4   : > { %v5112_v19 = vpop.permute.xlu1 %5111  ;;  %v5253_v20 = vld [vmem:[#allocation7 + $0x30] sm:$0xff] }
 0x4c5   : > { %5131 = vst.msk [vmem:[#allocation7 + $0x48] sm:$0xff] %vm4708_vm10, %v5112_v19  ;;  %5382 = vmatmul.mubr.f32.gmra.mxu1 %v5253_v20  ;;  %v4730_v14 = vld [vmem:[#allocation2 + $0x13a] ss:$2 sm:$0xff] }
 0x4c6   : > { %4694 = vrot.lane.b32.xlu1 %v4671_v18, %s9702_s25  ;;  %v4787_v18 = vld [vmem:[#allocation2 + $0x13b] ss:$2 sm:$0xff] }
 0x4c8   : > { %v4693_v22 = vpop.permute.xlu1 %4692 }
 0x4c9   : > { %4713 = vst.msk [vmem:[#allocation7 + $0x40] sm:$0xff] %vm4708_vm10, %v4693_v22 }
 0x4ca   : > { %5169 = vrot.lane.b32.xlu1 %v5146_v21, %s9703_s24 }
 0x4cc   : > { %v5168_v23 = vpop.permute.xlu1 %5167 }
 0x4cd   : > { %5187 = vst.msk [vmem:[#allocation7 + $0x48] sm:$0xff] %vm4765_vm3, %v5168_v23 }
 0x4ce   : > { %4751 = vrot.lane.b32.xlu1 %v4728_v24, %s9703_s24 }
 0x4d0   : > { %v4750_v26 = vpop.permute.xlu1 %4749 }
 0x4d1   : > { %4770 = vst.msk [vmem:[#allocation7 + $0x40] sm:$0xff] %vm4765_vm3, %v4750_v26  ;;  %v5038_v26 = vld [vmem:[#allocation2 + $0x198] ss:$2 sm:$0xff] }
 0x4d2   : > { %5225 = vrot.lane.b32.xlu1 %v5202_v25, %s9704_s26 }
 0x4d4   : > { %v5224_v27 = vpop.permute.xlu1 %5223 }
 0x4d5   : > { %5243 = vst.msk [vmem:[#allocation7 + $0x48] sm:$0xff] %vm4822_vm14, %v5224_v27 }
 0x4d6   : > { %4808 = vrot.lane.b32.xlu1 %v4785_v47, %s9704_s26 }
 0x4d8   : > { %v4807_v29 = vpop.permute.xlu1 %4806 }
 0x4d9   : > { %4827 = vst.msk [vmem:[#allocation7 + $0x40] sm:$0xff] %vm4822_vm14, %v4807_v29  ;;  %v11882_v29 = vld [vmem:[%s13613_s4] ss:$0 sm:$0xff] }
 0x4da   : > { %4639 = vrot.lane.b32.xlu1 %v4616_v28, %s9701_s18 }
 0x4dc   : > { %v5256_v31 = vld [vmem:[#allocation7 + $0x48] sm:$0xff]  ;;  %v4638_v3 = vpop.permute.xlu1 %4637 }
 0x4dd   : > { %v9619_v30 = vpop.f32.mrf.mxu0  ;;  %5386 = vmatprep.mubr.f32.mxu1 %v5256_v31  ;;  %v5094_v31 = vld [vmem:[#allocation2 + $0x199] ss:$2 sm:$0xff] }
 0x4de   : > { %v4202_v32 = vadd.f32 %v11765_v63, %v9619_v30 }
 0x4df   : > { %v4196_v33 = vpop.f32.mrf.mxu0 }
 0x4e0   : > { %vm4252_vm6 = vcmp.ge.f32.partialorder %v4202_v32, 0.0  ;;  %v4284_v34 = vmul.f32 0.2, %v4202_v32  ;;  %v4197_v35 = vadd.f32 %v11765_v63, %v4196_v33  ;;  %v5255_v36 = vld [vmem:[#allocation7 + $0x40] sm:$0xff] }
 0x4e1   : > { %5387 = vmatmul.mubr.f32.gmra.mxu1 %v5255_v36  ;;  %v5150_v36 = vld [vmem:[#allocation2 + $0x19a] ss:$2 sm:$0xff] }
 0x4e2   : > { %v4316_v37 = vsel %vm4252_vm6, %v4202_v32, %v4284_v34  ;;  %vm4251_vm1 = vcmp.ge.f32.partialorder %v4197_v35, 0.0  ;;  %v4283_v38 = vmul.f32 0.2, %v4197_v35  ;;  %vm13758_vm6 = vmmov %vm13756_vm0  ;;  %v5462_v34 = vld [vmem:[#allocation3] ss:$2 sm:$0xf] }
 0x4e3   : > { %4405 = vst.msk [vmem:[#allocation2 + $0x159] sm:$0xff] %vm13754_vm12, %v4316_v37 }
 0x4e4   : > { %v4315_v39 = vsel %vm4251_vm1, %v4197_v35, %v4283_v38  ;;  %vm13759_vm1 = vmmov %vm13756_vm0 }
 0x4e5   : > { %4404 = vst.msk [vmem:[#allocation2 + $0x151] sm:$0xff] %vm13755_vm7, %v4315_v39 }
 0x4ec   : > { %v4868_v40 = vld [vmem:[#allocation2 + $0x151] ss:$2 sm:$0xff]  ;;  %v4844_v41 = vld [vmem:[#allocation2 + $0x150] ss:$2 sm:$0xff] }
 0x4ed   : > { %4891 = vrot.lane.b32.xlu0 %v4868_v40, %s9688_s27  ;;  %v4424_v42 = vld [vmem:[#allocation2 + $0x150] ss:$2 sm:$0xff]  ;;  %4853 = vst.msk [vmem:[#allocation7 + $0x68] sm:$0xff] %vm13756_vm0, %v4844_v41  ;;  %v4980_v48 = vld [vmem:[#allocation2 + $0x153] ss:$2 sm:$0xff] }
 0x4ee   : > { %4432 = vst.msk [vmem:[#allocation7 + $0x70] sm:$0xff] %vm13757_vm2, %v4424_v42  ;;  %v4924_v44 = vld [vmem:[#allocation2 + $0x152] ss:$2 sm:$0xff]  ;;  %vm13760_vm2 = vmmov %vm13756_vm0  ;;  %v4448_v17 = vld [vmem:[#allocation2 + $0x151] ss:$2 sm:$0xff] }
 0x4ef   : > { %v4505_v21 = vld [vmem:[#allocation2 + $0x152] ss:$2 sm:$0xff]  ;;  %v4562_v25 = vld [vmem:[#allocation2 + $0x153] ss:$2 sm:$0xff] }
 0x4f0   : > { %v5206_v40 = vld [vmem:[#allocation2 + $0x19b] ss:$2 sm:$0xff]  ;;  %v5475_v42 = vld [vmem:[#allocation3 + $0x1] ss:$2 sm:$0xf] }
 0x4f1   : > { %4469 = vrot.lane.b32.xlu0 %v4446_v43, %s9688_s27 }
 0x4f5   : > { %4947 = vrot.lane.b32.xlu0 %v4924_v44, %s9692_s12 }
 0x4f8   : > { %v4890_v45 = vpop.permute.xlu0 %4889 }
 0x4f9   : > { %4908 = vst.msk [vmem:[#allocation7 + $0x58] sm:$0xff] %vm4481_vm5, %v4890_v45  ;;  %4526 = vrot.lane.b32.xlu0 %v4503_v46, %s9692_s12 }
 0x4fc   : > { %v4468_v62 = vpop.permute.xlu0 %4467 }
 0x4fd   : > { %4487 = vst.msk [vmem:[#allocation7 + $0x50] sm:$0xff] %vm4481_vm5, %v4468_v62  ;;  %5003 = vrot.lane.b32.xlu0 %v4980_v48, %s9696_s16  ;;  %v5504_v62 = vld [vmem:[#allocation3 + $0x2] ss:$2 sm:$0xf] }
 0x4fe   : > { %v9622_v49 = vpop.f32.mrf.mxu0 }
 0x4ff   : > { %v4212_v50 = vadd.f32 %v11765_v63, %v9622_v49 }
 0x500   : > { %v4206_v51 = vpop.f32.mrf.mxu0  ;;  %v4946_v52 = vpop.permute.xlu0 %4945 }
 0x501   : > { %vm4254_vm11 = vcmp.ge.f32.partialorder %v4212_v50, 0.0  ;;  %v4286_v53 = vmul.f32 0.2, %v4212_v50  ;;  %v4207_v54 = vadd.f32 %v11765_v63, %v4206_v51  ;;  %4964 = vst.msk [vmem:[#allocation7 + $0x58] sm:$0xff] %vm4538_vm15, %v4946_v52  ;;  %4583 = vrot.lane.b32.xlu0 %v4560_v55, %s9696_s16 }
 0x503   : > { %v4318_v56 = vsel %vm4254_vm11, %v4212_v50, %v4286_v53  ;;  %vm4253_vm13 = vcmp.ge.f32.partialorder %v4207_v54, 0.0  ;;  %v4285_v57 = vmul.f32 0.2, %v4207_v54  ;;  %vm13761_vm11 = vmmov %vm13756_vm0  ;;  %v5533_v53 = vld [vmem:[#allocation3 + $0x3] ss:$2 sm:$0xf] }
 0x504   : > { %4407 = vst.msk [vmem:[#allocation2 + $0x171] sm:$0xff] %vm13758_vm6, %v4318_v56  ;;  %v4525_v58 = vpop.permute.xlu0 %4524 }
 0x505   : > { %v4317_v60 = vsel %vm4253_vm13, %v4207_v54, %v4285_v57  ;;  %4544 = vst.msk [vmem:[#allocation7 + $0x50] sm:$0xff] %vm4538_vm15, %v4525_v58  ;;  %vm5469_vm13 = vcmask 257024   ;;  %v5887_v57 = vld [vmem:[%s13614_s5 + $0xf8] sm:$0xff] }
 0x506   : > { %4406 = vst.msk [vmem:[#allocation2 + $0x169] sm:$0xff] %vm13759_vm1, %v4317_v60  ;;  %v5871_v58 = vld [vmem:[%s13614_s5 + $0x78] sm:$0xff]  ;;  %v5886_v60 = vld [vmem:[%s13614_s5 + $0xf0] sm:$0xff]  ;;  %9066 = vmatprep.subr.mxu1 %v5887_v57 }
 0x507   : > { %5470 = vst.msk [vmem:[#allocation8] sm:$0xf] %vm5469_vm13, %v5462_v34  ;;  %9067 = vmatpush3.msra.mxu1 %v5871_v58  ;;  %v5858_v57 = vld [vmem:[%s13614_s5 + $0x10] sm:$0xff] }
 0x508   : > { %v5002_v61 = vpop.permute.xlu0 %5001  ;;  %9068 = vmatprep.subr.mxu1 %v5886_v60  ;;  %v5873_v60 = vld [vmem:[%s13614_s5 + $0x88] sm:$0xff] }
 0x509   : > { %5020 = vst.msk [vmem:[#allocation7 + $0x58] sm:$0xff] %vm4595_vm8, %v5002_v61  ;;  %v5870_v61 = vld [vmem:[%s13614_s5 + $0x70] sm:$0xff] }
 0x50a   : > { %9069 = vmatpush3.msra.mxu1 %v5870_v61 }
 0x50c   : > { %v9625_v0 = vpop.f32.mrf.mxu0  ;;  %v4582_v2 = vpop.permute.xlu0 %4581 }
 0x50d   : > { %v4222_v1 = vadd.f32 %v11765_v63, %v9625_v0  ;;  %4601 = vst.msk [vmem:[#allocation7 + $0x50] sm:$0xff] %vm4595_vm8, %v4582_v2  ;;  %v5036_v5 = vld [vmem:[#allocation2 + $0x168] ss:$2 sm:$0xff]  ;;  %v5092_v6 = vld [vmem:[#allocation2 + $0x169] ss:$2 sm:$0xff] }
 0x50e   : > { %v4216_v4 = vpop.f32.mrf.mxu0  ;;  %4657 = vst.msk [vmem:[#allocation7 + $0x50] sm:$0xff] %vm4651_vm9, %v4638_v3  ;;  %5059 = vrot.lane.b32.xlu0 %v5036_v5, %s9701_s18  ;;  %5115 = vrot.lane.b32.xlu1 %v5092_v6, %s9702_s25  ;;  %v5148_v13 = vld [vmem:[#allocation2 + $0x16a] ss:$2 sm:$0xff]  ;;  %v5204_v16 = vld [vmem:[#allocation2 + $0x16b] ss:$2 sm:$0xff] }
 0x50f   : > { %vm4256_vm12 = vcmp.ge.f32.partialorder %v4222_v1, 0.0  ;;  %v4288_v7 = vmul.f32 0.2, %v4222_v1  ;;  %v4217_v8 = vadd.f32 %v11765_v63, %v4216_v4  ;;  %v4618_v20 = vld [vmem:[#allocation2 + $0x168] ss:$2 sm:$0xff] }
 0x510   : > { %v4675_v22 = vld [vmem:[#allocation2 + $0x169] ss:$2 sm:$0xff]  ;;  %v4732_v23 = vld [vmem:[#allocation2 + $0x16a] ss:$2 sm:$0xff] }
 0x511   : > { %v4320_v9 = vsel %vm4256_vm12, %v4222_v1, %v4288_v7  ;;  %vm4255_vm7 = vcmp.ge.f32.partialorder %v4217_v8, 0.0  ;;  %v4287_v10 = vmul.f32 0.2, %v4217_v8  ;;  %v4789_v47 = vld [vmem:[#allocation2 + $0x16b] ss:$2 sm:$0xff] }
 0x512   : > { %4409 = vst.msk [vmem:[#allocation2 + $0x189] sm:$0xff] %vm13756_vm0, %v4320_v9  ;;  %4696 = vrot.lane.b32.xlu1 %v4673_v11, %s9702_s25  ;;  %v5885_v1 = vld [vmem:[%s13614_s5 + $0xe8] sm:$0xff]  ;;  %vm6129_vm0 = vcmask 517120  }
 0x513   : > { %v4319_v12 = vsel %vm4255_vm7, %v4217_v8, %v4287_v10  ;;  %9070 = vmatprep.subr.mxu1 %v5885_v1 }
 0x514   : > { %4408 = vst.msk [vmem:[#allocation2 + $0x181] sm:$0xff] %vm13760_vm2, %v4319_v12  ;;  %vm6158_vm2 = vcmask 1041920  }
 0x516   : > { %5171 = vrot.lane.b32.xlu1 %v5148_v13, %s9703_s24 }
 0x51a   : > { %4753 = vrot.lane.b32.xlu1 %v4730_v14, %s9703_s24 }
 0x51b   : > { %v4870_v63 = vld [vmem:[#allocation2 + $0x181] ss:$2 sm:$0xff]  ;;  %v4846_v15 = vld [vmem:[#allocation2 + $0x180] ss:$2 sm:$0xff] }
 0x51c   : > { %4893 = vrot.lane.b32.xlu0 %v4870_v63, %s9688_s27  ;;  %4854 = vst.msk [vmem:[#allocation7 + $0x78] sm:$0xff] %vm13761_vm11, %v4846_v15  ;;  %v4926_v19 = vld [vmem:[#allocation2 + $0x182] ss:$2 sm:$0xff]  ;;  %v4982_v24 = vld [vmem:[#allocation2 + $0x183] ss:$2 sm:$0xff] }
 0x51d   : > { %v5869_v15 = vld [vmem:[%s13614_s5 + $0x68] sm:$0xff] }
 0x51e   : > { %5227 = vrot.lane.b32.xlu1 %v5204_v16, %s9704_s26  ;;  %v5884_v16 = vld [vmem:[%s13614_s5 + $0xe0] sm:$0xff]  ;;  %9071 = vmatpush3.msra.mxu1 %v5869_v15 }
 0x51f   : > { %9072 = vmatprep.subr.mxu1 %v5884_v16 }
 0x520   : > { %4471 = vrot.lane.b32.xlu0 %v4448_v17, %s9688_s27  ;;  %v5868_v17 = vld [vmem:[%s13614_s5 + $0x60] sm:$0xff]  ;;  %s384_s27 = scalar_lea.vmem %s13620_s11, %s13765_s20 }
 0x521   : > { %9073 = vmatpush3.msra.mxu1 %v5868_v17 }
 0x522   : > { %4810 = vrot.lane.b32.xlu1 %v4787_v18, %s9704_s26 }
 0x524   : > { %4949 = vrot.lane.b32.xlu0 %v4926_v19, %s9692_s12  ;;  %v5883_v19 = vld [vmem:[%s13614_s5 + $0xd8] sm:$0xff] }
 0x525   : > { %9074 = vmatprep.subr.mxu1 %v5883_v19 }
 0x526   : > { %4641 = vrot.lane.b32.xlu1 %v4618_v20, %s9701_s18 }
 0x528   : > { %4528 = vrot.lane.b32.xlu0 %v4505_v21, %s9692_s12 }
 0x52a   : > { %4698 = vrot.lane.b32.xlu1 %v4675_v22, %s9702_s25  ;;  %v5867_v22 = vld [vmem:[%s13614_s5 + $0x58] sm:$0xff] }
 0x52b   : > { %9075 = vmatpush3.msra.mxu1 %v5867_v22 }
 0x52c   : > { %5005 = vrot.lane.b32.xlu0 %v4982_v24, %s9696_s16  ;;  %v5882_v24 = vld [vmem:[%s13614_s5 + $0xd0] sm:$0xff] }
 0x52d   : > { %9076 = vmatprep.subr.mxu1 %v5882_v24 }
 0x52e   : > { %4755 = vrot.lane.b32.xlu1 %v4732_v23, %s9703_s24  ;;  %v5866_v23 = vld [vmem:[%s13614_s5 + $0x50] sm:$0xff] }
 0x52f   : > { %9077 = vmatpush3.msra.mxu1 %v5866_v23 }
 0x530   : > { %4585 = vrot.lane.b32.xlu0 %v4562_v25, %s9696_s16 }
 0x531   : > { %v9042_v27 = vpop.f32.mrf.mxu1 }
 0x532   : > { %4812 = vrot.lane.b32.xlu1 %v4789_v47, %s9704_s26 }
 0x533   : > { %v9043_v30 = vpop.f32.mrf.mxu1 }
 0x534   : > { %5061 = vrot.lane.b32.xlu0 %v5038_v26, %s9701_s18  ;;  %v5058_v28 = vpop.permute.xlu0 %5057  ;;  %v9044_v32 = vadd.f32 %v9043_v30, %v9042_v27  ;;  %v5114_v33 = vpop.permute.xlu1 %5113  ;;  %v5881_v26 = vld [vmem:[%s13614_s5 + $0xc8] sm:$0xff]  ;;  %v5864_v30 = vld [vmem:[%s13614_s5 + $0x40] sm:$0xff] }
 0x535   : > { %5076 = vst.msk [vmem:[#allocation7 + $0x58] sm:$0xff] %vm4651_vm9, %v5058_v28  ;;  %9078 = vmatprep.subr.mxu1 %v5881_v26  ;;  %v5865_v27 = vld [vmem:[%s13614_s5 + $0x48] sm:$0xff]  ;;  %v5880_v28 = vld [vmem:[%s13614_s5 + $0xc0] sm:$0xff] }
 0x536   : > { %5132 = vst.msk [vmem:[#allocation7 + $0x58] sm:$0xff] %vm4708_vm10, %v5114_v33  ;;  %v5369_v35 = vadd.f32 %v9044_v32, %v11882_v29  ;;  %9079 = vmatpush3.msra.mxu1 %v5865_v27 }
 0x537   : > { %9080 = vmatprep.subr.mxu1 %v5880_v28 }
 0x538   : > { %5117 = vrot.lane.b32.xlu0 %v5094_v31, %s9702_s25  ;;  %vm5407_vm6 = vcmp.ge.f32.partialorder %v5369_v35, 0.0  ;;  %v5415_v37 = vmul.f32 0.2, %v5369_v35  ;;  %v4695_v38 = vpop.permute.xlu1 %4694  ;;  %v5879_v31 = vld [vmem:[%s13614_s5 + $0xb8] sm:$0xff]  ;;  %9081 = vmatpush3.msra.mxu1 %v5864_v30 }
 0x539   : > { %4714 = vst.msk [vmem:[#allocation7 + $0x50] sm:$0xff] %vm4708_vm10, %v4695_v38  ;;  %9082 = vmatprep.subr.mxu1 %v5879_v31  ;;  %v5863_v38 = vld [vmem:[%s13614_s5 + $0x38] sm:$0xff] }
 0x53a   : > { %v5423_v39 = vsel %vm5407_vm6, %v5369_v35, %v5415_v37  ;;  %9083 = vmatpush3.msra.mxu1 %v5863_v38 }
 0x53b   : > { %5454 = vst.msk [vmem:[#allocation3 + $0x11] sm:$0xff] %vm5431_vm4, %v5423_v39  ;;  %v5878_v39 = vld [vmem:[%s13614_s5 + $0xb0] sm:$0xff] }
 0x53c   : > { %5173 = vrot.lane.b32.xlu0 %v5150_v36, %s9703_s24  ;;  %v5170_v41 = vpop.permute.xlu1 %5169  ;;  %9084 = vmatprep.subr.mxu1 %v5878_v39 }
 0x53d   : > { %5188 = vst.msk [vmem:[#allocation7 + $0x58] sm:$0xff] %vm4765_vm3, %v5170_v41 }
 0x540   : > { %5229 = vrot.lane.b32.xlu0 %v5206_v40, %s9704_s26  ;;  %v4752_v43 = vpop.permute.xlu1 %4751 }
 0x541   : > { %4771 = vst.msk [vmem:[#allocation7 + $0x50] sm:$0xff] %vm4765_vm3, %v4752_v43 }
 0x542   : > { %v5561_v44 = vld [vmem:[#allocation3 + $0x10] ss:$2 sm:$0xf]  ;;  %v5573_v46 = vld [vmem:[#allocation3 + $0x11] ss:$2 sm:$0xf] }
 0x543   : > { %5568 = vst.msk [vmem:[#allocation8 + $0x4] sm:$0xf] %vm5469_vm13, %v5561_v44  ;;  %v5601_v51 = vld [vmem:[#allocation3 + $0x12] ss:$2 sm:$0xf] }
 0x544   : > { %5486 = vrot.lane.b32.xlu0 %v5475_v42, %s9692_s12  ;;  %v5226_v45 = vpop.permute.xlu1 %5225  ;;  %v5629_v2 = vld [vmem:[#allocation3 + $0x13] ss:$2 sm:$0xf]  ;;  %v5862_v42 = vld [vmem:[%s13614_s5 + $0x30] sm:$0xff] }
 0x545   : > { %5244 = vst.msk [vmem:[#allocation7 + $0x58] sm:$0xff] %vm4822_vm14, %v5226_v45  ;;  %v5877_v44 = vld [vmem:[%s13614_s5 + $0xa8] sm:$0xff]  ;;  %9085 = vmatpush3.msra.mxu1 %v5862_v42 }
 0x546   : > { %9086 = vmatprep.subr.mxu1 %v5877_v44 }
 0x548   : > { %5584 = vrot.lane.b32.xlu0 %v5573_v46, %s9692_s12  ;;  %v4809_v48 = vpop.permute.xlu1 %4808  ;;  %v5861_v46 = vld [vmem:[%s13614_s5 + $0x28] sm:$0xff] }
 0x549   : > { %4828 = vst.msk [vmem:[#allocation7 + $0x50] sm:$0xff] %vm4822_vm14, %v4809_v48  ;;  %v5876_v48 = vld [vmem:[%s13614_s5 + $0xa0] sm:$0xff]  ;;  %9087 = vmatpush3.msra.mxu1 %v5861_v46 }
 0x54a   : > { %9088 = vmatprep.subr.mxu1 %v5876_v48 }
 0x54c   : > { %5515 = vrot.lane.b32.xlu0 %v5504_v62, %s9701_s18  ;;  %v5258_v49 = vld [vmem:[#allocation7 + $0x58] sm:$0xff]  ;;  %v4640_v47 = vpop.permute.xlu1 %4639 }
 0x54d   : > { %5391 = vmatprep.mubr.f32.mxu1 %v5258_v49  ;;  %v9045_v50 = vpop.f32.mrf.mxu1  ;;  %v5860_v49 = vld [vmem:[%s13614_s5 + $0x20] sm:$0xff] }
 0x54e   : > { %9089 = vmatpush3.msra.mxu1 %v5860_v49 }
 0x54f   : > { %v9046_v52 = vpop.f32.mrf.mxu1 }
 0x550   : > { %5612 = vrot.lane.b32.xlu0 %v5601_v51, %s9701_s18  ;;  %v9047_v54 = vadd.f32 %v9046_v52, %v9045_v50  ;;  %v5257_v55 = vld [vmem:[#allocation7 + $0x50] sm:$0xff]  ;;  %v5875_v50 = vld [vmem:[%s13614_s5 + $0x98] sm:$0xff] }
 0x551   : > { %5392 = vmatmul.mubr.f32.gmra.mxu1 %v5257_v55  ;;  %v5874_v55 = vld [vmem:[%s13614_s5 + $0x90] sm:$0xff]  ;;  %9090 = vmatprep.subr.mxu1 %v5875_v50 }
 0x552   : > { %v5374_v56 = vadd.f32 %v9047_v54, %v11882_v29 }
 0x554   : > { %5544 = vrot.lane.b32.xlu0 %v5533_v53, %s9703_s24  ;;  %vm5408_vm1 = vcmp.ge.f32.partialorder %v5374_v56, 0.0  ;;  %v5416_v0 = vmul.f32 0.2, %v5374_v56  ;;  %v5859_v53 = vld [vmem:[%s13614_s5 + $0x18] sm:$0xff] }
 0x555   : > { %9091 = vmatpush3.msra.mxu1 %v5859_v53 }
 0x556   : > { %v5424_v3 = vsel %vm5408_vm1, %v5374_v56, %v5416_v0  ;;  %9092 = vmatprep.subr.mxu1 %v5874_v55  ;;  %v5857_v0 = vld [vmem:[%s13614_s5 + $0x8] sm:$0xff] }
 0x557   : > { %5455 = vst.msk [vmem:[#allocation3 + $0x21] sm:$0xff] %vm5431_vm4, %v5424_v3  ;;  %9093 = vmatpush3.msra.mxu1 %v5858_v57  ;;  %v5872_v3 = vld [vmem:[%s13614_s5 + $0x80] sm:$0xff] }
 0x558   : > { %5640 = vrot.lane.b32.xlu0 %v5629_v2, %s9703_s24  ;;  %9094 = vmatprep.subr.mxu1 %v5873_v60 }
 0x559   : > { %9095 = vmatpush3.msra.mxu1 %v5857_v0 }
 0x55a   : > { %9096 = vmatprep.subr.mxu1 %v5872_v3 }
 0x55e   : > { %v5669_v4 = vld [vmem:[#allocation3 + $0x21] ss:$2 sm:$0xf]  ;;  %v5657_v7 = vld [vmem:[#allocation3 + $0x20] ss:$2 sm:$0xf] }
 0x55f   : > { %v5477_v5 = vld [vmem:[#allocation3 + $0x21] ss:$2 sm:$0xf]  ;;  %v4892_v6 = vpop.permute.xlu0 %4891  ;;  %5680 = vrot.lane.b32.xlu0 %v5669_v4, %s9692_s12  ;;  %v5464_v8 = vld [vmem:[#allocation3 + $0x20] ss:$2 sm:$0xf] }
 0x560   : > { %5488 = vrot.lane.b32.xlu1 %v5477_v5, %s9692_s12  ;;  %4909 = vst.msk [vmem:[#allocation7 + $0x68] sm:$0xff] %vm4481_vm5, %v4892_v6  ;;  %v5697_v34 = vld [vmem:[#allocation3 + $0x22] ss:$2 sm:$0xf]  ;;  %v5856_v5 = vld [vmem:[%s13614_s5] sm:$0xff] }
 0x561   : > { %5664 = vst.msk [vmem:[#allocation8 + $0x8] sm:$0xf] %vm5469_vm13, %v5657_v7  ;;  %5471 = vst.msk [vmem:[#allocation8 + $0x10] sm:$0xf] %vm5469_vm13, %v5464_v8  ;;  %9097 = vmatpush3.msra.mxu1 %v5856_v5 }
 0x562   : > { %v5506_v37 = vld [vmem:[#allocation3 + $0x22] ss:$2 sm:$0xf]  ;;  %v5535_v52 = vld [vmem:[#allocation3 + $0x23] ss:$2 sm:$0xf] }
 0x563   : > { %v4470_v9 = vpop.permute.xlu0 %4469 }
 0x564   : > { %4488 = vst.msk [vmem:[#allocation7 + $0x60] sm:$0xff] %vm4481_vm5, %v4470_v9 }
 0x567   : > { %v4948_v10 = vpop.permute.xlu0 %4947 }
 0x568   : > { %4965 = vst.msk [vmem:[#allocation7 + $0x68] sm:$0xff] %vm4538_vm15, %v4948_v10 }
 0x569   : > { %v9048_v11 = vpop.f32.mrf.mxu1 }
 0x56b   : > { %v4527_v12 = vpop.permute.xlu0 %4526  ;;  %v9049_v13 = vpop.f32.mrf.mxu1 }
 0x56c   : > { %4545 = vst.msk [vmem:[#allocation7 + $0x60] sm:$0xff] %vm4538_vm15, %v4527_v12  ;;  %v9050_v14 = vadd.f32 %v9049_v13, %v9048_v11 }
 0x56e   : > { %v5379_v63 = vadd.f32 %v9050_v14, %v11882_v29 }
 0x56f   : > { %v5004_v18 = vpop.permute.xlu0 %5003 }
 0x570   : > { %vm5409_vm12 = vcmp.ge.f32.partialorder %v5379_v63, 0.0  ;;  %v5417_v20 = vmul.f32 0.2, %v5379_v63  ;;  %5021 = vst.msk [vmem:[#allocation7 + $0x68] sm:$0xff] %vm4595_vm8, %v5004_v18 }
 0x572   : > { %v5425_v21 = vsel %vm5409_vm12, %v5379_v63, %v5417_v20 }
 0x573   : > { %5456 = vst.msk [vmem:[#allocation3 + $0x31] sm:$0xff] %vm5431_vm4, %v5425_v21  ;;  %v4584_v25 = vpop.permute.xlu0 %4583 }
 0x574   : > { %4602 = vst.msk [vmem:[#allocation7 + $0x60] sm:$0xff] %vm4595_vm8, %v4584_v25 }
 0x575   : > { %4658 = vst.msk [vmem:[#allocation7 + $0x60] sm:$0xff] %vm4651_vm9, %v4640_v47 }
 0x57a   : > { %v5765_v32 = vld [vmem:[#allocation3 + $0x31] ss:$2 sm:$0xf]  ;;  %v5753_v35 = vld [vmem:[#allocation3 + $0x30] ss:$2 sm:$0xf] }
 0x57b   : > { %v5575_v33 = vld [vmem:[#allocation3 + $0x31] ss:$2 sm:$0xf]  ;;  %5776 = vrot.lane.b32.xlu0 %v5765_v32, %s9692_s12  ;;  %v5563_v36 = vld [vmem:[#allocation3 + $0x30] ss:$2 sm:$0xf] }
 0x57c   : > { %5586 = vrot.lane.b32.xlu1 %v5575_v33, %s9692_s12  ;;  %5760 = vst.msk [vmem:[#allocation8 + $0xc] sm:$0xf] %vm5469_vm13, %v5753_v35  ;;  %5569 = vst.msk [vmem:[#allocation8 + $0x14] sm:$0xf] %vm5469_vm13, %v5563_v36 }
 0x57d   : > { %v5793_v43 = vld [vmem:[#allocation3 + $0x32] ss:$2 sm:$0xf]  ;;  %v5631_v61 = vld [vmem:[#allocation3 + $0x33] ss:$2 sm:$0xf] }
 0x57e   : > { %v5603_v45 = vld [vmem:[#allocation3 + $0x32] ss:$2 sm:$0xf] }
 0x57f   : > { %5708 = vrot.lane.b32.xlu0 %v5697_v34, %s9701_s18 }
 0x580   : > { %v5060_v40 = vpop.permute.xlu0 %5059  ;;  %5517 = vrot.lane.b32.xlu1 %v5506_v37, %s9701_s18  ;;  %v5116_v41 = vpop.permute.xlu1 %5115 }
 0x581   : > { %5077 = vst.msk [vmem:[#allocation7 + $0x68] sm:$0xff] %vm4651_vm9, %v5060_v40  ;;  %v5725_v40 = vld [vmem:[#allocation3 + $0x23] ss:$2 sm:$0xf] }
 0x582   : > { %5133 = vst.msk [vmem:[#allocation7 + $0x68] sm:$0xff] %vm4708_vm10, %v5116_v41 }
 0x583   : > { %5804 = vrot.lane.b32.xlu0 %v5793_v43, %s9701_s18 }
 0x584   : > { %5614 = vrot.lane.b32.xlu1 %v5603_v45, %s9701_s18  ;;  %v4697_v62 = vpop.permute.xlu1 %4696  ;;  %v5821_v45 = vld [vmem:[#allocation3 + $0x33] ss:$2 sm:$0xf] }
 0x585   : > { %4715 = vst.msk [vmem:[#allocation7 + $0x60] sm:$0xff] %vm4708_vm10, %v4697_v62  ;;  %v9051_v51 = vpop.f32.mrf.mxu1 }
 0x587   : > { %v9052_v56 = vpop.f32.mrf.mxu1 }
 0x588   : > { %5546 = vrot.lane.b32.xlu1 %v5535_v52, %s9703_s24  ;;  %v5172_v54 = vpop.permute.xlu1 %5171  ;;  %v9053_v58 = vadd.f32 %v9052_v56, %v9051_v51 }
 0x589   : > { %5189 = vst.msk [vmem:[#allocation7 + $0x68] sm:$0xff] %vm4765_vm3, %v5172_v54 }
 0x58a   : > { %v5384_v1 = vadd.f32 %v9053_v58, %v11882_v29 }
 0x58c   : > { %5642 = vrot.lane.b32.xlu1 %v5631_v61, %s9703_s24  ;;  %v4754_v2 = vpop.permute.xlu1 %4753  ;;  %vm5410_vm7 = vcmp.ge.f32.partialorder %v5384_v1, 0.0  ;;  %v5418_v6 = vmul.f32 0.2, %v5384_v1 }
 0x58d   : > { %4772 = vst.msk [vmem:[#allocation7 + $0x60] sm:$0xff] %vm4765_vm3, %v4754_v2 }
 0x58e   : > { %v4894_v4 = vpop.permute.xlu0 %4893  ;;  %v5426_v7 = vsel %vm5410_vm7, %v5384_v1, %v5418_v6  ;;  %vm7825_vm7 = vcmask 0  }
 0x58f   : > { %4910 = vst.msk [vmem:[#allocation7 + $0x78] sm:$0xff] %vm4481_vm5, %v4894_v4 }
 0x590   : > { %v5228_v8 = vpop.permute.xlu1 %5227  ;;  %5457 = vst.msk [vmem:[#allocation3 + $0x41] sm:$0xff] %vm5431_vm4, %v5426_v7 }
 0x591   : > { %5245 = vst.msk [vmem:[#allocation7 + $0x68] sm:$0xff] %vm4822_vm14, %v5228_v8 }
 0x592   : > { %v4472_v9 = vpop.permute.xlu0 %4471 }
 0x593   : > { %4489 = vst.msk [vmem:[#allocation7 + $0x70] sm:$0xff] %vm4481_vm5, %v4472_v9 }
 0x594   : > { %v4811_v10 = vpop.permute.xlu1 %4810 }
 0x595   : > { %4829 = vst.msk [vmem:[#allocation7 + $0x60] sm:$0xff] %vm4822_vm14, %v4811_v10 }
 0x596   : > { %v4950_v11 = vpop.permute.xlu0 %4949 }
 0x597   : > { %4966 = vst.msk [vmem:[#allocation7 + $0x78] sm:$0xff] %vm4538_vm15, %v4950_v11  ;;  %v5671_v12 = vld [vmem:[#allocation3 + $0x41] ss:$2 sm:$0xf] }
 0x598   : > { %v5479_v13 = vld [vmem:[#allocation3 + $0x41] ss:$2 sm:$0xf]  ;;  %v4642_v14 = vpop.permute.xlu1 %4641  ;;  %5682 = vrot.lane.b32.xlu1 %v5671_v12, %s9692_s12  ;;  %v5260_v15 = vld [vmem:[#allocation7 + $0x68] sm:$0xff] }
 0x599   : > { %5490 = vrot.lane.b32.xlu0 %v5479_v13, %s9692_s12  ;;  %5396 = vmatprep.mubr.f32.mxu1 %v5260_v15  ;;  %v5466_v16 = vld [vmem:[#allocation3 + $0x40] ss:$2 sm:$0xf]  ;;  %v5537_v51 = vld [vmem:[#allocation3 + $0x43] ss:$2 sm:$0xf] }
 0x59a   : > { %v4529_v63 = vpop.permute.xlu0 %4528  ;;  %v5659_v17 = vld [vmem:[#allocation3 + $0x40] ss:$2 sm:$0xf]  ;;  %5472 = vst.msk [vmem:[#allocation8 + $0x20] sm:$0xf] %vm5469_vm13, %v5466_v16 }
 0x59b   : > { %4546 = vst.msk [vmem:[#allocation7 + $0x70] sm:$0xff] %vm4538_vm15, %v4529_v63  ;;  %vm5498_vm15 = vcmask 519424   ;;  %v5699_v39 = vld [vmem:[#allocation3 + $0x42] ss:$2 sm:$0xf] }
 0x59c   : > { %v4699_v18 = vpop.permute.xlu1 %4698  ;;  %v5259_v19 = vld [vmem:[#allocation7 + $0x60] sm:$0xff]  ;;  %5665 = vst.msk [vmem:[#allocation8 + $0x18] sm:$0xf] %vm5469_vm13, %v5659_v17 }
 0x59d   : > { %5397 = vmatmul.mubr.f32.gmra.mxu1 %v5259_v19  ;;  %v5508_v62 = vld [vmem:[#allocation3 + $0x42] ss:$2 sm:$0xf] }
 0x59e   : > { %v5006_v20 = vpop.permute.xlu0 %5005 }
 0x59f   : > { %5022 = vst.msk [vmem:[#allocation7 + $0x78] sm:$0xff] %vm4595_vm8, %v5006_v20 }
 0x5a0   : > { %v4756_v21 = vpop.permute.xlu1 %4755 }
 0x5a1   : > { %v9054_v24 = vpop.f32.mrf.mxu1 }
 0x5a2   : > { %v4586_v22 = vpop.permute.xlu0 %4585 }
 0x5a3   : > { %4603 = vst.msk [vmem:[#allocation7 + $0x70] sm:$0xff] %vm4595_vm8, %v4586_v22  ;;  %v9055_v25 = vpop.f32.mrf.mxu1  ;;  %vm5527_vm8 = vcmask 781824  }
 0x5a4   : > { %4659 = vst.msk [vmem:[#allocation7 + $0x70] sm:$0xff] %vm4651_vm9, %v4642_v14  ;;  %v4813_v23 = vpop.permute.xlu1 %4812  ;;  %v9056_v47 = vadd.f32 %v9055_v25, %v9054_v24 }
 0x5a5   : > { %4716 = vst.msk [vmem:[#allocation7 + $0x70] sm:$0xff] %vm4708_vm10, %v4699_v18 }
 0x5a6   : > { %4773 = vst.msk [vmem:[#allocation7 + $0x70] sm:$0xff] %vm4765_vm3, %v4756_v21  ;;  %v5062_v26 = vpop.permute.xlu0 %5061  ;;  %v5389_v27 = vadd.f32 %v9056_v47, %v11882_v29  ;;  %v5903_v47 = vld [vmem:[%s13614_s5 + $0x178] sm:$0xff] }
 0x5a7   : > { %4830 = vst.msk [vmem:[#allocation7 + $0x70] sm:$0xff] %vm4822_vm14, %v4813_v23 }
 0x5a8   : > { %5078 = vst.msk [vmem:[#allocation7 + $0x78] sm:$0xff] %vm4651_vm9, %v5062_v26  ;;  %vm5411_vm5 = vcmp.ge.f32.partialorder %v5389_v27, 0.0  ;;  %v5419_v30 = vmul.f32 0.2, %v5389_v27  ;;  %vm5556_vm9 = vcmask 1044224   ;;  %v5919_v26 = vld [vmem:[%s13614_s5 + $0x1f8] sm:$0xff] }
 0x5a9   : > { %9104 = vmatprep.subr.mxu0 %v5919_v26 }
 0x5aa   : > { %v5118_v28 = vpop.permute.xlu0 %5117  ;;  %v5427_v31 = vsel %vm5411_vm5, %v5389_v27, %v5419_v30  ;;  %v5918_v27 = vld [vmem:[%s13614_s5 + $0x1f0] sm:$0xff]  ;;  %9105 = vmatpush3.msra.mxu0 %v5903_v47  ;;  %v5917_v30 = vld [vmem:[%s13614_s5 + $0x1e8] sm:$0xff] }
 0x5ab   : > { %5134 = vst.msk [vmem:[#allocation7 + $0x78] sm:$0xff] %vm4708_vm10, %v5118_v28  ;;  %v5902_v28 = vld [vmem:[%s13614_s5 + $0x170] sm:$0xff]  ;;  %9106 = vmatprep.subr.mxu0 %v5918_v27  ;;  %v5799_v27 = vld [vmem:[#allocation3 + $0x92] ss:$2 sm:$0xf] }
 0x5ac   : > { %5458 = vst.msk [vmem:[#allocation3 + $0x51] sm:$0xff] %vm5431_vm4, %v5427_v31  ;;  %v5901_v31 = vld [vmem:[%s13614_s5 + $0x168] sm:$0xff]  ;;  %9107 = vmatpush3.msra.mxu0 %v5902_v28 }
 0x5ad   : > { %9108 = vmatprep.subr.mxu0 %v5917_v30  ;;  %v5827_v30 = vld [vmem:[#allocation3 + $0x93] ss:$2 sm:$0xf] }
 0x5ae   : > { %v5174_v32 = vpop.permute.xlu0 %5173  ;;  %v5261_v43 = vld [vmem:[#allocation7 + $0x70] sm:$0xff]  ;;  %9109 = vmatpush3.msra.mxu0 %v5901_v31 }
 0x5af   : > { %5190 = vst.msk [vmem:[#allocation7 + $0x78] sm:$0xff] %vm4765_vm3, %v5174_v32  ;;  %v5916_v32 = vld [vmem:[%s13614_s5 + $0x1e0] sm:$0xff] }
 0x5b0   : > { %9110 = vmatprep.subr.mxu0 %v5916_v32 }
 0x5b2   : > { %v5230_v33 = vpop.permute.xlu0 %5229 }
 0x5b3   : > { %5246 = vst.msk [vmem:[#allocation7 + $0x78] sm:$0xff] %vm4822_vm14, %v5230_v33  ;;  %v5767_v34 = vld [vmem:[#allocation3 + $0x51] ss:$2 sm:$0xf] }
 0x5b4   : > { %v5577_v35 = vld [vmem:[#allocation3 + $0x51] ss:$2 sm:$0xf]  ;;  %5778 = vrot.lane.b32.xlu1 %v5767_v34, %s9692_s12  ;;  %v5565_v37 = vld [vmem:[#allocation3 + $0x50] ss:$2 sm:$0xf] }
 0x5b5   : > { %5588 = vrot.lane.b32.xlu0 %v5577_v35, %s9692_s12  ;;  %5570 = vst.msk [vmem:[#allocation8 + $0x24] sm:$0xf] %vm5469_vm13, %v5565_v37  ;;  %v5755_v38 = vld [vmem:[#allocation3 + $0x50] ss:$2 sm:$0xf]  ;;  %v5915_v34 = vld [vmem:[%s13614_s5 + $0x1d8] sm:$0xff] }
 0x5b6   : > { %v5487_v36 = vpop.permute.xlu0 %5486  ;;  %5761 = vst.msk [vmem:[#allocation8 + $0x1c] sm:$0xf] %vm5469_vm13, %v5755_v38  ;;  %v5795_v44 = vld [vmem:[#allocation3 + $0x52] ss:$2 sm:$0xf]  ;;  %v5899_v35 = vld [vmem:[%s13614_s5 + $0x158] sm:$0xff] }
 0x5b7   : > { %5499 = vst.msk [vmem:[#allocation8] sm:$0xf] %vm5498_vm15, %v5487_v36  ;;  %v5605_v49 = vld [vmem:[#allocation3 + $0x52] ss:$2 sm:$0xf]  ;;  %v5914_v36 = vld [vmem:[%s13614_s5 + $0x1d0] sm:$0xff] }
 0x5b8   : > { %5710 = vrot.lane.b32.xlu1 %v5699_v39, %s9701_s18  ;;  %v5633_v53 = vld [vmem:[#allocation3 + $0x53] ss:$2 sm:$0xf]  ;;  %v5898_v37 = vld [vmem:[%s13614_s5 + $0x150] sm:$0xff] }
 0x5b9   : > { %5736 = vrot.lane.b32.xlu0 %v5725_v40, %s9703_s24  ;;  %v5900_v33 = vld [vmem:[%s13614_s5 + $0x160] sm:$0xff]  ;;  %v5913_v38 = vld [vmem:[%s13614_s5 + $0x1c8] sm:$0xff] }
 0x5ba   : > { %v5585_v41 = vpop.permute.xlu0 %5584  ;;  %v5262_v42 = vld [vmem:[#allocation7 + $0x78] sm:$0xff]  ;;  %9111 = vmatpush3.msra.mxu0 %v5900_v33 }
 0x5bb   : > { %5596 = vst.msk [vmem:[#allocation8 + $0x4] sm:$0xf] %vm5498_vm15, %v5585_v41  ;;  %5401 = vmatprep.mubr.f32.mxu1 %v5262_v42  ;;  %9112 = vmatprep.subr.mxu0 %v5915_v34 }
 0x5bc   : > { %5402 = vmatmul.mubr.f32.gmra.mxu1 %v5261_v43  ;;  %5806 = vrot.lane.b32.xlu1 %v5795_v44, %s9701_s18  ;;  %v5897_v43 = vld [vmem:[%s13614_s5 + $0x148] sm:$0xff]  ;;  %v5912_v44 = vld [vmem:[%s13614_s5 + $0x1c0] sm:$0xff] }
 0x5bd   : > { %5832 = vrot.lane.b32.xlu0 %v5821_v45, %s9703_s24  ;;  %9113 = vmatpush3.msra.mxu0 %v5899_v35  ;;  %v5896_v45 = vld [vmem:[%s13614_s5 + $0x140] sm:$0xff] }
 0x5be   : > { %v5516_v46 = vpop.permute.xlu0 %5515  ;;  %9114 = vmatprep.subr.mxu0 %v5914_v36 }
 0x5bf   : > { %5528 = vst.msk [vmem:[#allocation8] sm:$0xf] %vm5527_vm8, %v5516_v46  ;;  %9115 = vmatpush3.msra.mxu0 %v5898_v37  ;;  %v5911_v46 = vld [vmem:[%s13614_s5 + $0x1b8] sm:$0xff] }
 0x5c0   : > { %9116 = vmatprep.subr.mxu0 %v5913_v38 }
 0x5c1   : > { %5519 = vrot.lane.b32.xlu0 %v5508_v62, %s9701_s18  ;;  %9117 = vmatpush3.msra.mxu0 %v5897_v43 }
 0x5c2   : > { %v5613_v48 = vpop.permute.xlu0 %5612  ;;  %9118 = vmatprep.subr.mxu0 %v5912_v44 }
 0x5c3   : > { %5624 = vst.msk [vmem:[#allocation8 + $0x4] sm:$0xf] %vm5527_vm8, %v5613_v48  ;;  %9119 = vmatpush3.msra.mxu0 %v5896_v45 }
 0x5c4   : > { %9120 = vmatprep.subr.mxu0 %v5911_v46 }
 0x5c5   : > { %5616 = vrot.lane.b32.xlu0 %v5605_v49, %s9701_s18  ;;  %v5895_v49 = vld [vmem:[%s13614_s5 + $0x138] sm:$0xff] }
 0x5c6   : > { %v5545_v50 = vpop.permute.xlu0 %5544  ;;  %9121 = vmatpush3.msra.mxu0 %v5895_v49 }
 0x5c7   : > { %5557 = vst.msk [vmem:[#allocation8] sm:$0xf] %vm5556_vm9, %v5545_v50  ;;  %v5910_v50 = vld [vmem:[%s13614_s5 + $0x1b0] sm:$0xff] }
 0x5c8   : > { %9122 = vmatprep.subr.mxu0 %v5910_v50 }
 0x5c9   : > { %5548 = vrot.lane.b32.xlu0 %v5537_v51, %s9703_s24  ;;  %v5894_v51 = vld [vmem:[%s13614_s5 + $0x130] sm:$0xff] }
 0x5ca   : > { %v5641_v52 = vpop.permute.xlu0 %5640  ;;  %9123 = vmatpush3.msra.mxu0 %v5894_v51 }
 0x5cb   : > { %5652 = vst.msk [vmem:[#allocation8 + $0x4] sm:$0xf] %vm5556_vm9, %v5641_v52  ;;  %v5909_v52 = vld [vmem:[%s13614_s5 + $0x1a8] sm:$0xff] }
 0x5cc   : > { %9124 = vmatprep.subr.mxu0 %v5909_v52 }
 0x5cd   : > { %5644 = vrot.lane.b32.xlu0 %v5633_v53, %s9703_s24  ;;  %v5893_v53 = vld [vmem:[%s13614_s5 + $0x128] sm:$0xff] }
 0x5ce   : > { %9125 = vmatpush3.msra.mxu0 %v5893_v53 }
 0x5d1   : > { %v5681_v54 = vpop.permute.xlu0 %5680 }
 0x5d2   : > { %v5489_v55 = vpop.permute.xlu1 %5488  ;;  %5692 = vst.msk [vmem:[#allocation8 + $0x8] sm:$0xf] %vm5498_vm15, %v5681_v54  ;;  %v5908_v54 = vld [vmem:[%s13614_s5 + $0x1a0] sm:$0xff] }
 0x5d3   : > { %5500 = vst.msk [vmem:[#allocation8 + $0x10] sm:$0xf] %vm5498_vm15, %v5489_v55  ;;  %v5892_v55 = vld [vmem:[%s13614_s5 + $0x120] sm:$0xff]  ;;  %9126 = vmatprep.subr.mxu0 %v5908_v54 }
 0x5d4   : > { %9127 = vmatpush3.msra.mxu0 %v5892_v55  ;;  %v9705_v55 = vmov 1983009808  }
 0x5ed   : > { %v5777_v56 = vpop.permute.xlu0 %5776 }
 0x5ee   : > { %v5587_v57 = vpop.permute.xlu1 %5586  ;;  %5788 = vst.msk [vmem:[#allocation8 + $0xc] sm:$0xf] %vm5498_vm15, %v5777_v56  ;;  %v5907_v56 = vld [vmem:[%s13614_s5 + $0x198] sm:$0xff] }
 0x5ef   : > { %5597 = vst.msk [vmem:[#allocation8 + $0x14] sm:$0xf] %vm5498_vm15, %v5587_v57  ;;  %9128 = vmatprep.subr.mxu0 %v5907_v56  ;;  %v6139_v56 = vunpack.c.l.s4 %v9705_v55  ;;  %v6428_v55 = vld [vmem:[%s13616_s7 + $0xd0] sm:$0xff] }
 0x5f1   : > { %v5709_v58 = vpop.permute.xlu0 %5708 }
 0x5f2   : > { %v5518_v60 = vpop.permute.xlu1 %5517  ;;  %5720 = vst.msk [vmem:[#allocation8 + $0x8] sm:$0xf] %vm5527_vm8, %v5709_v58 }
 0x5f3   : > { %5529 = vst.msk [vmem:[#allocation8 + $0x10] sm:$0xf] %vm5527_vm8, %v5518_v60  ;;  %v5727_v60 = vld [vmem:[#allocation3 + $0x43] ss:$2 sm:$0xf] }
 0x5f5   : > { %v5805_v61 = vpop.permute.xlu0 %5804 }
 0x5f6   : > { %v5615_v0 = vpop.permute.xlu1 %5614  ;;  %5816 = vst.msk [vmem:[#allocation8 + $0xc] sm:$0xf] %vm5527_vm8, %v5805_v61 }
 0x5f7   : > { %5625 = vst.msk [vmem:[#allocation8 + $0x14] sm:$0xf] %vm5527_vm8, %v5615_v0 }
 0x5fa   : > { %v5547_v1 = vpop.permute.xlu1 %5546 }
 0x5fb   : > { %5558 = vst.msk [vmem:[#allocation8 + $0x10] sm:$0xf] %vm5556_vm9, %v5547_v1 }
 0x5fe   : > { %v5643_v2 = vpop.permute.xlu1 %5642 }
 0x5ff   : > { %5653 = vst.msk [vmem:[#allocation8 + $0x14] sm:$0xf] %vm5556_vm9, %v5643_v2  ;;  %v5891_v2 = vld [vmem:[%s13614_s5 + $0x118] sm:$0xff] }
 0x600   : > { %9129 = vmatpush3.msra.mxu0 %v5891_v2 }
 0x602   : > { %v9656_v3 = vld [vmem:[#allocation8] ss:$16 sps:$4 sm:$0xff]  }
 0x606   : > { %v9658_v4 = vld [vmem:[#allocation8 + $0x4] ss:$16 sps:$4 sm:$0xff]  }
 0x607   : > { %6015 = vmatprep.mubr.f32.mxu1 %v9658_v4  ;;  %v5890_v4 = vld [vmem:[%s13614_s5 + $0x110] sm:$0xff] }
 0x608   : > { %6016 = vmatmul.mubr.f32.vlgmr.msra.gmra.mxu1 %v9656_v3  ;;  %v5906_v3 = vld [vmem:[%s13614_s5 + $0x190] sm:$0xff] }
 0x609   : > { %9130 = vmatprep.subr.mxu0 %v5906_v3 }
 0x60a   : > { %v5683_v6 = vpop.permute.xlu1 %5682  ;;  %9131 = vmatpush3.msra.mxu0 %v5890_v4 }
 0x60b   : > { %v5491_v5 = vpop.permute.xlu0 %5490  ;;  %5693 = vst.msk [vmem:[#allocation8 + $0x18] sm:$0xf] %vm5498_vm15, %v5683_v6  ;;  %v5905_v6 = vld [vmem:[%s13614_s5 + $0x188] sm:$0xff] }
 0x60c   : > { %5501 = vst.msk [vmem:[#allocation8 + $0x20] sm:$0xf] %vm5498_vm15, %v5491_v5  ;;  %v5823_v5 = vld [vmem:[#allocation3 + $0x53] ss:$2 sm:$0xf]  ;;  %9132 = vmatprep.subr.mxu0 %v5905_v6 }
 0x611   : > { %v9057_v7 = vpop.f32.mrf.mxu1 }
 0x613   : > { %v9058_v8 = vpop.f32.mrf.mxu1 }
 0x614   : > { %v9059_v9 = vadd.f32 %v9058_v8, %v9057_v7  ;;  %v5889_v8 = vld [vmem:[%s13614_s5 + $0x108] sm:$0xff] }
 0x615   : > { %9133 = vmatpush3.msra.mxu0 %v5889_v8  ;;  %v12263_v8 = vld [vmem:[%s13615_s6] ss:$0 sm:$0xff] }
 0x616   : > { %v5394_v10 = vadd.f32 %v9059_v9, %v11882_v29  ;;  %v5904_v9 = vld [vmem:[%s13614_s5 + $0x180] sm:$0xff] }
 0x617   : > { %9134 = vmatprep.subr.mxu0 %v5904_v9 }
 0x618   : > { %vm5412_vm10 = vcmp.ge.f32.partialorder %v5394_v10, 0.0  ;;  %v5420_v11 = vmul.f32 0.2, %v5394_v10 }
 0x61a   : > { %v5428_v12 = vsel %vm5412_vm10, %v5394_v10, %v5420_v11  ;;  %v5888_v10 = vld [vmem:[%s13614_s5 + $0x100] sm:$0xff] }
 0x61b   : > { %5459 = vst.msk [vmem:[#allocation3 + $0x61] sm:$0xff] %vm5431_vm4, %v5428_v12  ;;  %9135 = vmatpush3.msra.mxu0 %v5888_v10 }
 0x622   : > { %v5673_v13 = vld [vmem:[#allocation3 + $0x61] ss:$2 sm:$0xf]  ;;  %v5661_v63 = vld [vmem:[#allocation3 + $0x60] ss:$2 sm:$0xf] }
 0x623   : > { %v5481_v14 = vld [vmem:[#allocation3 + $0x61] ss:$2 sm:$0xf]  ;;  %5684 = vrot.lane.b32.xlu0 %v5673_v13, %s9692_s12  ;;  %v5468_v15 = vld [vmem:[#allocation3 + $0x60] ss:$2 sm:$0xf] }
 0x624   : > { %5492 = vrot.lane.b32.xlu1 %v5481_v14, %s9692_s12  ;;  %5666 = vst.msk [vmem:[#allocation8 + $0x28] sm:$0xf] %vm5469_vm13, %v5661_v63  ;;  %5473 = vst.msk [vmem:[#allocation8 + $0x30] sm:$0xf] %vm5469_vm13, %v5468_v15 }
 0x625   : > { %v5701_v1 = vld [vmem:[#allocation3 + $0x62] ss:$2 sm:$0xf]  ;;  %v5729_v11 = vld [vmem:[#allocation3 + $0x63] ss:$2 sm:$0xf] }
 0x626   : > { %v5779_v17 = vpop.permute.xlu1 %5778  ;;  %v5510_v12 = vld [vmem:[#allocation3 + $0x62] ss:$2 sm:$0xf] }
 0x627   : > { %v5589_v16 = vpop.permute.xlu0 %5588  ;;  %5789 = vst.msk [vmem:[#allocation8 + $0x1c] sm:$0xf] %vm5498_vm15, %v5779_v17 }
 0x628   : > { %5598 = vst.msk [vmem:[#allocation8 + $0x24] sm:$0xf] %vm5498_vm15, %v5589_v16 }
 0x62a   : > { %v5711_v19 = vpop.permute.xlu1 %5710 }
 0x62b   : > { %v5737_v18 = vpop.permute.xlu0 %5736  ;;  %5721 = vst.msk [vmem:[#allocation8 + $0x18] sm:$0xf] %vm5527_vm8, %v5711_v19 }
 0x62c   : > { %5748 = vst.msk [vmem:[#allocation8 + $0x8] sm:$0xf] %vm5556_vm9, %v5737_v18  ;;  %v5759_v18 = vld [vmem:[#allocation3 + $0x90] ss:$2 sm:$0xf] }
 0x62d   : > { %5763 = vst.msk [vmem:[#allocation8 + $0x3c] sm:$0xf] %vm5469_vm13, %v5759_v18 }
 0x62e   : > { %v5807_v21 = vpop.permute.xlu1 %5806 }
 0x62f   : > { %v5833_v20 = vpop.permute.xlu0 %5832  ;;  %5817 = vst.msk [vmem:[#allocation8 + $0x1c] sm:$0xf] %vm5527_vm8, %v5807_v21 }
 0x630   : > { %5844 = vst.msk [vmem:[#allocation8 + $0xc] sm:$0xf] %vm5556_vm9, %v5833_v20  ;;  %v5539_v20 = vld [vmem:[#allocation3 + $0x63] ss:$2 sm:$0xf] }
 0x633   : > { %v5520_v22 = vpop.permute.xlu0 %5519 }
 0x634   : > { %5530 = vst.msk [vmem:[#allocation8 + $0x20] sm:$0xf] %vm5527_vm8, %v5520_v22 }
 0x637   : > { %v5617_v24 = vpop.permute.xlu0 %5616 }
 0x638   : > { %5626 = vst.msk [vmem:[#allocation8 + $0x24] sm:$0xf] %vm5527_vm8, %v5617_v24 }
 0x63b   : > { %v5549_v23 = vpop.permute.xlu0 %5548 }
 0x63c   : > { %5559 = vst.msk [vmem:[#allocation8 + $0x20] sm:$0xf] %vm5556_vm9, %v5549_v23 }
 0x63f   : > { %v5645_v25 = vpop.permute.xlu0 %5644 }
 0x640   : > { %5654 = vst.msk [vmem:[#allocation8 + $0x24] sm:$0xf] %vm5556_vm9, %v5645_v25  ;;  %v5771_v25 = vld [vmem:[#allocation3 + $0x91] ss:$2 sm:$0xf] }
 0x65d   : > { %v9060_v39 = vpop.f32.mrf.mxu1 }
 0x65f   : > { %v9061_v40 = vpop.f32.mrf.mxu1 }
 0x660   : > { %v9062_v41 = vadd.f32 %v9061_v40, %v9060_v39 }
 0x662   : > { %v5399_v42 = vadd.f32 %v9062_v41, %v11882_v29 }
 0x664   : > { %vm5413_vm3 = vcmp.ge.f32.partialorder %v5399_v42, 0.0  ;;  %v5421_v62 = vmul.f32 0.2, %v5399_v42 }
 0x666   : > { %v5429_v48 = vsel %vm5413_vm3, %v5399_v42, %v5421_v62 }
 0x667   : > { %5460 = vst.msk [vmem:[#allocation3 + $0x71] sm:$0xff] %vm5431_vm4, %v5429_v48 }
 0x66e   : > { %v5769_v57 = vld [vmem:[#allocation3 + $0x71] ss:$2 sm:$0xf]  ;;  %v5757_v61 = vld [vmem:[#allocation3 + $0x70] ss:$2 sm:$0xf] }
 0x66f   : > { %v5579_v58 = vld [vmem:[#allocation3 + $0x71] ss:$2 sm:$0xf]  ;;  %5780 = vrot.lane.b32.xlu0 %v5769_v57, %s9692_s12  ;;  %v5567_v0 = vld [vmem:[#allocation3 + $0x70] ss:$2 sm:$0xf]  ;;  %v6141_v57 = vlaneseq }
 0x670   : > { %5590 = vrot.lane.b32.xlu1 %v5579_v58, %s9692_s12  ;;  %5762 = vst.msk [vmem:[#allocation8 + $0x2c] sm:$0xf] %vm5469_vm13, %v5757_v61  ;;  %5571 = vst.msk [vmem:[#allocation8 + $0x34] sm:$0xf] %vm5469_vm13, %v5567_v0  ;;  %v6140_v58 = vunpack.c.0.s8 %v6139_v56  ;;  %v6460_v56 = vld [vmem:[%s13616_s7 + $0x1d0] sm:$0xff] }
 0x671   : > { %v5797_v7 = vld [vmem:[#allocation3 + $0x72] ss:$2 sm:$0xf]  ;;  %v5825_v15 = vld [vmem:[#allocation3 + $0x73] ss:$2 sm:$0xf] }
 0x672   : > { %v5607_v16 = vld [vmem:[#allocation3 + $0x72] ss:$2 sm:$0xf]  ;;  %v5635_v22 = vld [vmem:[#allocation3 + $0x73] ss:$2 sm:$0xf] }
 0x673   : > { %5712 = vrot.lane.b32.xlu0 %v5701_v1, %s9701_s18  ;;  %vm12824_vm1 = vcmp.lt.s32.totalorder %v6141_v57, 128 }
 0x674   : > { %5738 = vrot.lane.b32.xlu1 %v5727_v60, %s9703_s24  ;;  %v12249_v60 = vshrl.u32 %v6141_v57, 7  ;;  %v6933_v57 = vld [vmem:[%s13618_s9 + $0x38] sm:$0xff] }
 0x676   : > { %v12252_v61 = vsub.s32 %v6140_v58, %v12249_v60 }
 0x677   : > { %5808 = vrot.lane.b32.xlu0 %v5797_v7, %s9701_s18 }
 0x678   : > { %5834 = vrot.lane.b32.xlu1 %v5823_v5, %s9703_s24 }
 0x67b   : > { %5740 = vrot.lane.b32.xlu0 %v5729_v11, %s9703_s24 }
 0x67c   : > { %5521 = vrot.lane.b32.xlu1 %v5510_v12, %s9701_s18  ;;  %v9063_v13 = vpop.f32.mrf.mxu1 }
 0x67e   : > { %v9064_v14 = vpop.f32.mrf.mxu1 }
 0x67f   : > { %v9065_v63 = vadd.f32 %v9064_v14, %v9063_v13  ;;  %5836 = vrot.lane.b32.xlu0 %v5825_v15, %s9703_s24 }
 0x680   : > { %5618 = vrot.lane.b32.xlu1 %v5607_v16, %s9701_s18 }
 0x681   : > { %v5404_v17 = vadd.f32 %v9065_v63, %v11882_v29 }
 0x683   : > { %vm5414_vm14 = vcmp.ge.f32.partialorder %v5404_v17, 0.0  ;;  %v5422_v19 = vmul.f32 0.2, %v5404_v17 }
 0x684   : > { %5550 = vrot.lane.b32.xlu1 %v5539_v20, %s9703_s24 }
 0x685   : > { %v5430_v21 = vsel %vm5414_vm14, %v5404_v17, %v5422_v19 }
 0x686   : > { %5461 = vst.msk [vmem:[#allocation3 + $0x81] sm:$0xff] %vm5431_vm4, %v5430_v21  ;;  %vm6113_vm4 = vcmask 521216  }
 0x687   : > { %6114 = vst.msk [vmem:[#allocation4] sm:$0x3f] %vm6113_vm4, %v9700_v59  ;;  %6115 = vst.msk [vmem:[#allocation4 + $0x8] sm:$0x3f] %vm6113_vm4, %v9700_v59 }
 0x688   : > { %5646 = vrot.lane.b32.xlu1 %v5635_v22, %s9703_s24  ;;  %6116 = vst.msk [vmem:[#allocation4 + $0x10] sm:$0x3f] %vm6113_vm4, %v9700_v59  ;;  %6119 = vst.msk [vmem:[#allocation4 + $0x28] sm:$0x3f] %vm6113_vm4, %v9700_v59 }
 0x689   : > { %6117 = vst.msk [vmem:[#allocation4 + $0x18] sm:$0x3f] %vm6113_vm4, %v9700_v59  ;;  %6118 = vst.msk [vmem:[#allocation4 + $0x20] sm:$0x3f] %vm6113_vm4, %v9700_v59 }
 0x68d   : > { %v5675_v24 = vld [vmem:[#allocation3 + $0x81] ss:$2 sm:$0xf]  ;;  %v5663_v23 = vld [vmem:[#allocation3 + $0x80] ss:$2 sm:$0xf] }
 0x68e   : > { %5686 = vrot.lane.b32.xlu1 %v5675_v24, %s9692_s12  ;;  %5667 = vst.msk [vmem:[#allocation8 + $0x38] sm:$0xf] %vm5469_vm13, %v5663_v23  ;;  %v5703_v29 = vld [vmem:[#allocation3 + $0x82] ss:$2 sm:$0xf]  ;;  %vm6121_vm13 = vcmask 519168  }
 0x68f   : > { %v5731_v28 = vld [vmem:[#allocation3 + $0x83] ss:$2 sm:$0xf]  ;;  %v6126_v59 = vld [vmem:[#allocation4] ss:$2 sm:$0x3] }
 0x690   : > { %v6133_v0 = vld [vmem:[#allocation4 + $0x1] ss:$2 sm:$0x3]  ;;  %6130 = vst.msk [vmem:[#allocation9] sm:$0x3] %vm6129_vm0, %v6126_v59  ;;  %v6411_v59 = vld [vmem:[%s13616_s7 + $0x48] sm:$0xff] }
 0x691   : > { %v6168_v1 = vld [vmem:[#allocation4 + $0x3] ss:$2 sm:$0x3]  ;;  %v6144_v2 = vrot.slane %v6133_v0, %v12252_v61  ;;  %v6162_v4 = vld [vmem:[#allocation4 + $0x2] ss:$2 sm:$0x3] }
 0x692   : > { %5782 = vrot.lane.b32.xlu1 %v5771_v25, %s9692_s12  ;;  %v6179_v3 = vrot.slane %v6168_v1, %v12252_v61  ;;  %6165 = vst.msk [vmem:[#allocation9 + $0x2] sm:$0x3] %vm6129_vm0, %v6162_v4  ;;  %v6412_v0 = vld [vmem:[%s13616_s7 + $0x50] sm:$0xff]  ;;  %v6443_v4 = vld [vmem:[%s13616_s7 + $0x148] sm:$0xff] }
 0x693   : > { %6152 = vrot.lane.b32.xlu0 %v6144_v2, %s9701_s18  ;;  %v6444_v1 = vld [vmem:[%s13616_s7 + $0x150] sm:$0xff]  ;;  %v6427_v2 = vld [vmem:[%s13616_s7 + $0xc8] sm:$0xff] }
 0x695   : > { %v5685_v26 = vpop.permute.xlu0 %5684 }
 0x696   : > { %5714 = vrot.lane.b32.xlu1 %v5703_v29, %s9701_s18  ;;  %v5493_v47 = vpop.permute.xlu1 %5492  ;;  %5694 = vst.msk [vmem:[#allocation8 + $0x28] sm:$0xf] %vm5498_vm15, %v5685_v26 }
 0x697   : > { %5502 = vst.msk [vmem:[#allocation8 + $0x30] sm:$0xf] %vm5498_vm15, %v5493_v47  ;;  %6187 = vrot.lane.b32.xlu0 %v6179_v3, %s9701_s18  ;;  %v6459_v3 = vld [vmem:[%s13616_s7 + $0x1c8] sm:$0xff] }
 0x69a   : > { %5810 = vrot.lane.b32.xlu1 %v5799_v27, %s9701_s18 }
 0x69e   : > { %5742 = vrot.lane.b32.xlu1 %v5731_v28, %s9703_s24 }
 0x6a2   : > { %5838 = vrot.lane.b32.xlu1 %v5827_v30, %s9703_s24 }
 0x6c8   : > { %v9098_v5 = vpop.f32.mrf.mxu1 }
 0x6ca   : > { %v9099_v6 = vpop.f32.mrf.mxu1 }
 0x6cb   : > { %v9100_v7 = vadd.f32 %v9099_v6, %v9098_v5 }
 0x6cd   : > { %v6018_v11 = vadd.f32 %v9100_v7, %v12263_v8 }
 0x6e1   : > { %v5781_v31 = vpop.permute.xlu0 %5780 }
 0x6e2   : > { %v5591_v32 = vpop.permute.xlu1 %5590  ;;  %5790 = vst.msk [vmem:[#allocation8 + $0x2c] sm:$0xf] %vm5498_vm15, %v5781_v31  ;;  %v6433_v31 = vld [vmem:[%s13616_s7 + $0xf8] sm:$0xff] }
 0x6e3   : > { %5599 = vst.msk [vmem:[#allocation8 + $0x34] sm:$0xf] %vm5498_vm15, %v5591_v32  ;;  %v6465_v32 = vld [vmem:[%s13616_s7 + $0x1f8] sm:$0xff]  ;;  %9142 = vmatprep.subr.mxu1 %v6433_v31  ;;  %v6406_v31 = vld [vmem:[%s13616_s7 + $0x20] sm:$0xff] }
 0x6e4   : > { %9177 = vmatprep.subr.mxu0 %v6465_v32  ;;  %v6438_v32 = vld [vmem:[%s13616_s7 + $0x120] sm:$0xff] }
 0x6e5   : > { %v5713_v33 = vpop.permute.xlu0 %5712 }
 0x6e6   : > { %v5739_v34 = vpop.permute.xlu1 %5738  ;;  %5722 = vst.msk [vmem:[#allocation8 + $0x28] sm:$0xf] %vm5527_vm8, %v5713_v33  ;;  %v6417_v33 = vld [vmem:[%s13616_s7 + $0x78] sm:$0xff] }
 0x6e7   : > { %5749 = vst.msk [vmem:[#allocation8 + $0x18] sm:$0xf] %vm5556_vm9, %v5739_v34  ;;  %9143 = vmatpush3.msra.mxu1 %v6417_v33  ;;  %v6421_v33 = vld [vmem:[%s13616_s7 + $0x98] sm:$0xff] }
 0x6e9   : > { %v5809_v35 = vpop.permute.xlu0 %5808 }
 0x6ea   : > { %v5835_v36 = vpop.permute.xlu1 %5834  ;;  %5818 = vst.msk [vmem:[#allocation8 + $0x2c] sm:$0xf] %vm5527_vm8, %v5809_v35  ;;  %v6449_v35 = vld [vmem:[%s13616_s7 + $0x178] sm:$0xff] }
 0x6eb   : > { %5845 = vst.msk [vmem:[#allocation8 + $0x1c] sm:$0xf] %vm5556_vm9, %v5835_v36  ;;  %v6432_v36 = vld [vmem:[%s13616_s7 + $0xf0] sm:$0xff] }
 0x6ec   : > { %9144 = vmatprep.subr.mxu1 %v6432_v36 }
 0x6ed   : > { %v5741_v37 = vpop.permute.xlu0 %5740 }
 0x6ee   : > { %v5522_v38 = vpop.permute.xlu1 %5521  ;;  %5750 = vst.msk [vmem:[#allocation8 + $0x28] sm:$0xf] %vm5556_vm9, %v5741_v37  ;;  %v9659_v41 = vld [vmem:[#allocation8 + $0x8] ss:$16 sps:$4 sm:$0xff]   ;;  %v6464_v37 = vld [vmem:[%s13616_s7 + $0x1f0] sm:$0xff] }
 0x6ef   : > { %5531 = vst.msk [vmem:[#allocation8 + $0x30] sm:$0xf] %vm5527_vm8, %v5522_v38  ;;  %v6416_v38 = vld [vmem:[%s13616_s7 + $0x70] sm:$0xff] }
 0x6f0   : > { %9145 = vmatpush3.msra.mxu1 %v6416_v38 }
 0x6f1   : > { %v5837_v39 = vpop.permute.xlu0 %5836 }
 0x6f2   : > { %v5619_v40 = vpop.permute.xlu1 %5618  ;;  %v9661_v42 = vld [vmem:[#allocation8 + $0xc] ss:$16 sps:$4 sm:$0xff]   ;;  %5846 = vst.msk [vmem:[#allocation8 + $0x2c] sm:$0xf] %vm5556_vm9, %v5837_v39 }
 0x6f3   : > { %5627 = vst.msk [vmem:[#allocation8 + $0x34] sm:$0xf] %vm5527_vm8, %v5619_v40  ;;  %6090 = vmatprep.mubr.f32.mxu0 %v9661_v42  ;;  %v6448_v40 = vld [vmem:[%s13616_s7 + $0x170] sm:$0xff] }
 0x6f4   : > { %6091 = vmatmul.mubr.f32.vlgmr.msra.gmra.mxu0 %v9659_v41  ;;  %v6431_v41 = vld [vmem:[%s13616_s7 + $0xe8] sm:$0xff] }
 0x6f5   : > { %9178 = vmatpush3.msra.mxu0 %v6449_v35  ;;  %9146 = vmatprep.subr.mxu1 %v6431_v41 }
 0x6f6   : > { %v5551_v43 = vpop.permute.xlu1 %5550  ;;  %9179 = vmatprep.subr.mxu0 %v6464_v37 }
 0x6f7   : > { %5560 = vst.msk [vmem:[#allocation8 + $0x30] sm:$0xf] %vm5556_vm9, %v5551_v43  ;;  %v6463_v43 = vld [vmem:[%s13616_s7 + $0x1e8] sm:$0xff]  ;;  %9180 = vmatpush3.msra.mxu0 %v6448_v40 }
 0x6f8   : > { %9181 = vmatprep.subr.mxu0 %v6463_v43 }
 0x6fa   : > { %v5647_v44 = vpop.permute.xlu1 %5646 }
 0x6fb   : > { %5655 = vst.msk [vmem:[#allocation8 + $0x34] sm:$0xf] %vm5556_vm9, %v5647_v44  ;;  %v6415_v44 = vld [vmem:[%s13616_s7 + $0x68] sm:$0xff] }
 0x6fc   : > { %9147 = vmatpush3.msra.mxu1 %v6415_v44 }
 0x6fe   : > { %v9664_v62 = vld [vmem:[#allocation8 + $0x20] ss:$16 sps:$4 sm:$0xff]  }
 0x700   : > { %v5687_v45 = vpop.permute.xlu1 %5686 }
 0x701   : > { %5695 = vst.msk [vmem:[#allocation8 + $0x38] sm:$0xf] %vm5498_vm15, %v5687_v45  ;;  %v6447_v45 = vld [vmem:[%s13616_s7 + $0x168] sm:$0xff] }
 0x702   : > { %v9662_v46 = vld [vmem:[#allocation8 + $0x24] ss:$16 sps:$4 sm:$0xff]   ;;  %9182 = vmatpush3.msra.mxu0 %v6447_v45 }
 0x703   : > { %6020 = vmatprep.mubr.f32.mxu1 %v9662_v46  ;;  %v6430_v46 = vld [vmem:[%s13616_s7 + $0xe0] sm:$0xff] }
 0x704   : > { %v5783_v48 = vpop.permute.xlu1 %5782  ;;  %6021 = vmatmul.mubr.f32.gmra.mxu1 %v9664_v62  ;;  %v6462_v62 = vld [vmem:[%s13616_s7 + $0x1e0] sm:$0xff]  ;;  %9148 = vmatprep.subr.mxu1 %v6430_v46 }
 0x705   : > { %5791 = vst.msk [vmem:[#allocation8 + $0x3c] sm:$0xf] %vm5498_vm15, %v5783_v48  ;;  %v6153_v13 = vpop.permute.xlu0 %6152  ;;  %9183 = vmatprep.subr.mxu0 %v6462_v62 }
 0x706   : > { %6159 = vst.msk [vmem:[#allocation9] sm:$0x3] %vm6158_vm2, %v6153_v13 }
 0x708   : > { %v5715_v49 = vpop.permute.xlu1 %5714 }
 0x709   : > { %5723 = vst.msk [vmem:[#allocation8 + $0x38] sm:$0xf] %vm5527_vm8, %v5715_v49  ;;  %v6188_v15 = vpop.permute.xlu0 %6187  ;;  %v6414_v49 = vld [vmem:[%s13616_s7 + $0x60] sm:$0xff] }
 0x70a   : > { %6193 = vst.msk [vmem:[#allocation9 + $0x2] sm:$0x3] %vm6158_vm2, %v6188_v15  ;;  %9149 = vmatpush3.msra.mxu1 %v6414_v49  ;;  %v6410_v15 = vld [vmem:[%s13616_s7 + $0x40] sm:$0xff]  ;;  %v6405_v49 = vld [vmem:[%s13616_s7 + $0x18] sm:$0xff] }
 0x70c   : > { %v5811_v50 = vpop.permute.xlu1 %5810 }
 0x70d   : > { %5819 = vst.msk [vmem:[#allocation8 + $0x3c] sm:$0xf] %vm5527_vm8, %v5811_v50  ;;  %v6446_v50 = vld [vmem:[%s13616_s7 + $0x160] sm:$0xff] }
 0x70e   : > { %9184 = vmatpush3.msra.mxu0 %v6446_v50  ;;  %v6437_v50 = vld [vmem:[%s13616_s7 + $0x118] sm:$0xff] }
 0x710   : > { %v5743_v51 = vpop.permute.xlu1 %5742 }
 0x711   : > { %5751 = vst.msk [vmem:[#allocation8 + $0x38] sm:$0xf] %vm5556_vm9, %v5743_v51  ;;  %v6429_v51 = vld [vmem:[%s13616_s7 + $0xd8] sm:$0xff] }
 0x712   : > { %9150 = vmatprep.subr.mxu1 %v6429_v51 }
 0x714   : > { %v5839_v52 = vpop.permute.xlu1 %5838 }
 0x715   : > { %5847 = vst.msk [vmem:[#allocation8 + $0x3c] sm:$0xf] %vm5556_vm9, %v5839_v52  ;;  %v6461_v52 = vld [vmem:[%s13616_s7 + $0x1d8] sm:$0xff] }
 0x716   : > { %9185 = vmatprep.subr.mxu0 %v6461_v52  ;;  %v6420_v52 = vld [vmem:[%s13616_s7 + $0x90] sm:$0xff] }
 0x718   : > { %v9667_v54 = vld [vmem:[#allocation8 + $0x28] ss:$16 sps:$4 sm:$0xff]  }
 0x71c   : > { %v9665_v53 = vld [vmem:[#allocation8 + $0x2c] ss:$16 sps:$4 sm:$0xff]  }
 0x71d   : > { %6095 = vmatprep.mubr.f32.mxu0 %v9665_v53  ;;  %v6413_v53 = vld [vmem:[%s13616_s7 + $0x58] sm:$0xff] }
 0x71e   : > { %6096 = vmatmul.mubr.f32.gmra.mxu0 %v9667_v54  ;;  %v6445_v54 = vld [vmem:[%s13616_s7 + $0x158] sm:$0xff]  ;;  %9151 = vmatpush3.msra.mxu1 %v6413_v53  ;;  %v6452_v53 = vld [vmem:[%s13616_s7 + $0x190] sm:$0xff] }
 0x71f   : > { %9186 = vmatpush3.msra.mxu0 %v6445_v54  ;;  %9152 = vmatprep.subr.mxu1 %v6428_v55  ;;  %v6404_v54 = vld [vmem:[%s13616_s7 + $0x10] sm:$0xff] }
 0x720   : > { %9187 = vmatprep.subr.mxu0 %v6460_v56  ;;  %9153 = vmatpush3.msra.mxu1 %v6412_v0  ;;  %v6436_v55 = vld [vmem:[%s13616_s7 + $0x110] sm:$0xff]  ;;  %v6333_v56 = vld [vmem:[#allocation4 + $0x28] ss:$2 sm:$0x3]  ;;  %v6451_v0 = vld [vmem:[%s13616_s7 + $0x188] sm:$0xff] }
 0x721   : > { %9188 = vmatpush3.msra.mxu0 %v6444_v1  ;;  %9154 = vmatprep.subr.mxu1 %v6427_v2  ;;  %v6403_v1 = vld [vmem:[%s13616_s7 + $0x8] sm:$0xff]  ;;  %6335 = vst.msk [vmem:[#allocation9 + $0x1c] sm:$0x3] %vm6129_vm0, %v6333_v56 }
 0x722   : > { %9189 = vmatprep.subr.mxu0 %v6459_v3  ;;  %9155 = vmatpush3.msra.mxu1 %v6411_v59  ;;  %v6435_v3 = vld [vmem:[%s13616_s7 + $0x108] sm:$0xff]  ;;  %v6418_v59 = vld [vmem:[%s13616_s7 + $0x80] sm:$0xff] }
 0x723   : > { %9190 = vmatpush3.msra.mxu0 %v6443_v4  ;;  %v6491_v56 = vld [vmem:[%s13616_s7 + $0x2c8] sm:$0xff] }
 0x7b4   : > { %v9136_v9 = vpop.f32.mrf.mxu0 }
 0x7b6   : > { %v9137_v10 = vpop.f32.mrf.mxu0 }
 0x7b7   : > { %v9138_v12 = vadd.f32 %v9137_v10, %v9136_v9 }
 0x7b9   : > { %v6093_v14 = vadd.f32 %v9138_v12, %v6018_v11 }
 0x7bb   : > { %vm6101_vm11 = vcmp.ge.f32.partialorder %v6093_v14, 0.0  ;;  %v6103_v63 = vmul.f32 0.2, %v6093_v14 }
 0x7bd   : > { %v6105_v16 = vsel %vm6101_vm11, %v6093_v14, %v6103_v63  ;;  %v6426_v14 = vld [vmem:[%s13616_s7 + $0xc0] sm:$0xff] }
 0x7be   : > { %v6109_v17 = vcombine.high %v6105_v16, %v6105_v16  ;;  %6122 = vst.msk [vmem:[#allocation4 + $0x9] sm:$0xf] %vm6121_vm13, %v6105_v16  ;;  %v6458_v63 = vld [vmem:[%s13616_s7 + $0x1c0] sm:$0xff]  ;;  %9156 = vmatprep.subr.mxu1 %v6426_v14  ;;  %v6425_v16 = vld [vmem:[%s13616_s7 + $0xb8] sm:$0xff] }
 0x7bf   : > { %9191 = vmatprep.subr.mxu0 %v6458_v63  ;;  %9157 = vmatpush3.msra.mxu1 %v6410_v15  ;;  %v6373_v63 = vld [vmem:[#allocation4 + $0x2b] ss:$2 sm:$0x3] }
 0x7c0   : > { %6123 = vst.msk [vmem:[#allocation4 + $0x11] sm:$0xf] %vm6121_vm13, %v6109_v17  ;;  %v6457_v17 = vld [vmem:[%s13616_s7 + $0x1b8] sm:$0xff]  ;;  %9158 = vmatprep.subr.mxu1 %v6425_v16  ;;  %v6389_v15 = vrot.slane %v6373_v63, %v12252_v61 }
 0x7c1   : > { %v6505_v63 = vld [vmem:[%s13616_s7 + $0x338] sm:$0xff] }
 0x7c4   : > { %v9101_v58 = vpop.f32.mrf.mxu1 }
 0x7c5   : > { %v6201_v18 = vld [vmem:[#allocation4 + $0x9] ss:$2 sm:$0x3]  ;;  %v6195_v20 = vld [vmem:[#allocation4 + $0x8] ss:$2 sm:$0x3] }
 0x7c6   : > { %v6212_v19 = vrot.slane %v6201_v18, %v12252_v61  ;;  %v6229_v21 = vld [vmem:[#allocation4 + $0xa] ss:$2 sm:$0x3]  ;;  %v6235_v24 = vld [vmem:[#allocation4 + $0xb] ss:$2 sm:$0x3]  ;;  %v9102_v5 = vpop.f32.mrf.mxu1 }
 0x7c7   : > { %v6135_v22 = vld [vmem:[#allocation4 + $0x11] ss:$2 sm:$0x3]  ;;  %6198 = vst.msk [vmem:[#allocation9 + $0x4] sm:$0x3] %vm6129_vm0, %v6195_v20  ;;  %v6246_v27 = vrot.slane %v6235_v24, %v12252_v61  ;;  %v9103_v6 = vadd.f32 %v9102_v5, %v9101_v58  ;;  %v6441_v20 = vld [vmem:[%s13616_s7 + $0x138] sm:$0xff] }
 0x7c8   : > { %6232 = vst.msk [vmem:[#allocation9 + $0x6] sm:$0x3] %vm6129_vm0, %v6229_v21  ;;  %6220 = vrot.lane.b32.xlu0 %v6212_v19, %s9701_s18  ;;  %v6151_v23 = vrot.slane %v6135_v22, %v12252_v61  ;;  %v6170_v25 = vld [vmem:[#allocation4 + $0x13] ss:$2 sm:$0x3]  ;;  %v6409_v19 = vld [vmem:[%s13616_s7 + $0x38] sm:$0xff] }
 0x7c9   : > { %v6269_v29 = vld [vmem:[#allocation4 + $0x11] ss:$2 sm:$0x3]  ;;  %v6128_v26 = vld [vmem:[#allocation4 + $0x10] ss:$2 sm:$0x3]  ;;  %v6186_v34 = vrot.slane %v6170_v25, %v12252_v61  ;;  %v6023_v10 = vadd.f32 %v9103_v6, %v12263_v8  ;;  %9159 = vmatpush3.msra.mxu1 %v6409_v19 }
 0x7ca   : > { %v6164_v47 = vld [vmem:[#allocation4 + $0x12] ss:$2 sm:$0x3]  ;;  %6154 = vrot.lane.b32.xlu1 %v6151_v23, %s9701_s18  ;;  %6131 = vst.msk [vmem:[#allocation9 + $0x10] sm:$0x3] %vm6129_vm0, %v6128_v26  ;;  %v6280_v39 = vrot.slane %v6269_v29, %v12252_v61  ;;  %v6424_v22 = vld [vmem:[%s13616_s7 + $0xb0] sm:$0xff] }
 0x7cb   : > { %6166 = vst.msk [vmem:[#allocation9 + $0x12] sm:$0x3] %vm6129_vm0, %v6164_v47  ;;  %v6263_v28 = vld [vmem:[#allocation4 + $0x10] ss:$2 sm:$0x3]  ;;  %v6456_v24 = vld [vmem:[%s13616_s7 + $0x1b0] sm:$0xff]  ;;  %9160 = vmatprep.subr.mxu1 %v6424_v22 }
 0x7cc   : > { %v6297_v30 = vld [vmem:[#allocation4 + $0x12] ss:$2 sm:$0x3]  ;;  %6266 = vst.msk [vmem:[#allocation9 + $0x8] sm:$0x3] %vm6129_vm0, %v6263_v28  ;;  %6254 = vrot.lane.b32.xlu0 %v6246_v27, %s9701_s18  ;;  %v6408_v23 = vld [vmem:[%s13616_s7 + $0x30] sm:$0xff] }
 0x7cd   : > { %6300 = vst.msk [vmem:[#allocation9 + $0xa] sm:$0x3] %vm6129_vm0, %v6297_v30  ;;  %v6303_v42 = vld [vmem:[#allocation4 + $0x13] ss:$2 sm:$0x3]  ;;  %v6440_v25 = vld [vmem:[%s13616_s7 + $0x130] sm:$0xff]  ;;  %9161 = vmatpush3.msra.mxu1 %v6408_v23 }
 0x7ce   : > { %6189 = vrot.lane.b32.xlu1 %v6186_v34, %s9701_s18  ;;  %v6314_v48 = vrot.slane %v6303_v42, %v12252_v61  ;;  %v6442_v8 = vld [vmem:[%s13616_s7 + $0x140] sm:$0xff]  ;;  %v6423_v29 = vld [vmem:[%s13616_s7 + $0xa8] sm:$0xff]  ;;  %v6453_v34 = vld [vmem:[%s13616_s7 + $0x198] sm:$0xff] }
 0x7cf   : > { %9192 = vmatpush3.msra.mxu0 %v6442_v8  ;;  %v6455_v26 = vld [vmem:[%s13616_s7 + $0x1a8] sm:$0xff]  ;;  %9162 = vmatprep.subr.mxu1 %v6423_v29  ;;  %v6422_v28 = vld [vmem:[%s13616_s7 + $0xa0] sm:$0xff] }
 0x7d0   : > { %6288 = vrot.lane.b32.xlu0 %v6280_v39, %s9701_s18  ;;  %9193 = vmatprep.subr.mxu0 %v6457_v17  ;;  %v6407_v47 = vld [vmem:[%s13616_s7 + $0x28] sm:$0xff]  ;;  %v6454_v30 = vld [vmem:[%s13616_s7 + $0x1a0] sm:$0xff] }
 0x7d1   : > { %9194 = vmatpush3.msra.mxu0 %v6441_v20  ;;  %v6439_v27 = vld [vmem:[%s13616_s7 + $0x128] sm:$0xff]  ;;  %9163 = vmatpush3.msra.mxu1 %v6407_v47  ;;  %v6450_v5 = vld [vmem:[%s13616_s7 + $0x180] sm:$0xff] }
 0x7d2   : > { %9195 = vmatprep.subr.mxu0 %v6456_v24  ;;  %9164 = vmatprep.subr.mxu1 %v6422_v28  ;;  %v6419_v58 = vld [vmem:[%s13616_s7 + $0x88] sm:$0xff]  ;;  %v6402_v6 = vld [vmem:[%s13616_s7] sm:$0xff] }
 0x7d3   : > { %9196 = vmatpush3.msra.mxu0 %v6440_v25  ;;  %9165 = vmatpush3.msra.mxu1 %v6406_v31 }
 0x7d4   : > { %6322 = vrot.lane.b32.xlu0 %v6314_v48, %s9701_s18  ;;  %9197 = vmatprep.subr.mxu0 %v6455_v26 }
 0x7d5   : > { %9198 = vmatpush3.msra.mxu0 %v6439_v27  ;;  %9166 = vmatprep.subr.mxu1 %v6421_v33  ;;  %v6481_v33 = vld [vmem:[%s13616_s7 + $0x278] sm:$0xff] }
 0x7d6   : > { %9199 = vmatprep.subr.mxu0 %v6454_v30  ;;  %9167 = vmatpush3.msra.mxu1 %v6405_v49  ;;  %v6525_v49 = vld [vmem:[%s13616_s7 + $0x3d8] sm:$0xff] }
 0x7d7   : > { %9200 = vmatpush3.msra.mxu0 %v6438_v32  ;;  %9168 = vmatprep.subr.mxu1 %v6420_v52  ;;  %v6492_v52 = vld [vmem:[%s13616_s7 + $0x2d0] sm:$0xff] }
 0x7d8   : > { %9201 = vmatprep.subr.mxu0 %v6453_v34  ;;  %9169 = vmatpush3.msra.mxu1 %v6404_v54  ;;  %v6513_v34 = vld [vmem:[%s13616_s7 + $0x378] sm:$0xff]  ;;  %v6476_v54 = vld [vmem:[%s13616_s7 + $0x250] sm:$0xff] }
 0x7d9   : > { %9202 = vmatpush3.msra.mxu0 %v6437_v50  ;;  %9170 = vmatprep.subr.mxu1 %v6419_v58  ;;  %v6477_v50 = vld [vmem:[%s13616_s7 + $0x258] sm:$0xff]  ;;  %v6523_v58 = vld [vmem:[%s13616_s7 + $0x3c8] sm:$0xff] }
 0x7da   : > { %9203 = vmatprep.subr.mxu0 %v6452_v53  ;;  %9171 = vmatpush3.msra.mxu1 %v6403_v1  ;;  %v6524_v53 = vld [vmem:[%s13616_s7 + $0x3d0] sm:$0xff] }
 0x7db   : > { %9204 = vmatpush3.msra.mxu0 %v6436_v55  ;;  %9172 = vmatprep.subr.mxu1 %v6418_v59  ;;  %v6508_v55 = vld [vmem:[%s13616_s7 + $0x350] sm:$0xff]  ;;  %v6490_v59 = vld [vmem:[%s13616_s7 + $0x2c0] sm:$0xff] }
 0x7dc   : > { %9205 = vmatprep.subr.mxu0 %v6451_v0  ;;  %9173 = vmatpush3.msra.mxu1 %v6402_v6 }
 0x7dd   : > { %9206 = vmatpush3.msra.mxu0 %v6435_v3  ;;  %v6507_v3 = vld [vmem:[%s13616_s7 + $0x348] sm:$0xff] }
 0x7de   : > { %v9139_v7 = vpop.f32.mrf.mxu0  ;;  %9207 = vmatprep.subr.mxu0 %v6450_v5 }
 0x7e0   : > { %v9140_v9 = vpop.f32.mrf.mxu0 }
 0x7e1   : > { %v9141_v11 = vadd.f32 %v9140_v9, %v9139_v7  ;;  %v6339_v7 = vld [vmem:[#allocation4 + $0x29] ss:$2 sm:$0x3]  ;;  %v6434_v9 = vld [vmem:[%s13616_s7 + $0x100] sm:$0xff] }
 0x7e2   : > { %9208 = vmatpush3.msra.mxu0 %v6434_v9  ;;  %v6355_v14 = vrot.slane %v6339_v7, %v12252_v61  ;;  %v6474_v7 = vld [vmem:[%s13616_s7 + $0x240] sm:$0xff] }
 0x7e3   : > { %v6098_v12 = vadd.f32 %v9141_v11, %v6023_v10  ;;  %v6497_v10 = vld [vmem:[%s13616_s7 + $0x2f8] sm:$0xff]  ;;  %v6506_v9 = vld [vmem:[%s13616_s7 + $0x340] sm:$0xff] }
 0x7e4   : > { %v6529_v11 = vld [vmem:[%s13616_s7 + $0x3f8] sm:$0xff]  ;;  %9212 = vmatprep.subr.mxu1 %v6497_v10 }
 0x7e5   : > { %vm6102_vm6 = vcmp.ge.f32.partialorder %v6098_v12, 0.0  ;;  %v6104_v13 = vmul.f32 0.2, %v6098_v12  ;;  %9247 = vmatprep.subr.mxu0 %v6529_v11  ;;  %v6489_v10 = vld [vmem:[%s13616_s7 + $0x2b8] sm:$0xff] }
 0x7e7   : > { %v6106_v18 = vsel %vm6102_vm6, %v6098_v12, %v6104_v13  ;;  %v6367_v12 = vld [vmem:[#allocation4 + $0x2a] ss:$2 sm:$0x3] }
 0x7e8   : > { %v6110_v21 = vcombine.high %v6106_v18, %v6106_v18  ;;  %6124 = vst.msk [vmem:[#allocation4 + $0x19] sm:$0xf] %vm6121_vm13, %v6106_v18 }
 0x7e9   : > { %6369 = vst.msk [vmem:[#allocation9 + $0x1e] sm:$0x3] %vm6129_vm0, %v6367_v12 }
 0x7ea   : > { %6125 = vst.msk [vmem:[#allocation4 + $0x21] sm:$0xf] %vm6121_vm13, %v6110_v21 }
 0x7ef   : > { %v6337_v35 = vld [vmem:[#allocation4 + $0x19] ss:$2 sm:$0x3]  ;;  %v6331_v41 = vld [vmem:[#allocation4 + $0x18] ss:$2 sm:$0x3] }
 0x7f0   : > { %v6203_v36 = vld [vmem:[#allocation4 + $0x19] ss:$2 sm:$0x3]  ;;  %v6348_v37 = vrot.slane %v6337_v35, %v12252_v61  ;;  %v6197_v42 = vld [vmem:[#allocation4 + $0x18] ss:$2 sm:$0x3] }
 0x7f1   : > { %v6219_v38 = vrot.slane %v6203_v36, %v12252_v61  ;;  %v6371_v39 = vld [vmem:[#allocation4 + $0x1b] ss:$2 sm:$0x3]  ;;  %v6271_v43 = vld [vmem:[#allocation4 + $0x21] ss:$2 sm:$0x3] }
 0x7f2   : > { %v6237_v40 = vld [vmem:[#allocation4 + $0x1b] ss:$2 sm:$0x3]  ;;  %6356 = vrot.lane.b32.xlu0 %v6348_v37, %s9701_s18  ;;  %6334 = vst.msk [vmem:[#allocation9 + $0xc] sm:$0x3] %vm6129_vm0, %v6331_v41  ;;  %v6382_v46 = vrot.slane %v6371_v39, %v12252_v61  ;;  %v6287_v2 = vrot.slane %v6271_v43, %v12252_v61  ;;  %v6496_v35 = vld [vmem:[%s13616_s7 + $0x2f0] sm:$0xff] }
 0x7f3   : > { %6222 = vrot.lane.b32.xlu1 %v6219_v38, %s9701_s18  ;;  %6199 = vst.msk [vmem:[#allocation9 + $0x14] sm:$0x3] %vm6129_vm0, %v6197_v42  ;;  %v6365_v44 = vld [vmem:[#allocation4 + $0x1a] ss:$2 sm:$0x3]  ;;  %v6253_v62 = vrot.slane %v6237_v40, %v12252_v61  ;;  %v6528_v36 = vld [vmem:[%s13616_s7 + $0x3f0] sm:$0xff] }
 0x7f4   : > { %v6231_v45 = vld [vmem:[#allocation4 + $0x1a] ss:$2 sm:$0x3]  ;;  %6368 = vst.msk [vmem:[#allocation9 + $0xe] sm:$0x3] %vm6129_vm0, %v6365_v44  ;;  %v6480_v37 = vld [vmem:[%s13616_s7 + $0x270] sm:$0xff] }
 0x7f5   : > { %6233 = vst.msk [vmem:[#allocation9 + $0x16] sm:$0x3] %vm6129_vm0, %v6231_v45  ;;  %v6265_v48 = vld [vmem:[#allocation4 + $0x20] ss:$2 sm:$0x3]  ;;  %v6495_v40 = vld [vmem:[%s13616_s7 + $0x2e8] sm:$0xff] }
 0x7f6   : > { %6267 = vst.msk [vmem:[#allocation9 + $0x18] sm:$0x3] %vm6129_vm0, %v6265_v48  ;;  %v6299_v51 = vld [vmem:[#allocation4 + $0x22] ss:$2 sm:$0x3]  ;;  %6390 = vrot.lane.b32.xlu0 %v6382_v46, %s9701_s18  ;;  %v6527_v41 = vld [vmem:[%s13616_s7 + $0x3e8] sm:$0xff] }
 0x7f7   : > { %6256 = vrot.lane.b32.xlu1 %v6253_v62, %s9701_s18  ;;  %6301 = vst.msk [vmem:[#allocation9 + $0x1a] sm:$0x3] %vm6129_vm0, %v6299_v51  ;;  %v6305_v4 = vld [vmem:[#allocation4 + $0x23] ss:$2 sm:$0x3]  ;;  %v6479_v42 = vld [vmem:[%s13616_s7 + $0x268] sm:$0xff] }
 0x7f8   : > { %v6321_v13 = vrot.slane %v6305_v4, %v12252_v61  ;;  %v6512_v38 = vld [vmem:[%s13616_s7 + $0x370] sm:$0xff]  ;;  %v6511_v43 = vld [vmem:[%s13616_s7 + $0x368] sm:$0xff]  ;;  %v6494_v44 = vld [vmem:[%s13616_s7 + $0x2e0] sm:$0xff] }
 0x7f9   : > { %v6526_v45 = vld [vmem:[%s13616_s7 + $0x3e0] sm:$0xff]  ;;  %v6493_v48 = vld [vmem:[%s13616_s7 + $0x2d8] sm:$0xff] }
 0x7fa   : > { %v6478_v46 = vld [vmem:[%s13616_s7 + $0x260] sm:$0xff]  ;;  %v6509_v51 = vld [vmem:[%s13616_s7 + $0x358] sm:$0xff] }
 0x7fb   : > { %6290 = vrot.lane.b32.xlu1 %v6287_v2, %s9701_s18  ;;  %v6510_v62 = vld [vmem:[%s13616_s7 + $0x360] sm:$0xff]  ;;  %v6475_v2 = vld [vmem:[%s13616_s7 + $0x248] sm:$0xff] }
 0x7fc   : > { %v6522_v4 = vld [vmem:[%s13616_s7 + $0x3c0] sm:$0xff] }
 0x7ff   : > { %6324 = vrot.lane.b32.xlu1 %v6321_v13, %s9701_s18  ;;  %v6521_v13 = vld [vmem:[%s13616_s7 + $0x3b8] sm:$0xff] }
 0x803   : > { %6358 = vrot.lane.b32.xlu1 %v6355_v14, %s9701_s18  ;;  %v6473_v14 = vld [vmem:[%s13616_s7 + $0x238] sm:$0xff] }
 0x807   : > { %6392 = vrot.lane.b32.xlu1 %v6389_v15, %s9701_s18  ;;  %v6488_v15 = vld [vmem:[%s13616_s7 + $0x2b0] sm:$0xff] }
 0x83a   : > { %v6221_v8 = vpop.permute.xlu0 %6220 }
 0x83b   : > { %6226 = vst.msk [vmem:[#allocation9 + $0x4] sm:$0x3] %vm6158_vm2, %v6221_v8  ;;  %v6520_v8 = vld [vmem:[%s13616_s7 + $0x3b0] sm:$0xff] }
 0x83c   : > { %v6155_v16 = vpop.permute.xlu1 %6154 }
 0x83d   : > { %6160 = vst.msk [vmem:[#allocation9 + $0x10] sm:$0x3] %vm6158_vm2, %v6155_v16  ;;  %v6472_v16 = vld [vmem:[%s13616_s7 + $0x230] sm:$0xff] }
 0x83e   : > { %v6255_v17 = vpop.permute.xlu0 %6254 }
 0x83f   : > { %6260 = vst.msk [vmem:[#allocation9 + $0x6] sm:$0x3] %vm6158_vm2, %v6255_v17  ;;  %v6504_v17 = vld [vmem:[%s13616_s7 + $0x330] sm:$0xff] }
 0x840   : > { %v6190_v18 = vpop.permute.xlu1 %6189 }
 0x841   : > { %6194 = vst.msk [vmem:[#allocation9 + $0x12] sm:$0x3] %vm6158_vm2, %v6190_v18  ;;  %v6487_v18 = vld [vmem:[%s13616_s7 + $0x2a8] sm:$0xff] }
 0x842   : > { %v6289_v19 = vpop.permute.xlu0 %6288 }
 0x843   : > { %6294 = vst.msk [vmem:[#allocation9 + $0x8] sm:$0x3] %vm6158_vm2, %v6289_v19  ;;  %v6519_v19 = vld [vmem:[%s13616_s7 + $0x3a8] sm:$0xff] }
 0x846   : > { %v6323_v20 = vpop.permute.xlu0 %6322 }
 0x847   : > { %6328 = vst.msk [vmem:[#allocation9 + $0xa] sm:$0x3] %vm6158_vm2, %v6323_v20  ;;  %v6471_v20 = vld [vmem:[%s13616_s7 + $0x228] sm:$0xff] }
 0x848   : > { %v9668_v26 = vld [vmem:[#allocation9] ss:$16 sps:$4 sm:$0xff]  }
 0x849   : > { %v6549_v27 = vrot.slane %v9668_v26, %v12252_v61  ;;  %v6517_v26 = vld [vmem:[%s13616_s7 + $0x398] sm:$0xff] }
 0x84b   : > { %v6557_v31 = vcombine.high %v6549_v27, %v6549_v27 }
 0x84d   : > { %6649 = vmatprep.mubr.f32.mxu1 %v6557_v31  ;;  %v6468_v31 = vld [vmem:[%s13616_s7 + $0x210] sm:$0xff] }
 0x84e   : > { %6650 = vmatmul.mubr.f32.vlgmr.msra.gmra.mxu1 %v6549_v27  ;;  %v6501_v27 = vld [vmem:[%s13616_s7 + $0x318] sm:$0xff] }
 0x84f   : > { %9213 = vmatpush3.msra.mxu1 %v6481_v33  ;;  %v6483_v33 = vld [vmem:[%s13616_s7 + $0x288] sm:$0xff] }
 0x850   : > { %9214 = vmatprep.subr.mxu1 %v6496_v35  ;;  %v6467_v35 = vld [vmem:[%s13616_s7 + $0x208] sm:$0xff] }
 0x851   : > { %9215 = vmatpush3.msra.mxu1 %v6480_v37  ;;  %v6482_v37 = vld [vmem:[%s13616_s7 + $0x280] sm:$0xff] }
 0x852   : > { %9216 = vmatprep.subr.mxu1 %v6495_v40  ;;  %v6498_v40 = vld [vmem:[%s13616_s7 + $0x300] sm:$0xff] }
 0x853   : > { %9217 = vmatpush3.msra.mxu1 %v6479_v42  ;;  %v6989_v42 = vld [vmem:[%s13618_s9 + $0x1f8] sm:$0xff] }
 0x854   : > { %9218 = vmatprep.subr.mxu1 %v6494_v44  ;;  %v6973_v44 = vld [vmem:[%s13618_s9 + $0x178] sm:$0xff] }
 0x855   : > { %9219 = vmatpush3.msra.mxu1 %v6478_v46  ;;  %v6988_v46 = vld [vmem:[%s13618_s9 + $0x1f0] sm:$0xff] }
 0x856   : > { %9220 = vmatprep.subr.mxu1 %v6493_v48  ;;  %v6972_v48 = vld [vmem:[%s13618_s9 + $0x170] sm:$0xff] }
 0x857   : > { %9221 = vmatpush3.msra.mxu1 %v6477_v50  ;;  %v6987_v50 = vld [vmem:[%s13618_s9 + $0x1e8] sm:$0xff] }
 0x858   : > { %9222 = vmatprep.subr.mxu1 %v6492_v52  ;;  %v6971_v52 = vld [vmem:[%s13618_s9 + $0x168] sm:$0xff] }
 0x859   : > { %9223 = vmatpush3.msra.mxu1 %v6476_v54  ;;  %v6986_v54 = vld [vmem:[%s13618_s9 + $0x1e0] sm:$0xff] }
 0x85a   : > { %9224 = vmatprep.subr.mxu1 %v6491_v56  ;;  %v6970_v56 = vld [vmem:[%s13618_s9 + $0x160] sm:$0xff] }
 0x85b   : > { %9225 = vmatpush3.msra.mxu1 %v6475_v2  ;;  %v6969_v2 = vld [vmem:[%s13618_s9 + $0x158] sm:$0xff] }
 0x85c   : > { %9226 = vmatprep.subr.mxu1 %v6490_v59  ;;  %v6984_v59 = vld [vmem:[%s13618_s9 + $0x1d0] sm:$0xff] }
 0x85d   : > { %9227 = vmatpush3.msra.mxu1 %v6474_v7  ;;  %v6983_v7 = vld [vmem:[%s13618_s9 + $0x1c8] sm:$0xff] }
 0x85e   : > { %9228 = vmatprep.subr.mxu1 %v6489_v10  ;;  %v6967_v10 = vld [vmem:[%s13618_s9 + $0x148] sm:$0xff] }
 0x85f   : > { %9229 = vmatpush3.msra.mxu1 %v6473_v14  ;;  %v6966_v14 = vld [vmem:[%s13618_s9 + $0x140] sm:$0xff] }
 0x860   : > { %9230 = vmatprep.subr.mxu1 %v6488_v15  ;;  %v6898_v15 = vld [vmem:[#allocation5 + $0x4] sm:$0x1] }
 0x861   : > { %9231 = vmatpush3.msra.mxu1 %v6472_v16  ;;  %v6981_v16 = vld [vmem:[%s13618_s9 + $0x1b8] sm:$0xff]  ;;  %6899 = vst.msk [vmem:[#allocation10 + $0x4] sm:$0x1] %vm12824_vm1, %v6898_v15 }
 0x862   : > { %9232 = vmatprep.subr.mxu1 %v6487_v18  ;;  %v6948_v18 = vld [vmem:[%s13618_s9 + $0xb0] sm:$0xff] }
 0x863   : > { %9233 = vmatpush3.msra.mxu1 %v6471_v20  ;;  %v6932_v20 = vld [vmem:[%s13618_s9 + $0x30] sm:$0xff] }
 0x864   : > { %v6357_v21 = vpop.permute.xlu0 %6356 }
 0x865   : > { %v6223_v22 = vpop.permute.xlu1 %6222  ;;  %6362 = vst.msk [vmem:[#allocation9 + $0xc] sm:$0x3] %vm6158_vm2, %v6357_v21  ;;  %v6503_v21 = vld [vmem:[%s13616_s7 + $0x328] sm:$0xff] }
 0x866   : > { %6227 = vst.msk [vmem:[#allocation9 + $0x14] sm:$0x3] %vm6158_vm2, %v6223_v22  ;;  %v6486_v22 = vld [vmem:[%s13616_s7 + $0x2a0] sm:$0xff] }
 0x867   : > { %9234 = vmatprep.subr.mxu1 %v6486_v22  ;;  %v6904_v22 = vld [vmem:[#allocation5 + $0x7] sm:$0x1] }
 0x868   : > { %v6391_v24 = vpop.permute.xlu0 %6390  ;;  %6905 = vst.msk [vmem:[#allocation10 + $0x7] sm:$0x1] %vm12824_vm1, %v6904_v22 }
 0x869   : > { %v6257_v23 = vpop.permute.xlu1 %6256  ;;  %6396 = vst.msk [vmem:[#allocation9 + $0xe] sm:$0x3] %vm6158_vm2, %v6391_v24  ;;  %v6518_v24 = vld [vmem:[%s13616_s7 + $0x3a0] sm:$0xff] }
 0x86a   : > { %6261 = vst.msk [vmem:[#allocation9 + $0x16] sm:$0x3] %vm6158_vm2, %v6257_v23  ;;  %v6470_v23 = vld [vmem:[%s13616_s7 + $0x220] sm:$0xff] }
 0x86b   : > { %9235 = vmatpush3.msra.mxu1 %v6470_v23  ;;  %v6947_v23 = vld [vmem:[%s13618_s9 + $0xa8] sm:$0xff] }
 0x86d   : > { %v6291_v25 = vpop.permute.xlu1 %6290 }
 0x86e   : > { %6295 = vst.msk [vmem:[#allocation9 + $0x18] sm:$0x3] %vm6158_vm2, %v6291_v25  ;;  %v6502_v25 = vld [vmem:[%s13616_s7 + $0x320] sm:$0xff] }
 0x871   : > { %v6325_v29 = vpop.permute.xlu1 %6324  ;;  %v9670_v47 = vld [vmem:[#allocation9 + $0x4] ss:$16 sps:$4 sm:$0xff]  }
 0x872   : > { %6329 = vst.msk [vmem:[#allocation9 + $0x1a] sm:$0x3] %vm6158_vm2, %v6325_v29  ;;  %v6556_v28 = vrot.slane %v9670_v47, %v12252_v61  ;;  %v6485_v29 = vld [vmem:[%s13616_s7 + $0x298] sm:$0xff] }
 0x873   : > { %v6469_v47 = vld [vmem:[%s13616_s7 + $0x218] sm:$0xff]  ;;  %9236 = vmatprep.subr.mxu1 %v6485_v29  ;;  %v6931_v29 = vld [vmem:[%s13618_s9 + $0x28] sm:$0xff] }
 0x874   : > { %v6558_v32 = vcombine.high %v6556_v28, %v6556_v28  ;;  %9237 = vmatpush3.msra.mxu1 %v6469_v47  ;;  %v6946_v47 = vld [vmem:[%s13618_s9 + $0xa0] sm:$0xff] }
 0x875   : > { %v6359_v30 = vpop.permute.xlu1 %6358 }
 0x876   : > { %6363 = vst.msk [vmem:[#allocation9 + $0x1c] sm:$0x3] %vm6158_vm2, %v6359_v30  ;;  %6719 = vmatprep.mubr.f32.mxu0 %v6558_v32  ;;  %v6516_v30 = vld [vmem:[%s13616_s7 + $0x390] sm:$0xff] }
 0x877   : > { %6720 = vmatmul.mubr.f32.vlgmr.msra.gmra.mxu0 %v6556_v28  ;;  %v6484_v28 = vld [vmem:[%s13616_s7 + $0x290] sm:$0xff] }
 0x878   : > { %9248 = vmatpush3.msra.mxu0 %v6513_v34  ;;  %v6500_v32 = vld [vmem:[%s13616_s7 + $0x310] sm:$0xff]  ;;  %v6515_v34 = vld [vmem:[%s13616_s7 + $0x388] sm:$0xff]  ;;  %9238 = vmatprep.subr.mxu1 %v6484_v28  ;;  %v6886_v28 = vld [vmem:[#allocation5] sm:$0x1] }
 0x879   : > { %v6393_v39 = vpop.permute.xlu1 %6392  ;;  %9249 = vmatprep.subr.mxu0 %v6528_v36  ;;  %v9671_v0 = vld [vmem:[#allocation9 + $0x8] ss:$16 sps:$4 sm:$0xff]   ;;  %9239 = vmatpush3.msra.mxu1 %v6468_v31  ;;  %v6962_v31 = vld [vmem:[%s13618_s9 + $0x120] sm:$0xff]  ;;  %6891 = vst.msk [vmem:[#allocation10] sm:$0x1] %vm12824_vm1, %v6886_v28 }
 0x87a   : > { %6397 = vst.msk [vmem:[#allocation9 + $0x1e] sm:$0x3] %vm6158_vm2, %v6393_v39  ;;  %9250 = vmatpush3.msra.mxu0 %v6512_v38  ;;  %v12614_v5 = vrot.slane %v9671_v0, %v12252_v61  ;;  %v6499_v36 = vld [vmem:[%s13616_s7 + $0x308] sm:$0xff]  ;;  %v6514_v38 = vld [vmem:[%s13616_s7 + $0x380] sm:$0xff]  ;;  %9240 = vmatprep.subr.mxu1 %v6483_v33  ;;  %v6985_v0 = vld [vmem:[%s13618_s9 + $0x1d8] sm:$0xff] }
 0x87b   : > { %9251 = vmatprep.subr.mxu0 %v6527_v41  ;;  %v6466_v39 = vld [vmem:[%s13616_s7 + $0x200] sm:$0xff]  ;;  %9241 = vmatpush3.msra.mxu1 %v6467_v35  ;;  %v6957_v41 = vld [vmem:[%s13618_s9 + $0xf8] sm:$0xff]  ;;  %v6913_v33 = vld [vmem:[#allocation5 + $0xb] sm:$0x1] }
 0x87c   : > { %9252 = vmatpush3.msra.mxu0 %v6511_v43  ;;  %v6575_v11 = vcombine.high %v12614_v5, %v12614_v5  ;;  %9242 = vmatprep.subr.mxu1 %v6482_v37  ;;  %v6941_v43 = vld [vmem:[%s13618_s9 + $0x78] sm:$0xff]  ;;  %6914 = vst.msk [vmem:[#allocation10 + $0xb] sm:$0x1] %vm12824_vm1, %v6913_v33  ;;  %v7020_v33 = vld [vmem:[%s13618_s9 + $0x2f0] sm:$0xff] }
 0x87d   : > { %9253 = vmatprep.subr.mxu0 %v6526_v45  ;;  %9243 = vmatpush3.msra.mxu1 %v6466_v39  ;;  %v6956_v45 = vld [vmem:[%s13618_s9 + $0xf0] sm:$0xff]  ;;  %v6977_v35 = vld [vmem:[%s13618_s9 + $0x198] sm:$0xff] }
 0x87e   : > { %9254 = vmatpush3.msra.mxu0 %v6510_v62  ;;  %6789 = vmatprep.mubr.f32.mxu1 %v6575_v11  ;;  %v6940_v62 = vld [vmem:[%s13618_s9 + $0x70] sm:$0xff]  ;;  %v6950_v11 = vld [vmem:[%s13618_s9 + $0xc0] sm:$0xff]  ;;  %v6961_v37 = vld [vmem:[%s13618_s9 + $0x118] sm:$0xff] }
 0x87f   : > { %9255 = vmatprep.subr.mxu0 %v6525_v49  ;;  %6790 = vmatmul.mubr.f32.vlgmr.msra.gmra.mxu1 %v12614_v5  ;;  %v6955_v49 = vld [vmem:[%s13618_s9 + $0xe8] sm:$0xff]  ;;  %v6968_v5 = vld [vmem:[%s13618_s9 + $0x150] sm:$0xff] }
 0x880   : > { %9256 = vmatpush3.msra.mxu0 %v6509_v51  ;;  %9282 = vmatprep.subr.mxu1 %v6957_v41  ;;  %v6939_v51 = vld [vmem:[%s13618_s9 + $0x68] sm:$0xff]  ;;  %v6976_v39 = vld [vmem:[%s13618_s9 + $0x190] sm:$0xff] }
 0x881   : > { %v9673_v1 = vld [vmem:[#allocation9 + $0xc] ss:$16 sps:$4 sm:$0xff]   ;;  %9257 = vmatprep.subr.mxu0 %v6524_v53  ;;  %9283 = vmatpush3.msra.mxu1 %v6941_v43  ;;  %v6954_v53 = vld [vmem:[%s13618_s9 + $0xe0] sm:$0xff]  ;;  %v6960_v41 = vld [vmem:[%s13618_s9 + $0x110] sm:$0xff] }
 0x882   : > { %9258 = vmatpush3.msra.mxu0 %v6508_v55  ;;  %v12617_v6 = vrot.slane %v9673_v1, %v12252_v61  ;;  %9284 = vmatprep.subr.mxu1 %v6956_v45  ;;  %v6938_v55 = vld [vmem:[%s13618_s9 + $0x60] sm:$0xff]  ;;  %v6937_v1 = vld [vmem:[%s13618_s9 + $0x58] sm:$0xff]  ;;  %v6975_v43 = vld [vmem:[%s13618_s9 + $0x188] sm:$0xff] }
 0x883   : > { %9259 = vmatprep.subr.mxu0 %v6523_v58  ;;  %9285 = vmatpush3.msra.mxu1 %v6940_v62  ;;  %v6953_v58 = vld [vmem:[%s13618_s9 + $0xd8] sm:$0xff]  ;;  %v6959_v45 = vld [vmem:[%s13618_s9 + $0x108] sm:$0xff]  ;;  %v6974_v62 = vld [vmem:[%s13618_s9 + $0x180] sm:$0xff] }
 0x884   : > { %9260 = vmatpush3.msra.mxu0 %v6507_v3  ;;  %v6576_v12 = vcombine.high %v12617_v6, %v12617_v6  ;;  %9286 = vmatprep.subr.mxu1 %v6955_v49  ;;  %v6952_v3 = vld [vmem:[%s13618_s9 + $0xd0] sm:$0xff]  ;;  %v6894_v49 = vld [vmem:[#allocation5 + $0x2] sm:$0x1] }
 0x885   : > { %9261 = vmatprep.subr.mxu0 %v6522_v4  ;;  %9287 = vmatpush3.msra.mxu1 %v6939_v51  ;;  %v6936_v4 = vld [vmem:[%s13618_s9 + $0x50] sm:$0xff]  ;;  %6895 = vst.msk [vmem:[#allocation10 + $0x2] sm:$0x1] %vm12824_vm1, %v6894_v49  ;;  %v6896_v51 = vld [vmem:[#allocation5 + $0x3] sm:$0x1] }
 0x886   : > { %9262 = vmatpush3.msra.mxu0 %v6506_v9  ;;  %6859 = vmatprep.mubr.f32.mxu0 %v6576_v12  ;;  %v6935_v9 = vld [vmem:[%s13618_s9 + $0x48] sm:$0xff]  ;;  %v6982_v12 = vld [vmem:[%s13618_s9 + $0x1c0] sm:$0xff]  ;;  %6897 = vst.msk [vmem:[#allocation10 + $0x3] sm:$0x1] %vm12824_vm1, %v6896_v51 }
 0x887   : > { %9263 = vmatprep.subr.mxu0 %v6521_v13  ;;  %9288 = vmatprep.subr.mxu1 %v6954_v53  ;;  %v6934_v13 = vld [vmem:[%s13618_s9 + $0x40] sm:$0xff]  ;;  %v7053_v53 = vld [vmem:[%s13618_s9 + $0x3f8] sm:$0xff] }
 0x888   : > { %9264 = vmatpush3.msra.mxu0 %v6505_v63  ;;  %9289 = vmatpush3.msra.mxu1 %v6938_v55  ;;  %v6918_v55 = vld [vmem:[#allocation5 + $0xd] sm:$0x1]  ;;  %v7050_v49 = vld [vmem:[%s13618_s9 + $0x3e0] sm:$0xff] }
 0x889   : > { %9265 = vmatprep.subr.mxu0 %v6520_v8  ;;  %9290 = vmatprep.subr.mxu1 %v6953_v58  ;;  %v6949_v8 = vld [vmem:[%s13618_s9 + $0xb8] sm:$0xff]  ;;  %6919 = vst.msk [vmem:[#allocation10 + $0xd] sm:$0x1] %vm12824_vm1, %v6918_v55  ;;  %v6922_v58 = vld [vmem:[#allocation5 + $0xf] sm:$0x1]  ;;  %v7034_v51 = vld [vmem:[%s13618_s9 + $0x360] sm:$0xff] }
 0x88a   : > { %9266 = vmatpush3.msra.mxu0 %v6504_v17  ;;  %9291 = vmatpush3.msra.mxu1 %v6937_v1  ;;  %v6965_v17 = vld [vmem:[%s13618_s9 + $0x138] sm:$0xff]  ;;  %6923 = vst.msk [vmem:[#allocation10 + $0xf] sm:$0x1] %vm12824_vm1, %v6922_v58  ;;  %v7048_v58 = vld [vmem:[%s13618_s9 + $0x3d0] sm:$0xff] }
 0x88b   : > { %9267 = vmatprep.subr.mxu0 %v6519_v19  ;;  %9292 = vmatprep.subr.mxu1 %v6952_v3  ;;  %v6980_v19 = vld [vmem:[%s13618_s9 + $0x1b0] sm:$0xff]  ;;  %v7033_v55 = vld [vmem:[%s13618_s9 + $0x358] sm:$0xff] }
 0x88c   : > { %9268 = vmatpush3.msra.mxu0 %v6503_v21  ;;  %9293 = vmatpush3.msra.mxu1 %v6936_v4  ;;  %v6964_v21 = vld [vmem:[%s13618_s9 + $0x130] sm:$0xff] }
 0x88d   : > { %9269 = vmatprep.subr.mxu0 %v6518_v24  ;;  %v6907_v24 = vld [vmem:[#allocation5 + $0x8] sm:$0x1] }
 0x88e   : > { %9270 = vmatpush3.msra.mxu0 %v6502_v25  ;;  %6908 = vst.msk [vmem:[#allocation10 + $0x8] sm:$0x1] %vm12824_vm1, %v6907_v24  ;;  %v6979_v25 = vld [vmem:[%s13618_s9 + $0x1a8] sm:$0xff]  ;;  %v7199_v24 = vsub.s32 3, %v12249_v60 }
 0x88f   : > { %9271 = vmatprep.subr.mxu0 %v6517_v26  ;;  %v6963_v26 = vld [vmem:[%s13618_s9 + $0x128] sm:$0xff] }
 0x890   : > { %9272 = vmatpush3.msra.mxu0 %v6501_v27  ;;  %v6978_v27 = vld [vmem:[%s13618_s9 + $0x1a0] sm:$0xff] }
 0x891   : > { %9273 = vmatprep.subr.mxu0 %v6516_v30  ;;  %v6930_v30 = vld [vmem:[%s13618_s9 + $0x20] sm:$0xff] }
 0x892   : > { %9274 = vmatpush3.msra.mxu0 %v6500_v32  ;;  %v6892_v32 = vld [vmem:[#allocation5 + $0x1] sm:$0x1] }
 0x893   : > { %9275 = vmatprep.subr.mxu0 %v6515_v34  ;;  %v6945_v34 = vld [vmem:[%s13618_s9 + $0x98] sm:$0xff]  ;;  %6893 = vst.msk [vmem:[#allocation10 + $0x1] sm:$0x1] %vm12824_vm1, %v6892_v32 }
 0x894   : > { %9276 = vmatpush3.msra.mxu0 %v6499_v36  ;;  %v6929_v36 = vld [vmem:[%s13618_s9 + $0x18] sm:$0xff] }
 0x895   : > { %9277 = vmatprep.subr.mxu0 %v6514_v38  ;;  %v6944_v38 = vld [vmem:[%s13618_s9 + $0x90] sm:$0xff]  ;;  %v7037_v32 = vld [vmem:[%s13618_s9 + $0x378] sm:$0xff] }
 0x896   : > { %9278 = vmatpush3.msra.mxu0 %v6498_v40  ;;  %v6928_v40 = vld [vmem:[%s13618_s9 + $0x10] sm:$0xff] }
 0x897   : > { %6860 = vmatmul.mubr.f32.vlgmr.msra.gmra.mxu0 %v12617_v6  ;;  %9317 = vmatprep.subr.mxu0 %v6989_v42  ;;  %v6951_v6 = vld [vmem:[%s13618_s9 + $0xc8] sm:$0xff] }
 0x898   : > { %9318 = vmatpush3.msra.mxu0 %v6973_v44  ;;  %9294 = vmatprep.subr.mxu1 %v6951_v6  ;;  %v6943_v42 = vld [vmem:[%s13618_s9 + $0x88] sm:$0xff] }
 0x899   : > { %9319 = vmatprep.subr.mxu0 %v6988_v46  ;;  %9295 = vmatpush3.msra.mxu1 %v6935_v9  ;;  %v6927_v44 = vld [vmem:[%s13618_s9 + $0x8] sm:$0xff]  ;;  %v6942_v46 = vld [vmem:[%s13618_s9 + $0x80] sm:$0xff] }
 0x89a   : > { %9320 = vmatpush3.msra.mxu0 %v6972_v48  ;;  %9296 = vmatprep.subr.mxu1 %v6950_v11  ;;  %v6926_v48 = vld [vmem:[%s13618_s9] sm:$0xff] }
 0x89b   : > { %9321 = vmatprep.subr.mxu0 %v6987_v50  ;;  %9297 = vmatpush3.msra.mxu1 %v6934_v13  ;;  %v6958_v50 = vld [vmem:[%s13618_s9 + $0x100] sm:$0xff] }
 0x89c   : > { %9322 = vmatpush3.msra.mxu0 %v6971_v52  ;;  %9298 = vmatprep.subr.mxu1 %v6949_v8  ;;  %v7021_v52 = vld [vmem:[%s13618_s9 + $0x2f8] sm:$0xff] }
 0x89d   : > { %9323 = vmatprep.subr.mxu0 %v6986_v54  ;;  %9299 = vmatpush3.msra.mxu1 %v6933_v57  ;;  %v6916_v54 = vld [vmem:[#allocation5 + $0xc] sm:$0x1] }
 0x89e   : > { %9324 = vmatpush3.msra.mxu0 %v6970_v56  ;;  %9300 = vmatprep.subr.mxu1 %v6948_v18  ;;  %6917 = vst.msk [vmem:[#allocation10 + $0xc] sm:$0x1] %vm12824_vm1, %v6916_v54  ;;  %v6920_v56 = vld [vmem:[#allocation5 + $0xe] sm:$0x1]  ;;  %v7001_v54 = vld [vmem:[%s13618_s9 + $0x258] sm:$0xff] }
 0x89f   : > { %9325 = vmatprep.subr.mxu0 %v6985_v0  ;;  %9301 = vmatpush3.msra.mxu1 %v6932_v20  ;;  %6921 = vst.msk [vmem:[#allocation10 + $0xe] sm:$0x1] %vm12824_vm1, %v6920_v56  ;;  %v7016_v56 = vld [vmem:[%s13618_s9 + $0x2d0] sm:$0xff] }
 0x8a0   : > { %9326 = vmatpush3.msra.mxu0 %v6969_v2  ;;  %9302 = vmatprep.subr.mxu1 %v6947_v23  ;;  %v7187_v23 = vsub.s32 0, %v12249_v60 }
 0x8a1   : > { %9327 = vmatprep.subr.mxu0 %v6984_v59  ;;  %9303 = vmatpush3.msra.mxu1 %v6931_v29  ;;  %v8966_v59 = vld [vmem:[%s13617_s8] ss:$0 sm:$0xff] }
 0x8a2   : > { %9328 = vmatpush3.msra.mxu0 %v6968_v5  ;;  %9304 = vmatprep.subr.mxu1 %v6946_v47  ;;  %v7215_v47 = vsub.s32 7, %v12249_v60 }
 0x8a3   : > { %9329 = vmatprep.subr.mxu0 %v6983_v7  ;;  %9305 = vmatpush3.msra.mxu1 %v6930_v30 }
 0x8a4   : > { %9330 = vmatpush3.msra.mxu0 %v6967_v10  ;;  %9306 = vmatprep.subr.mxu1 %v6945_v34 }
 0x8a5   : > { %9331 = vmatprep.subr.mxu0 %v6982_v12  ;;  %9307 = vmatpush3.msra.mxu1 %v6929_v36 }
 0x8a6   : > { %9332 = vmatpush3.msra.mxu0 %v6966_v14  ;;  %9308 = vmatprep.subr.mxu1 %v6944_v38  ;;  %v7004_v38 = vld [vmem:[%s13618_s9 + $0x270] sm:$0xff] }
 0x8a7   : > { %9333 = vmatprep.subr.mxu0 %v6981_v16  ;;  %9309 = vmatpush3.msra.mxu1 %v6928_v40  ;;  %v7203_v40 = vsub.s32 4, %v12249_v60 }
 0x8a8   : > { %9334 = vmatpush3.msra.mxu0 %v6965_v17  ;;  %9310 = vmatprep.subr.mxu1 %v6943_v42  ;;  %v7019_v42 = vld [vmem:[%s13618_s9 + $0x2e8] sm:$0xff] }
 0x8a9   : > { %9335 = vmatprep.subr.mxu0 %v6980_v19  ;;  %9311 = vmatpush3.msra.mxu1 %v6927_v44  ;;  %v7003_v44 = vld [vmem:[%s13618_s9 + $0x268] sm:$0xff] }
 0x8aa   : > { %9336 = vmatpush3.msra.mxu0 %v6964_v21  ;;  %9312 = vmatprep.subr.mxu1 %v6942_v46 }
 0x8ab   : > { %9337 = vmatprep.subr.mxu0 %v6979_v25  ;;  %9313 = vmatpush3.msra.mxu1 %v6926_v48  ;;  %v7195_v25 = vsub.s32 2, %v12249_v60  ;;  %v7018_v48 = vld [vmem:[%s13618_s9 + $0x2e0] sm:$0xff] }
 0x8ac   : > { %9338 = vmatpush3.msra.mxu0 %v6963_v26  ;;  %9352 = vmatprep.subr.mxu1 %v7021_v52  ;;  %v7207_v26 = vsub.s32 5, %v12249_v60  ;;  %v7017_v52 = vld [vmem:[%s13618_s9 + $0x2d8] sm:$0xff] }
 0x8ad   : > { %9339 = vmatprep.subr.mxu0 %v6978_v27 }
 0x8ae   : > { %9340 = vmatpush3.msra.mxu0 %v6962_v31  ;;  %v7005_v31 = vld [vmem:[%s13618_s9 + $0x278] sm:$0xff] }
 0x8af   : > { %9341 = vmatprep.subr.mxu0 %v6977_v35  ;;  %v7052_v35 = vld [vmem:[%s13618_s9 + $0x3f0] sm:$0xff] }
 0x8b0   : > { %9342 = vmatpush3.msra.mxu0 %v6961_v37 }
 0x8b1   : > { %9343 = vmatprep.subr.mxu0 %v6976_v39  ;;  %v7036_v39 = vld [vmem:[%s13618_s9 + $0x370] sm:$0xff] }
 0x8b2   : > { %9344 = vmatpush3.msra.mxu0 %v6960_v41  ;;  %v7211_v41 = vsub.s32 6, %v12249_v60 }
 0x8b3   : > { %9345 = vmatprep.subr.mxu0 %v6975_v43  ;;  %v7051_v43 = vld [vmem:[%s13618_s9 + $0x3e8] sm:$0xff] }
 0x8b4   : > { %9346 = vmatpush3.msra.mxu0 %v6959_v45  ;;  %v7035_v45 = vld [vmem:[%s13618_s9 + $0x368] sm:$0xff] }
 0x8b5   : > { %9347 = vmatprep.subr.mxu0 %v6974_v62 }
 0x8b6   : > { %9348 = vmatpush3.msra.mxu0 %v6958_v50  ;;  %v7002_v50 = vld [vmem:[%s13618_s9 + $0x260] sm:$0xff] }
 0x8b7   : > { %9387 = vmatprep.subr.mxu0 %v7053_v53  ;;  %v7049_v53 = vld [vmem:[%s13618_s9 + $0x3d8] sm:$0xff] }
 0x90e   : > { %v9174_v0 = vpop.f32.mrf.mxu1 }
 0x910   : > { %v9175_v1 = vpop.f32.mrf.mxu1 }
 0x911   : > { %v9176_v3 = vadd.f32 %v9175_v1, %v9174_v0  ;;  %v7000_v0 = vld [vmem:[%s13618_s9 + $0x250] sm:$0xff] }
 0x912   : > { %v7032_v1 = vld [vmem:[%s13618_s9 + $0x350] sm:$0xff] }
 0x913   : > { %v6652_v5 = vadd.f32 %v9176_v3, %v8966_v59  ;;  %v7047_v3 = vld [vmem:[%s13618_s9 + $0x3c8] sm:$0xff] }
 0x914   : > { %v6999_v59 = vld [vmem:[%s13618_s9 + $0x248] sm:$0xff] }
 0x937   : > { %v9209_v2 = vpop.f32.mrf.mxu0 }
 0x939   : > { %v9210_v4 = vpop.f32.mrf.mxu0 }
 0x93a   : > { %v9211_v9 = vadd.f32 %v9210_v4, %v9209_v2  ;;  %v7015_v2 = vld [vmem:[%s13618_s9 + $0x2c8] sm:$0xff] }
 0x93b   : > { %v7031_v4 = vld [vmem:[%s13618_s9 + $0x348] sm:$0xff] }
 0x93c   : > { %v6722_v12 = vadd.f32 %v9211_v9, %v6652_v5  ;;  %v7014_v5 = vld [vmem:[%s13618_s9 + $0x2c0] sm:$0xff] }
 0x93d   : > { %v7030_v9 = vld [vmem:[%s13618_s9 + $0x340] sm:$0xff] }
 0x93f   : > { %v9244_v6 = vpop.f32.mrf.mxu1 }
 0x941   : > { %v9245_v10 = vpop.f32.mrf.mxu1 }
 0x942   : > { %v9246_v13 = vadd.f32 %v9245_v10, %v9244_v6  ;;  %v7046_v6 = vld [vmem:[%s13618_s9 + $0x3c0] sm:$0xff]  ;;  %v7013_v10 = vld [vmem:[%s13618_s9 + $0x2b8] sm:$0xff] }
 0x944   : > { %v6792_v14 = vadd.f32 %v9246_v13, %v6722_v12  ;;  %v6997_v12 = vld [vmem:[%s13618_s9 + $0x238] sm:$0xff] }
 0x945   : > { %v7029_v13 = vld [vmem:[%s13618_s9 + $0x338] sm:$0xff] }
 0x957   : > { %v9279_v7 = vpop.f32.mrf.mxu0 }
 0x959   : > { %v9280_v11 = vpop.f32.mrf.mxu0 }
 0x95a   : > { %v9281_v15 = vadd.f32 %v9280_v11, %v9279_v7  ;;  %v6998_v7 = vld [vmem:[%s13618_s9 + $0x240] sm:$0xff]  ;;  %v7045_v11 = vld [vmem:[%s13618_s9 + $0x3b8] sm:$0xff] }
 0x95c   : > { %v6862_v8 = vadd.f32 %v9281_v15, %v6792_v14  ;;  %v7012_v14 = vld [vmem:[%s13618_s9 + $0x2b0] sm:$0xff] }
 0x95d   : > { %v7044_v15 = vld [vmem:[%s13618_s9 + $0x3b0] sm:$0xff] }
 0x95e   : > { %vm6865_vm12 = vcmp.ge.f32.partialorder %v6862_v8, 0.0  ;;  %v6866_v16 = vmul.f32 0.2, %v6862_v8 }
 0x960   : > { %v6867_v57 = vsel %vm6865_vm12, %v6862_v8, %v6866_v16  ;;  %v6996_v8 = vld [vmem:[%s13618_s9 + $0x230] sm:$0xff] }
 0x961   : > { %v6875_v17 = vrot.slane %v6867_v57, %v12252_v61  ;;  %8967 = vst.sshfl [vmem:[#allocation5 + $0x5] sm:$0x3 pattern:$0x76325410] %v6867_v57  ;;  %v7191_v61 = vsub.s32 1, %v12249_v60  ;;  %v7028_v16 = vld [vmem:[%s13618_s9 + $0x330] sm:$0xff] }
 0x962   : > { %v7011_v57 = vld [vmem:[%s13618_s9 + $0x2a8] sm:$0xff]  ;;  %v7164_v60 = vld [vmem:[%s13618_s9 + $0x770] sm:$0xff] }
 0x963   : > { %v6876_v18 = vcombine.high %v6875_v17, %v6875_v17  ;;  %v7043_v17 = vld [vmem:[%s13618_s9 + $0x3a8] sm:$0xff] }
 0x965   : > { %6885 = vst [vmem:[#allocation5 + $0x9] sm:$0x3] %v6876_v18  ;;  %v6995_v18 = vld [vmem:[%s13618_s9 + $0x228] sm:$0xff] }
 0x968   : > { %v6900_v19 = vld [vmem:[#allocation5 + $0x5] sm:$0x1]  ;;  %v6902_v20 = vld [vmem:[#allocation5 + $0x6] sm:$0x1] }
 0x969   : > { %6901 = vst.msk [vmem:[#allocation10 + $0x5] sm:$0x1] %vm12824_vm1, %v6900_v19  ;;  %6903 = vst.msk [vmem:[#allocation10 + $0x6] sm:$0x1] %vm12824_vm1, %v6902_v20  ;;  %v7027_v19 = vld [vmem:[%s13618_s9 + $0x328] sm:$0xff]  ;;  %v7010_v20 = vld [vmem:[%s13618_s9 + $0x2a0] sm:$0xff] }
 0x96c   : > { %v6909_v21 = vld [vmem:[#allocation5 + $0x9] sm:$0x1]  ;;  %v6911_v22 = vld [vmem:[#allocation5 + $0xa] sm:$0x1] }
 0x96d   : > { %6910 = vst.msk [vmem:[#allocation10 + $0x9] sm:$0x1] %vm12824_vm1, %v6909_v21  ;;  %6912 = vst.msk [vmem:[#allocation10 + $0xa] sm:$0x1] %vm12824_vm1, %v6911_v22  ;;  %v7042_v21 = vld [vmem:[%s13618_s9 + $0x3a0] sm:$0xff] }
 0x96e   : > { %v6994_v22 = vld [vmem:[%s13618_s9 + $0x220] sm:$0xff] }
 0x970   : > { %v12970_v29 = vld [vmem:[#allocation10] sm:$0xff] }
 0x971   : > { %v7192_v27 = vrot.slane %v12970_v29, %v7191_v61  ;;  %v7200_v63 = vrot.slane %v12970_v29, %v7199_v24  ;;  %v7188_v28 = vrot.slane %v12970_v29, %v7187_v23  ;;  %v7196_v30 = vrot.slane %v12970_v29, %v7195_v25 }
 0x972   : > { %v7208_v34 = vrot.slane %v12970_v29, %v7207_v26  ;;  %v7216_v37 = vrot.slane %v12970_v29, %v7215_v47 }
 0x973   : > { %7329 = vmatprep.mubr.f32.mxu1 %v7192_v27  ;;  %7399 = vmatprep.mubr.f32.mxu0 %v7200_v63  ;;  %v7026_v27 = vld [vmem:[%s13618_s9 + $0x320] sm:$0xff]  ;;  %v7009_v63 = vld [vmem:[%s13618_s9 + $0x298] sm:$0xff] }
 0x974   : > { %7330 = vmatmul.mubr.f32.vlgmr.msra.gmra.mxu1 %v7188_v28  ;;  %7400 = vmatmul.mubr.f32.vlgmr.msra.gmra.mxu0 %v7196_v30  ;;  %v13001_v36 = vld [vmem:[#allocation10 + $0x8] sm:$0xff] }
 0x975   : > { %9353 = vmatpush3.msra.mxu1 %v7005_v31  ;;  %9388 = vmatpush3.msra.mxu0 %v7037_v32  ;;  %v13029_v46 = vrot.slane %v13001_v36, %v7203_v40  ;;  %v13034_v62 = vrot.slane %v13001_v36, %v7211_v41  ;;  %v7041_v28 = vld [vmem:[%s13618_s9 + $0x398] sm:$0xff]  ;;  %v7008_v32 = vld [vmem:[%s13618_s9 + $0x290] sm:$0xff] }
 0x976   : > { %9354 = vmatprep.subr.mxu1 %v7020_v33  ;;  %7469 = vmatprep.mubr.f32.mxu1 %v7208_v34  ;;  %v6993_v30 = vld [vmem:[%s13618_s9 + $0x218] sm:$0xff]  ;;  %v7040_v33 = vld [vmem:[%s13618_s9 + $0x390] sm:$0xff] }
 0x977   : > { %9389 = vmatprep.subr.mxu0 %v7052_v35  ;;  %7539 = vmatprep.mubr.f32.mxu0 %v7216_v37  ;;  %v7025_v31 = vld [vmem:[%s13618_s9 + $0x318] sm:$0xff]  ;;  %v6992_v34 = vld [vmem:[%s13618_s9 + $0x210] sm:$0xff]  ;;  %v7007_v37 = vld [vmem:[%s13618_s9 + $0x288] sm:$0xff] }
 0x978   : > { %9355 = vmatpush3.msra.mxu1 %v7004_v38  ;;  %9390 = vmatpush3.msra.mxu0 %v7036_v39  ;;  %v7024_v35 = vld [vmem:[%s13618_s9 + $0x310] sm:$0xff]  ;;  %v7039_v38 = vld [vmem:[%s13618_s9 + $0x388] sm:$0xff] }
 0x979   : > { %9356 = vmatprep.subr.mxu1 %v7019_v42  ;;  %9391 = vmatprep.subr.mxu0 %v7051_v43  ;;  %v6991_v39 = vld [vmem:[%s13618_s9 + $0x208] sm:$0xff]  ;;  %v7006_v43 = vld [vmem:[%s13618_s9 + $0x280] sm:$0xff] }
 0x97a   : > { %9357 = vmatpush3.msra.mxu1 %v7003_v44  ;;  %9392 = vmatpush3.msra.mxu0 %v7035_v45  ;;  %v7023_v42 = vld [vmem:[%s13618_s9 + $0x308] sm:$0xff]  ;;  %v7038_v44 = vld [vmem:[%s13618_s9 + $0x380] sm:$0xff] }
 0x97b   : > { %9358 = vmatprep.subr.mxu1 %v7018_v48  ;;  %9393 = vmatprep.subr.mxu0 %v7050_v49  ;;  %v6990_v45 = vld [vmem:[%s13618_s9 + $0x200] sm:$0xff]  ;;  %v7204_v49 = vrot.slane %v12970_v29, %v7203_v40  ;;  %v7101_v40 = vld [vmem:[%s13618_s9 + $0x578] sm:$0xff] }
 0x97c   : > { %9359 = vmatpush3.msra.mxu1 %v7002_v50  ;;  %9394 = vmatpush3.msra.mxu0 %v7034_v51  ;;  %v7022_v48 = vld [vmem:[%s13618_s9 + $0x300] sm:$0xff]  ;;  %v7212_v50 = vrot.slane %v12970_v29, %v7211_v41  ;;  %v7085_v51 = vld [vmem:[%s13618_s9 + $0x4f8] sm:$0xff]  ;;  %v7224_v29 = vrot.slane %v13001_v36, %v7191_v61  ;;  %v7232_v41 = vrot.slane %v13001_v36, %v7199_v24  ;;  %v7068_v61 = vld [vmem:[%s13618_s9 + $0x470] sm:$0xff] }
 0x97d   : > { %9360 = vmatprep.subr.mxu1 %v7017_v52  ;;  %9395 = vmatprep.subr.mxu0 %v7049_v53  ;;  %v7117_v52 = vld [vmem:[%s13618_s9 + $0x5f8] sm:$0xff]  ;;  %v7083_v24 = vld [vmem:[%s13618_s9 + $0x4e8] sm:$0xff] }
 0x97e   : > { %9361 = vmatpush3.msra.mxu1 %v7001_v54  ;;  %9396 = vmatpush3.msra.mxu0 %v7033_v55  ;;  %v7069_v53 = vld [vmem:[%s13618_s9 + $0x478] sm:$0xff]  ;;  %v7084_v54 = vld [vmem:[%s13618_s9 + $0x4f0] sm:$0xff] }
 0x97f   : > { %9362 = vmatprep.subr.mxu1 %v7016_v56  ;;  %9397 = vmatprep.subr.mxu0 %v7048_v58  ;;  %v7116_v55 = vld [vmem:[%s13618_s9 + $0x5f0] sm:$0xff]  ;;  %v7115_v58 = vld [vmem:[%s13618_s9 + $0x5e8] sm:$0xff] }
 0x980   : > { %9363 = vmatpush3.msra.mxu1 %v7000_v0  ;;  %9398 = vmatpush3.msra.mxu0 %v7032_v1  ;;  %v7100_v56 = vld [vmem:[%s13618_s9 + $0x570] sm:$0xff]  ;;  %v7067_v0 = vld [vmem:[%s13618_s9 + $0x468] sm:$0xff] }
 0x981   : > { %9364 = vmatprep.subr.mxu1 %v7015_v2  ;;  %9399 = vmatprep.subr.mxu0 %v7047_v3  ;;  %v7099_v1 = vld [vmem:[%s13618_s9 + $0x568] sm:$0xff]  ;;  %v7082_v2 = vld [vmem:[%s13618_s9 + $0x4e0] sm:$0xff] }
 0x982   : > { %9365 = vmatpush3.msra.mxu1 %v6999_v59  ;;  %9400 = vmatpush3.msra.mxu0 %v7031_v4  ;;  %v7114_v3 = vld [vmem:[%s13618_s9 + $0x5e0] sm:$0xff] }
 0x983   : > { %9366 = vmatprep.subr.mxu1 %v7014_v5  ;;  %9401 = vmatprep.subr.mxu0 %v7046_v6  ;;  %v7066_v59 = vld [vmem:[%s13618_s9 + $0x460] sm:$0xff]  ;;  %v7081_v5 = vld [vmem:[%s13618_s9 + $0x4d8] sm:$0xff] }
 0x984   : > { %9367 = vmatpush3.msra.mxu1 %v6998_v7  ;;  %9402 = vmatpush3.msra.mxu0 %v7030_v9  ;;  %v7098_v4 = vld [vmem:[%s13618_s9 + $0x560] sm:$0xff]  ;;  %v7113_v6 = vld [vmem:[%s13618_s9 + $0x5d8] sm:$0xff] }
 0x985   : > { %9368 = vmatprep.subr.mxu1 %v7013_v10  ;;  %9403 = vmatprep.subr.mxu0 %v7045_v11  ;;  %v7065_v7 = vld [vmem:[%s13618_s9 + $0x458] sm:$0xff]  ;;  %v7080_v10 = vld [vmem:[%s13618_s9 + $0x4d0] sm:$0xff] }
 0x986   : > { %9369 = vmatpush3.msra.mxu1 %v6997_v12  ;;  %9404 = vmatpush3.msra.mxu0 %v7029_v13  ;;  %v7097_v9 = vld [vmem:[%s13618_s9 + $0x558] sm:$0xff]  ;;  %v7112_v11 = vld [vmem:[%s13618_s9 + $0x5d0] sm:$0xff] }
 0x987   : > { %9370 = vmatprep.subr.mxu1 %v7012_v14  ;;  %9405 = vmatprep.subr.mxu0 %v7044_v15  ;;  %v7064_v12 = vld [vmem:[%s13618_s9 + $0x450] sm:$0xff]  ;;  %v7079_v14 = vld [vmem:[%s13618_s9 + $0x4c8] sm:$0xff] }
 0x988   : > { %9371 = vmatpush3.msra.mxu1 %v6996_v8  ;;  %9406 = vmatpush3.msra.mxu0 %v7028_v16  ;;  %v7096_v13 = vld [vmem:[%s13618_s9 + $0x550] sm:$0xff]  ;;  %v7111_v15 = vld [vmem:[%s13618_s9 + $0x5c8] sm:$0xff] }
 0x989   : > { %9372 = vmatprep.subr.mxu1 %v7011_v57  ;;  %9407 = vmatprep.subr.mxu0 %v7043_v17  ;;  %v7063_v8 = vld [vmem:[%s13618_s9 + $0x448] sm:$0xff]  ;;  %v7078_v57 = vld [vmem:[%s13618_s9 + $0x4c0] sm:$0xff] }
 0x98a   : > { %9373 = vmatpush3.msra.mxu1 %v6995_v18  ;;  %9408 = vmatpush3.msra.mxu0 %v7027_v19  ;;  %v7095_v16 = vld [vmem:[%s13618_s9 + $0x548] sm:$0xff]  ;;  %v7110_v17 = vld [vmem:[%s13618_s9 + $0x5c0] sm:$0xff] }
 0x98b   : > { %9374 = vmatprep.subr.mxu1 %v7010_v20  ;;  %9409 = vmatprep.subr.mxu0 %v7042_v21  ;;  %v7062_v18 = vld [vmem:[%s13618_s9 + $0x440] sm:$0xff]  ;;  %v7077_v20 = vld [vmem:[%s13618_s9 + $0x4b8] sm:$0xff] }
 0x98c   : > { %9375 = vmatpush3.msra.mxu1 %v6994_v22  ;;  %9410 = vmatpush3.msra.mxu0 %v7026_v27  ;;  %v7094_v19 = vld [vmem:[%s13618_s9 + $0x540] sm:$0xff]  ;;  %v7109_v21 = vld [vmem:[%s13618_s9 + $0x5b8] sm:$0xff] }
 0x98d   : > { %9376 = vmatprep.subr.mxu1 %v7009_v63  ;;  %9411 = vmatprep.subr.mxu0 %v7041_v28  ;;  %v7061_v22 = vld [vmem:[%s13618_s9 + $0x438] sm:$0xff]  ;;  %v7076_v63 = vld [vmem:[%s13618_s9 + $0x4b0] sm:$0xff] }
 0x98e   : > { %9377 = vmatpush3.msra.mxu1 %v6993_v30  ;;  %9412 = vmatpush3.msra.mxu0 %v7025_v31  ;;  %v7093_v27 = vld [vmem:[%s13618_s9 + $0x538] sm:$0xff]  ;;  %v7108_v28 = vld [vmem:[%s13618_s9 + $0x5b0] sm:$0xff] }
 0x98f   : > { %9378 = vmatprep.subr.mxu1 %v7008_v32  ;;  %9413 = vmatprep.subr.mxu0 %v7040_v33  ;;  %v7060_v30 = vld [vmem:[%s13618_s9 + $0x430] sm:$0xff]  ;;  %v7075_v32 = vld [vmem:[%s13618_s9 + $0x4a8] sm:$0xff] }
 0x990   : > { %9379 = vmatpush3.msra.mxu1 %v6992_v34  ;;  %9414 = vmatpush3.msra.mxu0 %v7024_v35  ;;  %v7092_v31 = vld [vmem:[%s13618_s9 + $0x530] sm:$0xff]  ;;  %v7107_v33 = vld [vmem:[%s13618_s9 + $0x5a8] sm:$0xff] }
 0x991   : > { %9380 = vmatprep.subr.mxu1 %v7007_v37  ;;  %9415 = vmatprep.subr.mxu0 %v7039_v38  ;;  %v7059_v34 = vld [vmem:[%s13618_s9 + $0x428] sm:$0xff]  ;;  %v7074_v37 = vld [vmem:[%s13618_s9 + $0x4a0] sm:$0xff] }
 0x992   : > { %9381 = vmatpush3.msra.mxu1 %v6991_v39  ;;  %9416 = vmatpush3.msra.mxu0 %v7023_v42  ;;  %v7091_v35 = vld [vmem:[%s13618_s9 + $0x528] sm:$0xff]  ;;  %v7106_v38 = vld [vmem:[%s13618_s9 + $0x5a0] sm:$0xff] }
 0x993   : > { %9382 = vmatprep.subr.mxu1 %v7006_v43  ;;  %9417 = vmatprep.subr.mxu0 %v7038_v44  ;;  %v7058_v39 = vld [vmem:[%s13618_s9 + $0x420] sm:$0xff]  ;;  %v7073_v43 = vld [vmem:[%s13618_s9 + $0x498] sm:$0xff] }
 0x994   : > { %9383 = vmatpush3.msra.mxu1 %v6990_v45  ;;  %9418 = vmatpush3.msra.mxu0 %v7022_v48  ;;  %v7090_v42 = vld [vmem:[%s13618_s9 + $0x520] sm:$0xff]  ;;  %v7105_v44 = vld [vmem:[%s13618_s9 + $0x598] sm:$0xff] }
 0x995   : > { %7470 = vmatmul.mubr.f32.vlgmr.msra.gmra.mxu1 %v7204_v49  ;;  %7540 = vmatmul.mubr.f32.vlgmr.msra.gmra.mxu0 %v7212_v50  ;;  %v7057_v45 = vld [vmem:[%s13618_s9 + $0x418] sm:$0xff]  ;;  %v7072_v49 = vld [vmem:[%s13618_s9 + $0x490] sm:$0xff] }
 0x996   : > { %9422 = vmatprep.subr.mxu1 %v7085_v51  ;;  %9457 = vmatprep.subr.mxu0 %v7117_v52  ;;  %v7089_v48 = vld [vmem:[%s13618_s9 + $0x518] sm:$0xff]  ;;  %v7104_v50 = vld [vmem:[%s13618_s9 + $0x590] sm:$0xff] }
 0x997   : > { %9423 = vmatpush3.msra.mxu1 %v7069_v53  ;;  %7609 = vmatprep.mubr.f32.mxu1 %v7224_v29  ;;  %v7056_v51 = vld [vmem:[%s13618_s9 + $0x410] sm:$0xff]  ;;  %v7071_v53 = vld [vmem:[%s13618_s9 + $0x488] sm:$0xff] }
 0x998   : > { %9458 = vmatpush3.msra.mxu0 %v7101_v40  ;;  %7679 = vmatprep.mubr.f32.mxu0 %v7232_v41  ;;  %v7088_v52 = vld [vmem:[%s13618_s9 + $0x510] sm:$0xff]  ;;  %v7103_v29 = vld [vmem:[%s13618_s9 + $0x588] sm:$0xff] }
 0x999   : > { %9424 = vmatprep.subr.mxu1 %v7084_v54  ;;  %9459 = vmatprep.subr.mxu0 %v7116_v55  ;;  %v7055_v40 = vld [vmem:[%s13618_s9 + $0x408] sm:$0xff]  ;;  %v7070_v54 = vld [vmem:[%s13618_s9 + $0x480] sm:$0xff] }
 0x99a   : > { %9425 = vmatpush3.msra.mxu1 %v7068_v61  ;;  %9460 = vmatpush3.msra.mxu0 %v7100_v56  ;;  %v7087_v41 = vld [vmem:[%s13618_s9 + $0x508] sm:$0xff]  ;;  %v7102_v55 = vld [vmem:[%s13618_s9 + $0x580] sm:$0xff] }
 0x99b   : > { %9426 = vmatprep.subr.mxu1 %v7083_v24  ;;  %9461 = vmatprep.subr.mxu0 %v7115_v58  ;;  %v7054_v61 = vld [vmem:[%s13618_s9 + $0x400] sm:$0xff]  ;;  %v7220_v24 = vrot.slane %v13001_v36, %v7187_v23  ;;  %v7228_v58 = vrot.slane %v13001_v36, %v7195_v25  ;;  %v7240_v23 = vrot.slane %v13001_v36, %v7207_v26  ;;  %v7165_v25 = vld [vmem:[%s13618_s9 + $0x778] sm:$0xff]  ;;  %v7132_v26 = vld [vmem:[%s13618_s9 + $0x670] sm:$0xff] }
 0x99c   : > { %9427 = vmatpush3.msra.mxu1 %v7067_v0  ;;  %9462 = vmatpush3.msra.mxu0 %v7099_v1  ;;  %v7086_v56 = vld [vmem:[%s13618_s9 + $0x500] sm:$0xff]  ;;  %v7149_v0 = vld [vmem:[%s13618_s9 + $0x6f8] sm:$0xff] }
 0x99d   : > { %9428 = vmatprep.subr.mxu1 %v7082_v2  ;;  %9463 = vmatprep.subr.mxu0 %v7114_v3  ;;  %v7181_v1 = vld [vmem:[%s13618_s9 + $0x7f8] sm:$0xff]  ;;  %v7248_v3 = vrot.slane %v13001_v36, %v7215_v47  ;;  %v7147_v47 = vld [vmem:[%s13618_s9 + $0x6e8] sm:$0xff] }
 0x99e   : > { %9429 = vmatpush3.msra.mxu1 %v7066_v59  ;;  %9464 = vmatpush3.msra.mxu0 %v7098_v4  ;;  %v7133_v2 = vld [vmem:[%s13618_s9 + $0x678] sm:$0xff]  ;;  %v7148_v59 = vld [vmem:[%s13618_s9 + $0x6f0] sm:$0xff]  ;;  %v7179_v36 = vld [vmem:[%s13618_s9 + $0x7e8] sm:$0xff] }
 0x99f   : > { %9430 = vmatprep.subr.mxu1 %v7081_v5  ;;  %9465 = vmatprep.subr.mxu0 %v7113_v6  ;;  %v7180_v4 = vld [vmem:[%s13618_s9 + $0x7f0] sm:$0xff]  ;;  %v7131_v5 = vld [vmem:[%s13618_s9 + $0x668] sm:$0xff] }
 0x9a0   : > { %9431 = vmatpush3.msra.mxu1 %v7065_v7  ;;  %9466 = vmatpush3.msra.mxu0 %v7097_v9  ;;  %v7163_v6 = vld [vmem:[%s13618_s9 + $0x768] sm:$0xff]  ;;  %v7146_v7 = vld [vmem:[%s13618_s9 + $0x6e0] sm:$0xff] }
 0x9a1   : > { %9432 = vmatprep.subr.mxu1 %v7080_v10  ;;  %9467 = vmatprep.subr.mxu0 %v7112_v11  ;;  %v7178_v9 = vld [vmem:[%s13618_s9 + $0x7e0] sm:$0xff] }
 0x9a2   : > { %9433 = vmatpush3.msra.mxu1 %v7064_v12  ;;  %9468 = vmatpush3.msra.mxu0 %v7096_v13  ;;  %v7130_v10 = vld [vmem:[%s13618_s9 + $0x660] sm:$0xff]  ;;  %v7145_v12 = vld [vmem:[%s13618_s9 + $0x6d8] sm:$0xff] }
 0x9a3   : > { %9434 = vmatprep.subr.mxu1 %v7079_v14  ;;  %9469 = vmatprep.subr.mxu0 %v7111_v15  ;;  %v7162_v11 = vld [vmem:[%s13618_s9 + $0x760] sm:$0xff]  ;;  %v7177_v13 = vld [vmem:[%s13618_s9 + $0x7d8] sm:$0xff] }
 0x9a4   : > { %9435 = vmatpush3.msra.mxu1 %v7063_v8  ;;  %9470 = vmatpush3.msra.mxu0 %v7095_v16  ;;  %v7129_v14 = vld [vmem:[%s13618_s9 + $0x658] sm:$0xff]  ;;  %v7144_v8 = vld [vmem:[%s13618_s9 + $0x6d0] sm:$0xff] }
 0x9a5   : > { %9436 = vmatprep.subr.mxu1 %v7078_v57  ;;  %9471 = vmatprep.subr.mxu0 %v7110_v17  ;;  %v7161_v15 = vld [vmem:[%s13618_s9 + $0x758] sm:$0xff]  ;;  %v7176_v16 = vld [vmem:[%s13618_s9 + $0x7d0] sm:$0xff] }
 0x9a6   : > { %9437 = vmatpush3.msra.mxu1 %v7062_v18  ;;  %9472 = vmatpush3.msra.mxu0 %v7094_v19  ;;  %v7128_v57 = vld [vmem:[%s13618_s9 + $0x650] sm:$0xff]  ;;  %v7143_v18 = vld [vmem:[%s13618_s9 + $0x6c8] sm:$0xff] }
 0x9a7   : > { %9438 = vmatprep.subr.mxu1 %v7077_v20  ;;  %9473 = vmatprep.subr.mxu0 %v7109_v21  ;;  %v7160_v17 = vld [vmem:[%s13618_s9 + $0x750] sm:$0xff]  ;;  %v7175_v19 = vld [vmem:[%s13618_s9 + $0x7c8] sm:$0xff] }
 0x9a8   : > { %9439 = vmatpush3.msra.mxu1 %v7061_v22  ;;  %9474 = vmatpush3.msra.mxu0 %v7093_v27  ;;  %v7127_v20 = vld [vmem:[%s13618_s9 + $0x648] sm:$0xff]  ;;  %v7142_v22 = vld [vmem:[%s13618_s9 + $0x6c0] sm:$0xff] }
 0x9a9   : > { %9440 = vmatprep.subr.mxu1 %v7076_v63  ;;  %9475 = vmatprep.subr.mxu0 %v7108_v28  ;;  %v7159_v21 = vld [vmem:[%s13618_s9 + $0x748] sm:$0xff]  ;;  %v7174_v27 = vld [vmem:[%s13618_s9 + $0x7c0] sm:$0xff] }
 0x9aa   : > { %9441 = vmatpush3.msra.mxu1 %v7060_v30  ;;  %9476 = vmatpush3.msra.mxu0 %v7092_v31  ;;  %v7126_v63 = vld [vmem:[%s13618_s9 + $0x640] sm:$0xff]  ;;  %v7141_v30 = vld [vmem:[%s13618_s9 + $0x6b8] sm:$0xff] }
 0x9ab   : > { %9442 = vmatprep.subr.mxu1 %v7075_v32  ;;  %9477 = vmatprep.subr.mxu0 %v7107_v33  ;;  %v7158_v28 = vld [vmem:[%s13618_s9 + $0x740] sm:$0xff]  ;;  %v7173_v31 = vld [vmem:[%s13618_s9 + $0x7b8] sm:$0xff] }
 0x9ac   : > { %9443 = vmatpush3.msra.mxu1 %v7059_v34  ;;  %9478 = vmatpush3.msra.mxu0 %v7091_v35  ;;  %v7125_v32 = vld [vmem:[%s13618_s9 + $0x638] sm:$0xff]  ;;  %v7140_v34 = vld [vmem:[%s13618_s9 + $0x6b0] sm:$0xff] }
 0x9ad   : > { %9444 = vmatprep.subr.mxu1 %v7074_v37  ;;  %9479 = vmatprep.subr.mxu0 %v7106_v38  ;;  %v7157_v33 = vld [vmem:[%s13618_s9 + $0x738] sm:$0xff]  ;;  %v7172_v35 = vld [vmem:[%s13618_s9 + $0x7b0] sm:$0xff] }
 0x9ae   : > { %9445 = vmatpush3.msra.mxu1 %v7058_v39  ;;  %9480 = vmatpush3.msra.mxu0 %v7090_v42  ;;  %v7124_v37 = vld [vmem:[%s13618_s9 + $0x630] sm:$0xff]  ;;  %v7139_v39 = vld [vmem:[%s13618_s9 + $0x6a8] sm:$0xff] }
 0x9af   : > { %9446 = vmatprep.subr.mxu1 %v7073_v43  ;;  %9481 = vmatprep.subr.mxu0 %v7105_v44  ;;  %v7156_v38 = vld [vmem:[%s13618_s9 + $0x730] sm:$0xff]  ;;  %v7171_v42 = vld [vmem:[%s13618_s9 + $0x7a8] sm:$0xff] }
 0x9b0   : > { %9447 = vmatpush3.msra.mxu1 %v7057_v45  ;;  %9482 = vmatpush3.msra.mxu0 %v7089_v48  ;;  %v7123_v43 = vld [vmem:[%s13618_s9 + $0x628] sm:$0xff]  ;;  %v7138_v45 = vld [vmem:[%s13618_s9 + $0x6a0] sm:$0xff] }
 0x9b1   : > { %9448 = vmatprep.subr.mxu1 %v7072_v49  ;;  %9483 = vmatprep.subr.mxu0 %v7104_v50  ;;  %v7155_v44 = vld [vmem:[%s13618_s9 + $0x728] sm:$0xff]  ;;  %v7170_v48 = vld [vmem:[%s13618_s9 + $0x7a0] sm:$0xff] }
 0x9b2   : > { %9449 = vmatpush3.msra.mxu1 %v7056_v51  ;;  %9484 = vmatpush3.msra.mxu0 %v7088_v52  ;;  %v7122_v49 = vld [vmem:[%s13618_s9 + $0x620] sm:$0xff]  ;;  %v7137_v51 = vld [vmem:[%s13618_s9 + $0x698] sm:$0xff] }
 0x9b3   : > { %9450 = vmatprep.subr.mxu1 %v7071_v53  ;;  %9485 = vmatprep.subr.mxu0 %v7103_v29  ;;  %v7154_v50 = vld [vmem:[%s13618_s9 + $0x720] sm:$0xff]  ;;  %v7169_v52 = vld [vmem:[%s13618_s9 + $0x798] sm:$0xff] }
 0x9b4   : > { %9451 = vmatpush3.msra.mxu1 %v7055_v40  ;;  %9486 = vmatpush3.msra.mxu0 %v7087_v41  ;;  %v7121_v53 = vld [vmem:[%s13618_s9 + $0x618] sm:$0xff]  ;;  %v7136_v40 = vld [vmem:[%s13618_s9 + $0x690] sm:$0xff] }
 0x9b5   : > { %9452 = vmatprep.subr.mxu1 %v7070_v54  ;;  %9487 = vmatprep.subr.mxu0 %v7102_v55  ;;  %v7153_v29 = vld [vmem:[%s13618_s9 + $0x718] sm:$0xff]  ;;  %v7168_v41 = vld [vmem:[%s13618_s9 + $0x790] sm:$0xff] }
 0x9b6   : > { %9453 = vmatpush3.msra.mxu1 %v7054_v61  ;;  %9488 = vmatpush3.msra.mxu0 %v7086_v56  ;;  %v7120_v54 = vld [vmem:[%s13618_s9 + $0x610] sm:$0xff]  ;;  %v7135_v61 = vld [vmem:[%s13618_s9 + $0x688] sm:$0xff] }
 0x9b7   : > { %7610 = vmatmul.mubr.f32.vlgmr.msra.gmra.mxu1 %v7220_v24  ;;  %7680 = vmatmul.mubr.f32.vlgmr.msra.gmra.mxu0 %v7228_v58  ;;  %v7152_v55 = vld [vmem:[%s13618_s9 + $0x710] sm:$0xff]  ;;  %v7167_v56 = vld [vmem:[%s13618_s9 + $0x788] sm:$0xff] }
 0x9b8   : > { %9492 = vmatprep.subr.mxu1 %v7149_v0  ;;  %9527 = vmatprep.subr.mxu0 %v7181_v1  ;;  %v7119_v24 = vld [vmem:[%s13618_s9 + $0x608] sm:$0xff]  ;;  %v7134_v0 = vld [vmem:[%s13618_s9 + $0x680] sm:$0xff] }
 0x9b9   : > { %9493 = vmatpush3.msra.mxu1 %v7133_v2  ;;  %7749 = vmatprep.mubr.f32.mxu1 %v7240_v23  ;;  %v7151_v58 = vld [vmem:[%s13618_s9 + $0x708] sm:$0xff]  ;;  %v7166_v1 = vld [vmem:[%s13618_s9 + $0x780] sm:$0xff] }
 0x9ba   : > { %9528 = vmatpush3.msra.mxu0 %v7165_v25  ;;  %7819 = vmatprep.mubr.f32.mxu0 %v7248_v3  ;;  %v7118_v2 = vld [vmem:[%s13618_s9 + $0x600] sm:$0xff] }
 0x9bb   : > { %9494 = vmatprep.subr.mxu1 %v7148_v59  ;;  %9529 = vmatprep.subr.mxu0 %v7180_v4  ;;  %v7150_v23 = vld [vmem:[%s13618_s9 + $0x700] sm:$0xff] }
 0x9bc   : > { %9495 = vmatpush3.msra.mxu1 %v7132_v26  ;;  %9530 = vmatpush3.msra.mxu0 %v7164_v60  ;;  %v7182_v60 = vld [vmem:[#allocation11] sm:$0x1] }
 0x9bd   : > { %9496 = vmatprep.subr.mxu1 %v7147_v47  ;;  %9531 = vmatprep.subr.mxu0 %v7179_v36 }
 0x9be   : > { %9497 = vmatpush3.msra.mxu1 %v7131_v5  ;;  %9532 = vmatpush3.msra.mxu0 %v7163_v6 }
 0x9bf   : > { %9498 = vmatprep.subr.mxu1 %v7146_v7  ;;  %9533 = vmatprep.subr.mxu0 %v7178_v9 }
 0x9c0   : > { %9499 = vmatpush3.msra.mxu1 %v7130_v10  ;;  %9534 = vmatpush3.msra.mxu0 %v7162_v11 }
 0x9c1   : > { %9500 = vmatprep.subr.mxu1 %v7145_v12  ;;  %9535 = vmatprep.subr.mxu0 %v7177_v13 }
 0x9c2   : > { %9501 = vmatpush3.msra.mxu1 %v7129_v14  ;;  %9536 = vmatpush3.msra.mxu0 %v7161_v15 }
 0x9c3   : > { %9502 = vmatprep.subr.mxu1 %v7144_v8  ;;  %9537 = vmatprep.subr.mxu0 %v7176_v16 }
 0x9c4   : > { %9503 = vmatpush3.msra.mxu1 %v7128_v57  ;;  %9538 = vmatpush3.msra.mxu0 %v7160_v17 }
 0x9c5   : > { %9504 = vmatprep.subr.mxu1 %v7143_v18  ;;  %9539 = vmatprep.subr.mxu0 %v7175_v19 }
 0x9c6   : > { %9505 = vmatpush3.msra.mxu1 %v7127_v20  ;;  %9540 = vmatpush3.msra.mxu0 %v7159_v21 }
 0x9c7   : > { %9506 = vmatprep.subr.mxu1 %v7142_v22  ;;  %9541 = vmatprep.subr.mxu0 %v7174_v27 }
 0x9c8   : > { %9507 = vmatpush3.msra.mxu1 %v7126_v63  ;;  %9542 = vmatpush3.msra.mxu0 %v7158_v28 }
 0x9c9   : > { %9508 = vmatprep.subr.mxu1 %v7141_v30  ;;  %9543 = vmatprep.subr.mxu0 %v7173_v31 }
 0x9ca   : > { %9509 = vmatpush3.msra.mxu1 %v7125_v32  ;;  %9544 = vmatpush3.msra.mxu0 %v7157_v33 }
 0x9cb   : > { %9510 = vmatprep.subr.mxu1 %v7140_v34  ;;  %9545 = vmatprep.subr.mxu0 %v7172_v35 }
 0x9cc   : > { %9511 = vmatpush3.msra.mxu1 %v7124_v37  ;;  %9546 = vmatpush3.msra.mxu0 %v7156_v38 }
 0x9cd   : > { %9512 = vmatprep.subr.mxu1 %v7139_v39  ;;  %9547 = vmatprep.subr.mxu0 %v7171_v42 }
 0x9ce   : > { %9513 = vmatpush3.msra.mxu1 %v7123_v43  ;;  %9548 = vmatpush3.msra.mxu0 %v7155_v44 }
 0x9cf   : > { %9514 = vmatprep.subr.mxu1 %v7138_v45  ;;  %9549 = vmatprep.subr.mxu0 %v7170_v48 }
 0x9d0   : > { %9515 = vmatpush3.msra.mxu1 %v7122_v49  ;;  %9550 = vmatpush3.msra.mxu0 %v7154_v50 }
 0x9d1   : > { %9516 = vmatprep.subr.mxu1 %v7137_v51  ;;  %9551 = vmatprep.subr.mxu0 %v7169_v52 }
 0x9d2   : > { %9517 = vmatpush3.msra.mxu1 %v7121_v53  ;;  %9552 = vmatpush3.msra.mxu0 %v7153_v29 }
 0x9d3   : > { %9518 = vmatprep.subr.mxu1 %v7136_v40  ;;  %9553 = vmatprep.subr.mxu0 %v7168_v41 }
 0x9d4   : > { %9519 = vmatpush3.msra.mxu1 %v7120_v54  ;;  %9554 = vmatpush3.msra.mxu0 %v7152_v55 }
 0x9d5   : > { %9520 = vmatprep.subr.mxu1 %v7135_v61  ;;  %9555 = vmatprep.subr.mxu0 %v7167_v56 }
 0x9d6   : > { %9521 = vmatpush3.msra.mxu1 %v7119_v24  ;;  %9556 = vmatpush3.msra.mxu0 %v7151_v58 }
 0x9d7   : > { %9522 = vmatprep.subr.mxu1 %v7134_v0  ;;  %9557 = vmatprep.subr.mxu0 %v7166_v1 }
 0x9d8   : > { %9523 = vmatpush3.msra.mxu1 %v7118_v2  ;;  %9558 = vmatpush3.msra.mxu0 %v7150_v23 }
 0x9d9   : > { %7750 = vmatmul.mubr.f32.vlgmr.msra.gmra.mxu1 %v13029_v46  ;;  %7820 = vmatmul.mubr.f32.vlgmr.msra.gmra.mxu0 %v13034_v62 }
 0xa34   : > { %v9314_v25 = vpop.f32.mrf.mxu1  ;;  %v9349_v59 = vpop.f32.mrf.mxu0 }
 0xa36   : > { %v9315_v3 = vpop.f32.mrf.mxu1  ;;  %v9350_v47 = vpop.f32.mrf.mxu0 }
 0xa37   : > { %v9316_v26 = vadd.f32 %v9315_v3, %v9314_v25  ;;  %v9351_v9 = vadd.f32 %v9350_v47, %v9349_v59 }
 0xa39   : > { %v7332_v5 = vadd.f32 %v9316_v26, %v7182_v60 }
 0xa3b   : > { %v7402_v11 = vadd.f32 %v9351_v9, %v7332_v5 }
 0xa55   : > { %v9384_v4 = vpop.f32.mrf.mxu1  ;;  %v9419_v6 = vpop.f32.mrf.mxu0 }
 0xa57   : > { %v9385_v36 = vpop.f32.mrf.mxu1  ;;  %v9420_v12 = vpop.f32.mrf.mxu0 }
 0xa58   : > { %v9386_v10 = vadd.f32 %v9385_v36, %v9384_v4  ;;  %v9421_v62 = vadd.f32 %v9420_v12, %v9419_v6 }
 0xa5a   : > { %v7472_v14 = vadd.f32 %v9386_v10, %v7402_v11 }
 0xa5c   : > { %v7542_v8 = vadd.f32 %v9421_v62, %v7472_v14 }
 0xa77   : > { %v9454_v7 = vpop.f32.mrf.mxu1  ;;  %v9489_v46 = vpop.f32.mrf.mxu0 }
 0xa79   : > { %v9455_v13 = vpop.f32.mrf.mxu1  ;;  %v9490_v16 = vpop.f32.mrf.mxu0 }
 0xa7a   : > { %v9456_v15 = vadd.f32 %v9455_v13, %v9454_v7  ;;  %v9491_v19 = vadd.f32 %v9490_v16, %v9489_v46 }
 0xa7c   : > { %v7612_v57 = vadd.f32 %v9456_v15, %v7542_v8 }
 0xa7e   : > { %v7682_v22 = vadd.f32 %v9491_v19, %v7612_v57 }
 0xa99   : > { %v9524_v17 = vpop.f32.mrf.mxu1  ;;  %v9559_v18 = vpop.f32.mrf.mxu0 }
 0xa9b   : > { %v9525_v20 = vpop.f32.mrf.mxu1  ;;  %v9560_v21 = vpop.f32.mrf.mxu0 }
 0xa9c   : > { %v9526_v27 = vadd.f32 %v9525_v20, %v9524_v17  ;;  %v9561_v28 = vadd.f32 %v9560_v21, %v9559_v18 }
 0xa9e   : > { %v7752_v63 = vadd.f32 %v9526_v27, %v7682_v22 }
 0xaa0   : > { %v7822_v30 = vadd.f32 %v9561_v28, %v7752_v63 }
 0xaa2   : > { %7826 = vst.msk [vmem:[%s384_s27] sm:$0x1] %vm7825_vm7, %v7822_v30 }
 0xaa3 PF: > { %s23_s19 = sadd.s32 1, %s9683_s19  }
 0xaa4   : > { %p20_p4 = scmp.ge.s32.totalorder %s23_s19, 4  }
 0xaa6   :  { %22 = sbr.rel (!%p20_p4) target bundleno = 3 (0x3), region = 829 }

</bundles_post_ra>
